<compile_context>
chip_gen: v5e
topology: v5e:2x2
jax: 0.10.0
libtpu: 0.0.40
codegen_flags: <defaults>
</compile_context>

<pallas_src>
import functools

import jax
import jax.numpy as jnp
from jax.experimental import pallas as pl
from jax.experimental.pallas import tpu as pltpu

DIM_FEATURE = 256        # self.dim_feature
DIM_HIDDEN = 500         # FF(256, 500, 500, num_layers - 1)
HID_PAD = 512            # DIM_HIDDEN zero-padded to a lane-dense multiple of 128
HEAD_PAD = 8             # (2 + rank) head rows padded to one sublane tile
EPS = 1e-12
LOGIT_CLAMP = 27.631021  # log(1e12): torch's log(ber+1e-12)-log(1-ber+1e-12) saturates here


def _erf(x):
    # Abramowitz & Stegun 7.1.26 polynomial erf (max err ~1e-4 with the approx reciprocal,
    # plenty for the relaxed-bernoulli sampler).  exp + vrcp use the EUP slot.
    a1, a2, a3, a4, a5 = 0.254829592, -0.284496736, 1.421413741, -1.453152027, 1.061405429
    p = 0.3275911
    ax = jnp.abs(x)
    t = pl.reciprocal(1.0 + p * ax, approx=True)
    poly = ((((a5 * t + a4) * t + a3) * t + a2) * t + a1) * t
    y = 1.0 - poly * jnp.exp(-ax * ax)
    return jnp.where(x >= 0, y, -y)


def _softplus(x):
    # log1p avoided on purpose (keep to ops with guaranteed Mosaic lowering).
    return jnp.maximum(x, 0.0) + jnp.log(1.0 + jnp.exp(-jnp.abs(x)))


def recnet_elbo_kernel(vr_ref, eps_ref, epsc_ref, unif_ref,
                       w0_ref, b0_ref, w1_ref, b1_ref, w2_ref, b2_ref,
                       wht_ref, bht_ref, wsc_ref,
                       elbo_ref, *, bt, vs, M, rank, tau):
    R = bt * vs   # rows in this tile, ordered (batch, set-element)

    # ---------------- encode(): init_layer -> FF -> relu -> heads ----------------
    vr = vr_ref[...]                                                    # [R, 2] f32
    # init_layer = Linear(2, 256): degenerate K=2 MXU matmul (keeps the XLU free).
    x = jnp.dot(vr, w0_ref[...], preferred_element_type=jnp.float32) + b0_ref[...]
    # TODO(synk): FF definition is not shown in the reference; assumed a standard MLP with
    # (num_layers-1)=1 ReLU hidden layer of width 500 and a linear output of width 500.
    a1 = jnp.dot(x.astype(jnp.bfloat16), w1_ref[...],
                 preferred_element_type=jnp.float32) + b1_ref[...]      # [R, 512]
    a1 = jnp.maximum(a1, 0.0)
    a2 = jnp.dot(a1.astype(jnp.bfloat16), w2_ref[...],
                 preferred_element_type=jnp.float32) + b2_ref[...]      # [R, 512]
    h = jnp.maximum(a2, 0.0)                                            # torch.relu(self.ff(fea))

    # h_to_mu / h_to_std / h_to_U fused into one flash-attention-style transpose_rhs matmul
    # (contract last dims of both operands -> native MXU path, no [R,512] XLU transpose);
    # per-(batch, element) head values land on the LANE axis: heads_t is [8, R].
    heads_t = jax.lax.dot_general(
        wht_ref[...], h.astype(jnp.bfloat16),
        dimension_numbers=(((1,), (1,)), ((), ())),
        preferred_element_type=jnp.float32) + bht_ref[...]
    z = heads_t[0:1, :]                        # bernoulli logit; ber = sigmoid(z)
    std = _softplus(heads_t[1:2, :])           # F.softplus(h_to_std(h))
    tanh_u = jnp.tanh(heads_t[2:2 + rank, :])  # all rank U-heads in one batched tanh

    # Batch-segment selector seg[b, b*vs+v] = 1, built once and reused for the eps_corr
    # expansion, the set-function reduction and the entropy reduction.
    row_id = jax.lax.broadcasted_iota(jnp.int32, (bt, R), 0)
    col_id = jax.lax.broadcasted_iota(jnp.int32, (bt, R), 1)
    seg = jnp.logical_and(col_id >= row_id * vs,
                          col_id < (row_id + 1) * vs).astype(jnp.float32)       # [bt, R]

    # ---------------- MCsampling(): everything [M, R] -> lane dense ----------------
    # eps_corr arrives un-expanded ([rank*M, bt]); expand over the vs lanes of each batch
    # with one tiny MXU matmul instead of a vs-times-larger DMA stream.
    epsc = jnp.dot(epsc_ref[0], seg, preferred_element_type=jnp.float32)        # [rank*M, R]

    g = eps_ref[...] * std                                                       # [M, R]
    for r in range(rank):                       # rank = 3 -> three VPU broadcast-FMAs
        g = g + tanh_u[r:r + 1, :] * epsc[r * M:(r + 1) * M, :]
    u = 0.5 * (1.0 + _erf(g * 0.7071067811865476))          # normal_cdf(g, 0, 1)
    # log(ber+1e-12) - log(1-ber+1e-12) == z while unsaturated; clamp reproduces the
    # torch 1e-12 saturation for |z| > log(1e12).
    zc = jnp.clip(z, -LOGIT_CLAMP, LOGIT_CLAMP)
    l = zc + jnp.log(u + EPS) - jnp.log(1.0 - u + EPS)
    prob = jax.nn.sigmoid(l * (1.0 / tau))
    rnd = (unif_ref[...] < prob).astype(jnp.float32)         # torch.bernoulli(prob)
    s = prob + jax.lax.stop_gradient(rnd - prob)
    # TODO(synk): forward-only; training through pallas_call would need a jax.custom_vjp.

    # ---------------- cal_elbo() ----------------
    # TODO(synk): set_func is an external module in the reference; a synthetic linear set
    # utility F_S(V, S)[b, m] = sum_v S[b,m,v] * (V[b,v] . w_score) is used here.
    scores = jax.lax.dot_general(wsc_ref[...], vr,
                                 dimension_numbers=(((1,), (1,)), ((), ())),
                                 preferred_element_type=jnp.float32)             # [1, R]
    ws = s * scores                                                              # [M, R]
    f_mb = jax.lax.dot_general(ws, seg,
                               dimension_numbers=(((1,), (1,)), ((), ())),
                               preferred_element_type=jnp.float32)               # [M, bt]
    f_b = jnp.sum(f_mb, axis=0, keepdims=True) * (1.0 / M)                       # [1, bt]

    # Bernoulli entropy: -q log q - (1-q) log(1-q) == softplus(z) - z * sigmoid(z)
    ent_row = _softplus(z) - z * jax.nn.sigmoid(z)                               # [1, R]
    ent_b = jax.lax.dot_general(ent_row, seg,
                                dimension_numbers=(((1,), (1,)), ((), ())),
                                preferred_element_type=jnp.float32)              # [1, bt]

    elbo_ref[0] = f_b + ent_b                                    # lane-major per-batch ELBO


def prepare_params(w0, b0, w1, b1, w2, b2, w_heads, b_heads, wsc):
    """Host-side weight prep: pad 500->512 (lane-dense), transpose the tiny head matrix so
    its outputs are lane-major, cast the big MXU weights to bf16."""
    pad = HID_PAD - w1.shape[1]
    nh = w_heads.shape[1]                                              # 2 + rank
    assert nh <= HEAD_PAD
    w1p = jnp.pad(w1, ((0, 0), (0, pad))).astype(jnp.bfloat16)         # [256, 512]
    b1p = jnp.pad(b1, ((0, 0), (0, pad)))                              # [1, 512] f32
    w2p = jnp.pad(w2, ((0, pad), (0, pad))).astype(jnp.bfloat16)       # [512, 512]
    b2p = jnp.pad(b2, ((0, 0), (0, pad)))                              # [1, 512] f32
    wht = jnp.pad(w_heads.T, ((0, HEAD_PAD - nh), (0, pad))).astype(jnp.bfloat16)  # [8, 512]
    bht = jnp.pad(b_heads.reshape(1, nh).T, ((0, HEAD_PAD - nh), (0, 0)))          # [8, 1]
    return (w0, b0, w1p, b1p, w2p, b2p, wht, bht, wsc.reshape(1, -1))


def _pick_b_tile(bs, vs, target_rows):
    """Largest batch tile with bs % bt == 0, bt*vs <= target_rows and bt*vs % 128 == 0
    (128-lane-aligned blocks).  Falls back to a single tile if no aligned divisor exists."""
    cands = [bt for bt in range(1, bs + 1)
             if bs % bt == 0 and (bt * vs) % 128 == 0 and bt * vs <= target_rows]
    return max(cands) if cands else bs


def recnet_loss(V, eps, eps_corr, unif, params, *, rank, tau,
                b_tile=None, target_rows=1024):
    """forward(): returns -elbo.mean().

    V:        [bs, vs, 2]   set elements ('moons'/'gaussian' features)
    eps:      [M, bs*vs]    N(0,1) draws, already in the kernel's lane-dense layout
                            (MC sample on sublanes, (batch, element) on lanes)
    eps_corr: [bs, M, rank] N(0,1) low-rank correlation draws (torch layout; tiny)
    unif:     [M, bs*vs]    U(0,1) draws driving torch.bernoulli
    target_rows: rows per grid tile (512 on v5e, 1024-2048 on v6e/v7x).
    """
    bs, vs, d_in = V.shape
    M = eps.shape[0]
    bt = b_tile if b_tile is not None else _pick_b_tile(bs, vs, target_rows)
    assert bs % bt == 0, "b_tile must divide bs"
    n_tiles = bs // bt
    R = bt * vs
    assert (R % 128 == 0) or (n_tiles == 1), \
        "tile rows must be a multiple of 128 (or use a single tile)"

    v_rows = V.reshape(bs * vs, d_in)                                  # [bs*vs, 2]
    # eps_corr is tiny (bs*M*rank); relayout to [n_tiles, rank*M, bt] so the kernel can
    # expand it over the vs lanes itself (no vs-times-larger HBM stream).
    epsc = jnp.transpose(eps_corr, (2, 1, 0)).reshape(rank * M, n_tiles, bt)
    epsc = jnp.transpose(epsc, (1, 0, 2))                              # [n_tiles, rank*M, bt]

    w0, b0, w1p, b1p, w2p, b2p, wht, bht, wsc = params
    kernel = functools.partial(recnet_elbo_kernel, bt=bt, vs=vs, M=M,
                               rank=rank, tau=float(tau))

    def const(a):                                  # grid-invariant weight block
        return pl.BlockSpec(a.shape, lambda i, _nd=a.ndim: (0,) * _nd)

    flops = (2 * bs * vs * (2 * DIM_FEATURE + DIM_FEATURE * HID_PAD
                            + HID_PAD * HID_PAD + HEAD_PAD * HID_PAD)
             + 2 * bs * vs * bt * (rank * M + M + 1) + 30 * M * bs * vs)
    transcend = 5 * M * bs * vs + 12 * bs * vs
    bytes_acc = (4 * (v_rows.size + eps.size + unif.size + epsc.size + bs
                      + w0.size + b0.size + b1p.size + b2p.size + bht.size + wsc.size)
                 + 2 * (w1p.size + w2p.size + wht.size))

    out = pl.pallas_call(
        kernel,
        out_shape=jax.ShapeDtypeStruct((n_tiles, 1, bt), jnp.float32),
        grid=(n_tiles,),
        in_specs=[
            pl.BlockSpec((R, d_in), lambda i: (i, 0)),                 # V rows
            pl.BlockSpec((M, R), lambda i: (0, i)),                    # eps
            pl.BlockSpec((1, rank * M, bt), lambda i: (i, 0, 0)),      # eps_corr (un-expanded)
            pl.BlockSpec((M, R), lambda i: (0, i)),                    # uniforms (bernoulli)
            const(w0), const(b0),
            const(w1p), const(b1p), const(w2p), const(b2p),
            const(wht), const(bht), const(wsc),
        ],
        out_specs=pl.BlockSpec((1, 1, bt), lambda i: (i, 0, 0)),       # lane-major ELBO
        compiler_params=pltpu.CompilerParams(
            dimension_semantics=("parallel",),                         # batch tiles independent
            vmem_limit_bytes=64 * 1024 * 1024),
        cost_estimate=pl.CostEstimate(flops=int(flops),
                                      transcendentals=int(transcend),
                                      bytes_accessed=int(bytes_acc)),
    )(v_rows, eps, epsc, unif,
      w0, b0, w1p, b1p, w2p, b2p, wht, bht, wsc)

    elbo = out.reshape(bs)            # per-batch ELBO
    return -jnp.mean(elbo)            # forward() returns -elbo.mean()


if __name__ == "__main__":
    # params: data_name='moons', num_layers=2, rank=3, num_samples=8, tau=0.1
    bs, vs, d_in = 32, 8, 2
    rank, M, tau = 3, 8, 0.1

    key = jax.random.PRNGKey(0)
    keys = jax.random.split(key, 16)

    V = jax.random.normal(keys[0], (bs, vs, d_in), jnp.float32)
    # Sampling noise generated directly in the kernel's [M, bs*vs] layout (iid draws, so it
    # matches torch.randn((bs, M, vs)) in distribution with no host transpose pass).
    eps = jax.random.normal(keys[1], (M, bs * vs), jnp.float32)
    eps_corr = jax.random.normal(keys[2], (bs, M, rank), jnp.float32)   # torch.randn((bs,M,rank,1))
    unif = jax.random.uniform(keys[3], (M, bs * vs), jnp.float32)       # drives torch.bernoulli

    def linear_init(k, fin, fout):
        kw, kb = jax.random.split(k)
        bound = 1.0 / (fin ** 0.5)
        W = jax.random.uniform(kw, (fin, fout), jnp.float32, minval=-bound, maxval=bound)
        b = jax.random.uniform(kb, (1, fout), jnp.float32, minval=-bound, maxval=bound)
        return W, b

    w0, b0 = linear_init(keys[4], d_in, DIM_FEATURE)          # init_layer: Linear(2, 256)
    w1, b1 = linear_init(keys[5], DIM_FEATURE, DIM_HIDDEN)    # FF hidden: Linear(256, 500)
    w2, b2 = linear_init(keys[6], DIM_HIDDEN, DIM_HIDDEN)     # FF output: Linear(500, 500)
    wmu, bmu = linear_init(keys[7], DIM_HIDDEN, 1)            # h_to_mu
    wstd, bstd = linear_init(keys[8], DIM_HIDDEN, 1)          # h_to_std
    wu = [linear_init(keys[9 + i], DIM_HIDDEN, 1) for i in range(rank)]   # h_to_U
    w_heads = jnp.concatenate([wmu, wstd] + [w for w, _ in wu], axis=1)   # [500, 2+rank]
    b_heads = jnp.concatenate([bmu, bstd] + [b for _, b in wu], axis=1)   # [1, 2+rank]
    wsc = jax.random.normal(keys[12], (d_in, 1), jnp.float32)             # synthetic set_func weight

    params = prepare_params(w0, b0, w1, b1, w2, b2, w_heads, b_heads, wsc)

    # 1) default tiling: one 256-row tile here (512-2048-row tiles at realistic batch sizes).
    loss = jax.block_until_ready(
        recnet_loss(V, eps, eps_corr, unif, params, rank=rank, tau=tau))
    assert bool(jnp.isfinite(loss)), "non-finite loss"

    # 2) multi-tile path (2 x 128-row tiles) to exercise the grid / BlockSpec indexing.
    loss2 = jax.block_until_ready(
        recnet_loss(V, eps, eps_corr, unif, params, rank=rank, tau=tau, b_tile=16))
    assert bool(jnp.isfinite(loss2)), "non-finite loss (tiled)"
    assert abs(float(loss) - float(loss2)) < 2e-3, "tile-size dependence in result"

    print("KERNEL_OK")
</pallas_src>

<mosaic_0001>
module attributes {stable_mosaic.version = 11 : i64} {
  func.func @recnet_elbo_kernel(%arg0: i32, %arg1: memref<256x2xf32, #tpu.memory_space<vmem>>, %arg2: memref<8x256xf32, #tpu.memory_space<vmem>>, %arg3: memref<1x24x32xf32, #tpu.memory_space<vmem>>, %arg4: memref<8x256xf32, #tpu.memory_space<vmem>>, %arg5: memref<2x256xf32, #tpu.memory_space<vmem>>, %arg6: memref<1x256xf32, #tpu.memory_space<vmem>>, %arg7: memref<256x512xbf16, #tpu.memory_space<vmem>>, %arg8: memref<1x512xf32, #tpu.memory_space<vmem>>, %arg9: memref<512x512xbf16, #tpu.memory_space<vmem>>, %arg10: memref<1x512xf32, #tpu.memory_space<vmem>>, %arg11: memref<8x512xbf16, #tpu.memory_space<vmem>>, %arg12: memref<8x1xf32, #tpu.memory_space<vmem>>, %arg13: memref<1x2xf32, #tpu.memory_space<vmem>>, %arg14: memref<1x1x32xf32, #tpu.memory_space<vmem>>) attributes {dimension_semantics = [#tpu.dimension_semantics<parallel>], iteration_bounds = array<i64: 1>, scalar_prefetch = 0 : i64, scratch_operands = 0 : i64, tpu.core_type = #tpu.core_type<tc>, window_params = [{transform_indices = @transform_0, window_bounds = array<i64: 256, 2>}, {transform_indices = @transform_1, window_bounds = array<i64: 8, 256>}, {transform_indices = @transform_2, window_bounds = array<i64: 1, 24, 32>}, {transform_indices = @transform_3, window_bounds = array<i64: 8, 256>}, {pipeline_mode = #tpu.pipeline_mode<synchronous>, transform_indices = @transform_4, window_bounds = array<i64: 2, 256>}, {pipeline_mode = #tpu.pipeline_mode<synchronous>, transform_indices = @transform_5, window_bounds = array<i64: 1, 256>}, {pipeline_mode = #tpu.pipeline_mode<synchronous>, transform_indices = @transform_6, window_bounds = array<i64: 256, 512>}, {pipeline_mode = #tpu.pipeline_mode<synchronous>, transform_indices = @transform_7, window_bounds = array<i64: 1, 512>}, {pipeline_mode = #tpu.pipeline_mode<synchronous>, transform_indices = @transform_8, window_bounds = array<i64: 512, 512>}, {pipeline_mode = #tpu.pipeline_mode<synchronous>, transform_indices = @transform_9, window_bounds = array<i64: 1, 512>}, {pipeline_mode = #tpu.pipeline_mode<synchronous>, transform_indices = @transform_10, window_bounds = array<i64: 8, 512>}, {pipeline_mode = #tpu.pipeline_mode<synchronous>, transform_indices = @transform_11, window_bounds = array<i64: 8, 1>}, {pipeline_mode = #tpu.pipeline_mode<synchronous>, transform_indices = @transform_12, window_bounds = array<i64: 1, 2>}, {transform_indices = @transform_13, window_bounds = array<i64: 1, 1, 32>}]} {
    %c0 = arith.constant 0 : index
    %c0_0 = arith.constant 0 : index
    %0 = vector.load %arg1[%c0, %c0_0] : memref<256x2xf32, #tpu.memory_space<vmem>>, vector<256x2xf32>
    %c0_1 = arith.constant 0 : index
    %c0_2 = arith.constant 0 : index
    %1 = vector.load %arg5[%c0_1, %c0_2] : memref<2x256xf32, #tpu.memory_space<vmem>>, vector<2x256xf32>
    %cst = arith.constant dense<0.000000e+00> : vector<256x256xf32>
    %2 = tpu.matmul %0, %1, %cst {dimension_numbers = #tpu.dot_dimension_numbers<[1], [0], [0], [1], [0, 0, 1, 1], [], []>} : vector<256x2xf32>, vector<2x256xf32>, vector<256x256xf32> -> vector<256x256xf32>
    %c0_3 = arith.constant 0 : index
    %c0_4 = arith.constant 0 : index
    %3 = vector.load %arg6[%c0_3, %c0_4] : memref<1x256xf32, #tpu.memory_space<vmem>>, vector<1x256xf32>
    %4 = vector.broadcast %3 : vector<1x256xf32> to vector<256x256xf32>
    %5 = arith.addf %2, %4 : vector<256x256xf32>
    %6 = arith.truncf %5 : vector<256x256xf32> to vector<256x256xbf16>
    %c0_5 = arith.constant 0 : index
    %c0_6 = arith.constant 0 : index
    %7 = vector.load %arg7[%c0_5, %c0_6] : memref<256x512xbf16, #tpu.memory_space<vmem>>, vector<256x512xbf16>
    %cst_7 = arith.constant dense<0.000000e+00> : vector<256x512xf32>
    %8 = tpu.matmul %6, %7, %cst_7 {dimension_numbers = #tpu.dot_dimension_numbers<[1], [0], [0], [1], [0, 0, 1, 1], [], []>} : vector<256x256xbf16>, vector<256x512xbf16>, vector<256x512xf32> -> vector<256x512xf32>
    %c0_8 = arith.constant 0 : index
    %c0_9 = arith.constant 0 : index
    %9 = vector.load %arg8[%c0_8, %c0_9] : memref<1x512xf32, #tpu.memory_space<vmem>>, vector<1x512xf32>
    %10 = vector.broadcast %9 : vector<1x512xf32> to vector<256x512xf32>
    %11 = arith.addf %8, %10 : vector<256x512xf32>
    %cst_10 = arith.constant 0.000000e+00 : f32
    %12 = vector.broadcast %cst_10 : f32 to vector<256x512xf32>
    %13 = arith.maximumf %11, %12 : vector<256x512xf32>
    %14 = arith.truncf %13 : vector<256x512xf32> to vector<256x512xbf16>
    %c0_11 = arith.constant 0 : index
    %c0_12 = arith.constant 0 : index
    %15 = vector.load %arg9[%c0_11, %c0_12] : memref<512x512xbf16, #tpu.memory_space<vmem>>, vector<512x512xbf16>
    %cst_13 = arith.constant dense<0.000000e+00> : vector<256x512xf32>
    %16 = tpu.matmul %14, %15, %cst_13 {dimension_numbers = #tpu.dot_dimension_numbers<[1], [0], [0], [1], [0, 0, 1, 1], [], []>} : vector<256x512xbf16>, vector<512x512xbf16>, vector<256x512xf32> -> vector<256x512xf32>
    %c0_14 = arith.constant 0 : index
    %c0_15 = arith.constant 0 : index
    %17 = vector.load %arg10[%c0_14, %c0_15] : memref<1x512xf32, #tpu.memory_space<vmem>>, vector<1x512xf32>
    %18 = vector.broadcast %17 : vector<1x512xf32> to vector<256x512xf32>
    %19 = arith.addf %16, %18 : vector<256x512xf32>
    %cst_16 = arith.constant 0.000000e+00 : f32
    %20 = vector.broadcast %cst_16 : f32 to vector<256x512xf32>
    %21 = arith.maximumf %19, %20 : vector<256x512xf32>
    %c0_17 = arith.constant 0 : index
    %c0_18 = arith.constant 0 : index
    %22 = vector.load %arg11[%c0_17, %c0_18] : memref<8x512xbf16, #tpu.memory_space<vmem>>, vector<8x512xbf16>
    %23 = arith.truncf %21 : vector<256x512xf32> to vector<256x512xbf16>
    %cst_19 = arith.constant dense<0.000000e+00> : vector<8x256xf32>
    %24 = tpu.matmul %22, %23, %cst_19 {dimension_numbers = #tpu.dot_dimension_numbers<[1], [1], [0], [0], [0, 0, 1, 0], [], []>} : vector<8x512xbf16>, vector<256x512xbf16>, vector<8x256xf32> -> vector<8x256xf32>
    %c0_20 = arith.constant 0 : index
    %c0_21 = arith.constant 0 : index
    %25 = vector.load %arg12[%c0_20, %c0_21] : memref<8x1xf32, #tpu.memory_space<vmem>>, vector<8x1xf32>
    %26 = vector.broadcast %25 : vector<8x1xf32> to vector<8x256xf32>
    %27 = arith.addf %24, %26 : vector<8x256xf32>
    %28 = vector.extract_strided_slice %27 {offsets = [0, 0], sizes = [1, 256], strides = [1, 1]} : vector<8x256xf32> to vector<1x256xf32>
    %29 = vector.extract_strided_slice %27 {offsets = [1, 0], sizes = [1, 256], strides = [1, 1]} : vector<8x256xf32> to vector<1x256xf32>
    %cst_22 = arith.constant 0.000000e+00 : f32
    %30 = vector.broadcast %cst_22 : f32 to vector<1x256xf32>
    %31 = arith.maximumf %29, %30 : vector<1x256xf32>
    %32 = math.absf %29 : vector<1x256xf32>
    %cst_23 = arith.constant 0.000000e+00 : f32
    %33 = vector.broadcast %cst_23 : f32 to vector<1x256xf32>
    %34 = arith.subf %33, %32 : vector<1x256xf32>
    %35 = math.exp %34 : vector<1x256xf32>
    %cst_24 = arith.constant 1.000000e+00 : f32
    %36 = vector.broadcast %cst_24 : f32 to vector<1x256xf32>
    %37 = arith.addf %36, %35 : vector<1x256xf32>
    %38 = math.log %37 : vector<1x256xf32>
    %39 = arith.addf %31, %38 : vector<1x256xf32>
    %40 = vector.extract_strided_slice %27 {offsets = [2, 0], sizes = [3, 256], strides = [1, 1]} : vector<8x256xf32> to vector<3x256xf32>
    %41 = math.tanh %40 : vector<3x256xf32>
    %42 = tpu.iota {dimensions = array<i32: 0>} : vector<32x256xi32>
    %43 = tpu.iota {dimensions = array<i32: 1>} : vector<32x256xi32>
    %c8_i32 = arith.constant 8 : i32
    %44 = vector.broadcast %c8_i32 : i32 to vector<32x256xi32>
    %45 = arith.muli %42, %44 : vector<32x256xi32>
    %46 = arith.cmpi sge, %43, %45 : vector<32x256xi32>
    %c1_i32 = arith.constant 1 : i32
    %47 = vector.broadcast %c1_i32 : i32 to vector<32x256xi32>
    %48 = arith.addi %42, %47 : vector<32x256xi32>
    %c8_i32_25 = arith.constant 8 : i32
    %49 = vector.broadcast %c8_i32_25 : i32 to vector<32x256xi32>
    %50 = arith.muli %48, %49 : vector<32x256xi32>
    %51 = arith.cmpi slt, %43, %50 : vector<32x256xi32>
    %52 = arith.andi %46, %51 : vector<32x256xi1>
    %53 = arith.extui %52 : vector<32x256xi1> to vector<32x256xi32>
    %54 = arith.sitofp %53 : vector<32x256xi32> to vector<32x256xf32>
    %c0_26 = arith.constant 0 : index
    %c0_27 = arith.constant 0 : index
    %c0_28 = arith.constant 0 : index
    %55 = vector.load %arg3[%c0_26, %c0_27, %c0_28] : memref<1x24x32xf32, #tpu.memory_space<vmem>>, vector<1x24x32xf32>
    %56 = vector.shape_cast %55 : vector<1x24x32xf32> to vector<24x32xf32>
    %cst_29 = arith.constant dense<0.000000e+00> : vector<24x256xf32>
    %57 = tpu.matmul %56, %54, %cst_29 {dimension_numbers = #tpu.dot_dimension_numbers<[1], [0], [0], [1], [0, 0, 1, 1], [], []>} : vector<24x32xf32>, vector<32x256xf32>, vector<24x256xf32> -> vector<24x256xf32>
    %c0_30 = arith.constant 0 : index
    %c0_31 = arith.constant 0 : index
    %58 = vector.load %arg2[%c0_30, %c0_31] : memref<8x256xf32, #tpu.memory_space<vmem>>, vector<8x256xf32>
    %59 = vector.broadcast %39 : vector<1x256xf32> to vector<8x256xf32>
    %60 = arith.mulf %58, %59 : vector<8x256xf32>
    %61 = vector.extract_strided_slice %41 {offsets = [0, 0], sizes = [1, 256], strides = [1, 1]} : vector<3x256xf32> to vector<1x256xf32>
    %62 = vector.extract_strided_slice %57 {offsets = [0, 0], sizes = [8, 256], strides = [1, 1]} : vector<24x256xf32> to vector<8x256xf32>
    %63 = vector.broadcast %61 : vector<1x256xf32> to vector<8x256xf32>
    %64 = arith.mulf %63, %62 : vector<8x256xf32>
    %65 = arith.addf %60, %64 : vector<8x256xf32>
    %66 = vector.extract_strided_slice %41 {offsets = [1, 0], sizes = [1, 256], strides = [1, 1]} : vector<3x256xf32> to vector<1x256xf32>
    %67 = vector.extract_strided_slice %57 {offsets = [8, 0], sizes = [8, 256], strides = [1, 1]} : vector<24x256xf32> to vector<8x256xf32>
    %68 = vector.broadcast %66 : vector<1x256xf32> to vector<8x256xf32>
    %69 = arith.mulf %68, %67 : vector<8x256xf32>
    %70 = arith.addf %65, %69 : vector<8x256xf32>
    %71 = vector.extract_strided_slice %41 {offsets = [2, 0], sizes = [1, 256], strides = [1, 1]} : vector<3x256xf32> to vector<1x256xf32>
    %72 = vector.extract_strided_slice %57 {offsets = [16, 0], sizes = [8, 256], strides = [1, 1]} : vector<24x256xf32> to vector<8x256xf32>
    %73 = vector.broadcast %71 : vector<1x256xf32> to vector<8x256xf32>
    %74 = arith.mulf %73, %72 : vector<8x256xf32>
    %75 = arith.addf %70, %74 : vector<8x256xf32>
    %cst_32 = arith.constant 0.707106769 : f32
    %76 = vector.broadcast %cst_32 : f32 to vector<8x256xf32>
    %77 = arith.mulf %75, %76 : vector<8x256xf32>
    %78 = math.absf %77 : vector<8x256xf32>
    %cst_33 = arith.constant 0.327591091 : f32
    %79 = vector.broadcast %cst_33 : f32 to vector<8x256xf32>
    %80 = arith.mulf %79, %78 : vector<8x256xf32>
    %cst_34 = arith.constant 1.000000e+00 : f32
    %81 = vector.broadcast %cst_34 : f32 to vector<8x256xf32>
    %82 = arith.addf %81, %80 : vector<8x256xf32>
    %83 = tpu.reciprocal %82 {approx = true} : vector<8x256xf32> -> vector<8x256xf32>
    %cst_35 = arith.constant 1.06140542 : f32
    %84 = vector.broadcast %cst_35 : f32 to vector<8x256xf32>
    %85 = arith.mulf %84, %83 : vector<8x256xf32>
    %cst_36 = arith.constant -1.45315206 : f32
    %86 = vector.broadcast %cst_36 : f32 to vector<8x256xf32>
    %87 = arith.addf %85, %86 : vector<8x256xf32>
    %88 = arith.mulf %87, %83 : vector<8x256xf32>
    %cst_37 = arith.constant 1.42141378 : f32
    %89 = vector.broadcast %cst_37 : f32 to vector<8x256xf32>
    %90 = arith.addf %88, %89 : vector<8x256xf32>
    %91 = arith.mulf %90, %83 : vector<8x256xf32>
    %cst_38 = arith.constant -0.284496725 : f32
    %92 = vector.broadcast %cst_38 : f32 to vector<8x256xf32>
    %93 = arith.addf %91, %92 : vector<8x256xf32>
    %94 = arith.mulf %93, %83 : vector<8x256xf32>
    %cst_39 = arith.constant 0.254829586 : f32
    %95 = vector.broadcast %cst_39 : f32 to vector<8x256xf32>
    %96 = arith.addf %94, %95 : vector<8x256xf32>
    %97 = arith.mulf %96, %83 : vector<8x256xf32>
    %cst_40 = arith.constant 0.000000e+00 : f32
    %98 = vector.broadcast %cst_40 : f32 to vector<8x256xf32>
    %99 = arith.subf %98, %78 : vector<8x256xf32>
    %100 = arith.mulf %99, %78 : vector<8x256xf32>
    %101 = math.exp %100 : vector<8x256xf32>
    %102 = arith.mulf %97, %101 : vector<8x256xf32>
    %cst_41 = arith.constant 1.000000e+00 : f32
    %103 = vector.broadcast %cst_41 : f32 to vector<8x256xf32>
    %104 = arith.subf %103, %102 : vector<8x256xf32>
    %cst_42 = arith.constant 0.000000e+00 : f32
    %105 = vector.broadcast %cst_42 : f32 to vector<8x256xf32>
    %106 = arith.cmpf oge, %77, %105 : vector<8x256xf32>
    %cst_43 = arith.constant 0.000000e+00 : f32
    %107 = vector.broadcast %cst_43 : f32 to vector<8x256xf32>
    %108 = arith.subf %107, %104 : vector<8x256xf32>
    %109 = arith.select %106, %104, %108 : vector<8x256xi1>, vector<8x256xf32>
    %cst_44 = arith.constant 1.000000e+00 : f32
    %110 = vector.broadcast %cst_44 : f32 to vector<8x256xf32>
    %111 = arith.addf %110, %109 : vector<8x256xf32>
    %cst_45 = arith.constant 5.000000e-01 : f32
    %112 = vector.broadcast %cst_45 : f32 to vector<8x256xf32>
    %113 = arith.mulf %112, %111 : vector<8x256xf32>
    %cst_46 = arith.constant -27.6310215 : f32
    %cst_47 = arith.constant 27.6310215 : f32
    %114 = vector.broadcast %cst_46 : f32 to vector<1x256xf32>
    %115 = arith.maximumf %114, %28 : vector<1x256xf32>
    %116 = vector.broadcast %cst_47 : f32 to vector<1x256xf32>
    %117 = arith.minimumf %116, %115 : vector<1x256xf32>
    %cst_48 = arith.constant 9.99999996E-13 : f32
    %118 = vector.broadcast %cst_48 : f32 to vector<8x256xf32>
    %119 = arith.addf %113, %118 : vector<8x256xf32>
    %120 = math.log %119 : vector<8x256xf32>
    %121 = vector.broadcast %117 : vector<1x256xf32> to vector<8x256xf32>
    %122 = arith.addf %121, %120 : vector<8x256xf32>
    %cst_49 = arith.constant 1.000000e+00 : f32
    %123 = vector.broadcast %cst_49 : f32 to vector<8x256xf32>
    %124 = arith.subf %123, %113 : vector<8x256xf32>
    %cst_50 = arith.constant 9.99999996E-13 : f32
    %125 = vector.broadcast %cst_50 : f32 to vector<8x256xf32>
    %126 = arith.addf %124, %125 : vector<8x256xf32>
    %127 = math.log %126 : vector<8x256xf32>
    %128 = arith.subf %122, %127 : vector<8x256xf32>
    %cst_51 = arith.constant 1.000000e+01 : f32
    %129 = vector.broadcast %cst_51 : f32 to vector<8x256xf32>
    %130 = arith.mulf %128, %129 : vector<8x256xf32>
    %131 = arith.negf %130 : vector<8x256xf32>
    %132 = math.exp %131 : vector<8x256xf32>
    %cst_52 = arith.constant 1.000000e+00 : f32
    %133 = vector.broadcast %cst_52 : f32 to vector<8x256xf32>
    %134 = arith.addf %133, %132 : vector<8x256xf32>
    %135 = arith.divf %133, %134 : vector<8x256xf32>
    %c0_53 = arith.constant 0 : index
    %c0_54 = arith.constant 0 : index
    %136 = vector.load %arg4[%c0_53, %c0_54] : memref<8x256xf32, #tpu.memory_space<vmem>>, vector<8x256xf32>
    %137 = arith.cmpf olt, %136, %135 : vector<8x256xf32>
    %138 = arith.extui %137 : vector<8x256xi1> to vector<8x256xi32>
    %139 = arith.sitofp %138 : vector<8x256xi32> to vector<8x256xf32>
    %140 = arith.subf %139, %135 : vector<8x256xf32>
    %141 = arith.addf %135, %140 : vector<8x256xf32>
    %c0_55 = arith.constant 0 : index
    %c0_56 = arith.constant 0 : index
    %142 = vector.load %arg13[%c0_55, %c0_56] : memref<1x2xf32, #tpu.memory_space<vmem>>, vector<1x2xf32>
    %cst_57 = arith.constant dense<0.000000e+00> : vector<1x256xf32>
    %143 = tpu.matmul %142, %0, %cst_57 {dimension_numbers = #tpu.dot_dimension_numbers<[1], [1], [0], [0], [0, 0, 1, 0], [], []>} : vector<1x2xf32>, vector<256x2xf32>, vector<1x256xf32> -> vector<1x256xf32>
    %144 = vector.broadcast %143 : vector<1x256xf32> to vector<8x256xf32>
    %145 = arith.mulf %141, %144 : vector<8x256xf32>
    %cst_58 = arith.constant dense<0.000000e+00> : vector<8x32xf32>
    %146 = tpu.matmul %145, %54, %cst_58 {dimension_numbers = #tpu.dot_dimension_numbers<[1], [1], [0], [0], [0, 0, 1, 0], [], []>} : vector<8x256xf32>, vector<32x256xf32>, vector<8x32xf32> -> vector<8x32xf32>
    %cst_59 = arith.constant dense<0.000000e+00> : vector<32xf32>
    %147 = vector.multi_reduction <add>, %146, %cst_59 [0] : vector<8x32xf32> to vector<32xf32>
    %148 = vector.shape_cast %147 : vector<32xf32> to vector<1x32xf32>
    %cst_60 = arith.constant 1.250000e-01 : f32
    %149 = vector.broadcast %cst_60 : f32 to vector<1x32xf32>
    %150 = arith.mulf %148, %149 : vector<1x32xf32>
    %cst_61 = arith.constant 0.000000e+00 : f32
    %151 = vector.broadcast %cst_61 : f32 to vector<1x256xf32>
    %152 = arith.maximumf %28, %151 : vector<1x256xf32>
    %153 = math.absf %28 : vector<1x256xf32>
    %cst_62 = arith.constant 0.000000e+00 : f32
    %154 = vector.broadcast %cst_62 : f32 to vector<1x256xf32>
    %155 = arith.subf %154, %153 : vector<1x256xf32>
    %156 = math.exp %155 : vector<1x256xf32>
    %cst_63 = arith.constant 1.000000e+00 : f32
    %157 = vector.broadcast %cst_63 : f32 to vector<1x256xf32>
    %158 = arith.addf %157, %156 : vector<1x256xf32>
    %159 = math.log %158 : vector<1x256xf32>
    %160 = arith.addf %152, %159 : vector<1x256xf32>
    %161 = arith.negf %28 : vector<1x256xf32>
    %162 = math.exp %161 : vector<1x256xf32>
    %cst_64 = arith.constant 1.000000e+00 : f32
    %163 = vector.broadcast %cst_64 : f32 to vector<1x256xf32>
    %164 = arith.addf %163, %162 : vector<1x256xf32>
    %165 = arith.divf %163, %164 : vector<1x256xf32>
    %166 = arith.mulf %28, %165 : vector<1x256xf32>
    %167 = arith.subf %160, %166 : vector<1x256xf32>
    %cst_65 = arith.constant dense<0.000000e+00> : vector<1x32xf32>
    %168 = tpu.matmul %167, %54, %cst_65 {dimension_numbers = #tpu.dot_dimension_numbers<[1], [1], [0], [0], [0, 0, 1, 0], [], []>} : vector<1x256xf32>, vector<32x256xf32>, vector<1x32xf32> -> vector<1x32xf32>
    %169 = arith.addf %150, %168 : vector<1x32xf32>
    %c0_66 = arith.constant 0 : index
    %c0_67 = arith.constant 0 : index
    %c0_68 = arith.constant 0 : index
    %170 = vector.load %arg14[%c0_66, %c0_67, %c0_68] : memref<1x1x32xf32, #tpu.memory_space<vmem>>, vector<1x1x32xf32>
    %171 = vector.shape_cast %170 : vector<1x1x32xf32> to vector<1x32xf32>
    %172 = vector.shape_cast %169 : vector<1x32xf32> to vector<1x1x32xf32>
    tpu.vector_store %arg14[%c0_66, %c0_67, %c0_68], %172 {strides = array<i32>} : memref<1x1x32xf32, #tpu.memory_space<vmem>>, vector<1x1x32xf32>,
    return
  }
  func.func @transform_0(%arg0: i32) -> (i32, i32) {
    %c0_i32 = arith.constant 0 : i32
    %c0_i32_0 = arith.constant 0 : i32
    return %arg0, %c0_i32 : i32, i32
  }
  func.func @transform_1(%arg0: i32) -> (i32, i32) {
    %c0_i32 = arith.constant 0 : i32
    %c0_i32_0 = arith.constant 0 : i32
    return %c0_i32, %arg0 : i32, i32
  }
  func.func @transform_2(%arg0: i32) -> (i32, i32, i32) {
    %c0_i32 = arith.constant 0 : i32
    %c0_i32_0 = arith.constant 0 : i32
    %c0_i32_1 = arith.constant 0 : i32
    return %arg0, %c0_i32, %c0_i32_0 : i32, i32, i32
  }
  func.func @transform_3(%arg0: i32) -> (i32, i32) {
    %c0_i32 = arith.constant 0 : i32
    %c0_i32_0 = arith.constant 0 : i32
    return %c0_i32, %arg0 : i32, i32
  }
  func.func @transform_4(%arg0: i32) -> (i32, i32) {
    %c0_i32 = arith.constant 0 : i32
    %c0_i32_0 = arith.constant 0 : i32
    %c0_i32_1 = arith.constant 0 : i32
    return %c0_i32, %c0_i32_0 : i32, i32
  }
  func.func @transform_5(%arg0: i32) -> (i32, i32) {
    %c0_i32 = arith.constant 0 : i32
    %c0_i32_0 = arith.constant 0 : i32
    %c0_i32_1 = arith.constant 0 : i32
    return %c0_i32, %c0_i32_0 : i32, i32
  }
  func.func @transform_6(%arg0: i32) -> (i32, i32) {
    %c0_i32 = arith.constant 0 : i32
    %c0_i32_0 = arith.constant 0 : i32
    %c0_i32_1 = arith.constant 0 : i32
    return %c0_i32, %c0_i32_0 : i32, i32
  }
  func.func @transform_7(%arg0: i32) -> (i32, i32) {
    %c0_i32 = arith.constant 0 : i32
    %c0_i32_0 = arith.constant 0 : i32
    %c0_i32_1 = arith.constant 0 : i32
    return %c0_i32, %c0_i32_0 : i32, i32
  }
  func.func @transform_8(%arg0: i32) -> (i32, i32) {
    %c0_i32 = arith.constant 0 : i32
    %c0_i32_0 = arith.constant 0 : i32
    %c0_i32_1 = arith.constant 0 : i32
    return %c0_i32, %c0_i32_0 : i32, i32
  }
  func.func @transform_9(%arg0: i32) -> (i32, i32) {
    %c0_i32 = arith.constant 0 : i32
    %c0_i32_0 = arith.constant 0 : i32
    %c0_i32_1 = arith.constant 0 : i32
    return %c0_i32, %c0_i32_0 : i32, i32
  }
  func.func @transform_10(%arg0: i32) -> (i32, i32) {
    %c0_i32 = arith.constant 0 : i32
    %c0_i32_0 = arith.constant 0 : i32
    %c0_i32_1 = arith.constant 0 : i32
    return %c0_i32, %c0_i32_0 : i32, i32
  }
  func.func @transform_11(%arg0: i32) -> (i32, i32) {
    %c0_i32 = arith.constant 0 : i32
    %c0_i32_0 = arith.constant 0 : i32
    %c0_i32_1 = arith.constant 0 : i32
    return %c0_i32, %c0_i32_0 : i32, i32
  }
  func.func @transform_12(%arg0: i32) -> (i32, i32) {
    %c0_i32 = arith.constant 0 : i32
    %c0_i32_0 = arith.constant 0 : i32
    %c0_i32_1 = arith.constant 0 : i32
    return %c0_i32, %c0_i32_0 : i32, i32
  }
  func.func @transform_13(%arg0: i32) -> (i32, i32, i32) {
    %c0_i32 = arith.constant 0 : i32
    %c0_i32_0 = arith.constant 0 : i32
    %c0_i32_1 = arith.constant 0 : i32
    return %arg0, %c0_i32, %c0_i32_0 : i32, i32, i32
  }
}

</mosaic_0001>

<bundles_post_ra>
// kernel: tpu_custom_call.1
= control target key start
LH: loop header
LB: loop body
LE: loop exit
PB: predicated region body
PF: predicated region fallthrough
CT: control target
= control target key end

     0   :  { %18 = vsyncpa [#allocation3], 0  ;;  %s8247_s0 = inlined_call_operand.vmem [shape: f32[256,2], index: 0, kind: input, shape index: {}]   ;;  %s8248_s1 = inlined_call_operand.vmem [shape: f32[8,256], index: 1, kind: input, shape index: {}]   ;;  %s8249_s2 = inlined_call_operand.vmem [shape: f32[1,24,32], index: 2, kind: input, shape index: {}]   ;;  %s8250_s3 = inlined_call_operand.vmem [shape: f32[8,256], index: 3, kind: input, shape index: {}]   ;;  %s8251_s4 = inlined_call_operand.vmem [shape: f32[2,256], index: 4, kind: input, shape index: {}]   ;;  %s8252_s5 = inlined_call_operand.vmem [shape: f32[1,256], index: 5, kind: input, shape index: {}]   ;;  %s8253_s6 = inlined_call_operand.hbm [shape: bf16[256,512], index: 6, kind: input, shape index: {}]   ;;  %s8254_s7 = inlined_call_operand.vmem [shape: f32[1,512], index: 7, kind: input, shape index: {}]   ;;  %s8255_s8 = inlined_call_operand.hbm [shape: bf16[512,512], index: 8, kind: input, shape index: {}]   ;;  %s8256_s9 = inlined_call_operand.vmem [shape: f32[1,512], index: 9, kind: input, shape index: {}]   ;;  %s8257_s10 = inlined_call_operand.vmem [shape: bf16[8,512], index: 10, kind: input, shape index: {}]   ;;  %s8258_s11 = inlined_call_operand.vmem [shape: f32[8,1], index: 11, kind: input, shape index: {}]   ;;  %s8259_s12 = inlined_call_operand.vmem [shape: f32[1,2], index: 12, kind: input, shape index: {}]   ;;  %s8260_s13 = inlined_call_operand.hbm [shape: f32[1,1,32], index: 13, kind: output, shape index: {}]  }
   0x1   :  { %19 = vsyncpa [#allocation6], 0 }
   0x2   :  { %20 = vsyncpa [#allocation4], 0  ;;  %s37_s27 = sshll.u32 %s8253_s6, 4  ;;  %s6063_s28 = smov [#allocation2]   ;;  %s38_s27 = int_to_ptr.hbm [resolvable:$true] %s37_s27 }
   0x3   :  { %s39_s29 = sshll.u32 %s6063_s28, 4  ;;  %s52_s15 = sshll.u32 %s8255_s8, 4  ;;  %s40_s29 = int_to_ptr.vmem [resolvable:$true] %s39_s29  ;;  %s53_s15 = int_to_ptr.hbm [resolvable:$true] %s52_s15 }
   0x4   :  { %s6064_s16 = smov 256   ;;  %s6065_s17 = smov 16  }
   0x5   :  { %45 = dma.hbm_to_vmem [thread:$0]  %s38_s27, 8192, %s40_s29, [#allocation3], %s6064_s16, %s6064_s16, %s6065_s17  }
   0x6   :  { %s6066_s18 = smov [#allocation5]  }
   0x7   :  { %s54_s19 = sshll.u32 %s6066_s18, 4  ;;  %s55_s19 = int_to_ptr.vmem [resolvable:$true] %s54_s19 }
   0x8   :  { %60 = dma.hbm_to_vmem [thread:$0]  %s53_s15, 16384, %s55_s19, [#allocation6], %s6064_s16, %s6064_s16, %s6065_s17  }
   0x9   :  { %6057 = dma.done.wait [#allocation3], 8192  }
   0xa   :  { %6058 = vsyncadd [#allocation3], 4294959104 }
   0xb   :  { %6059 = dma.done.wait [#allocation6], 16384  }
   0xc   :  { %6060 = vsyncadd [#allocation6], 4294950912  ;;  %v109_v0 = vld [vmem:[%s8251_s4] sm:$0xf]  ;;  %v5734_v1 = vld [vmem:[#allocation2 + $0xe4] sm:$0xf] }
   0xd   :  { %117 = vst [vmem:[#allocation1] ss:$4 sm:$0xff] %v109_v0  ;;  %v4974_v2 = vld [vmem:[#allocation2 + $0xf0] sm:$0xf0]  ;;  %v5766_v3 = vld [vmem:[#allocation2 + $0x1e4] sm:$0xf] }
   0xe   :  { %v5102_v4 = vld [vmem:[#allocation2 + $0x1f0] sm:$0xf0]  ;;  %vm217_vm0 = vcmask 1041408   ;;  %v77_v5 = vld [vmem:[%s8247_s0] sm:$0xff]  ;;  %vm120_vm1 = vcmask 15360   ;;  %v4977_v6 = vor.u32 %v5734_v1, %v4974_v2  ;;  %v78_v16 = vld [vmem:[%s8247_s0 + $0x8] sm:$0xff] }
   0xf   :  { %v5105_v7 = vor.u32 %v5766_v3, %v5102_v4  ;;  %v5730_v10 = vld [vmem:[#allocation2 + $0xc4] sm:$0xf]  ;;  %v4958_v11 = vld [vmem:[#allocation2 + $0xd0] sm:$0xf0]  ;;  %v79_v17 = vld [vmem:[%s8247_s0 + $0x10] sm:$0xff]  ;;  %vm4381_vm14 = vcmask 261120  }
  0x10   :  { %v5762_v12 = vld [vmem:[#allocation2 + $0x1c4] sm:$0xf]  ;;  %v4961_v13 = vor.u32 %v5730_v10, %v4958_v11  ;;  %v5086_v14 = vld [vmem:[#allocation2 + $0x1d0] sm:$0xf0]  ;;  %v81_v19 = vld [vmem:[%s8247_s0 + $0x20] sm:$0xff]  ;;  %s4781_s22 = sshll.u32 %s8260_s13, 4  ;;  %s4782_s22 = int_to_ptr.hbm [resolvable:$true] %s4781_s22 }
  0x11   :  { %v5089_v15 = vor.u32 %v5762_v12, %v5086_v14  ;;  %v80_v18 = vld [vmem:[%s8247_s0 + $0x18] sm:$0xff]  ;;  %v5726_v20 = vld [vmem:[#allocation2 + $0xa4] sm:$0xf]  ;;  %v83_v27 = vld [vmem:[%s8247_s0 + $0x30] sm:$0xff] }
  0x12   :  { %v4942_v21 = vld [vmem:[#allocation2 + $0xb0] sm:$0xf0]  ;;  %v5758_v22 = vld [vmem:[#allocation2 + $0x1a4] sm:$0xf]  ;;  %v85_v29 = vld [vmem:[%s8247_s0 + $0x40] sm:$0xff] }
  0x13   :  { %v4945_v23 = vor.u32 %v5726_v20, %v4942_v21  ;;  %v5070_v24 = vld [vmem:[#allocation2 + $0x1b0] sm:$0xf0]  ;;  %v82_v26 = vld [vmem:[%s8247_s0 + $0x28] sm:$0xff]  ;;  %v5736_v38 = vld [vmem:[#allocation2 + $0xec] sm:$0xf0] }
  0x14   :  { %v118_v8 = vld.sshfl [vmem:[#allocation1] sm:$0xff pattern:$0x73625140]  ;;  %v119_v9 = vld.sshfl [vmem:[#allocation1 + $0x8] sm:$0xff pattern:$0x73625140]  ;;  %v5073_v25 = vor.u32 %v5758_v22, %v5070_v24 }
  0x15   :  { %4792 = vmatpush.msk.msra.mxu0 %vm217_vm0, %v118_v8  ;;  %4825 = vmatpush.msk.msra.mxu1 %vm217_vm0, %v119_v9  ;;  %v84_v28 = vld [vmem:[%s8247_s0 + $0x38] sm:$0xff]  ;;  %v5722_v30 = vld [vmem:[#allocation2 + $0x84] sm:$0xf]  ;;  %v4972_v37 = vld [vmem:[#allocation2 + $0xe0] sm:$0xf] }
  0x16   :  { %4793 = vmatmul.msk.f32.vlgmr.msra.gmra.mxu0 %vm120_vm1, %v77_v5  ;;  %4826 = vmatmul.msk.f32.vlgmr.msra.gmra.mxu1 %vm120_vm1, %v77_v5  ;;  %v4926_v31 = vld [vmem:[#allocation2 + $0x90] sm:$0xf0]  ;;  %v5754_v32 = vld [vmem:[#allocation2 + $0x184] sm:$0xf]  ;;  %v5100_v39 = vld [vmem:[#allocation2 + $0x1e0] sm:$0xf]  ;;  %v4973_v40 = vor.u32 %v5736_v38, %v4972_v37 }
  0x17   :  { %1052 = vmatpush.bf16.msrb.mxu0 %v4977_v6  ;;  %1141 = vmatpush.bf16.msrb.mxu1 %v5105_v7  ;;  %v4929_v33 = vor.u32 %v5722_v30, %v4926_v31  ;;  %v5054_v34 = vld [vmem:[#allocation2 + $0x190] sm:$0xf0]  ;;  %v86_v36 = vld [vmem:[%s8247_s0 + $0x48] sm:$0xff]  ;;  %v5768_v41 = vld [vmem:[#allocation2 + $0x1ec] sm:$0xf0] }
  0x18   :  { %v5057_v35 = vor.u32 %v5754_v32, %v5054_v34  ;;  %v4956_v42 = vld [vmem:[#allocation2 + $0xc0] sm:$0xf]  ;;  %v5732_v43 = vld [vmem:[#allocation2 + $0xcc] sm:$0xf0]  ;;  %v5101_v44 = vor.u32 %v5768_v41, %v5100_v39  ;;  %874 = vmatpush.bf16.msra.mxu2 %v4973_v40  ;;  %v87_v48 = vld [vmem:[%s8247_s0 + $0x50] sm:$0xff] }
  0x19   :  { %v5084_v45 = vld [vmem:[#allocation2 + $0x1c0] sm:$0xf]  ;;  %v5764_v46 = vld [vmem:[#allocation2 + $0x1cc] sm:$0xf0]  ;;  %v4957_v47 = vor.u32 %v5732_v43, %v4956_v42  ;;  %v89_v8 = vld [vmem:[%s8247_s0 + $0x60] sm:$0xff] }
  0x1a   :  { %963 = vmatpush.bf16.msra.mxu3 %v5101_v44  ;;  %v5085_v49 = vor.u32 %v5764_v46, %v5084_v45  ;;  %v4940_v50 = vld [vmem:[#allocation2 + $0xa0] sm:$0xf]  ;;  %v5728_v51 = vld [vmem:[#allocation2 + $0xac] sm:$0xf0]  ;;  %v5718_v12 = vld [vmem:[#allocation2 + $0x64] sm:$0xf] }
  0x1b   :  { %1053 = vmatpush.bf16.msrb.mxu0 %v4961_v13  ;;  %1142 = vmatpush.bf16.msrb.mxu1 %v5089_v15  ;;  %v5068_v52 = vld [vmem:[#allocation2 + $0x1a0] sm:$0xf]  ;;  %v4941_v53 = vor.u32 %v5728_v51, %v4940_v50  ;;  %v5760_v54 = vld [vmem:[#allocation2 + $0x1ac] sm:$0xf0]  ;;  %v4910_v13 = vld [vmem:[#allocation2 + $0x70] sm:$0xf0] }
  0x1c   :  { %875 = vmatpush.bf16.msra.mxu2 %v4957_v47  ;;  %v4924_v55 = vld [vmem:[#allocation2 + $0x80] sm:$0xf]  ;;  %v5724_v56 = vld [vmem:[#allocation2 + $0x8c] sm:$0xf0]  ;;  %v5069_v57 = vor.u32 %v5760_v54, %v5068_v52  ;;  %v5750_v14 = vld [vmem:[#allocation2 + $0x164] sm:$0xf]  ;;  %v4913_v15 = vor.u32 %v5718_v12, %v4910_v13 }
  0x1d   :  { %v5052_v58 = vld [vmem:[#allocation2 + $0x180] sm:$0xf]  ;;  %v5756_v59 = vld [vmem:[#allocation2 + $0x18c] sm:$0xf0]  ;;  %v4925_v60 = vor.u32 %v5724_v56, %v4924_v55  ;;  %v91_v31 = vld [vmem:[%s8247_s0 + $0x70] sm:$0xff] }
  0x1e   :  { %4794 = vmatmul.msk.f32.gmra.mxu0 %vm120_vm1, %v78_v16  ;;  %4827 = vmatmul.msk.f32.gmra.mxu1 %vm120_vm1, %v78_v16  ;;  %v88_v61 = vld [vmem:[%s8247_s0 + $0x58] sm:$0xff]  ;;  %v5053_v62 = vor.u32 %v5756_v59, %v5052_v58  ;;  %v4908_v63 = vld [vmem:[#allocation2 + $0x60] sm:$0xf]  ;;  %v5714_v37 = vld [vmem:[#allocation2 + $0x44] sm:$0xf] }
  0x1f   :  { %1054 = vmatpush.bf16.msrb.mxu0 %v4945_v23  ;;  %1143 = vmatpush.bf16.msrb.mxu1 %v5073_v25  ;;  %v5720_v0 = vld [vmem:[#allocation2 + $0x6c] sm:$0xf0]  ;;  %v5036_v1 = vld [vmem:[#allocation2 + $0x160] sm:$0xf]  ;;  %v5038_v16 = vld [vmem:[#allocation2 + $0x170] sm:$0xf0] }
  0x20   :  { %964 = vmatpush.bf16.msra.mxu3 %v5085_v49  ;;  %876 = vmatpush.bf16.msra.mxu2 %v4941_v53  ;;  %v4909_v2 = vor.u32 %v5720_v0, %v4908_v63  ;;  %v5752_v3 = vld [vmem:[#allocation2 + $0x16c] sm:$0xf0]  ;;  %v4892_v5 = vld [vmem:[#allocation2 + $0x40] sm:$0xf]  ;;  %v4894_v38 = vld [vmem:[#allocation2 + $0x50] sm:$0xf0] }
  0x21   :  { %v5037_v4 = vor.u32 %v5752_v3, %v5036_v1  ;;  %v5716_v6 = vld [vmem:[#allocation2 + $0x4c] sm:$0xf0]  ;;  %v5020_v7 = vld [vmem:[#allocation2 + $0x140] sm:$0xf]  ;;  %v5746_v39 = vld [vmem:[#allocation2 + $0x144] sm:$0xf]  ;;  %v4897_v40 = vor.u32 %v5714_v37, %v4894_v38 }
  0x22   :  { %v4893_v9 = vor.u32 %v5716_v6, %v4892_v5  ;;  %v5748_v10 = vld [vmem:[#allocation2 + $0x14c] sm:$0xf0]  ;;  %v5004_v21 = vld [vmem:[#allocation2 + $0x120] sm:$0xf]  ;;  %v5022_v41 = vld [vmem:[#allocation2 + $0x150] sm:$0xf0] }
  0x23   :  { %1055 = vmatpush.bf16.msrb.mxu0 %v4929_v33  ;;  %1144 = vmatpush.bf16.msrb.mxu1 %v5057_v35  ;;  %v5021_v11 = vor.u32 %v5748_v10, %v5020_v7  ;;  %v5744_v22 = vld [vmem:[#allocation2 + $0x12c] sm:$0xf0]  ;;  %v4860_v24 = vld [vmem:[#allocation2] sm:$0xf]  ;;  %v93_v35 = vld [vmem:[%s8247_s0 + $0x80] sm:$0xff]  ;;  %v5025_v44 = vor.u32 %v5746_v39, %v5022_v41 }
  0x24   :  { %965 = vmatpush.bf16.msra.mxu3 %v5069_v57  ;;  %877 = vmatpush.bf16.msra.mxu2 %v4925_v60  ;;  %v5005_v23 = vor.u32 %v5744_v22, %v5004_v21  ;;  %v5708_v25 = vld [vmem:[#allocation2 + $0xc] sm:$0xf0]  ;;  %v94_v47 = vld [vmem:[%s8247_s0 + $0x88] sm:$0xff]  ;;  %v95_v56 = vld [vmem:[%s8247_s0 + $0x90] sm:$0xff] }
  0x25   :  { %v92_v32 = vld [vmem:[%s8247_s0 + $0x78] sm:$0xff]  ;;  %v5710_v5 = vld [vmem:[#allocation2 + $0x24] sm:$0xf]  ;;  %v99_v22 = vld [vmem:[%s8247_s0 + $0xb0] sm:$0xff] }
  0x26   :  { %4795 = vmatmul.msk.f32.gmra.mxu0 %vm120_vm1, %v79_v17  ;;  %4828 = vmatmul.msk.f32.gmra.mxu1 %vm120_vm1, %v79_v17  ;;  %v4876_v17 = vld [vmem:[#allocation2 + $0x20] sm:$0xf]  ;;  %v96_v59 = vld [vmem:[%s8247_s0 + $0x98] sm:$0xff]  ;;  %v5742_v7 = vld [vmem:[#allocation2 + $0x124] sm:$0xf] }
  0x27   :  { %1056 = vmatpush.bf16.msrb.mxu0 %v4913_v15  ;;  %v4878_v6 = vld [vmem:[#allocation2 + $0x30] sm:$0xf0]  ;;  %v98_v13 = vld [vmem:[%s8247_s0 + $0xa8] sm:$0xff] }
  0x28   :  { %966 = vmatpush.bf16.msra.mxu3 %v5053_v62  ;;  %878 = vmatpush.bf16.msra.mxu2 %v4909_v2  ;;  %v5738_v37 = vld [vmem:[#allocation2 + $0x104] sm:$0xf]  ;;  %v4990_v39 = vld [vmem:[#allocation2 + $0x110] sm:$0xf0] }
  0x2b   :  { %1057 = vmatpush.bf16.msrb.mxu0 %v4897_v40  ;;  %v4993_v40 = vor.u32 %v5738_v37, %v4990_v39  ;;  %v108_v37 = vld [vmem:[%s8247_s0 + $0xf8] sm:$0xff] }
  0x2c   :  { %967 = vmatpush.bf16.msra.mxu3 %v5037_v4  ;;  %879 = vmatpush.bf16.msra.mxu2 %v4893_v9  ;;  %v97_v4 = vld [vmem:[%s8247_s0 + $0xa0] sm:$0xff]  ;;  %v5006_v9 = vld [vmem:[#allocation2 + $0x130] sm:$0xf0] }
  0x2d   :  { %v5009_v10 = vor.u32 %v5742_v7, %v5006_v9 }
  0x2e   :  { %4796 = vmatmul.msk.f32.gmra.mxu0 %vm120_vm1, %v80_v18  ;;  %4829 = vmatmul.msk.f32.gmra.mxu1 %vm120_vm1, %v80_v18  ;;  %v5712_v18 = vld [vmem:[#allocation2 + $0x2c] sm:$0xf0] }
  0x2f   :  { %v4877_v20 = vor.u32 %v5712_v18, %v4876_v17 }
  0x30   :  { %968 = vmatpush.bf16.msra.mxu3 %v5021_v11 }
  0x31   :  { %880 = vmatpush.bf16.msra.mxu2 %v4877_v20 }
  0x34   :  { %969 = vmatpush.bf16.msra.mxu3 %v5005_v23 }
  0x36   :  { %4797 = vmatmul.msk.f32.gmra.mxu0 %vm120_vm1, %v81_v19  ;;  %4830 = vmatmul.msk.f32.gmra.mxu1 %vm120_vm1, %v81_v19  ;;  %v5041_v19 = vor.u32 %v5750_v14, %v5038_v16 }
  0x38   :  { %1145 = vmatpush.bf16.msrb.mxu1 %v5041_v19 }
  0x3c   :  { %1146 = vmatpush.bf16.msrb.mxu1 %v5025_v44 }
  0x3e   :  { %4798 = vmatmul.msk.f32.gmra.mxu0 %vm120_vm1, %v82_v26  ;;  %4831 = vmatmul.msk.f32.gmra.mxu1 %vm120_vm1, %v82_v26  ;;  %v4988_v26 = vld [vmem:[#allocation2 + $0x100] sm:$0xf] }
  0x40   :  { %1147 = vmatpush.bf16.msrb.mxu1 %v5009_v10 }
  0x44   :  { %1148 = vmatpush.bf16.msrb.mxu1 %v4993_v40 }
  0x46   :  { %4799 = vmatmul.msk.f32.gmra.mxu0 %vm120_vm1, %v83_v27  ;;  %4832 = vmatmul.msk.f32.gmra.mxu1 %vm120_vm1, %v83_v27  ;;  %v90_v27 = vld [vmem:[%s8247_s0 + $0x68] sm:$0xff] }
  0x4e   :  { %4800 = vmatmul.msk.f32.gmra.mxu0 %vm120_vm1, %v84_v28  ;;  %4833 = vmatmul.msk.f32.gmra.mxu1 %vm120_vm1, %v84_v28  ;;  %v4861_v28 = vor.u32 %v5708_v25, %v4860_v24  ;;  %v100_v25 = vld [vmem:[%s8247_s0 + $0xb8] sm:$0xff] }
  0x50   :  { %881 = vmatpush.bf16.msra.mxu2 %v4861_v28 }
  0x56   :  { %4801 = vmatmul.msk.f32.gmra.mxu0 %vm120_vm1, %v85_v29  ;;  %4834 = vmatmul.msk.f32.gmra.mxu1 %vm120_vm1, %v85_v29  ;;  %v5740_v29 = vld [vmem:[#allocation2 + $0x10c] sm:$0xf0] }
  0x57   :  { %v4989_v30 = vor.u32 %v5740_v29, %v4988_v26 }
  0x59   :  { %970 = vmatpush.bf16.msra.mxu3 %v4989_v30 }
  0x5e   :  { %4802 = vmatmul.msk.f32.gmra.mxu0 %vm120_vm1, %v86_v36  ;;  %4835 = vmatmul.msk.f32.gmra.mxu1 %vm120_vm1, %v86_v36  ;;  %v110_v36 = vld [vmem:[%s8252_s5] sm:$0x3] }
  0x5f   :  { %v6238_v42 = vperm.slane %v110_v36, 0  ;;  %v6240_v43 = vperm.slane %v110_v36, 1  ;;  %v4862_v36 = vld [vmem:[#allocation2 + $0x10] sm:$0xf0] }
  0x66   :  { %4803 = vmatmul.msk.f32.gmra.mxu0 %vm120_vm1, %v87_v48  ;;  %4836 = vmatmul.msk.f32.gmra.mxu1 %vm120_vm1, %v87_v48 }
  0x6e   :  { %4804 = vmatmul.msk.f32.gmra.mxu0 %vm120_vm1, %v88_v61  ;;  %4837 = vmatmul.msk.f32.gmra.mxu1 %vm120_vm1, %v88_v61 }
  0x76   :  { %4805 = vmatmul.msk.f32.gmra.mxu0 %vm120_vm1, %v89_v8  ;;  %4838 = vmatmul.msk.f32.gmra.mxu1 %vm120_vm1, %v89_v8  ;;  %v4881_v8 = vor.u32 %v5710_v5, %v4878_v6  ;;  %v5737_v5 = vld [vmem:[#allocation2 + $0xf4] sm:$0xf0]  ;;  %v5108_v6 = vld [vmem:[#allocation2 + $0x1e8] sm:$0xf] }
  0x78   :  { %1058 = vmatpush.bf16.msrb.mxu0 %v4881_v8  ;;  %v5769_v8 = vld [vmem:[#allocation2 + $0x1f4] sm:$0xf0] }
  0x79   :  { %v5109_v9 = vor.u32 %v5769_v8, %v5108_v6 }
  0x7b   :  { %1319 = vmatpush.bf16.msrb.mxu3 %v5109_v9 }
  0x7e   :  { %4806 = vmatmul.msk.f32.gmra.mxu0 %vm120_vm1, %v90_v27  ;;  %4839 = vmatmul.msk.f32.gmra.mxu1 %vm120_vm1, %v90_v27 }
  0x86   :  { %4807 = vmatmul.msk.f32.gmra.mxu0 %vm120_vm1, %v91_v31  ;;  %4840 = vmatmul.msk.f32.gmra.mxu1 %vm120_vm1, %v91_v31 }
  0x8e   :  { %4808 = vmatmul.msk.f32.gmra.mxu0 %vm120_vm1, %v92_v32  ;;  %4841 = vmatmul.msk.f32.gmra.mxu1 %vm120_vm1, %v92_v32 }
  0x93   :  { %v239_v33 = vpop.f32.mrf.mxu0  ;;  %v352_v34 = vpop.f32.mrf.mxu1 }
  0x94   :  { %v240_v48 = vadd.f32 %v239_v33, %v6238_v42  ;;  %v353_v49 = vadd.f32 %v352_v34, %v6240_v43  ;;  %v101_v34 = vld [vmem:[%s8247_s0 + $0xc0] sm:$0xff] }
  0x96   :  { %4809 = vmatmul.msk.f32.gmra.mxu0 %vm120_vm1, %v93_v35  ;;  %4842 = vmatmul.msk.f32.gmra.mxu1 %vm120_vm1, %v93_v35  ;;  %v5706_v35 = vld [vmem:[#allocation2 + $0x4] sm:$0xf] }
  0x97   :  { %v4865_v38 = vor.u32 %v5706_v35, %v4862_v36 }
  0x99   :  { %1059 = vmatpush.bf16.msrb.mxu0 %v4865_v38 }
  0x9b   :  { %v242_v45 = vpop.f32.mrf.mxu0  ;;  %v355_v46 = vpop.f32.mrf.mxu1 }
  0x9c   :  { %v243_v50 = vadd.f32 %v242_v45, %v6238_v42  ;;  %v356_v51 = vadd.f32 %v355_v46, %v6240_v43  ;;  %v102_v45 = vld [vmem:[%s8247_s0 + $0xc8] sm:$0xff] }
  0x9e   :  { %v6249_v52 = vpack.c.bf16 %v243_v50, %v240_v48  ;;  %v6251_v53 = vpack.c.bf16 %v356_v51, %v353_v49  ;;  %4810 = vmatmul.msk.f32.gmra.mxu0 %vm120_vm1, %v94_v47  ;;  %4843 = vmatmul.msk.f32.gmra.mxu1 %vm120_vm1, %v94_v47 }
  0xa0   :  { %882 = vmatmul.bf16.vlgmr.msra.gmra.mxu2 %v6249_v52  ;;  %971 = vmatmul.bf16.vlgmr.msra.gmra.mxu3 %v6251_v53 }
  0xa3   :  { %v245_v54 = vpop.f32.mrf.mxu0  ;;  %v358_v55 = vpop.f32.mrf.mxu1 }
  0xa4   :  { %v246_v60 = vadd.f32 %v245_v54, %v6238_v42  ;;  %v359_v61 = vadd.f32 %v358_v55, %v6240_v43 }
  0xa6   :  { %4811 = vmatmul.msk.f32.gmra.mxu0 %vm120_vm1, %v95_v56  ;;  %4844 = vmatmul.msk.f32.gmra.mxu1 %vm120_vm1, %v95_v56  ;;  %v103_v56 = vld [vmem:[%s8247_s0 + $0xd0] sm:$0xff] }
  0xab   :  { %v248_v57 = vpop.f32.mrf.mxu0  ;;  %v361_v58 = vpop.f32.mrf.mxu1 }
  0xac   :  { %v249_v62 = vadd.f32 %v248_v57, %v6238_v42  ;;  %v362_v63 = vadd.f32 %v361_v58, %v6240_v43 }
  0xae   :  { %v6269_v0 = vpack.c.bf16 %v249_v62, %v246_v60  ;;  %v6271_v1 = vpack.c.bf16 %v362_v63, %v359_v61  ;;  %4812 = vmatmul.msk.f32.gmra.mxu0 %vm120_vm1, %v96_v59  ;;  %4845 = vmatmul.msk.f32.gmra.mxu1 %vm120_vm1, %v96_v59  ;;  %v104_v59 = vld [vmem:[%s8247_s0 + $0xd8] sm:$0xff] }
  0xb0   :  { %887 = vmatmul.bf16.gmra.mxu2 %v6269_v0  ;;  %976 = vmatmul.bf16.gmra.mxu3 %v6271_v1 }
  0xb3   :  { %v251_v2 = vpop.f32.mrf.mxu0  ;;  %v364_v3 = vpop.f32.mrf.mxu1 }
  0xb4   :  { %v252_v14 = vadd.f32 %v251_v2, %v6238_v42  ;;  %v365_v15 = vadd.f32 %v364_v3, %v6240_v43 }
  0xb6   :  { %4813 = vmatmul.msk.f32.gmra.mxu0 %vm120_vm1, %v97_v4  ;;  %4846 = vmatmul.msk.f32.gmra.mxu1 %vm120_vm1, %v97_v4  ;;  %v4980_v4 = vld [vmem:[#allocation2 + $0xe8] sm:$0xf] }
  0xb7   :  { %v4981_v7 = vor.u32 %v5737_v5, %v4980_v4 }
  0xb9   :  { %1230 = vmatpush.bf16.msrb.mxu2 %v4981_v7 }
  0xbb   :  { %v254_v11 = vpop.f32.mrf.mxu0  ;;  %v367_v12 = vpop.f32.mrf.mxu1 }
  0xbc   :  { %v255_v16 = vadd.f32 %v254_v11, %v6238_v42  ;;  %v368_v17 = vadd.f32 %v367_v12, %v6240_v43  ;;  %v105_v12 = vld [vmem:[%s8247_s0 + $0xe0] sm:$0xff] }
  0xbe   :  { %v6289_v18 = vpack.c.bf16 %v255_v16, %v252_v14  ;;  %v6291_v19 = vpack.c.bf16 %v368_v17, %v365_v15  ;;  %4814 = vmatmul.msk.f32.gmra.mxu0 %vm120_vm1, %v98_v13  ;;  %4847 = vmatmul.msk.f32.gmra.mxu1 %vm120_vm1, %v98_v13  ;;  %v5735_v13 = vld [vmem:[#allocation2 + $0xec] sm:$0xf]  ;;  %v4982_v14 = vld [vmem:[#allocation2 + $0xf8] sm:$0xf0] }
  0xbf   :  { %v5767_v15 = vld [vmem:[#allocation2 + $0x1ec] sm:$0xf]  ;;  %v4985_v16 = vor.u32 %v5735_v13, %v4982_v14  ;;  %v5110_v17 = vld [vmem:[#allocation2 + $0x1f8] sm:$0xf0] }
  0xc0   :  { %892 = vmatmul.bf16.gmra.mxu2 %v6289_v18  ;;  %981 = vmatmul.bf16.gmra.mxu3 %v6291_v19 }
  0xc1   :  { %1408 = vmatpush.bf16.msra.mxu0 %v4985_v16 }
  0xc3   :  { %v257_v20 = vpop.f32.mrf.mxu0  ;;  %v370_v21 = vpop.f32.mrf.mxu1 }
  0xc4   :  { %v258_v26 = vadd.f32 %v257_v20, %v6238_v42  ;;  %v371_v27 = vadd.f32 %v370_v21, %v6240_v43  ;;  %v5113_v20 = vor.u32 %v5767_v15, %v5110_v17 }
  0xc6   :  { %4815 = vmatmul.msk.f32.gmra.mxu0 %vm120_vm1, %v99_v22  ;;  %4848 = vmatmul.msk.f32.gmra.mxu1 %vm120_vm1, %v99_v22 }
  0xc7   :  { %1497 = vmatpush.bf16.msra.mxu1 %v5113_v20 }
  0xcb   :  { %v260_v23 = vpop.f32.mrf.mxu0  ;;  %v373_v24 = vpop.f32.mrf.mxu1 }
  0xcc   :  { %v261_v28 = vadd.f32 %v260_v23, %v6238_v42  ;;  %v374_v29 = vadd.f32 %v373_v24, %v6240_v43  ;;  %v106_v23 = vld [vmem:[%s8247_s0 + $0xe8] sm:$0xff] }
  0xce   :  { %v6309_v30 = vpack.c.bf16 %v261_v28, %v258_v26  ;;  %v6311_v31 = vpack.c.bf16 %v374_v29, %v371_v27  ;;  %4816 = vmatmul.msk.f32.gmra.mxu0 %vm120_vm1, %v100_v25  ;;  %4849 = vmatmul.msk.f32.gmra.mxu1 %vm120_vm1, %v100_v25 }
  0xd0   :  { %897 = vmatmul.bf16.gmra.mxu2 %v6309_v30  ;;  %986 = vmatmul.bf16.gmra.mxu3 %v6311_v31 }
  0xd3   :  { %v263_v32 = vpop.f32.mrf.mxu0  ;;  %v376_v33 = vpop.f32.mrf.mxu1 }
  0xd4   :  { %v264_v46 = vadd.f32 %v263_v32, %v6238_v42  ;;  %v377_v47 = vadd.f32 %v376_v33, %v6240_v43 }
  0xd6   :  { %4817 = vmatmul.msk.f32.gmra.mxu0 %vm120_vm1, %v101_v34  ;;  %4850 = vmatmul.msk.f32.gmra.mxu1 %vm120_vm1, %v101_v34  ;;  %v107_v34 = vld [vmem:[%s8247_s0 + $0xf0] sm:$0xff] }
  0xdb   :  { %v266_v41 = vpop.f32.mrf.mxu0  ;;  %v379_v44 = vpop.f32.mrf.mxu1 }
  0xdc   :  { %v267_v48 = vadd.f32 %v266_v41, %v6238_v42  ;;  %v380_v49 = vadd.f32 %v379_v44, %v6240_v43 }
  0xde   :  { %v6329_v50 = vpack.c.bf16 %v267_v48, %v264_v46  ;;  %v6331_v51 = vpack.c.bf16 %v380_v49, %v377_v47  ;;  %4818 = vmatmul.msk.f32.gmra.mxu0 %vm120_vm1, %v102_v45  ;;  %4851 = vmatmul.msk.f32.gmra.mxu1 %vm120_vm1, %v102_v45  ;;  %v4964_v48 = vld [vmem:[#allocation2 + $0xc8] sm:$0xf]  ;;  %v5733_v49 = vld [vmem:[#allocation2 + $0xd4] sm:$0xf0] }
  0xe0   :  { %902 = vmatmul.bf16.gmra.mxu2 %v6329_v50  ;;  %991 = vmatmul.bf16.gmra.mxu3 %v6331_v51 }
  0xe3   :  { %v269_v54 = vpop.f32.mrf.mxu0  ;;  %v382_v55 = vpop.f32.mrf.mxu1 }
  0xe4   :  { %v270_v60 = vadd.f32 %v269_v54, %v6238_v42  ;;  %v383_v61 = vadd.f32 %v382_v55, %v6240_v43  ;;  %v5092_v54 = vld [vmem:[#allocation2 + $0x1c8] sm:$0xf]  ;;  %v4965_v55 = vor.u32 %v5733_v49, %v4964_v48  ;;  %v5729_v48 = vld [vmem:[#allocation2 + $0xb4] sm:$0xf0] }
  0xe5   :  { %v5076_v49 = vld [vmem:[#allocation2 + $0x1a8] sm:$0xf] }
  0xe6   :  { %4819 = vmatmul.msk.f32.gmra.mxu0 %vm120_vm1, %v103_v56  ;;  %4852 = vmatmul.msk.f32.gmra.mxu1 %vm120_vm1, %v103_v56  ;;  %v5765_v56 = vld [vmem:[#allocation2 + $0x1d4] sm:$0xf0] }
  0xe7   :  { %1231 = vmatpush.bf16.msrb.mxu2 %v4965_v55 }
  0xeb   :  { %v272_v57 = vpop.f32.mrf.mxu0  ;;  %v385_v58 = vpop.f32.mrf.mxu1 }
  0xec   :  { %v273_v62 = vadd.f32 %v272_v57, %v6238_v42  ;;  %v386_v63 = vadd.f32 %v385_v58, %v6240_v43  ;;  %v5093_v57 = vor.u32 %v5765_v56, %v5092_v54  ;;  %v5731_v58 = vld [vmem:[#allocation2 + $0xcc] sm:$0xf] }
  0xee   :  { %v6349_v2 = vpack.c.bf16 %v273_v62, %v270_v60  ;;  %v6351_v3 = vpack.c.bf16 %v386_v63, %v383_v61  ;;  %4820 = vmatmul.msk.f32.gmra.mxu0 %vm120_vm1, %v104_v59  ;;  %4853 = vmatmul.msk.f32.gmra.mxu1 %vm120_vm1, %v104_v59  ;;  %v4966_v59 = vld [vmem:[#allocation2 + $0xd8] sm:$0xf0]  ;;  %v5763_v60 = vld [vmem:[#allocation2 + $0x1cc] sm:$0xf] }
  0xef   :  { %1320 = vmatpush.bf16.msrb.mxu3 %v5093_v57  ;;  %v4969_v61 = vor.u32 %v5731_v58, %v4966_v59  ;;  %v5094_v62 = vld [vmem:[#allocation2 + $0x1d8] sm:$0xf0]  ;;  %v5761_v57 = vld [vmem:[#allocation2 + $0x1b4] sm:$0xf0] }
  0xf0   :  { %907 = vmatmul.bf16.gmra.mxu2 %v6349_v2  ;;  %996 = vmatmul.bf16.gmra.mxu3 %v6351_v3  ;;  %v5097_v5 = vor.u32 %v5763_v60, %v5094_v62  ;;  %v5077_v59 = vor.u32 %v5761_v57, %v5076_v49  ;;  %v4950_v62 = vld [vmem:[#allocation2 + $0xb8] sm:$0xf0] }
  0xf1   :  { %1409 = vmatpush.bf16.msra.mxu0 %v4969_v61  ;;  %v5727_v61 = vld [vmem:[#allocation2 + $0xac] sm:$0xf] }
  0xf2   :  { %1498 = vmatpush.bf16.msra.mxu1 %v5097_v5  ;;  %v5078_v5 = vld [vmem:[#allocation2 + $0x1b8] sm:$0xf0] }
  0xf3   :  { %v275_v10 = vpop.f32.mrf.mxu0  ;;  %v388_v11 = vpop.f32.mrf.mxu1  ;;  %1321 = vmatpush.bf16.msrb.mxu3 %v5077_v59 }
  0xf4   :  { %v276_v24 = vadd.f32 %v275_v10, %v6238_v42  ;;  %v389_v25 = vadd.f32 %v388_v11, %v6240_v43 }
  0xf6   :  { %4821 = vmatmul.msk.f32.gmra.mxu0 %vm120_vm1, %v105_v12  ;;  %4854 = vmatmul.msk.f32.gmra.mxu1 %vm120_vm1, %v105_v12  ;;  %v6410_v12 = vld [vmem:[%s8254_s7] sm:$0xf] }
  0xf7   :  { %v6415_v13 = vperm.slane %v6410_v12, 0 }
  0xfb   :  { %v278_v21 = vpop.f32.mrf.mxu0  ;;  %v391_v22 = vpop.f32.mrf.mxu1 }
  0xfc   :  { %v279_v26 = vadd.f32 %v278_v21, %v6238_v42  ;;  %v392_v27 = vadd.f32 %v391_v22, %v6240_v43 }
  0xfe   :  { %v6369_v28 = vpack.c.bf16 %v279_v26, %v276_v24  ;;  %v6371_v29 = vpack.c.bf16 %v392_v27, %v389_v25  ;;  %4822 = vmatmul.msk.f32.gmra.mxu0 %vm120_vm1, %v106_v23  ;;  %4855 = vmatmul.msk.f32.gmra.mxu1 %vm120_vm1, %v106_v23 }
 0x100   :  { %912 = vmatmul.bf16.gmra.mxu2 %v6369_v28  ;;  %1001 = vmatmul.bf16.gmra.mxu3 %v6371_v29 }
 0x103   :  { %v281_v32 = vpop.f32.mrf.mxu0  ;;  %v394_v33 = vpop.f32.mrf.mxu1 }
 0x104   :  { %v282_v38 = vadd.f32 %v281_v32, %v6238_v42  ;;  %v395_v39 = vadd.f32 %v394_v33, %v6240_v43 }
 0x106   :  { %4823 = vmatmul.msk.f32.gmra.mxu0 %vm120_vm1, %v107_v34  ;;  %4856 = vmatmul.msk.f32.gmra.mxu1 %vm120_vm1, %v107_v34 }
 0x10b   :  { %v284_v35 = vpop.f32.mrf.mxu0  ;;  %v397_v36 = vpop.f32.mrf.mxu1 }
 0x10c   :  { %v285_v40 = vadd.f32 %v284_v35, %v6238_v42  ;;  %v398_v41 = vadd.f32 %v397_v36, %v6240_v43 }
 0x10e   :  { %v6389_v44 = vpack.c.bf16 %v285_v40, %v282_v38  ;;  %v6391_v45 = vpack.c.bf16 %v398_v41, %v395_v39  ;;  %4824 = vmatmul.msk.f32.gmra.mxu0 %vm120_vm1, %v108_v37  ;;  %4857 = vmatmul.msk.f32.gmra.mxu1 %vm120_vm1, %v108_v37 }
 0x110   :  { %917 = vmatmul.bf16.gmra.mxu2 %v6389_v44  ;;  %1006 = vmatmul.bf16.gmra.mxu3 %v6391_v45 }
 0x113   :  { %v287_v46 = vpop.f32.mrf.mxu0  ;;  %v400_v47 = vpop.f32.mrf.mxu1 }
 0x114   :  { %v288_v6 = vadd.f32 %v287_v46, %v6238_v42  ;;  %v401_v7 = vadd.f32 %v400_v47, %v6240_v43  ;;  %v4948_v47 = vld [vmem:[#allocation2 + $0xa8] sm:$0xf] }
 0x115   :  { %v4949_v56 = vor.u32 %v5729_v48, %v4948_v47 }
 0x116   :  { %1060 = vmatmul.bf16.vlgmr.msrb.gmra.mxu0 %v6249_v52  ;;  %1149 = vmatmul.bf16.vlgmr.msrb.gmra.mxu1 %v6251_v53 }
 0x117   :  { %1232 = vmatpush.bf16.msrb.mxu2 %v4949_v56 }
 0x11b   :  { %v290_v63 = vpop.f32.mrf.mxu0  ;;  %v403_v4 = vpop.f32.mrf.mxu1 }
 0x11c   :  { %v291_v8 = vadd.f32 %v290_v63, %v6238_v42  ;;  %v404_v9 = vadd.f32 %v403_v4, %v6240_v43  ;;  %v4953_v63 = vor.u32 %v5727_v61, %v4950_v62  ;;  %v5759_v4 = vld [vmem:[#allocation2 + $0x1ac] sm:$0xf] }
 0x11e   :  { %v6403_v10 = vpack.c.bf16 %v291_v8, %v288_v6  ;;  %v6405_v11 = vpack.c.bf16 %v404_v9, %v401_v7  ;;  %v5081_v8 = vor.u32 %v5759_v4, %v5078_v5  ;;  %1410 = vmatpush.bf16.msra.mxu0 %v4953_v63 }
 0x120   :  { %922 = vmatmul.bf16.gmra.mxu2 %v6403_v10  ;;  %1011 = vmatmul.bf16.gmra.mxu3 %v6405_v11 }
 0x121   :  { %1499 = vmatpush.bf16.msra.mxu1 %v5081_v8  ;;  %v5060_v8 = vld [vmem:[#allocation2 + $0x188] sm:$0xf] }
 0x123   :  { %v293_v14 = vpop.f32.mrf.mxu0  ;;  %v406_v15 = vpop.f32.mrf.mxu1 }
 0x124   :  { %v883_v16 = vpop.f32.mrf.mxu2  ;;  %v972_v17 = vpop.f32.mrf.mxu3  ;;  %v294_v24 = vadd.f32 %v293_v14, %v6238_v42  ;;  %v407_v25 = vadd.f32 %v406_v15, %v6240_v43 }
 0x125   :  { %v884_v20 = vadd.f32 %v883_v16, %v6415_v13 }
 0x126   :  { %1065 = vmatmul.bf16.gmra.mxu0 %v6269_v0  ;;  %1154 = vmatmul.bf16.gmra.mxu1 %v6271_v1 }
 0x127   :  { %v973_v21 = vadd.f32 %v972_v17, %v884_v20 }
 0x129   :  { %v1586_v38 = vmax.f32 %v973_v21, 0.0 }
 0x12b   :  { %v296_v22 = vpop.f32.mrf.mxu0  ;;  %v409_v23 = vpop.f32.mrf.mxu1 }
 0x12c   :  { %v297_v26 = vadd.f32 %v296_v22, %v6238_v42  ;;  %v410_v27 = vadd.f32 %v409_v23, %v6240_v43  ;;  %v885_v32 = vpop.f32.mrf.mxu2  ;;  %v974_v33 = vpop.f32.mrf.mxu3 }
 0x12d   :  { %v886_v34 = vadd.f32 %v885_v32, %v6415_v13 }
 0x12e   :  { %v6425_v35 = vpack.c.bf16 %v297_v26, %v294_v24  ;;  %v6427_v36 = vpack.c.bf16 %v410_v27, %v407_v25 }
 0x12f   :  { %v975_v37 = vadd.f32 %v974_v33, %v886_v34 }
 0x130   :  { %927 = vmatmul.bf16.gmra.mxu2 %v6425_v35  ;;  %1016 = vmatmul.bf16.gmra.mxu3 %v6427_v36 }
 0x131   :  { %v1590_v39 = vmax.f32 %v975_v37, 0.0 }
 0x133   :  { %v6431_v40 = vpack.c.bf16 %v1590_v39, %v1586_v38  ;;  %v299_v41 = vpop.f32.mrf.mxu0  ;;  %v412_v46 = vpop.f32.mrf.mxu1 }
 0x134   :  { %v888_v54 = vpop.f32.mrf.mxu2  ;;  %v977_v55 = vpop.f32.mrf.mxu3  ;;  %v300_v9 = vadd.f32 %v299_v41, %v6238_v42  ;;  %v413_v14 = vadd.f32 %v412_v46, %v6240_v43 }
 0x135   :  { %v889_v58 = vadd.f32 %v888_v54, %v6415_v13 }
 0x136   :  { %1070 = vmatmul.bf16.gmra.mxu0 %v6289_v18  ;;  %1159 = vmatmul.bf16.gmra.mxu1 %v6291_v19 }
 0x137   :  { %v978_v60 = vadd.f32 %v977_v55, %v889_v58 }
 0x139   :  { %v1594_v25 = vmax.f32 %v978_v60, 0.0 }
 0x13b   :  { %v302_v6 = vpop.f32.mrf.mxu0  ;;  %v415_v7 = vpop.f32.mrf.mxu1 }
 0x13c   :  { %v303_v15 = vadd.f32 %v302_v6, %v6238_v42  ;;  %v416_v16 = vadd.f32 %v415_v7, %v6240_v43  ;;  %v890_v17 = vpop.f32.mrf.mxu2  ;;  %v979_v20 = vpop.f32.mrf.mxu3  ;;  %v4932_v6 = vld [vmem:[#allocation2 + $0x88] sm:$0xf]  ;;  %v5725_v7 = vld [vmem:[#allocation2 + $0x94] sm:$0xf0] }
 0x13d   :  { %v891_v21 = vadd.f32 %v890_v17, %v6415_v13 }
 0x13e   :  { %v6441_v22 = vpack.c.bf16 %v303_v15, %v300_v9  ;;  %v6443_v23 = vpack.c.bf16 %v416_v16, %v413_v14  ;;  %v4933_v15 = vor.u32 %v5725_v7, %v4932_v6  ;;  %v5757_v16 = vld [vmem:[#allocation2 + $0x194] sm:$0xf0] }
 0x13f   :  { %v980_v24 = vadd.f32 %v979_v20, %v891_v21  ;;  %v5061_v20 = vor.u32 %v5757_v16, %v5060_v8 }
 0x140   :  { %932 = vmatmul.bf16.gmra.mxu2 %v6441_v22  ;;  %1021 = vmatmul.bf16.gmra.mxu3 %v6443_v23 }
 0x141   :  { %v1598_v26 = vmax.f32 %v980_v24, 0.0  ;;  %1233 = vmatpush.bf16.msrb.mxu2 %v4933_v15  ;;  %1322 = vmatpush.bf16.msrb.mxu3 %v5061_v20  ;;  %v5723_v24 = vld [vmem:[#allocation2 + $0x8c] sm:$0xf] }
 0x143   :  { %v6447_v27 = vpack.c.bf16 %v1598_v26, %v1594_v25  ;;  %v305_v32 = vpop.f32.mrf.mxu0  ;;  %v418_v33 = vpop.f32.mrf.mxu1  ;;  %v4934_v25 = vld [vmem:[#allocation2 + $0x98] sm:$0xf0] }
 0x144   :  { %v893_v34 = vpop.f32.mrf.mxu2  ;;  %v982_v37 = vpop.f32.mrf.mxu3  ;;  %v306_v47 = vadd.f32 %v305_v32, %v6238_v42  ;;  %v419_v48 = vadd.f32 %v418_v33, %v6240_v43  ;;  %v4937_v26 = vor.u32 %v5723_v24, %v4934_v25  ;;  %v5755_v32 = vld [vmem:[#allocation2 + $0x18c] sm:$0xf]  ;;  %v5062_v33 = vld [vmem:[#allocation2 + $0x198] sm:$0xf0] }
 0x145   :  { %v894_v38 = vadd.f32 %v893_v34, %v6415_v13 }
 0x146   :  { %1075 = vmatmul.bf16.gmra.mxu0 %v6309_v30  ;;  %1164 = vmatmul.bf16.gmra.mxu1 %v6311_v31 }
 0x147   :  { %v983_v39 = vadd.f32 %v982_v37, %v894_v38  ;;  %v5065_v38 = vor.u32 %v5755_v32, %v5062_v33  ;;  %1411 = vmatpush.bf16.msra.mxu0 %v4937_v26 }
 0x149   :  { %v1602_v61 = vmax.f32 %v983_v39, 0.0  ;;  %1500 = vmatpush.bf16.msra.mxu1 %v5065_v38  ;;  %v5721_v38 = vld [vmem:[#allocation2 + $0x74] sm:$0xf0] }
 0x14b   :  { %v308_v41 = vpop.f32.mrf.mxu0  ;;  %v421_v46 = vpop.f32.mrf.mxu1 }
 0x14c   :  { %v309_v49 = vadd.f32 %v308_v41, %v6238_v42  ;;  %v422_v54 = vadd.f32 %v421_v46, %v6240_v43  ;;  %v895_v55 = vpop.f32.mrf.mxu2  ;;  %v984_v56 = vpop.f32.mrf.mxu3 }
 0x14d   :  { %v896_v57 = vadd.f32 %v895_v55, %v6415_v13 }
 0x14e   :  { %v6457_v58 = vpack.c.bf16 %v309_v49, %v306_v47  ;;  %v6459_v59 = vpack.c.bf16 %v422_v54, %v419_v48 }
 0x14f   :  { %v985_v60 = vadd.f32 %v984_v56, %v896_v57 }
 0x150   :  { %937 = vmatmul.bf16.gmra.mxu2 %v6457_v58  ;;  %1026 = vmatmul.bf16.gmra.mxu3 %v6459_v59 }
 0x151   :  { %v1606_v62 = vmax.f32 %v985_v60, 0.0 }
 0x153   :  { %v6463_v63 = vpack.c.bf16 %v1606_v62, %v1602_v61  ;;  %v311_v4 = vpop.f32.mrf.mxu0  ;;  %v424_v5 = vpop.f32.mrf.mxu1 }
 0x154   :  { %v898_v9 = vpop.f32.mrf.mxu2  ;;  %v987_v14 = vpop.f32.mrf.mxu3  ;;  %v312_v39 = vadd.f32 %v311_v4, %v6238_v42  ;;  %v425_v41 = vadd.f32 %v424_v5, %v6240_v43 }
 0x155   :  { %v899_v17 = vadd.f32 %v898_v9, %v6415_v13 }
 0x156   :  { %1080 = vmatmul.bf16.gmra.mxu0 %v6329_v50  ;;  %1169 = vmatmul.bf16.gmra.mxu1 %v6331_v51 }
 0x157   :  { %v988_v21 = vadd.f32 %v987_v14, %v899_v17 }
 0x159   :  { %v1610_v60 = vmax.f32 %v988_v21, 0.0 }
 0x15b   :  { %v314_v34 = vpop.f32.mrf.mxu0  ;;  %v427_v37 = vpop.f32.mrf.mxu1 }
 0x15c   :  { %v315_v46 = vadd.f32 %v314_v34, %v6238_v42  ;;  %v428_v47 = vadd.f32 %v427_v37, %v6240_v43  ;;  %v900_v48 = vpop.f32.mrf.mxu2  ;;  %v989_v49 = vpop.f32.mrf.mxu3  ;;  %v4916_v37 = vld [vmem:[#allocation2 + $0x68] sm:$0xf] }
 0x15d   :  { %v901_v54 = vadd.f32 %v900_v48, %v6415_v13 }
 0x15e   :  { %v6473_v55 = vpack.c.bf16 %v315_v46, %v312_v39  ;;  %v6475_v56 = vpack.c.bf16 %v428_v47, %v425_v41  ;;  %v5044_v39 = vld [vmem:[#allocation2 + $0x168] sm:$0xf]  ;;  %v4917_v41 = vor.u32 %v5721_v38, %v4916_v37  ;;  %v5753_v46 = vld [vmem:[#allocation2 + $0x174] sm:$0xf0] }
 0x15f   :  { %v990_v57 = vadd.f32 %v989_v49, %v901_v54  ;;  %v5045_v49 = vor.u32 %v5753_v46, %v5044_v39  ;;  %v5751_v39 = vld [vmem:[#allocation2 + $0x16c] sm:$0xf] }
 0x160   :  { %942 = vmatmul.bf16.gmra.mxu2 %v6473_v55  ;;  %1031 = vmatmul.bf16.gmra.mxu3 %v6475_v56 }
 0x161   :  { %v1614_v61 = vmax.f32 %v990_v57, 0.0  ;;  %1234 = vmatpush.bf16.msrb.mxu2 %v4917_v41  ;;  %1323 = vmatpush.bf16.msrb.mxu3 %v5045_v49  ;;  %v5046_v41 = vld [vmem:[#allocation2 + $0x178] sm:$0xf0] }
 0x162   :  { %v5049_v49 = vor.u32 %v5751_v39, %v5046_v41 }
 0x163   :  { %v6479_v62 = vpack.c.bf16 %v1614_v61, %v1610_v60  ;;  %v317_v4 = vpop.f32.mrf.mxu0  ;;  %v430_v5 = vpop.f32.mrf.mxu1  ;;  %v4900_v61 = vld [vmem:[#allocation2 + $0x48] sm:$0xf] }
 0x164   :  { %v903_v6 = vpop.f32.mrf.mxu2  ;;  %v992_v7 = vpop.f32.mrf.mxu3  ;;  %v318_v16 = vadd.f32 %v317_v4, %v6238_v42  ;;  %v431_v17 = vadd.f32 %v430_v5, %v6240_v43  ;;  %v5717_v4 = vld [vmem:[#allocation2 + $0x54] sm:$0xf0]  ;;  %1501 = vmatpush.bf16.msra.mxu1 %v5049_v49 }
 0x165   :  { %8349 = vst [vmem:[#allocation11_spill] sm:$0xff] %v6479_v62  ;;  %v904_v8 = vadd.f32 %v903_v6, %v6415_v13 }
 0x166   :  { %1085 = vmatmul.bf16.gmra.mxu0 %v6349_v2  ;;  %1174 = vmatmul.bf16.gmra.mxu1 %v6351_v3 }
 0x167   :  { %v993_v9 = vadd.f32 %v992_v7, %v904_v8  ;;  %v4901_v7 = vor.u32 %v5717_v4, %v4900_v61  ;;  %v5028_v8 = vld [vmem:[#allocation2 + $0x148] sm:$0xf]  ;;  %v5709_v4 = vld [vmem:[#allocation2 + $0x14] sm:$0xf0] }
 0x168   :  { %v4868_v61 = vld [vmem:[#allocation2 + $0x8] sm:$0xf] }
 0x169   :  { %v1618_v47 = vmax.f32 %v993_v9, 0.0  ;;  %1235 = vmatpush.bf16.msrb.mxu2 %v4901_v7 }
 0x16b   :  { %v320_v14 = vpop.f32.mrf.mxu0  ;;  %v433_v15 = vpop.f32.mrf.mxu1 }
 0x16c   :  { %v321_v20 = vadd.f32 %v320_v14, %v6238_v42  ;;  %v434_v21 = vadd.f32 %v433_v15, %v6240_v43  ;;  %v905_v24 = vpop.f32.mrf.mxu2  ;;  %v994_v25 = vpop.f32.mrf.mxu3  ;;  %v5749_v14 = vld [vmem:[#allocation2 + $0x154] sm:$0xf0] }
 0x16d   :  { %v906_v26 = vadd.f32 %v905_v24, %v6415_v13 }
 0x16e   :  { %v6489_v32 = vpack.c.bf16 %v321_v20, %v318_v16  ;;  %v6491_v33 = vpack.c.bf16 %v434_v21, %v431_v17  ;;  %v5029_v16 = vor.u32 %v5749_v14, %v5028_v8  ;;  %v4884_v17 = vld [vmem:[#allocation2 + $0x28] sm:$0xf]  ;;  %v5713_v20 = vld [vmem:[#allocation2 + $0x34] sm:$0xf0] }
 0x16f   :  { %v995_v34 = vadd.f32 %v994_v25, %v906_v26  ;;  %v5012_v21 = vld [vmem:[#allocation2 + $0x128] sm:$0xf]  ;;  %v4885_v24 = vor.u32 %v5713_v20, %v4884_v17  ;;  %v5745_v25 = vld [vmem:[#allocation2 + $0x134] sm:$0xf0]  ;;  %v5719_v26 = vld [vmem:[#allocation2 + $0x6c] sm:$0xf] }
 0x170   :  { %947 = vmatmul.bf16.gmra.mxu2 %v6489_v32  ;;  %1036 = vmatmul.bf16.gmra.mxu3 %v6491_v33  ;;  %v5013_v37 = vor.u32 %v5745_v25, %v5012_v21  ;;  %v5741_v17 = vld [vmem:[#allocation2 + $0x114] sm:$0xf0] }
 0x171   :  { %v1622_v48 = vmax.f32 %v995_v34, 0.0  ;;  %1324 = vmatpush.bf16.msrb.mxu3 %v5029_v16  ;;  %v4918_v34 = vld [vmem:[#allocation2 + $0x78] sm:$0xf0]  ;;  %1236 = vmatpush.bf16.msrb.mxu2 %v4885_v24  ;;  %v4869_v16 = vor.u32 %v5709_v4, %v4868_v61 }
 0x172   :  { %v4921_v38 = vor.u32 %v5719_v26, %v4918_v34 }
 0x173   :  { %v6495_v54 = vpack.c.bf16 %v1622_v48, %v1618_v47  ;;  %v323_v57 = vpop.f32.mrf.mxu0  ;;  %v436_v60 = vpop.f32.mrf.mxu1 }
 0x174   :  { %v908_v5 = vpop.f32.mrf.mxu2  ;;  %v997_v6 = vpop.f32.mrf.mxu3  ;;  %v324_v46 = vadd.f32 %v323_v57, %v6238_v42  ;;  %1412 = vmatpush.bf16.msra.mxu0 %v4921_v38 }
 0x175   :  { %8350 = vst [vmem:[#allocation12_spill] sm:$0xff] %v6495_v54  ;;  %v909_v15 = vadd.f32 %v908_v5, %v6415_v13  ;;  %1325 = vmatpush.bf16.msrb.mxu3 %v5013_v37  ;;  %v4996_v5 = vld [vmem:[#allocation2 + $0x108] sm:$0xf]  ;;  %1237 = vmatpush.bf16.msrb.mxu2 %v4869_v16 }
 0x176   :  { %1090 = vmatmul.bf16.gmra.mxu0 %v6369_v28  ;;  %1179 = vmatmul.bf16.gmra.mxu1 %v6371_v29  ;;  %v4997_v20 = vor.u32 %v5741_v17, %v4996_v5  ;;  %v6528_v17 = vperm.slane %v6410_v12, 1  ;;  %v5715_v12 = vld [vmem:[#allocation2 + $0x4c] sm:$0xf] }
 0x177   :  { %v998_v9 = vadd.f32 %v997_v6, %v909_v15  ;;  %v437_v6 = vadd.f32 %v436_v60, %v6240_v43 }
 0x179   :  { %1326 = vmatpush.bf16.msrb.mxu3 %v4997_v20  ;;  %v1626_v60 = vmax.f32 %v998_v9, 0.0 }
 0x17b   :  { %v326_v47 = vpop.f32.mrf.mxu0  ;;  %v439_v48 = vpop.f32.mrf.mxu1 }
 0x17c   :  { %v327_v7 = vadd.f32 %v326_v47, %v6238_v42  ;;  %v440_v8 = vadd.f32 %v439_v48, %v6240_v43  ;;  %v910_v14 = vpop.f32.mrf.mxu2  ;;  %v999_v15 = vpop.f32.mrf.mxu3 }
 0x17d   :  { %v911_v57 = vadd.f32 %v910_v14, %v6415_v13 }
 0x17e   :  { %v6505_v21 = vpack.c.bf16 %v327_v7, %v324_v46  ;;  %v6507_v24 = vpack.c.bf16 %v440_v8, %v437_v6 }
 0x17f   :  { %v1000_v25 = vadd.f32 %v999_v15, %v911_v57 }
 0x180   :  { %952 = vmatmul.bf16.gmra.mxu2 %v6505_v21  ;;  %1041 = vmatmul.bf16.gmra.mxu3 %v6507_v24 }
 0x181   :  { %v1630_v26 = vmax.f32 %v1000_v25, 0.0 }
 0x183   :  { %v6511_v34 = vpack.c.bf16 %v1630_v26, %v1626_v60  ;;  %v329_v37 = vpop.f32.mrf.mxu0  ;;  %v442_v38 = vpop.f32.mrf.mxu1 }
 0x184   :  { %v913_v39 = vpop.f32.mrf.mxu2  ;;  %v1002_v41 = vpop.f32.mrf.mxu3  ;;  %v330_v61 = vadd.f32 %v329_v37, %v6238_v42  ;;  %v443_v9 = vadd.f32 %v442_v38, %v6240_v43 }
 0x185   :  { %8351 = vst [vmem:[#allocation13_spill] sm:$0xff] %v6511_v34  ;;  %v914_v46 = vadd.f32 %v913_v39, %v6415_v13  ;;  %v5356_v34 = vld [vmem:[#allocation5 + $0x1e0] sm:$0xf] }
 0x186   :  { %1095 = vmatmul.bf16.gmra.mxu0 %v6389_v44  ;;  %1184 = vmatmul.bf16.gmra.mxu1 %v6391_v45 }
 0x187   :  { %v1003_v47 = vadd.f32 %v1002_v41, %v914_v46  ;;  %v4902_v46 = vld [vmem:[#allocation2 + $0x58] sm:$0xf0] }
 0x189   :  { %v1634_v57 = vmax.f32 %v1003_v47, 0.0  ;;  %v4905_v47 = vor.u32 %v5715_v12, %v4902_v46 }
 0x18b   :  { %v332_v48 = vpop.f32.mrf.mxu0  ;;  %v445_v49 = vpop.f32.mrf.mxu1  ;;  %1413 = vmatpush.bf16.msra.mxu0 %v4905_v47 }
 0x18c   :  { %v333_v4 = vadd.f32 %v332_v48, %v6238_v42  ;;  %v446_v5 = vadd.f32 %v445_v49, %v6240_v43  ;;  %v915_v6 = vpop.f32.mrf.mxu2  ;;  %v1004_v7 = vpop.f32.mrf.mxu3  ;;  %v5747_v48 = vld [vmem:[#allocation2 + $0x14c] sm:$0xf]  ;;  %v5030_v49 = vld [vmem:[#allocation2 + $0x158] sm:$0xf0] }
 0x18d   :  { %v916_v8 = vadd.f32 %v915_v6, %v6415_v13 }
 0x18e   :  { %v6521_v14 = vpack.c.bf16 %v333_v4, %v330_v61  ;;  %v6523_v15 = vpack.c.bf16 %v446_v5, %v443_v9  ;;  %v5033_v4 = vor.u32 %v5747_v48, %v5030_v49 }
 0x18f   :  { %v1005_v16 = vadd.f32 %v1004_v7, %v916_v8 }
 0x190   :  { %957 = vmatmul.bf16.gmra.mxu2 %v6521_v14  ;;  %1046 = vmatmul.bf16.gmra.mxu3 %v6523_v15 }
 0x191   :  { %v1638_v42 = vmax.f32 %v1005_v16, 0.0  ;;  %1502 = vmatpush.bf16.msra.mxu1 %v5033_v4 }
 0x193   :  { %v6530_v20 = vpack.c.bf16 %v1638_v42, %v1634_v57  ;;  %v1061_v43 = vpop.f32.mrf.mxu0  ;;  %v1150_v25 = vpop.f32.mrf.mxu1 }
 0x194   :  { %v918_v60 = vpop.f32.mrf.mxu2  ;;  %v1007_v26 = vpop.f32.mrf.mxu3  ;;  %v1062_v37 = vadd.f32 %v1061_v43, %v6528_v17 }
 0x195   :  { %8352 = vst [vmem:[#allocation14_spill] sm:$0xff] %v6530_v20  ;;  %v919_v38 = vadd.f32 %v918_v60, %v6415_v13 }
 0x196   :  { %v1151_v39 = vadd.f32 %v1150_v25, %v1062_v37  ;;  %1100 = vmatmul.bf16.gmra.mxu0 %v6403_v10  ;;  %1189 = vmatmul.bf16.gmra.mxu1 %v6405_v11 }
 0x197   :  { %v1008_v41 = vadd.f32 %v1007_v26, %v919_v38 }
 0x198   :  { %v1587_v42 = vmax.f32 %v1151_v39, 0.0 }
 0x199   :  { %v1642_v25 = vmax.f32 %v1008_v41, 0.0 }
 0x19b   :  { %v1063_v61 = vpop.f32.mrf.mxu0  ;;  %v1152_v9 = vpop.f32.mrf.mxu1 }
 0x19c   :  { %v920_v5 = vpop.f32.mrf.mxu2  ;;  %v1009_v6 = vpop.f32.mrf.mxu3  ;;  %v1064_v7 = vadd.f32 %v1063_v61, %v6528_v17 }
 0x19d   :  { %v921_v8 = vadd.f32 %v920_v5, %v6415_v13 }
 0x19e   :  { %v1153_v16 = vadd.f32 %v1152_v9, %v1064_v7 }
 0x19f   :  { %v1010_v57 = vadd.f32 %v1009_v6, %v921_v8 }
 0x1a0   :  { %v1591_v43 = vmax.f32 %v1153_v16, 0.0  ;;  %1238 = vmatmul.bf16.vlgmr.msrb.gmra.mxu2 %v6249_v52  ;;  %1327 = vmatmul.bf16.vlgmr.msrb.gmra.mxu3 %v6251_v53 }
 0x1a1   :  { %v1646_v60 = vmax.f32 %v1010_v57, 0.0 }
 0x1a2   :  { %v6540_v26 = vpack.c.bf16 %v1591_v43, %v1587_v42 }
 0x1a3   :  { %v6542_v37 = vpack.c.bf16 %v1646_v60, %v1642_v25  ;;  %v1066_v38 = vpop.f32.mrf.mxu0  ;;  %v1155_v12 = vpop.f32.mrf.mxu1 }
 0x1a4   :  { %v923_v46 = vpop.f32.mrf.mxu2  ;;  %v1012_v47 = vpop.f32.mrf.mxu3  ;;  %v1067_v48 = vadd.f32 %v1066_v38, %v6528_v17 }
 0x1a5   :  { %8353 = vst [vmem:[#allocation15_spill] sm:$0xff] %v6542_v37  ;;  %v924_v49 = vadd.f32 %v923_v46, %v6415_v13 }
 0x1a6   :  { %v1156_v39 = vadd.f32 %v1155_v12, %v1067_v48  ;;  %1105 = vmatmul.bf16.gmra.mxu0 %v6425_v35  ;;  %1194 = vmatmul.bf16.gmra.mxu1 %v6427_v36 }
 0x1a7   :  { %v1013_v61 = vadd.f32 %v1012_v47, %v924_v49 }
 0x1a8   :  { %v1595_v57 = vmax.f32 %v1156_v39, 0.0 }
 0x1a9   :  { %v1650_v43 = vmax.f32 %v1013_v61, 0.0  ;;  %v5711_v61 = vld [vmem:[#allocation2 + $0x2c] sm:$0xf] }
 0x1ab   :  { %v1068_v41 = vpop.f32.mrf.mxu0  ;;  %v1157_v9 = vpop.f32.mrf.mxu1 }
 0x1ac   :  { %v925_v4 = vpop.f32.mrf.mxu2  ;;  %v1014_v5 = vpop.f32.mrf.mxu3  ;;  %v1069_v6 = vadd.f32 %v1068_v41, %v6528_v17 }
 0x1ad   :  { %v926_v7 = vadd.f32 %v925_v4, %v6415_v13  ;;  %v4886_v4 = vld [vmem:[#allocation2 + $0x38] sm:$0xf0] }
 0x1ae   :  { %v1158_v8 = vadd.f32 %v1157_v9, %v1069_v6  ;;  %v5743_v6 = vld [vmem:[#allocation2 + $0x12c] sm:$0xf] }
 0x1af   :  { %v1015_v16 = vadd.f32 %v1014_v5, %v926_v7  ;;  %v4889_v5 = vor.u32 %v5711_v61, %v4886_v4  ;;  %v5014_v7 = vld [vmem:[#allocation2 + $0x138] sm:$0xf0] }
 0x1b0   :  { %v1599_v42 = vmax.f32 %v1158_v8, 0.0  ;;  %1243 = vmatmul.bf16.gmra.mxu2 %v6269_v0  ;;  %1332 = vmatmul.bf16.gmra.mxu3 %v6271_v1 }
 0x1b1   :  { %v1654_v25 = vmax.f32 %v1015_v16, 0.0  ;;  %1414 = vmatpush.bf16.msra.mxu0 %v4889_v5 }
 0x1b2   :  { %v6552_v60 = vpack.c.bf16 %v1599_v42, %v1595_v57  ;;  %v5017_v57 = vor.u32 %v5743_v6, %v5014_v7 }
 0x1b3   :  { %v6554_v38 = vpack.c.bf16 %v1654_v25, %v1650_v43  ;;  %v1071_v12 = vpop.f32.mrf.mxu0  ;;  %v1160_v46 = vpop.f32.mrf.mxu1 }
 0x1b4   :  { %v928_v47 = vpop.f32.mrf.mxu2  ;;  %v1017_v48 = vpop.f32.mrf.mxu3  ;;  %v1072_v49 = vadd.f32 %v1071_v12, %v6528_v17  ;;  %1503 = vmatpush.bf16.msra.mxu1 %v5017_v57 }
 0x1b5   :  { %8354 = vst [vmem:[#allocation16_spill] sm:$0xff] %v6554_v38  ;;  %v929_v41 = vadd.f32 %v928_v47, %v6415_v13 }
 0x1b6   :  { %v1161_v39 = vadd.f32 %v1160_v46, %v1072_v49  ;;  %1110 = vmatmul.bf16.gmra.mxu0 %v6441_v22  ;;  %1199 = vmatmul.bf16.gmra.mxu1 %v6443_v23 }
 0x1b7   :  { %v1018_v9 = vadd.f32 %v1017_v48, %v929_v41 }
 0x1b8   :  { %v1603_v49 = vmax.f32 %v1161_v39, 0.0 }
 0x1b9   :  { %v1658_v41 = vmax.f32 %v1018_v9, 0.0 }
 0x1bb   :  { %v1073_v8 = vpop.f32.mrf.mxu0  ;;  %v1162_v16 = vpop.f32.mrf.mxu1 }
 0x1bc   :  { %v930_v42 = vpop.f32.mrf.mxu2  ;;  %v1019_v43 = vpop.f32.mrf.mxu3  ;;  %v1074_v25 = vadd.f32 %v1073_v8, %v6528_v17 }
 0x1bd   :  { %v931_v12 = vadd.f32 %v930_v42, %v6415_v13 }
 0x1be   :  { %v1163_v46 = vadd.f32 %v1162_v16, %v1074_v25 }
 0x1bf   :  { %v1020_v47 = vadd.f32 %v1019_v43, %v931_v12 }
 0x1c0   :  { %v1607_v48 = vmax.f32 %v1163_v46, 0.0  ;;  %1248 = vmatmul.bf16.gmra.mxu2 %v6289_v18  ;;  %1337 = vmatmul.bf16.gmra.mxu3 %v6291_v19 }
 0x1c1   :  { %v1662_v61 = vmax.f32 %v1020_v47, 0.0 }
 0x1c2   :  { %v6564_v4 = vpack.c.bf16 %v1607_v48, %v1603_v49 }
 0x1c3   :  { %v6566_v6 = vpack.c.bf16 %v1662_v61, %v1658_v41  ;;  %v1076_v7 = vpop.f32.mrf.mxu0  ;;  %v1165_v8 = vpop.f32.mrf.mxu1 }
 0x1c4   :  { %v933_v5 = vpop.f32.mrf.mxu2  ;;  %v1022_v38 = vpop.f32.mrf.mxu3  ;;  %v1077_v57 = vadd.f32 %v1076_v7, %v6528_v17 }
 0x1c5   :  { %8355 = vst [vmem:[#allocation17_spill] sm:$0xff] %v6566_v6  ;;  %v934_v16 = vadd.f32 %v933_v5, %v6415_v13 }
 0x1c6   :  { %v1166_v39 = vadd.f32 %v1165_v8, %v1077_v57  ;;  %1115 = vmatmul.bf16.gmra.mxu0 %v6457_v58  ;;  %1204 = vmatmul.bf16.gmra.mxu1 %v6459_v59 }
 0x1c7   :  { %v1023_v42 = vadd.f32 %v1022_v38, %v934_v16 }
 0x1c8   :  { %v1611_v41 = vmax.f32 %v1166_v39, 0.0 }
 0x1c9   :  { %v1666_v7 = vmax.f32 %v1023_v42, 0.0  ;;  %v5707_v42 = vld [vmem:[#allocation2 + $0xc] sm:$0xf] }
 0x1cb   :  { %v1078_v9 = vpop.f32.mrf.mxu0  ;;  %v1167_v43 = vpop.f32.mrf.mxu1 }
 0x1cc   :  { %v935_v25 = vpop.f32.mrf.mxu2  ;;  %v1024_v12 = vpop.f32.mrf.mxu3  ;;  %v1079_v46 = vadd.f32 %v1078_v9, %v6528_v17 }
 0x1cd   :  { %v936_v47 = vadd.f32 %v935_v25, %v6415_v13 }
 0x1ce   :  { %v1168_v49 = vadd.f32 %v1167_v43, %v1079_v46  ;;  %v4870_v46 = vld [vmem:[#allocation2 + $0x18] sm:$0xf0] }
 0x1cf   :  { %v1025_v48 = vadd.f32 %v1024_v12, %v936_v47  ;;  %v4873_v47 = vor.u32 %v5707_v42, %v4870_v46 }
 0x1d0   :  { %v1615_v61 = vmax.f32 %v1168_v49, 0.0  ;;  %1253 = vmatmul.bf16.gmra.mxu2 %v6309_v30  ;;  %1342 = vmatmul.bf16.gmra.mxu3 %v6311_v31  ;;  %v5739_v49 = vld [vmem:[#allocation2 + $0x10c] sm:$0xf] }
 0x1d1   :  { %v1670_v8 = vmax.f32 %v1025_v48, 0.0  ;;  %v4998_v48 = vld [vmem:[#allocation2 + $0x118] sm:$0xf0]  ;;  %1415 = vmatpush.bf16.msra.mxu0 %v4873_v47 }
 0x1d2   :  { %v6576_v5 = vpack.c.bf16 %v1615_v61, %v1611_v41 }
 0x1d3   :  { %v6578_v38 = vpack.c.bf16 %v1670_v8, %v1666_v7  ;;  %v1081_v57 = vpop.f32.mrf.mxu0  ;;  %v1170_v16 = vpop.f32.mrf.mxu1  ;;  %v5001_v7 = vor.u32 %v5739_v49, %v4998_v48 }
 0x1d4   :  { %8356 = vst [vmem:[#allocation18_spill] sm:$0xff] %v6576_v5  ;;  %v938_v6 = vpop.f32.mrf.mxu2  ;;  %v1027_v9 = vpop.f32.mrf.mxu3  ;;  %v1082_v25 = vadd.f32 %v1081_v57, %v6528_v17 }
 0x1d5   :  { %8357 = vst [vmem:[#allocation19_spill] sm:$0xff] %v6578_v38  ;;  %v939_v43 = vadd.f32 %v938_v6, %v6415_v13  ;;  %1504 = vmatpush.bf16.msra.mxu1 %v5001_v7 }
 0x1d6   :  { %v1171_v39 = vadd.f32 %v1170_v16, %v1082_v25  ;;  %1120 = vmatmul.bf16.gmra.mxu0 %v6473_v55  ;;  %1209 = vmatmul.bf16.gmra.mxu1 %v6475_v56 }
 0x1d7   :  { %v1028_v12 = vadd.f32 %v1027_v9, %v939_v43 }
 0x1d8   :  { %v1619_v37 = vmax.f32 %v1171_v39, 0.0 }
 0x1d9   :  { %v1674_v43 = vmax.f32 %v1028_v12, 0.0 }
 0x1db   :  { %v1083_v41 = vpop.f32.mrf.mxu0  ;;  %v1172_v61 = vpop.f32.mrf.mxu1 }
 0x1dc   :  { %v940_v8 = vpop.f32.mrf.mxu2  ;;  %v1029_v38 = vpop.f32.mrf.mxu3  ;;  %v1084_v57 = vadd.f32 %v1083_v41, %v6528_v17 }
 0x1dd   :  { %v941_v6 = vadd.f32 %v940_v8, %v6415_v13 }
 0x1de   :  { %v1173_v16 = vadd.f32 %v1172_v61, %v1084_v57 }
 0x1df   :  { %v1030_v25 = vadd.f32 %v1029_v38, %v941_v6 }
 0x1e0   :  { %v1623_v9 = vmax.f32 %v1173_v16, 0.0  ;;  %1258 = vmatmul.bf16.gmra.mxu2 %v6329_v50  ;;  %1347 = vmatmul.bf16.gmra.mxu3 %v6331_v51 }
 0x1e1   :  { %v1678_v42 = vmax.f32 %v1030_v25, 0.0 }
 0x1e2   :  { %v6588_v46 = vpack.c.bf16 %v1623_v9, %v1619_v37 }
 0x1e3   :  { %v6590_v49 = vpack.c.bf16 %v1678_v42, %v1674_v43  ;;  %v1086_v48 = vpop.f32.mrf.mxu0  ;;  %v1175_v41 = vpop.f32.mrf.mxu1 }
 0x1e4   :  { %8358 = vst [vmem:[#allocation20_spill] sm:$0xff] %v6588_v46  ;;  %v943_v47 = vpop.f32.mrf.mxu2  ;;  %v1032_v20 = vpop.f32.mrf.mxu3  ;;  %v1087_v7 = vadd.f32 %v1086_v48, %v6528_v17 }
 0x1e5   :  { %8359 = vst [vmem:[#allocation21_spill] sm:$0xff] %v6590_v49  ;;  %v944_v38 = vadd.f32 %v943_v47, %v6415_v13  ;;  %v5228_v49 = vld [vmem:[#allocation5 + $0xe0] sm:$0xf] }
 0x1e6   :  { %v1176_v39 = vadd.f32 %v1175_v41, %v1087_v7  ;;  %1125 = vmatmul.bf16.gmra.mxu0 %v6489_v32  ;;  %1214 = vmatmul.bf16.gmra.mxu1 %v6491_v33 }
 0x1e7   :  { %v1033_v61 = vadd.f32 %v1032_v20, %v944_v38 }
 0x1e8   :  { %v1627_v43 = vmax.f32 %v1176_v39, 0.0 }
 0x1e9   :  { %v1682_v48 = vmax.f32 %v1033_v61, 0.0 }
 0x1eb   :  { %v1088_v12 = vpop.f32.mrf.mxu0  ;;  %v1177_v8 = vpop.f32.mrf.mxu1 }
 0x1ec   :  { %v945_v37 = vpop.f32.mrf.mxu2  ;;  %v1034_v57 = vpop.f32.mrf.mxu3  ;;  %v1089_v6 = vadd.f32 %v1088_v12, %v6528_v17  ;;  %v5800_v12 = vld [vmem:[#allocation5 + $0xec] sm:$0xf0] }
 0x1ed   :  { %v946_v16 = vadd.f32 %v945_v37, %v6415_v13 }
 0x1ee   :  { %v1178_v25 = vadd.f32 %v1177_v8, %v1089_v6  ;;  %v5832_v6 = vld [vmem:[#allocation5 + $0x1ec] sm:$0xf0] }
 0x1ef   :  { %v1035_v9 = vadd.f32 %v1034_v57, %v946_v16  ;;  %v5229_v57 = vor.u32 %v5800_v12, %v5228_v49 }
 0x1f0   :  { %v1631_v42 = vmax.f32 %v1178_v25, 0.0  ;;  %1263 = vmatmul.bf16.gmra.mxu2 %v6349_v2  ;;  %1352 = vmatmul.bf16.gmra.mxu3 %v6351_v3  ;;  %v5357_v25 = vor.u32 %v5832_v6, %v5356_v34 }
 0x1f1   :  { %v1686_v41 = vmax.f32 %v1035_v9, 0.0  ;;  %2556 = vmatpush.bf16.msra.mxu2 %v5229_v57 }
 0x1f2   :  { %v6600_v47 = vpack.c.bf16 %v1631_v42, %v1627_v43  ;;  %2645 = vmatpush.bf16.msra.mxu3 %v5357_v25  ;;  %v5484_v43 = vld [vmem:[#allocation5 + $0x2e0] sm:$0xf]  ;;  %v5864_v42 = vld [vmem:[#allocation5 + $0x2ec] sm:$0xf0] }
 0x1f3   :  { %v6602_v20 = vpack.c.bf16 %v1686_v41, %v1682_v48  ;;  %v1091_v7 = vpop.f32.mrf.mxu0  ;;  %v1180_v38 = vpop.f32.mrf.mxu1  ;;  %v5485_v48 = vor.u32 %v5864_v42, %v5484_v43  ;;  %v5612_v41 = vld [vmem:[#allocation5 + $0x3e0] sm:$0xf] }
 0x1f4   :  { %8360 = vst [vmem:[#allocation22_spill] sm:$0xff] %v6600_v47  ;;  %v948_v37 = vpop.f32.mrf.mxu2  ;;  %v1037_v8 = vpop.f32.mrf.mxu3  ;;  %v1092_v39 = vadd.f32 %v1091_v7, %v6528_v17 }
 0x1f5   :  { %8361 = vst [vmem:[#allocation23_spill] sm:$0xff] %v6602_v20  ;;  %v949_v16 = vadd.f32 %v948_v37, %v6415_v13  ;;  %v5896_v20 = vld [vmem:[#allocation5 + $0x3ec] sm:$0xf0]  ;;  %2734 = vmatpush.bf16.msrb.mxu0 %v5485_v48 }
 0x1f6   :  { %v1181_v61 = vadd.f32 %v1180_v38, %v1092_v39  ;;  %1130 = vmatmul.bf16.gmra.mxu0 %v6505_v21  ;;  %1219 = vmatmul.bf16.gmra.mxu1 %v6507_v24  ;;  %v5613_v49 = vor.u32 %v5896_v20, %v5612_v41 }
 0x1f7   :  { %v1038_v9 = vadd.f32 %v1037_v8, %v949_v16 }
 0x1f8   :  { %2823 = vmatpush.bf16.msrb.mxu1 %v5613_v49  ;;  %v1635_v39 = vmax.f32 %v1181_v61, 0.0 }
 0x1f9   :  { %v1690_v6 = vmax.f32 %v1038_v9, 0.0 }
 0x1fb   :  { %v1093_v47 = vpop.f32.mrf.mxu0  ;;  %v1182_v7 = vpop.f32.mrf.mxu1 }
 0x1fc   :  { %v950_v12 = vpop.f32.mrf.mxu2  ;;  %v1039_v46 = vpop.f32.mrf.mxu3  ;;  %v1094_v34 = vadd.f32 %v1093_v47, %v6528_v17 }
 0x1fd   :  { %v951_v38 = vadd.f32 %v950_v12, %v6415_v13 }
 0x1fe   :  { %v1183_v37 = vadd.f32 %v1182_v7, %v1094_v34 }
 0x1ff   :  { %v1040_v8 = vadd.f32 %v1039_v46, %v951_v38 }
 0x200   :  { %v1639_v57 = vmax.f32 %v1183_v37, 0.0  ;;  %1268 = vmatmul.bf16.gmra.mxu2 %v6369_v28  ;;  %1357 = vmatmul.bf16.gmra.mxu3 %v6371_v29 }
 0x201   :  { %v1694_v16 = vmax.f32 %v1040_v8, 0.0 }
 0x202   :  { %v6612_v25 = vpack.c.bf16 %v1639_v57, %v1635_v39 }
 0x203   :  { %v6614_v20 = vpack.c.bf16 %v1694_v16, %v1690_v6  ;;  %v1096_v43 = vpop.f32.mrf.mxu0  ;;  %v1185_v47 = vpop.f32.mrf.mxu1 }
 0x204   :  { %8362 = vst [vmem:[#allocation24_spill] sm:$0xff] %v6612_v25  ;;  %v953_v42 = vpop.f32.mrf.mxu2  ;;  %v1042_v48 = vpop.f32.mrf.mxu3  ;;  %v1097_v41 = vadd.f32 %v1096_v43, %v6528_v17 }
 0x205   :  { %8363 = vst [vmem:[#allocation25_spill] sm:$0xff] %v6614_v20  ;;  %v954_v46 = vadd.f32 %v953_v42, %v6415_v13  ;;  %v5340_v20 = vld [vmem:[#allocation5 + $0x1c0] sm:$0xf] }
 0x206   :  { %v1186_v61 = vadd.f32 %v1185_v47, %v1097_v41  ;;  %1135 = vmatmul.bf16.gmra.mxu0 %v6521_v14  ;;  %1224 = vmatmul.bf16.gmra.mxu1 %v6523_v15 }
 0x207   :  { %v1043_v7 = vadd.f32 %v1042_v48, %v954_v46  ;;  %v5212_v46 = vld [vmem:[#allocation5 + $0xc0] sm:$0xf] }
 0x208   :  { %v1643_v57 = vmax.f32 %v1186_v61, 0.0 }
 0x209   :  { %v1698_v16 = vmax.f32 %v1043_v7, 0.0 }
 0x20b   :  { %v1098_v9 = vpop.f32.mrf.mxu0  ;;  %v1187_v49 = vpop.f32.mrf.mxu1 }
 0x20c   :  { %v955_v12 = vpop.f32.mrf.mxu2  ;;  %v1044_v34 = vpop.f32.mrf.mxu3  ;;  %v1099_v38 = vadd.f32 %v1098_v9, %v6528_v17  ;;  %v5796_v9 = vld [vmem:[#allocation5 + $0xcc] sm:$0xf0] }
 0x20d   :  { %v956_v37 = vadd.f32 %v955_v12, %v6415_v13 }
 0x20e   :  { %v1188_v8 = vadd.f32 %v1187_v49, %v1099_v38  ;;  %v5828_v38 = vld [vmem:[#allocation5 + $0x1cc] sm:$0xf0] }
 0x20f   :  { %v1045_v39 = vadd.f32 %v1044_v34, %v956_v37  ;;  %v5213_v34 = vor.u32 %v5796_v9, %v5212_v46 }
 0x210   :  { %v1647_v6 = vmax.f32 %v1188_v8, 0.0  ;;  %1273 = vmatmul.bf16.gmra.mxu2 %v6389_v44  ;;  %1362 = vmatmul.bf16.gmra.mxu3 %v6391_v45  ;;  %v5341_v8 = vor.u32 %v5828_v38, %v5340_v20 }
 0x211   :  { %v1702_v43 = vmax.f32 %v1045_v39, 0.0  ;;  %2557 = vmatpush.bf16.msra.mxu2 %v5213_v34 }
 0x212   :  { %v6624_v47 = vpack.c.bf16 %v1647_v6, %v1643_v57  ;;  %2646 = vmatpush.bf16.msra.mxu3 %v5341_v8  ;;  %v5468_v57 = vld [vmem:[#allocation5 + $0x2c0] sm:$0xf]  ;;  %v5860_v6 = vld [vmem:[#allocation5 + $0x2cc] sm:$0xf0] }
 0x213   :  { %v6626_v42 = vpack.c.bf16 %v1702_v43, %v1698_v16  ;;  %v1101_v48 = vpop.f32.mrf.mxu0  ;;  %v1190_v41 = vpop.f32.mrf.mxu1  ;;  %v5469_v16 = vor.u32 %v5860_v6, %v5468_v57  ;;  %v5596_v43 = vld [vmem:[#allocation5 + $0x3c0] sm:$0xf] }
 0x214   :  { %8364 = vst [vmem:[#allocation26_spill] sm:$0xff] %v6624_v47  ;;  %v958_v12 = vpop.f32.mrf.mxu2  ;;  %v1047_v49 = vpop.f32.mrf.mxu3  ;;  %v1102_v61 = vadd.f32 %v1101_v48, %v6528_v17 }
 0x215   :  { %8365 = vst [vmem:[#allocation27_spill] sm:$0xff] %v6626_v42  ;;  %v959_v37 = vadd.f32 %v958_v12, %v6415_v13  ;;  %v5892_v42 = vld [vmem:[#allocation5 + $0x3cc] sm:$0xf0]  ;;  %2735 = vmatpush.bf16.msrb.mxu0 %v5469_v16 }
 0x216   :  { %v1191_v7 = vadd.f32 %v1190_v41, %v1102_v61  ;;  %1416 = vmatmul.bf16.vlgmr.msra.gmra.mxu0 %v6249_v52  ;;  %1505 = vmatmul.bf16.vlgmr.msra.gmra.mxu1 %v6251_v53  ;;  %v5597_v46 = vor.u32 %v5892_v42, %v5596_v43  ;;  %v6639_v42 = vld [vmem:[%s8254_s7] sm:$0xf] }
 0x217   :  { %v1048_v39 = vadd.f32 %v1047_v49, %v959_v37 }
 0x218   :  { %2824 = vmatpush.bf16.msrb.mxu1 %v5597_v46  ;;  %v1651_v12 = vmax.f32 %v1191_v7, 0.0 }
 0x219   :  { %v1706_v61 = vmax.f32 %v1048_v39, 0.0 }
 0x21b   :  { %v1103_v47 = vpop.f32.mrf.mxu0  ;;  %v1192_v48 = vpop.f32.mrf.mxu1 }
 0x21c   :  { %v960_v9 = vpop.f32.mrf.mxu2  ;;  %v1049_v25 = vpop.f32.mrf.mxu3  ;;  %v1104_v20 = vadd.f32 %v1103_v47, %v6528_v17  ;;  %v6642_v47 = vperm.slane %v6639_v42, 2 }
 0x21d   :  { %v961_v52 = vadd.f32 %v960_v9, %v6415_v13 }
 0x21e   :  { %v1193_v53 = vadd.f32 %v1192_v48, %v1104_v20 }
 0x21f   :  { %v1050_v41 = vadd.f32 %v1049_v25, %v961_v52 }
 0x220   :  { %v1655_v49 = vmax.f32 %v1193_v53, 0.0  ;;  %1278 = vmatmul.bf16.gmra.mxu2 %v6403_v10  ;;  %1367 = vmatmul.bf16.gmra.mxu3 %v6405_v11 }
 0x221   :  { %v1710_v34 = vmax.f32 %v1050_v41, 0.0 }
 0x222   :  { %v6644_v13 = vpack.c.bf16 %v1655_v49, %v1651_v12 }
 0x223   :  { %v6646_v38 = vpack.c.bf16 %v1710_v34, %v1706_v61  ;;  %v1106_v25 = vpop.f32.mrf.mxu0  ;;  %v1195_v37 = vpop.f32.mrf.mxu1 }
 0x224   :  { %8366 = vst [vmem:[#allocation28_spill] sm:$0xff] %v6644_v13  ;;  %v1107_v8 = vadd.f32 %v1106_v25, %v6528_v17  ;;  %v1239_v7 = vpop.f32.mrf.mxu2  ;;  %v1328_v57 = vpop.f32.mrf.mxu3 }
 0x225   :  { %8367 = vst [vmem:[#allocation29_spill] sm:$0xff] %v6646_v38  ;;  %v1240_v39 = vadd.f32 %v1239_v7, %v6642_v47  ;;  %v5792_v7 = vld [vmem:[#allocation5 + $0xac] sm:$0xf0]  ;;  %v5548_v38 = vld [vmem:[#allocation5 + $0x360] sm:$0xf] }
 0x226   :  { %v1196_v6 = vadd.f32 %v1195_v37, %v1107_v8  ;;  %1421 = vmatmul.bf16.gmra.mxu0 %v6269_v0  ;;  %1510 = vmatmul.bf16.gmra.mxu1 %v6271_v1  ;;  %v5196_v8 = vld [vmem:[#allocation5 + $0xa0] sm:$0xf] }
 0x227   :  { %v1329_v16 = vadd.f32 %v1328_v57, %v1240_v39  ;;  %v5324_v57 = vld [vmem:[#allocation5 + $0x1a0] sm:$0xf] }
 0x228   :  { %v1659_v12 = vmax.f32 %v1196_v6, 0.0 }
 0x229   :  { %v1588_v0 = vmax.f32 %v1329_v16, 0.0 }
 0x22b   :  { %v1108_v43 = vpop.f32.mrf.mxu0  ;;  %v1197_v48 = vpop.f32.mrf.mxu1 }
 0x22c   :  { %v1109_v46 = vadd.f32 %v1108_v43, %v6528_v17  ;;  %v1241_v9 = vpop.f32.mrf.mxu2  ;;  %v1330_v20 = vpop.f32.mrf.mxu3 }
 0x22d   :  { %v1242_v52 = vadd.f32 %v1241_v9, %v6642_v47 }
 0x22e   :  { %v1198_v53 = vadd.f32 %v1197_v48, %v1109_v46  ;;  %v5197_v48 = vor.u32 %v5792_v7, %v5196_v8  ;;  %v5824_v46 = vld [vmem:[#allocation5 + $0x1ac] sm:$0xf0] }
 0x22f   :  { %v1331_v41 = vadd.f32 %v1330_v20, %v1242_v52  ;;  %v5325_v20 = vor.u32 %v5824_v46, %v5324_v57 }
 0x230   :  { %v1663_v49 = vmax.f32 %v1198_v53, 0.0  ;;  %1283 = vmatmul.bf16.gmra.mxu2 %v6425_v35  ;;  %1372 = vmatmul.bf16.gmra.mxu3 %v6427_v36  ;;  %v5452_v53 = vld [vmem:[#allocation5 + $0x2a0] sm:$0xf] }
 0x231   :  { %v1592_v61 = vmax.f32 %v1331_v41, 0.0  ;;  %2558 = vmatpush.bf16.msra.mxu2 %v5197_v48  ;;  %2647 = vmatpush.bf16.msra.mxu3 %v5325_v20  ;;  %v5856_v41 = vld [vmem:[#allocation5 + $0x2ac] sm:$0xf0] }
 0x232   :  { %v6656_v1 = vpack.c.bf16 %v1663_v49, %v1659_v12  ;;  %v5453_v12 = vor.u32 %v5856_v41, %v5452_v53  ;;  %v5580_v49 = vld [vmem:[#allocation5 + $0x3a0] sm:$0xf] }
 0x233   :  { %v6658_v34 = vpack.c.bf16 %v1592_v61, %v1588_v0  ;;  %v1111_v25 = vpop.f32.mrf.mxu0  ;;  %v1200_v37 = vpop.f32.mrf.mxu1  ;;  %v5888_v0 = vld [vmem:[#allocation5 + $0x3ac] sm:$0xf0] }
 0x234   :  { %8368 = vst [vmem:[#allocation30_spill] sm:$0xff] %v6656_v1  ;;  %v1112_v39 = vadd.f32 %v1111_v25, %v6528_v17  ;;  %v1244_v43 = vpop.f32.mrf.mxu2  ;;  %v1333_v6 = vpop.f32.mrf.mxu3  ;;  %v5581_v8 = vor.u32 %v5888_v0, %v5580_v49  ;;  %2736 = vmatpush.bf16.msrb.mxu0 %v5453_v12 }
 0x235   :  { %8369 = vst [vmem:[#allocation31_spill] sm:$0xff] %v6658_v34  ;;  %v1245_v9 = vadd.f32 %v1244_v43, %v6642_v47 }
 0x236   :  { %v1201_v16 = vadd.f32 %v1200_v37, %v1112_v39  ;;  %1426 = vmatmul.bf16.gmra.mxu0 %v6289_v18  ;;  %1515 = vmatmul.bf16.gmra.mxu1 %v6291_v19 }
 0x237   :  { %v1334_v52 = vadd.f32 %v1333_v6, %v1245_v9  ;;  %2825 = vmatpush.bf16.msrb.mxu1 %v5581_v8 }
 0x238   :  { %v1667_v39 = vmax.f32 %v1201_v16, 0.0 }
 0x239   :  { %v1596_v48 = vmax.f32 %v1334_v52, 0.0 }
 0x23b   :  { %v1113_v61 = vpop.f32.mrf.mxu0  ;;  %v1202_v25 = vpop.f32.mrf.mxu1 }
 0x23c   :  { %v1114_v7 = vadd.f32 %v1113_v61, %v6528_v17  ;;  %v1246_v43 = vpop.f32.mrf.mxu2  ;;  %v1335_v57 = vpop.f32.mrf.mxu3 }
 0x23d   :  { %v1247_v18 = vadd.f32 %v1246_v43, %v6642_v47 }
 0x23e   :  { %v1203_v19 = vadd.f32 %v1202_v25, %v1114_v7 }
 0x23f   :  { %v1336_v37 = vadd.f32 %v1335_v57, %v1247_v18 }
 0x240   :  { %v1671_v6 = vmax.f32 %v1203_v19, 0.0  ;;  %1288 = vmatmul.bf16.gmra.mxu2 %v6441_v22  ;;  %1377 = vmatmul.bf16.gmra.mxu3 %v6443_v23 }
 0x241   :  { %v1600_v46 = vmax.f32 %v1336_v37, 0.0 }
 0x242   :  { %v6668_v9 = vpack.c.bf16 %v1671_v6, %v1667_v39 }
 0x243   :  { %v6670_v20 = vpack.c.bf16 %v1600_v46, %v1596_v48  ;;  %v1116_v53 = vpop.f32.mrf.mxu0  ;;  %v1205_v41 = vpop.f32.mrf.mxu1 }
 0x244   :  { %8370 = vst [vmem:[#allocation32_spill] sm:$0xff] %v6668_v9  ;;  %v1117_v12 = vadd.f32 %v1116_v53, %v6528_v17  ;;  %v1249_v49 = vpop.f32.mrf.mxu2  ;;  %v1338_v0 = vpop.f32.mrf.mxu3 }
 0x245   :  { %8371 = vst [vmem:[#allocation33_spill] sm:$0xff] %v6670_v20  ;;  %v1250_v61 = vadd.f32 %v1249_v49, %v6642_v47  ;;  %v5788_v49 = vld [vmem:[#allocation5 + $0x8c] sm:$0xf0] }
 0x246   :  { %v1206_v16 = vadd.f32 %v1205_v41, %v1117_v12  ;;  %1431 = vmatmul.bf16.gmra.mxu0 %v6309_v30  ;;  %1520 = vmatmul.bf16.gmra.mxu1 %v6311_v31  ;;  %v5180_v12 = vld [vmem:[#allocation5 + $0x80] sm:$0xf] }
 0x247   :  { %v1339_v25 = vadd.f32 %v1338_v0, %v1250_v61  ;;  %v5308_v0 = vld [vmem:[#allocation5 + $0x180] sm:$0xf] }
 0x248   :  { %v1675_v39 = vmax.f32 %v1206_v16, 0.0 }
 0x249   :  { %v1604_v30 = vmax.f32 %v1339_v25, 0.0 }
 0x24b   :  { %v1118_v52 = vpop.f32.mrf.mxu0  ;;  %v1207_v8 = vpop.f32.mrf.mxu1 }
 0x24c   :  { %v1119_v7 = vadd.f32 %v1118_v52, %v6528_v17  ;;  %v1251_v43 = vpop.f32.mrf.mxu2  ;;  %v1340_v57 = vpop.f32.mrf.mxu3 }
 0x24d   :  { %v1252_v18 = vadd.f32 %v1251_v43, %v6642_v47 }
 0x24e   :  { %v1208_v19 = vadd.f32 %v1207_v8, %v1119_v7  ;;  %v5181_v8 = vor.u32 %v5788_v49, %v5180_v12  ;;  %v5820_v7 = vld [vmem:[#allocation5 + $0x18c] sm:$0xf0] }
 0x24f   :  { %v1341_v37 = vadd.f32 %v1340_v57, %v1252_v18  ;;  %v5309_v57 = vor.u32 %v5820_v7, %v5308_v0 }
 0x250   :  { %v1679_v6 = vmax.f32 %v1208_v19, 0.0  ;;  %1293 = vmatmul.bf16.gmra.mxu2 %v6457_v58  ;;  %1382 = vmatmul.bf16.gmra.mxu3 %v6459_v59  ;;  %v5436_v19 = vld [vmem:[#allocation5 + $0x280] sm:$0xf] }
 0x251   :  { %v1608_v48 = vmax.f32 %v1341_v37, 0.0  ;;  %2559 = vmatpush.bf16.msra.mxu2 %v5181_v8  ;;  %2648 = vmatpush.bf16.msra.mxu3 %v5309_v57  ;;  %v5852_v37 = vld [vmem:[#allocation5 + $0x28c] sm:$0xf0] }
 0x252   :  { %v6680_v31 = vpack.c.bf16 %v1679_v6, %v1675_v39  ;;  %v5437_v39 = vor.u32 %v5852_v37, %v5436_v19  ;;  %v5564_v6 = vld [vmem:[#allocation5 + $0x380] sm:$0xf] }
 0x253   :  { %v6682_v46 = vpack.c.bf16 %v1608_v48, %v1604_v30  ;;  %v1121_v53 = vpop.f32.mrf.mxu0  ;;  %v1210_v41 = vpop.f32.mrf.mxu1  ;;  %v5884_v30 = vld [vmem:[#allocation5 + $0x38c] sm:$0xf0] }
 0x254   :  { %8372 = vst [vmem:[#allocation34_spill] sm:$0xff] %v6680_v31  ;;  %v1122_v61 = vadd.f32 %v1121_v53, %v6528_v17  ;;  %v1254_v52 = vpop.f32.mrf.mxu2  ;;  %v1343_v16 = vpop.f32.mrf.mxu3  ;;  %v5565_v12 = vor.u32 %v5884_v30, %v5564_v6  ;;  %2737 = vmatpush.bf16.msrb.mxu0 %v5437_v39 }
 0x255   :  { %8373 = vst [vmem:[#allocation35_spill] sm:$0xff] %v6682_v46  ;;  %v1255_v43 = vadd.f32 %v1254_v52, %v6642_v47 }
 0x256   :  { %v1211_v25 = vadd.f32 %v1210_v41, %v1122_v61  ;;  %1436 = vmatmul.bf16.gmra.mxu0 %v6329_v50  ;;  %1525 = vmatmul.bf16.gmra.mxu1 %v6331_v51 }
 0x257   :  { %v1344_v18 = vadd.f32 %v1343_v16, %v1255_v43  ;;  %2826 = vmatpush.bf16.msrb.mxu1 %v5565_v12 }
 0x258   :  { %v1683_v61 = vmax.f32 %v1211_v25, 0.0 }
 0x259   :  { %v1612_v8 = vmax.f32 %v1344_v18, 0.0 }
 0x25b   :  { %v1123_v48 = vpop.f32.mrf.mxu0  ;;  %v1212_v53 = vpop.f32.mrf.mxu1 }
 0x25c   :  { %v1124_v49 = vadd.f32 %v1123_v48, %v6528_v17  ;;  %v1256_v52 = vpop.f32.mrf.mxu2  ;;  %v1345_v0 = vpop.f32.mrf.mxu3 }
 0x25d   :  { %v1257_v50 = vadd.f32 %v1256_v52, %v6642_v47 }
 0x25e   :  { %v1213_v51 = vadd.f32 %v1212_v53, %v1124_v49 }
 0x25f   :  { %v1346_v41 = vadd.f32 %v1345_v0, %v1257_v50 }
 0x260   :  { %v1687_v16 = vmax.f32 %v1213_v51, 0.0  ;;  %1298 = vmatmul.bf16.gmra.mxu2 %v6473_v55  ;;  %1387 = vmatmul.bf16.gmra.mxu3 %v6475_v56 }
 0x261   :  { %v1616_v7 = vmax.f32 %v1346_v41, 0.0 }
 0x262   :  { %v6692_v43 = vpack.c.bf16 %v1687_v16, %v1683_v61  ;;  %v5164_v61 = vld [vmem:[#allocation5 + $0x60] sm:$0xf]  ;;  %v5784_v16 = vld [vmem:[#allocation5 + $0x6c] sm:$0xf0] }
 0x263   :  { %v6694_v57 = vpack.c.bf16 %v1616_v7, %v1612_v8  ;;  %v1126_v19 = vpop.f32.mrf.mxu0  ;;  %v1215_v37 = vpop.f32.mrf.mxu1  ;;  %v5292_v8 = vld [vmem:[#allocation5 + $0x160] sm:$0xf] }
 0x264   :  { %8374 = vst [vmem:[#allocation36_spill] sm:$0xff] %v6692_v43  ;;  %v1127_v39 = vadd.f32 %v1126_v19, %v6528_v17  ;;  %v1259_v6 = vpop.f32.mrf.mxu2  ;;  %v1348_v30 = vpop.f32.mrf.mxu3 }
 0x265   :  { %8375 = vst [vmem:[#allocation37_spill] sm:$0xff] %v6694_v57  ;;  %v1260_v48 = vadd.f32 %v1259_v6, %v6642_v47 }
 0x266   :  { %v1216_v25 = vadd.f32 %v1215_v37, %v1127_v39  ;;  %1441 = vmatmul.bf16.gmra.mxu0 %v6349_v2  ;;  %1530 = vmatmul.bf16.gmra.mxu1 %v6351_v3  ;;  %v5165_v2 = vor.u32 %v5784_v16, %v5164_v61  ;;  %v5816_v3 = vld [vmem:[#allocation5 + $0x16c] sm:$0xf0]  ;;  %v5276_v61 = vld [vmem:[#allocation5 + $0x140] sm:$0xf] }
 0x267   :  { %v1349_v53 = vadd.f32 %v1348_v30, %v1260_v48  ;;  %v5293_v6 = vor.u32 %v5816_v3, %v5292_v8  ;;  %v5812_v16 = vld [vmem:[#allocation5 + $0x14c] sm:$0xf0]  ;;  %v5260_v3 = vld [vmem:[#allocation5 + $0x120] sm:$0xf] }
 0x268   :  { %v1691_v7 = vmax.f32 %v1216_v25, 0.0  ;;  %2560 = vmatpush.bf16.msra.mxu2 %v5165_v2  ;;  %v5780_v25 = vld [vmem:[#allocation5 + $0x4c] sm:$0xf0] }
 0x269   :  { %v1620_v37 = vmax.f32 %v1349_v53, 0.0  ;;  %2649 = vmatpush.bf16.msra.mxu3 %v5293_v6  ;;  %v5776_v2 = vld [vmem:[#allocation5 + $0x2c] sm:$0xf0]  ;;  %v5420_v6 = vld [vmem:[#allocation5 + $0x260] sm:$0xf] }
 0x26b   :  { %v1128_v18 = vpop.f32.mrf.mxu0  ;;  %v1217_v12 = vpop.f32.mrf.mxu1 }
 0x26c   :  { %v1129_v49 = vadd.f32 %v1128_v18, %v6528_v17  ;;  %v1261_v52 = vpop.f32.mrf.mxu2  ;;  %v1350_v0 = vpop.f32.mrf.mxu3 }
 0x26d   :  { %v1262_v50 = vadd.f32 %v1261_v52, %v6642_v47 }
 0x26e   :  { %v1218_v51 = vadd.f32 %v1217_v12, %v1129_v49  ;;  %v5148_v49 = vld [vmem:[#allocation5 + $0x40] sm:$0xf] }
 0x26f   :  { %v1351_v41 = vadd.f32 %v1350_v0, %v1262_v50 }
 0x270   :  { %v1695_v19 = vmax.f32 %v1218_v51, 0.0  ;;  %1303 = vmatmul.bf16.gmra.mxu2 %v6489_v32  ;;  %1392 = vmatmul.bf16.gmra.mxu3 %v6491_v33  ;;  %v5149_v51 = vor.u32 %v5780_v25, %v5148_v49 }
 0x271   :  { %v1624_v39 = vmax.f32 %v1351_v41, 0.0  ;;  %v5277_v41 = vor.u32 %v5812_v16, %v5276_v61 }
 0x272   :  { %v6704_v30 = vpack.c.bf16 %v1695_v19, %v1691_v7  ;;  %2561 = vmatpush.bf16.msra.mxu2 %v5149_v51  ;;  %v5132_v19 = vld [vmem:[#allocation5 + $0x20] sm:$0xf] }
 0x273   :  { %v6706_v48 = vpack.c.bf16 %v1624_v39, %v1620_v37  ;;  %v1131_v18 = vpop.f32.mrf.mxu0  ;;  %v1220_v12 = vpop.f32.mrf.mxu1  ;;  %2650 = vmatpush.bf16.msra.mxu3 %v5277_v41  ;;  %v5133_v37 = vor.u32 %v5776_v2, %v5132_v19  ;;  %v5808_v39 = vld [vmem:[#allocation5 + $0x12c] sm:$0xf0] }
 0x274   :  { %8376 = vst [vmem:[#allocation38_spill] sm:$0xff] %v6704_v30  ;;  %v1132_v52 = vadd.f32 %v1131_v18, %v6528_v17  ;;  %v1264_v0 = vpop.f32.mrf.mxu2  ;;  %v1353_v50 = vpop.f32.mrf.mxu3  ;;  %v5848_v18 = vld [vmem:[#allocation5 + $0x26c] sm:$0xf0]  ;;  %v5261_v49 = vor.u32 %v5808_v39, %v5260_v3 }
 0x275   :  { %8377 = vst [vmem:[#allocation39_spill] sm:$0xff] %v6706_v48  ;;  %v1265_v53 = vadd.f32 %v1264_v0, %v6642_v47  ;;  %v5421_v25 = vor.u32 %v5848_v18, %v5420_v6  ;;  %v5880_v0 = vld [vmem:[#allocation5 + $0x36c] sm:$0xf0] }
 0x276   :  { %v1221_v8 = vadd.f32 %v1220_v12, %v1132_v52  ;;  %1446 = vmatmul.bf16.gmra.mxu0 %v6369_v28  ;;  %1535 = vmatmul.bf16.gmra.mxu1 %v6371_v29  ;;  %v5549_v52 = vor.u32 %v5880_v0, %v5548_v38  ;;  %v5116_v28 = vld [vmem:[#allocation5] sm:$0xf]  ;;  %v5772_v29 = vld [vmem:[#allocation5 + $0xc] sm:$0xf0] }
 0x277   :  { %v1354_v7 = vadd.f32 %v1353_v50, %v1265_v53  ;;  %2562 = vmatpush.bf16.msra.mxu2 %v5133_v37  ;;  %2651 = vmatpush.bf16.msra.mxu3 %v5261_v49  ;;  %v5244_v50 = vld [vmem:[#allocation5 + $0x100] sm:$0xf]  ;;  %v5117_v41 = vor.u32 %v5772_v29, %v5116_v28  ;;  %v5804_v19 = vld [vmem:[#allocation5 + $0x10c] sm:$0xf0] }
 0x278   :  { %2738 = vmatpush.bf16.msrb.mxu0 %v5421_v25  ;;  %2827 = vmatpush.bf16.msrb.mxu1 %v5549_v52  ;;  %v5245_v3 = vor.u32 %v5804_v19, %v5244_v50  ;;  %v1699_v38 = vmax.f32 %v1221_v8, 0.0 }
 0x279   :  { %v1628_v18 = vmax.f32 %v1354_v7, 0.0 }
 0x27b   :  { %v1133_v61 = vpop.f32.mrf.mxu0  ;;  %v1222_v12 = vpop.f32.mrf.mxu1  ;;  %2563 = vmatpush.bf16.msra.mxu2 %v5117_v41  ;;  %2652 = vmatpush.bf16.msra.mxu3 %v5245_v3 }
 0x27c   :  { %v1134_v51 = vadd.f32 %v1133_v61, %v6528_v17  ;;  %v1266_v16 = vpop.f32.mrf.mxu2  ;;  %v1355_v53 = vpop.f32.mrf.mxu3 }
 0x27d   :  { %v1267_v2 = vadd.f32 %v1266_v16, %v6642_v47 }
 0x27e   :  { %v1223_v39 = vadd.f32 %v1222_v12, %v1134_v51 }
 0x27f   :  { %v1356_v6 = vadd.f32 %v1355_v53, %v1267_v2 }
 0x280   :  { %v1703_v37 = vmax.f32 %v1223_v39, 0.0  ;;  %1308 = vmatmul.bf16.gmra.mxu2 %v6505_v21  ;;  %1397 = vmatmul.bf16.gmra.mxu3 %v6507_v24 }
 0x281   :  { %v1632_v49 = vmax.f32 %v1356_v6, 0.0 }
 0x282   :  { %v6716_v0 = vpack.c.bf16 %v1703_v37, %v1699_v38 }
 0x283   :  { %v6718_v25 = vpack.c.bf16 %v1632_v49, %v1628_v18  ;;  %v1136_v61 = vpop.f32.mrf.mxu0  ;;  %v1225_v28 = vpop.f32.mrf.mxu1 }
 0x284   :  { %v1137_v52 = vadd.f32 %v1136_v61, %v6528_v17  ;;  %v1269_v12 = vpop.f32.mrf.mxu2  ;;  %v1358_v29 = vpop.f32.mrf.mxu3 }
 0x285   :  { %8378 = vst [vmem:[#allocation40_spill] sm:$0xff] %v6718_v25  ;;  %v1270_v50 = vadd.f32 %v1269_v12, %v6642_v47 }
 0x286   :  { %v1226_v8 = vadd.f32 %v1225_v28, %v1137_v52  ;;  %1451 = vmatmul.bf16.gmra.mxu0 %v6389_v44  ;;  %1540 = vmatmul.bf16.gmra.mxu1 %v6391_v45  ;;  %v6729_v44 = vperm.slane %v6639_v42, 3 }
 0x287   :  { %v1359_v51 = vadd.f32 %v1358_v29, %v1270_v50 }
 0x288   :  { %v1707_v6 = vmax.f32 %v1226_v8, 0.0  ;;  %v5404_v8 = vld [vmem:[#allocation5 + $0x240] sm:$0xf] }
 0x289   :  { %v1636_v45 = vmax.f32 %v1359_v51, 0.0  ;;  %v5844_v51 = vld [vmem:[#allocation5 + $0x24c] sm:$0xf0] }
 0x28b   :  { %v1138_v7 = vpop.f32.mrf.mxu0  ;;  %v1227_v16 = vpop.f32.mrf.mxu1 }
 0x28c   :  { %v1139_v53 = vadd.f32 %v1138_v7, %v6528_v17  ;;  %v1271_v41 = vpop.f32.mrf.mxu2  ;;  %v1360_v19 = vpop.f32.mrf.mxu3  ;;  %v5405_v7 = vor.u32 %v5844_v51, %v5404_v8 }
 0x28d   :  { %v1272_v2 = vadd.f32 %v1271_v41, %v6642_v47 }
 0x28e   :  { %v1228_v3 = vadd.f32 %v1227_v16, %v1139_v53  ;;  %v5532_v16 = vld [vmem:[#allocation5 + $0x340] sm:$0xf]  ;;  %v5876_v53 = vld [vmem:[#allocation5 + $0x34c] sm:$0xf0]  ;;  %2739 = vmatpush.bf16.msrb.mxu0 %v5405_v7 }
 0x28f   :  { %v1361_v39 = vadd.f32 %v1360_v19, %v1272_v2  ;;  %v5533_v2 = vor.u32 %v5876_v53, %v5532_v16 }
 0x290   :  { %v1711_v38 = vmax.f32 %v1228_v3, 0.0  ;;  %1313 = vmatmul.bf16.gmra.mxu2 %v6521_v14  ;;  %1402 = vmatmul.bf16.gmra.mxu3 %v6523_v15 }
 0x291   :  { %v1640_v37 = vmax.f32 %v1361_v39, 0.0  ;;  %2828 = vmatpush.bf16.msrb.mxu1 %v5533_v2 }
 0x292   :  { %v6731_v18 = vpack.c.bf16 %v1711_v38, %v1707_v6 }
 0x293   :  { %v6733_v17 = vpack.c.bf16 %v1640_v37, %v1636_v45  ;;  %v1417_v49 = vpop.f32.mrf.mxu0  ;;  %v1506_v61 = vpop.f32.mrf.mxu1 }
 0x294   :  { %8379 = vst [vmem:[#allocation41_spill] sm:$0xff] %v6731_v18  ;;  %v1274_v28 = vpop.f32.mrf.mxu2  ;;  %v1363_v52 = vpop.f32.mrf.mxu3  ;;  %v1418_v12 = vadd.f32 %v1417_v49, %v6729_v44 }
 0x295   :  { %8380 = vst [vmem:[#allocation42_spill] sm:$0xff] %v6733_v17  ;;  %v1275_v29 = vadd.f32 %v1274_v28, %v6642_v47 }
 0x296   :  { %v1507_v50 = vadd.f32 %v1506_v61, %v1418_v12  ;;  %1456 = vmatmul.bf16.gmra.mxu0 %v6403_v10  ;;  %1545 = vmatmul.bf16.gmra.mxu1 %v6405_v11 }
 0x297   :  { %v1364_v42 = vadd.f32 %v1363_v52, %v1275_v29 }
 0x298   :  { %v1589_v11 = vmax.f32 %v1507_v50, 0.0 }
 0x299   :  { %v1644_v49 = vmax.f32 %v1364_v42, 0.0 }
 0x29b   :  { %v1419_v41 = vpop.f32.mrf.mxu0  ;;  %v1508_v19 = vpop.f32.mrf.mxu1 }
 0x29c   :  { %v1276_v3 = vpop.f32.mrf.mxu2  ;;  %v1365_v39 = vpop.f32.mrf.mxu3  ;;  %v1420_v6 = vadd.f32 %v1419_v41, %v6729_v44 }
 0x29d   :  { %v1277_v38 = vadd.f32 %v1276_v3, %v6642_v47 }
 0x29e   :  { %v1509_v10 = vadd.f32 %v1508_v19, %v1420_v6 }
 0x29f   :  { %v1366_v45 = vadd.f32 %v1365_v39, %v1277_v38 }
 0x2a0   :  { %v1593_v37 = vmax.f32 %v1509_v10, 0.0  ;;  %2564 = vmatmul.bf16.vlgmr.msra.gmra.mxu2 %v6431_v40  ;;  %2653 = vmatmul.bf16.vlgmr.msra.gmra.mxu3 %v6540_v26 }
 0x2a1   :  { %v1648_v61 = vmax.f32 %v1366_v45, 0.0 }
 0x2a2   :  { %v6743_v28 = vpack.c.bf16 %v1593_v37, %v1589_v11 }
 0x2a3   :  { %v6745_v52 = vpack.c.bf16 %v1648_v61, %v1644_v49  ;;  %v1422_v12 = vpop.f32.mrf.mxu0  ;;  %v1511_v29 = vpop.f32.mrf.mxu1 }
 0x2a4   :  { %8381 = vst [vmem:[#allocation43_spill] sm:$0xff] %v6743_v28  ;;  %v1279_v8 = vpop.f32.mrf.mxu2  ;;  %v1368_v51 = vpop.f32.mrf.mxu3  ;;  %v1423_v7 = vadd.f32 %v1422_v12, %v6729_v44 }
 0x2a5   :  { %v1280_v16 = vadd.f32 %v1279_v8, %v6642_v47 }
 0x2a6   :  { %v1512_v50 = vadd.f32 %v1511_v29, %v1423_v7  ;;  %1461 = vmatmul.bf16.gmra.mxu0 %v6425_v35  ;;  %1550 = vmatmul.bf16.gmra.mxu1 %v6427_v36 }
 0x2a7   :  { %v1369_v53 = vadd.f32 %v1368_v51, %v1280_v16 }
 0x2a8   :  { %v1597_v10 = vmax.f32 %v1512_v50, 0.0  ;;  %v5388_v50 = vld [vmem:[#allocation5 + $0x220] sm:$0xf] }
 0x2a9   :  { %v1652_v35 = vmax.f32 %v1369_v53, 0.0  ;;  %v5840_v53 = vld [vmem:[#allocation5 + $0x22c] sm:$0xf0] }
 0x2ab   :  { %v1424_v42 = vpop.f32.mrf.mxu0  ;;  %v1513_v41 = vpop.f32.mrf.mxu1 }
 0x2ac   :  { %v1281_v19 = vpop.f32.mrf.mxu2  ;;  %v1370_v2 = vpop.f32.mrf.mxu3  ;;  %v1425_v3 = vadd.f32 %v1424_v42, %v6729_v44  ;;  %v5389_v42 = vor.u32 %v5840_v53, %v5388_v50 }
 0x2ad   :  { %v1282_v39 = vadd.f32 %v1281_v19, %v6642_v47  ;;  %v5872_v19 = vld [vmem:[#allocation5 + $0x32c] sm:$0xf0] }
 0x2ae   :  { %v1514_v6 = vadd.f32 %v1513_v41, %v1425_v3  ;;  %v5516_v41 = vld [vmem:[#allocation5 + $0x320] sm:$0xf]  ;;  %2740 = vmatpush.bf16.msrb.mxu0 %v5389_v42 }
 0x2af   :  { %v1371_v38 = vadd.f32 %v1370_v2, %v1282_v39  ;;  %v5517_v39 = vor.u32 %v5872_v19, %v5516_v41 }
 0x2b0   :  { %v1601_v45 = vmax.f32 %v1514_v6, 0.0  ;;  %2569 = vmatmul.bf16.gmra.mxu2 %v6447_v27  ;;  %2658 = vmatmul.bf16.gmra.mxu3 %v6552_v60 }
 0x2b1   :  { %v1656_v11 = vmax.f32 %v1371_v38, 0.0  ;;  %2829 = vmatpush.bf16.msrb.mxu1 %v5517_v39 }
 0x2b2   :  { %v6755_v36 = vpack.c.bf16 %v1601_v45, %v1597_v10 }
 0x2b3   :  { %v6757_v37 = vpack.c.bf16 %v1656_v11, %v1652_v35  ;;  %v1427_v49 = vpop.f32.mrf.mxu0  ;;  %v1516_v61 = vpop.f32.mrf.mxu1 }
 0x2b4   :  { %8382 = vst [vmem:[#allocation44_spill] sm:$0xff] %v6755_v36  ;;  %v1284_v12 = vpop.f32.mrf.mxu2  ;;  %v1373_v29 = vpop.f32.mrf.mxu3  ;;  %v1428_v8 = vadd.f32 %v1427_v49, %v6729_v44 }
 0x2b5   :  { %8383 = vst [vmem:[#allocation45_spill] sm:$0xff] %v6757_v37  ;;  %v1285_v51 = vadd.f32 %v1284_v12, %v6642_v47 }
 0x2b6   :  { %v1517_v7 = vadd.f32 %v1516_v61, %v1428_v8  ;;  %1466 = vmatmul.bf16.gmra.mxu0 %v6441_v22  ;;  %1555 = vmatmul.bf16.gmra.mxu1 %v6443_v23 }
 0x2b7   :  { %v1374_v16 = vadd.f32 %v1373_v29, %v1285_v51 }
 0x2b8   :  { %v1605_v23 = vmax.f32 %v1517_v7, 0.0 }
 0x2b9   :  { %v1660_v49 = vmax.f32 %v1374_v16, 0.0 }
 0x2bb   :  { %v1429_v2 = vpop.f32.mrf.mxu0  ;;  %v1518_v3 = vpop.f32.mrf.mxu1 }
 0x2bc   :  { %v1286_v6 = vpop.f32.mrf.mxu2  ;;  %v1375_v38 = vpop.f32.mrf.mxu3  ;;  %v1430_v10 = vadd.f32 %v1429_v2, %v6729_v44 }
 0x2bd   :  { %v1287_v45 = vadd.f32 %v1286_v6, %v6642_v47 }
 0x2be   :  { %v1519_v22 = vadd.f32 %v1518_v3, %v1430_v10 }
 0x2bf   :  { %v1376_v35 = vadd.f32 %v1375_v38, %v1287_v45 }
 0x2c0   :  { %v1609_v11 = vmax.f32 %v1519_v22, 0.0  ;;  %2574 = vmatmul.bf16.gmra.mxu2 %v6463_v63  ;;  %2663 = vmatmul.bf16.gmra.mxu3 %v6564_v4 }
 0x2c1   :  { %v1664_v61 = vmax.f32 %v1376_v35, 0.0 }
 0x2c2   :  { %v6767_v12 = vpack.c.bf16 %v1609_v11, %v1605_v23 }
 0x2c3   :  { %v6769_v29 = vpack.c.bf16 %v1664_v61, %v1660_v49  ;;  %v1432_v8 = vpop.f32.mrf.mxu0  ;;  %v1521_v51 = vpop.f32.mrf.mxu1 }
 0x2c4   :  { %8384 = vst [vmem:[#allocation46_spill] sm:$0xff] %v6767_v12  ;;  %v1289_v50 = vpop.f32.mrf.mxu2  ;;  %v1378_v53 = vpop.f32.mrf.mxu3  ;;  %v1433_v42 = vadd.f32 %v1432_v8, %v6729_v44 }
 0x2c5   :  { %v1290_v41 = vadd.f32 %v1289_v50, %v6642_v47 }
 0x2c6   :  { %v1522_v7 = vadd.f32 %v1521_v51, %v1433_v42  ;;  %1471 = vmatmul.bf16.gmra.mxu0 %v6457_v58  ;;  %1560 = vmatmul.bf16.gmra.mxu1 %v6459_v59 }
 0x2c7   :  { %v1379_v19 = vadd.f32 %v1378_v53, %v1290_v41 }
 0x2c8   :  { %v1613_v22 = vmax.f32 %v1522_v7, 0.0  ;;  %v5372_v7 = vld [vmem:[#allocation5 + $0x200] sm:$0xf] }
 0x2c9   :  { %v1668_v58 = vmax.f32 %v1379_v19, 0.0  ;;  %v5836_v19 = vld [vmem:[#allocation5 + $0x20c] sm:$0xf0] }
 0x2cb   :  { %v1434_v16 = vpop.f32.mrf.mxu0  ;;  %v1523_v2 = vpop.f32.mrf.mxu1 }
 0x2cc   :  { %v1291_v3 = vpop.f32.mrf.mxu2  ;;  %v1380_v39 = vpop.f32.mrf.mxu3  ;;  %v1435_v6 = vadd.f32 %v1434_v16, %v6729_v44  ;;  %v5373_v16 = vor.u32 %v5836_v19, %v5372_v7 }
 0x2cd   :  { %v1292_v38 = vadd.f32 %v1291_v3, %v6642_v47  ;;  %v5868_v3 = vld [vmem:[#allocation5 + $0x30c] sm:$0xf0] }
 0x2ce   :  { %v1524_v10 = vadd.f32 %v1523_v2, %v1435_v6  ;;  %v5500_v2 = vld [vmem:[#allocation5 + $0x300] sm:$0xf]  ;;  %2741 = vmatpush.bf16.msrb.mxu0 %v5373_v16 }
 0x2cf   :  { %v1381_v45 = vadd.f32 %v1380_v39, %v1292_v38  ;;  %v5501_v38 = vor.u32 %v5868_v3, %v5500_v2 }
 0x2d0   :  { %v1617_v35 = vmax.f32 %v1524_v10, 0.0  ;;  %2579 = vmatmul.bf16.gmra.mxu2 %v6479_v62  ;;  %2668 = vmatmul.bf16.gmra.mxu3 %v6576_v5 }
 0x2d1   :  { %v1672_v23 = vmax.f32 %v1381_v45, 0.0  ;;  %2830 = vmatpush.bf16.msrb.mxu1 %v5501_v38 }
 0x2d2   :  { %v6779_v59 = vpack.c.bf16 %v1617_v35, %v1613_v22 }
 0x2d3   :  { %v6781_v11 = vpack.c.bf16 %v1672_v23, %v1668_v58  ;;  %v1437_v49 = vpop.f32.mrf.mxu0  ;;  %v1526_v61 = vpop.f32.mrf.mxu1 }
 0x2d4   :  { %8385 = vst [vmem:[#allocation47_spill] sm:$0xff] %v6779_v59  ;;  %v1294_v8 = vpop.f32.mrf.mxu2  ;;  %v1383_v51 = vpop.f32.mrf.mxu3  ;;  %v1438_v50 = vadd.f32 %v1437_v49, %v6729_v44  ;;  %v8386_v49 = vld [vmem:[#allocation20_spill] sm:$0xff] }
 0x2d5   :  { %v1295_v53 = vadd.f32 %v1294_v8, %v6642_v47 }
 0x2d6   :  { %v1527_v42 = vadd.f32 %v1526_v61, %v1438_v50  ;;  %1476 = vmatmul.bf16.gmra.mxu0 %v6473_v55  ;;  %1565 = vmatmul.bf16.gmra.mxu1 %v6475_v56 }
 0x2d7   :  { %v1384_v41 = vadd.f32 %v1383_v51, %v1295_v53 }
 0x2d8   :  { %v1621_v56 = vmax.f32 %v1527_v42, 0.0 }
 0x2d9   :  { %v1676_v61 = vmax.f32 %v1384_v41, 0.0 }
 0x2db   :  { %v1439_v39 = vpop.f32.mrf.mxu0  ;;  %v1528_v6 = vpop.f32.mrf.mxu1 }
 0x2dc   :  { %v1296_v10 = vpop.f32.mrf.mxu2  ;;  %v1385_v45 = vpop.f32.mrf.mxu3  ;;  %v1440_v22 = vadd.f32 %v1439_v39, %v6729_v44 }
 0x2dd   :  { %v1297_v35 = vadd.f32 %v1296_v10, %v6642_v47 }
 0x2de   :  { %v1529_v55 = vadd.f32 %v1528_v6, %v1440_v22 }
 0x2df   :  { %v1386_v58 = vadd.f32 %v1385_v45, %v1297_v35 }
 0x2e0   :  { %v1625_v23 = vmax.f32 %v1529_v55, 0.0  ;;  %2584 = vmatmul.bf16.gmra.mxu2 %v6495_v54  ;;  %2673 = vmatmul.bf16.gmra.mxu3 %v8386_v49 }
 0x2e1   :  { %v1680_v8 = vmax.f32 %v1386_v58, 0.0 }
 0x2e2   :  { %v6791_v51 = vpack.c.bf16 %v1625_v23, %v1621_v56  ;;  %v8388_v23 = vld [vmem:[#allocation13_spill] sm:$0xff] }
 0x2e3   :  { %v6793_v50 = vpack.c.bf16 %v1680_v8, %v1676_v61  ;;  %v1442_v53 = vpop.f32.mrf.mxu0  ;;  %v1531_v7 = vpop.f32.mrf.mxu1  ;;  %v8389_v61 = vld [vmem:[#allocation22_spill] sm:$0xff] }
 0x2e4   :  { %8387 = vst [vmem:[#allocation48_spill] sm:$0xff] %v6791_v51  ;;  %v1299_v19 = vpop.f32.mrf.mxu2  ;;  %v1388_v16 = vpop.f32.mrf.mxu3  ;;  %v1443_v2 = vadd.f32 %v1442_v53, %v6729_v44 }
 0x2e5   :  { %v1300_v3 = vadd.f32 %v1299_v19, %v6642_v47 }
 0x2e6   :  { %v1532_v42 = vadd.f32 %v1531_v7, %v1443_v2  ;;  %1481 = vmatmul.bf16.gmra.mxu0 %v6489_v32  ;;  %1570 = vmatmul.bf16.gmra.mxu1 %v6491_v33  ;;  %v5230_v2 = vld [vmem:[#allocation5 + $0xf0] sm:$0xf0] }
 0x2e7   :  { %v1389_v39 = vadd.f32 %v1388_v16, %v1300_v3  ;;  %v5798_v16 = vld [vmem:[#allocation5 + $0xe4] sm:$0xf] }
 0x2e8   :  { %v1629_v58 = vmax.f32 %v1532_v42, 0.0  ;;  %v5830_v3 = vld [vmem:[#allocation5 + $0x1e4] sm:$0xf] }
 0x2e9   :  { %v1684_v32 = vmax.f32 %v1389_v39, 0.0 }
 0x2eb   :  { %v1444_v41 = vpop.f32.mrf.mxu0  ;;  %v1533_v6 = vpop.f32.mrf.mxu1 }
 0x2ec   :  { %v1301_v38 = vpop.f32.mrf.mxu2  ;;  %v1390_v10 = vpop.f32.mrf.mxu3  ;;  %v1445_v45 = vadd.f32 %v1444_v41, %v6729_v44 }
 0x2ed   :  { %v1302_v22 = vadd.f32 %v1301_v38, %v6642_v47  ;;  %v5233_v38 = vor.u32 %v5798_v16, %v5230_v2 }
 0x2ee   :  { %v1534_v35 = vadd.f32 %v1533_v6, %v1445_v45 }
 0x2ef   :  { %v1391_v55 = vadd.f32 %v1390_v10, %v1302_v22  ;;  %v5358_v10 = vld [vmem:[#allocation5 + $0x1f0] sm:$0xf0]  ;;  %2912 = vmatpush.bf16.msrb.mxu2 %v5233_v38  ;;  %v8393_v38 = vld [vmem:[#allocation24_spill] sm:$0xff] }
 0x2f0   :  { %v1633_v56 = vmax.f32 %v1534_v35, 0.0  ;;  %2589 = vmatmul.bf16.gmra.mxu2 %v8388_v23  ;;  %2678 = vmatmul.bf16.gmra.mxu3 %v8389_v61  ;;  %v5361_v22 = vor.u32 %v5830_v3, %v5358_v10 }
 0x2f1   :  { %v1688_v8 = vmax.f32 %v1391_v55, 0.0  ;;  %v5862_v55 = vld [vmem:[#allocation5 + $0x2e4] sm:$0xf] }
 0x2f2   :  { %v6803_v33 = vpack.c.bf16 %v1633_v56, %v1629_v58  ;;  %3001 = vmatpush.bf16.msrb.mxu3 %v5361_v22  ;;  %v5486_v58 = vld [vmem:[#allocation5 + $0x2f0] sm:$0xf0] }
 0x2f3   :  { %v6805_v53 = vpack.c.bf16 %v1688_v8, %v1684_v32  ;;  %v1447_v7 = vpop.f32.mrf.mxu0  ;;  %v1536_v19 = vpop.f32.mrf.mxu1  ;;  %v5489_v56 = vor.u32 %v5862_v55, %v5486_v58  ;;  %v5894_v32 = vld [vmem:[#allocation5 + $0x3e4] sm:$0xf]  ;;  %v5614_v8 = vld [vmem:[#allocation5 + $0x3f0] sm:$0xf0] }
 0x2f4   :  { %8390 = vst [vmem:[#allocation49_spill] sm:$0xff] %v6803_v33  ;;  %v1304_v41 = vpop.f32.mrf.mxu2  ;;  %v1393_v6 = vpop.f32.mrf.mxu3  ;;  %v1448_v42 = vadd.f32 %v1447_v7, %v6729_v44  ;;  %v5617_v16 = vor.u32 %v5894_v32, %v5614_v8 }
 0x2f5   :  { %8391 = vst [vmem:[#allocation50_spill] sm:$0xff] %v6805_v53  ;;  %v1305_v45 = vadd.f32 %v1304_v41, %v6642_v47  ;;  %3090 = vmatpush.bf16.msra.mxu0 %v5489_v56 }
 0x2f6   :  { %v1537_v39 = vadd.f32 %v1536_v19, %v1448_v42  ;;  %1486 = vmatmul.bf16.gmra.mxu0 %v6505_v21  ;;  %1575 = vmatmul.bf16.gmra.mxu1 %v6507_v24  ;;  %v8392_v42 = vld [vmem:[#allocation14_spill] sm:$0xff] }
 0x2f7   :  { %v1394_v35 = vadd.f32 %v1393_v6, %v1305_v45  ;;  %3179 = vmatpush.bf16.msra.mxu1 %v5617_v16 }
 0x2f8   :  { %v1637_v41 = vmax.f32 %v1537_v39, 0.0 }
 0x2f9   :  { %v1692_v10 = vmax.f32 %v1394_v35, 0.0 }
 0x2fb   :  { %v1449_v61 = vpop.f32.mrf.mxu0  ;;  %v1538_v7 = vpop.f32.mrf.mxu1 }
 0x2fc   :  { %v1306_v2 = vpop.f32.mrf.mxu2  ;;  %v1395_v23 = vpop.f32.mrf.mxu3  ;;  %v1450_v3 = vadd.f32 %v1449_v61, %v6729_v44 }
 0x2fd   :  { %v1307_v21 = vadd.f32 %v1306_v2, %v6642_v47 }
 0x2fe   :  { %v1539_v24 = vadd.f32 %v1538_v7, %v1450_v3 }
 0x2ff   :  { %v1396_v19 = vadd.f32 %v1395_v23, %v1307_v21 }
 0x300   :  { %v1641_v6 = vmax.f32 %v1539_v24, 0.0  ;;  %2594 = vmatmul.bf16.gmra.mxu2 %v8392_v42  ;;  %2683 = vmatmul.bf16.gmra.mxu3 %v8393_v38 }
 0x301   :  { %v1696_v45 = vmax.f32 %v1396_v19, 0.0 }
 0x302   :  { %v6815_v22 = vpack.c.bf16 %v1641_v6, %v1637_v41 }
 0x303   :  { %v6817_v55 = vpack.c.bf16 %v1696_v45, %v1692_v10  ;;  %v1452_v58 = vpop.f32.mrf.mxu0  ;;  %v1541_v61 = vpop.f32.mrf.mxu1  ;;  %v8396_v45 = vld [vmem:[#allocation15_spill] sm:$0xff] }
 0x304   :  { %8394 = vst [vmem:[#allocation51_spill] sm:$0xff] %v6815_v22  ;;  %v1309_v56 = vpop.f32.mrf.mxu2  ;;  %v1398_v32 = vpop.f32.mrf.mxu3  ;;  %v1453_v8 = vadd.f32 %v1452_v58, %v6729_v44  ;;  %v8397_v58 = vld [vmem:[#allocation26_spill] sm:$0xff] }
 0x305   :  { %8395 = vst [vmem:[#allocation52_spill] sm:$0xff] %v6817_v55  ;;  %v1310_v23 = vadd.f32 %v1309_v56, %v6642_v47  ;;  %v5794_v56 = vld [vmem:[#allocation5 + $0xc4] sm:$0xf] }
 0x306   :  { %v1542_v39 = vadd.f32 %v1541_v61, %v1453_v8  ;;  %1491 = vmatmul.bf16.gmra.mxu0 %v6521_v14  ;;  %1580 = vmatmul.bf16.gmra.mxu1 %v6523_v15  ;;  %v5826_v8 = vld [vmem:[#allocation5 + $0x1c4] sm:$0xf] }
 0x307   :  { %v1399_v7 = vadd.f32 %v1398_v32, %v1310_v23  ;;  %v5214_v32 = vld [vmem:[#allocation5 + $0xd0] sm:$0xf0] }
 0x308   :  { %v1645_v6 = vmax.f32 %v1542_v39, 0.0 }
 0x309   :  { %v1700_v14 = vmax.f32 %v1399_v7, 0.0 }
 0x30b   :  { %v1454_v35 = vpop.f32.mrf.mxu0  ;;  %v1543_v16 = vpop.f32.mrf.mxu1 }
 0x30c   :  { %v1311_v2 = vpop.f32.mrf.mxu2  ;;  %v1400_v3 = vpop.f32.mrf.mxu3  ;;  %v1455_v21 = vadd.f32 %v1454_v35, %v6729_v44 }
 0x30d   :  { %v1312_v24 = vadd.f32 %v1311_v2, %v6642_v47  ;;  %v5217_v2 = vor.u32 %v5794_v56, %v5214_v32  ;;  %v5598_v56 = vld [vmem:[#allocation5 + $0x3d0] sm:$0xf0] }
 0x30e   :  { %v1544_v19 = vadd.f32 %v1543_v16, %v1455_v21  ;;  %v5342_v16 = vld [vmem:[#allocation5 + $0x1d0] sm:$0xf0] }
 0x30f   :  { %v1401_v41 = vadd.f32 %v1400_v3, %v1312_v24  ;;  %v5345_v24 = vor.u32 %v5826_v8, %v5342_v16  ;;  %2913 = vmatpush.bf16.msrb.mxu2 %v5217_v2 }
 0x310   :  { %v1649_v10 = vmax.f32 %v1544_v19, 0.0  ;;  %2599 = vmatmul.bf16.gmra.mxu2 %v8396_v45  ;;  %2688 = vmatmul.bf16.gmra.mxu3 %v8397_v58 }
 0x311   :  { %v1704_v61 = vmax.f32 %v1401_v41, 0.0  ;;  %3002 = vmatpush.bf16.msrb.mxu3 %v5345_v24 }
 0x312   :  { %v6827_v15 = vpack.c.bf16 %v1649_v10, %v1645_v6  ;;  %v5858_v6 = vld [vmem:[#allocation5 + $0x2c4] sm:$0xf]  ;;  %v5470_v10 = vld [vmem:[#allocation5 + $0x2d0] sm:$0xf0] }
 0x313   :  { %v6829_v23 = vpack.c.bf16 %v1704_v61, %v1700_v14  ;;  %v1457_v35 = vpop.f32.mrf.mxu0  ;;  %v1546_v38 = vpop.f32.mrf.mxu1  ;;  %v5473_v14 = vor.u32 %v5858_v6, %v5470_v10  ;;  %v5890_v61 = vld [vmem:[#allocation5 + $0x3c4] sm:$0xf] }
 0x314   :  { %v1314_v3 = vpop.f32.mrf.mxu2  ;;  %v1403_v39 = vpop.f32.mrf.mxu3  ;;  %v1458_v21 = vadd.f32 %v1457_v35, %v6729_v44  ;;  %v5601_v32 = vor.u32 %v5890_v61, %v5598_v56 }
 0x315   :  { %8398 = vst [vmem:[#allocation53_spill] sm:$0xff] %v6829_v23  ;;  %v1315_v19 = vadd.f32 %v1314_v3, %v6642_v47  ;;  %3091 = vmatpush.bf16.msra.mxu0 %v5473_v14  ;;  %v6840_v3 = vld [vmem:[%s8256_s9] sm:$0xf] }
 0x316   :  { %v1547_v7 = vadd.f32 %v1546_v38, %v1458_v21  ;;  %2742 = vmatmul.bf16.vlgmr.msrb.gmra.mxu0 %v6658_v34  ;;  %2831 = vmatmul.bf16.vlgmr.msrb.gmra.mxu1 %v6743_v28  ;;  %8399 = vst [vmem:[#allocation54_spill] sm:$0xff] %v6840_v3  ;;  %v5550_v28 = vld [vmem:[#allocation5 + $0x370] sm:$0xf0] }
 0x317   :  { %v1404_v41 = vadd.f32 %v1403_v39, %v1315_v19  ;;  %3180 = vmatpush.bf16.msra.mxu1 %v5601_v32  ;;  %v8400_v19 = vld [vmem:[#allocation16_spill] sm:$0xff] }
 0x318   :  { %v1653_v21 = vmax.f32 %v1547_v7, 0.0 }
 0x319   :  { %v1708_v6 = vmax.f32 %v1404_v41, 0.0 }
 0x31b   :  { %v1459_v58 = vpop.f32.mrf.mxu0  ;;  %v1548_v45 = vpop.f32.mrf.mxu1 }
 0x31c   :  { %v1316_v8 = vpop.f32.mrf.mxu2  ;;  %v1405_v35 = vpop.f32.mrf.mxu3  ;;  %v1460_v2 = vadd.f32 %v1459_v58, %v6729_v44  ;;  %v6845_v58 = vperm.slane %v6840_v3, 0 }
 0x31d   :  { %v1317_v38 = vadd.f32 %v1316_v8, %v6642_v47 }
 0x31e   :  { %v1549_v16 = vadd.f32 %v1548_v45, %v1460_v2 }
 0x31f   :  { %v1406_v39 = vadd.f32 %v1405_v35, %v1317_v38 }
 0x320   :  { %v1657_v24 = vmax.f32 %v1549_v16, 0.0  ;;  %2604 = vmatmul.bf16.gmra.mxu2 %v8400_v19  ;;  %2693 = vmatmul.bf16.gmra.mxu3 %v6644_v13  ;;  %v5326_v13 = vld [vmem:[#allocation5 + $0x1b0] sm:$0xf0] }
 0x321   :  { %v1712_v10 = vmax.f32 %v1406_v39, 0.0 }
 0x322   :  { %v6847_v14 = vpack.c.bf16 %v1657_v24, %v1653_v21 }
 0x323   :  { %v6849_v47 = vpack.c.bf16 %v1712_v10, %v1708_v6  ;;  %v1462_v45 = vpop.f32.mrf.mxu0  ;;  %v1551_v61 = vpop.f32.mrf.mxu1 }
 0x324   :  { %8401 = vst [vmem:[#allocation55_spill] sm:$0xff] %v6847_v14  ;;  %v1463_v56 = vadd.f32 %v1462_v45, %v6729_v44  ;;  %v2565_v32 = vpop.f32.mrf.mxu2  ;;  %v2654_v7 = vpop.f32.mrf.mxu3 }
 0x325   :  { %8402 = vst [vmem:[#allocation56_spill] sm:$0xff] %v6849_v47  ;;  %v2566_v8 = vadd.f32 %v2565_v32, %v6845_v58 }
 0x326   :  { %v1552_v35 = vadd.f32 %v1551_v61, %v1463_v56  ;;  %2747 = vmatmul.bf16.gmra.mxu0 %v6670_v20  ;;  %2836 = vmatmul.bf16.gmra.mxu1 %v6755_v36  ;;  %v8403_v61 = vld [vmem:[#allocation17_spill] sm:$0xff]  ;;  %v5822_v36 = vld [vmem:[#allocation5 + $0x1a4] sm:$0xf] }
 0x327   :  { %v6855_v41 = vadd.f32 %v2654_v7, %v2566_v8  ;;  %v5790_v7 = vld [vmem:[#allocation5 + $0xa4] sm:$0xf]  ;;  %v5198_v8 = vld [vmem:[#allocation5 + $0xb0] sm:$0xf0] }
 0x328   :  { %v1661_v45 = vmax.f32 %v1552_v35, 0.0  ;;  %v5201_v3 = vor.u32 %v5790_v7, %v5198_v8  ;;  %v5886_v8 = vld [vmem:[#allocation5 + $0x3a4] sm:$0xf] }
 0x32a   :  { %2914 = vmatpush.bf16.msrb.mxu2 %v5201_v3 }
 0x32b   :  { %v1464_v2 = vpop.f32.mrf.mxu0  ;;  %v1553_v38 = vpop.f32.mrf.mxu1 }
 0x32c   :  { %v1465_v16 = vadd.f32 %v1464_v2, %v6729_v44  ;;  %v2567_v39 = vpop.f32.mrf.mxu2  ;;  %v2656_v21 = vpop.f32.mrf.mxu3 }
 0x32d   :  { %v2568_v24 = vadd.f32 %v2567_v39, %v6845_v58 }
 0x32e   :  { %v1554_v6 = vadd.f32 %v1553_v38, %v1465_v16 }
 0x32f   :  { %v6859_v10 = vadd.f32 %v2656_v21, %v2568_v24  ;;  %v5329_v21 = vor.u32 %v5822_v36, %v5326_v13 }
 0x330   :  { %v1665_v32 = vmax.f32 %v1554_v6, 0.0  ;;  %2609 = vmatmul.bf16.gmra.mxu2 %v8403_v61  ;;  %2698 = vmatmul.bf16.gmra.mxu3 %v6656_v1  ;;  %v5582_v1 = vld [vmem:[#allocation5 + $0x3b0] sm:$0xf0] }
 0x331   :  { %3003 = vmatpush.bf16.msrb.mxu3 %v5329_v21 }
 0x332   :  { %v6863_v56 = vpack.c.bf16 %v1665_v32, %v1661_v45  ;;  %v5854_v45 = vld [vmem:[#allocation5 + $0x2a4] sm:$0xf]  ;;  %v5454_v32 = vld [vmem:[#allocation5 + $0x2b0] sm:$0xf0] }
 0x333   :  { %v1467_v20 = vpop.f32.mrf.mxu0  ;;  %v1556_v2 = vpop.f32.mrf.mxu1  ;;  %v5457_v7 = vor.u32 %v5854_v45, %v5454_v32 }
 0x334   :  { %v1468_v39 = vadd.f32 %v1467_v20, %v6729_v44  ;;  %v2570_v38 = vpop.f32.mrf.mxu2  ;;  %v2659_v16 = vpop.f32.mrf.mxu3  ;;  %v5585_v20 = vor.u32 %v5886_v8, %v5582_v1 }
 0x335   :  { %v2571_v35 = vadd.f32 %v2570_v38, %v6845_v58  ;;  %3092 = vmatpush.bf16.msra.mxu0 %v5457_v7 }
 0x336   :  { %v1557_v24 = vadd.f32 %v1556_v2, %v1468_v39  ;;  %2752 = vmatmul.bf16.gmra.mxu0 %v6682_v46  ;;  %2841 = vmatmul.bf16.gmra.mxu1 %v6767_v12  ;;  %v5310_v12 = vld [vmem:[#allocation5 + $0x190] sm:$0xf0] }
 0x337   :  { %v6869_v6 = vadd.f32 %v2659_v16, %v2571_v35  ;;  %3181 = vmatpush.bf16.msra.mxu1 %v5585_v20  ;;  %v8404_v35 = vld [vmem:[#allocation19_spill] sm:$0xff] }
 0x338   :  { %v1669_v16 = vmax.f32 %v1557_v24, 0.0 }
 0x33b   :  { %v1469_v61 = vpop.f32.mrf.mxu0  ;;  %v1558_v19 = vpop.f32.mrf.mxu1 }
 0x33c   :  { %v1470_v13 = vadd.f32 %v1469_v61, %v6729_v44  ;;  %v2572_v36 = vpop.f32.mrf.mxu2  ;;  %v2661_v3 = vpop.f32.mrf.mxu3 }
 0x33d   :  { %v2573_v2 = vadd.f32 %v2572_v36, %v6845_v58 }
 0x33e   :  { %v1559_v39 = vadd.f32 %v1558_v19, %v1470_v13 }
 0x33f   :  { %v6873_v38 = vadd.f32 %v2661_v3, %v2573_v2 }
 0x340   :  { %v1673_v21 = vmax.f32 %v1559_v39, 0.0  ;;  %2614 = vmatmul.bf16.gmra.mxu2 %v8404_v35  ;;  %2703 = vmatmul.bf16.gmra.mxu3 %v6668_v9 }
 0x342   :  { %v6877_v1 = vpack.c.bf16 %v1673_v21, %v1669_v16 }
 0x343   :  { %v1472_v45 = vpop.f32.mrf.mxu0  ;;  %v1561_v32 = vpop.f32.mrf.mxu1 }
 0x344   :  { %v1473_v61 = vadd.f32 %v1472_v45, %v6729_v44  ;;  %v2575_v7 = vpop.f32.mrf.mxu2  ;;  %v2664_v8 = vpop.f32.mrf.mxu3 }
 0x345   :  { %v2576_v20 = vadd.f32 %v2575_v7, %v6845_v58 }
 0x346   :  { %v1562_v36 = vadd.f32 %v1561_v32, %v1473_v61  ;;  %2757 = vmatmul.bf16.gmra.mxu0 %v6694_v57  ;;  %2846 = vmatmul.bf16.gmra.mxu1 %v6779_v59  ;;  %v8405_v32 = vld [vmem:[#allocation21_spill] sm:$0xff]  ;;  %v5818_v59 = vld [vmem:[#allocation5 + $0x184] sm:$0xf] }
 0x347   :  { %v6883_v19 = vadd.f32 %v2664_v8, %v2576_v20  ;;  %v5786_v8 = vld [vmem:[#allocation5 + $0x84] sm:$0xf]  ;;  %v5182_v20 = vld [vmem:[#allocation5 + $0x90] sm:$0xf0] }
 0x348   :  { %v1677_v9 = vmax.f32 %v1562_v36, 0.0  ;;  %v5185_v35 = vor.u32 %v5786_v8, %v5182_v20  ;;  %v5882_v20 = vld [vmem:[#allocation5 + $0x384] sm:$0xf] }
 0x34a   :  { %2915 = vmatpush.bf16.msrb.mxu2 %v5185_v35 }
 0x34b   :  { %v1474_v24 = vpop.f32.mrf.mxu0  ;;  %v1563_v13 = vpop.f32.mrf.mxu1 }
 0x34c   :  { %v1475_v3 = vadd.f32 %v1474_v24, %v6729_v44  ;;  %v2577_v2 = vpop.f32.mrf.mxu2  ;;  %v2666_v39 = vpop.f32.mrf.mxu3 }
 0x34d   :  { %v2578_v16 = vadd.f32 %v2577_v2, %v6845_v58 }
 0x34e   :  { %v1564_v21 = vadd.f32 %v1563_v13, %v1475_v3 }
 0x34f   :  { %v6887_v45 = vadd.f32 %v2666_v39, %v2578_v16  ;;  %v5313_v39 = vor.u32 %v5818_v59, %v5310_v12 }
 0x350   :  { %v1681_v7 = vmax.f32 %v1564_v21, 0.0  ;;  %2619 = vmatmul.bf16.gmra.mxu2 %v8405_v32  ;;  %2708 = vmatmul.bf16.gmra.mxu3 %v6680_v31  ;;  %v5850_v21 = vld [vmem:[#allocation5 + $0x284] sm:$0xf]  ;;  %v5566_v31 = vld [vmem:[#allocation5 + $0x390] sm:$0xf0] }
 0x351   :  { %3004 = vmatpush.bf16.msrb.mxu3 %v5313_v39 }
 0x352   :  { %v6891_v61 = vpack.c.bf16 %v1681_v7, %v1677_v9  ;;  %v5438_v7 = vld [vmem:[#allocation5 + $0x290] sm:$0xf0] }
 0x353   :  { %v1477_v57 = vpop.f32.mrf.mxu0  ;;  %v1566_v24 = vpop.f32.mrf.mxu1  ;;  %v5441_v8 = vor.u32 %v5850_v21, %v5438_v7 }
 0x354   :  { %8406 = vst [vmem:[#allocation57_spill] sm:$0xff] %v6891_v61  ;;  %v1478_v2 = vadd.f32 %v1477_v57, %v6729_v44  ;;  %v2580_v13 = vpop.f32.mrf.mxu2  ;;  %v2669_v3 = vpop.f32.mrf.mxu3  ;;  %v5569_v57 = vor.u32 %v5882_v20, %v5566_v31 }
 0x355   :  { %v2581_v36 = vadd.f32 %v2580_v13, %v6845_v58  ;;  %3093 = vmatpush.bf16.msra.mxu0 %v5441_v8 }
 0x356   :  { %v1567_v16 = vadd.f32 %v1566_v24, %v1478_v2  ;;  %2762 = vmatmul.bf16.gmra.mxu0 %v6706_v48  ;;  %2851 = vmatmul.bf16.gmra.mxu1 %v6791_v51 }
 0x357   :  { %v6897_v9 = vadd.f32 %v2669_v3, %v2581_v36  ;;  %3182 = vmatpush.bf16.msra.mxu1 %v5569_v57  ;;  %v8407_v36 = vld [vmem:[#allocation23_spill] sm:$0xff] }
 0x358   :  { %v1685_v3 = vmax.f32 %v1567_v16, 0.0 }
 0x35b   :  { %v1479_v32 = vpop.f32.mrf.mxu0  ;;  %v1568_v46 = vpop.f32.mrf.mxu1 }
 0x35c   :  { %v1480_v12 = vadd.f32 %v1479_v32, %v6729_v44  ;;  %v2582_v59 = vpop.f32.mrf.mxu2  ;;  %v2671_v35 = vpop.f32.mrf.mxu3 }
 0x35d   :  { %v2583_v24 = vadd.f32 %v2582_v59, %v6845_v58 }
 0x35e   :  { %v1569_v2 = vadd.f32 %v1568_v46, %v1480_v12 }
 0x35f   :  { %v6901_v13 = vadd.f32 %v2671_v35, %v2583_v24 }
 0x360   :  { %v1689_v39 = vmax.f32 %v1569_v2, 0.0  ;;  %2624 = vmatmul.bf16.gmra.mxu2 %v8407_v36  ;;  %2713 = vmatmul.bf16.gmra.mxu3 %v6692_v43  ;;  %v5782_v43 = vld [vmem:[#allocation5 + $0x64] sm:$0xf]  ;;  %v8409_v36 = vld [vmem:[#allocation25_spill] sm:$0xff] }
 0x362   :  { %v6905_v31 = vpack.c.bf16 %v1689_v39, %v1685_v3 }
 0x363   :  { %v1482_v21 = vpop.f32.mrf.mxu0  ;;  %v1571_v7 = vpop.f32.mrf.mxu1 }
 0x364   :  { %8408 = vst [vmem:[#allocation58_spill] sm:$0xff] %v6905_v31  ;;  %v1483_v32 = vadd.f32 %v1482_v21, %v6729_v44  ;;  %v2585_v8 = vpop.f32.mrf.mxu2  ;;  %v2674_v20 = vpop.f32.mrf.mxu3 }
 0x365   :  { %v2586_v57 = vadd.f32 %v2585_v8, %v6845_v58  ;;  %v5166_v8 = vld [vmem:[#allocation5 + $0x70] sm:$0xf0] }
 0x366   :  { %v1572_v59 = vadd.f32 %v1571_v7, %v1483_v32  ;;  %2767 = vmatmul.bf16.gmra.mxu0 %v6718_v25  ;;  %2856 = vmatmul.bf16.gmra.mxu1 %v6803_v33  ;;  %v5814_v7 = vld [vmem:[#allocation5 + $0x164] sm:$0xf] }
 0x367   :  { %v6911_v46 = vadd.f32 %v2674_v20, %v2586_v57  ;;  %v5169_v20 = vor.u32 %v5782_v43, %v5166_v8  ;;  %v5294_v57 = vld [vmem:[#allocation5 + $0x170] sm:$0xf0] }
 0x368   :  { %v1693_v32 = vmax.f32 %v1572_v59, 0.0  ;;  %v5297_v33 = vor.u32 %v5814_v7, %v5294_v57  ;;  %v5134_v7 = vld [vmem:[#allocation5 + $0x30] sm:$0xf0] }
 0x369   :  { %2916 = vmatpush.bf16.msrb.mxu2 %v5169_v20  ;;  %v5422_v20 = vld [vmem:[#allocation5 + $0x270] sm:$0xf0] }
 0x36a   :  { %3005 = vmatpush.bf16.msrb.mxu3 %v5297_v33  ;;  %v5774_v33 = vld [vmem:[#allocation5 + $0x24] sm:$0xf] }
 0x36b   :  { %v1484_v16 = vpop.f32.mrf.mxu0  ;;  %v1573_v12 = vpop.f32.mrf.mxu1  ;;  %v5137_v57 = vor.u32 %v5774_v33, %v5134_v7  ;;  %v5246_v7 = vld [vmem:[#allocation5 + $0x110] sm:$0xf0] }
 0x36c   :  { %v1485_v35 = vadd.f32 %v1484_v16, %v6729_v44  ;;  %v2587_v24 = vpop.f32.mrf.mxu2  ;;  %v2676_v2 = vpop.f32.mrf.mxu3 }
 0x36d   :  { %v2588_v3 = vadd.f32 %v2587_v24, %v6845_v58 }
 0x36e   :  { %v1574_v39 = vadd.f32 %v1573_v12, %v1485_v35  ;;  %v5778_v12 = vld [vmem:[#allocation5 + $0x44] sm:$0xf]  ;;  %v5150_v35 = vld [vmem:[#allocation5 + $0x50] sm:$0xf0] }
 0x36f   :  { %v6915_v21 = vadd.f32 %v2676_v2, %v2588_v3  ;;  %v5810_v2 = vld [vmem:[#allocation5 + $0x144] sm:$0xf]  ;;  %v5153_v48 = vor.u32 %v5778_v12, %v5150_v35 }
 0x370   :  { %v1697_v25 = vmax.f32 %v1574_v39, 0.0  ;;  %2629 = vmatmul.bf16.gmra.mxu2 %v8409_v36  ;;  %2718 = vmatmul.bf16.gmra.mxu3 %v6704_v30  ;;  %v5278_v36 = vld [vmem:[#allocation5 + $0x150] sm:$0xf0]  ;;  %v5878_v35 = vld [vmem:[#allocation5 + $0x364] sm:$0xf] }
 0x371   :  { %v5281_v43 = vor.u32 %v5810_v2, %v5278_v36  ;;  %2917 = vmatpush.bf16.msrb.mxu2 %v5153_v48  ;;  %v5553_v36 = vor.u32 %v5878_v35, %v5550_v28  ;;  %v5802_v48 = vld [vmem:[#allocation5 + $0x104] sm:$0xf] }
 0x372   :  { %v6919_v16 = vpack.c.bf16 %v1697_v25, %v1693_v32  ;;  %v5806_v32 = vld [vmem:[#allocation5 + $0x124] sm:$0xf] }
 0x373   :  { %v1487_v51 = vpop.f32.mrf.mxu0  ;;  %v1576_v24 = vpop.f32.mrf.mxu1  ;;  %3006 = vmatpush.bf16.msrb.mxu3 %v5281_v43  ;;  %3183 = vmatpush.bf16.msra.mxu1 %v5553_v36  ;;  %v8411_v35 = vld [vmem:[#allocation27_spill] sm:$0xff] }
 0x374   :  { %8410 = vst [vmem:[#allocation59_spill] sm:$0xff] %v6919_v16  ;;  %v1488_v3 = vadd.f32 %v1487_v51, %v6729_v44  ;;  %v2590_v59 = vpop.f32.mrf.mxu2  ;;  %v2679_v39 = vpop.f32.mrf.mxu3  ;;  %v5846_v51 = vld [vmem:[#allocation5 + $0x264] sm:$0xf] }
 0x375   :  { %v2591_v30 = vadd.f32 %v2590_v59, %v6845_v58  ;;  %v5425_v12 = vor.u32 %v5846_v51, %v5422_v20  ;;  %v5262_v59 = vld [vmem:[#allocation5 + $0x130] sm:$0xf0]  ;;  %2918 = vmatpush.bf16.msrb.mxu2 %v5137_v57  ;;  %v5249_v20 = vor.u32 %v5802_v48, %v5246_v7 }
 0x376   :  { %v1577_v8 = vadd.f32 %v1576_v24, %v1488_v3  ;;  %2772 = vmatmul.bf16.gmra.mxu0 %v6733_v17  ;;  %2861 = vmatmul.bf16.gmra.mxu1 %v6815_v22  ;;  %v5265_v24 = vor.u32 %v5806_v32, %v5262_v59 }
 0x377   :  { %v6925_v25 = vadd.f32 %v2679_v39, %v2591_v30  ;;  %3094 = vmatpush.bf16.msra.mxu0 %v5425_v12  ;;  %v5770_v30 = vld [vmem:[#allocation5 + $0x4] sm:$0xf]  ;;  %v5118_v39 = vld [vmem:[#allocation5 + $0x10] sm:$0xf0] }
 0x378   :  { %3007 = vmatpush.bf16.msrb.mxu3 %v5265_v24  ;;  %v5121_v33 = vor.u32 %v5770_v30, %v5118_v39  ;;  %v1701_v12 = vmax.f32 %v1577_v8, 0.0 }
 0x37a   :  { %2919 = vmatpush.bf16.msrb.mxu2 %v5121_v33 }
 0x37b   :  { %v1489_v2 = vpop.f32.mrf.mxu0  ;;  %v1578_v3 = vpop.f32.mrf.mxu1 }
 0x37c   :  { %v1490_v43 = vadd.f32 %v1489_v2, %v6729_v44  ;;  %v2592_v22 = vpop.f32.mrf.mxu2  ;;  %v2681_v17 = vpop.f32.mrf.mxu3  ;;  %3008 = vmatpush.bf16.msrb.mxu3 %v5249_v20 }
 0x37d   :  { %v2593_v51 = vadd.f32 %v2592_v22, %v6845_v58 }
 0x37e   :  { %v1579_v28 = vadd.f32 %v1578_v3, %v1490_v43 }
 0x37f   :  { %v6929_v32 = vadd.f32 %v2681_v17, %v2593_v51 }
 0x380   :  { %v1705_v57 = vmax.f32 %v1579_v28, 0.0  ;;  %2634 = vmatmul.bf16.gmra.mxu2 %v8411_v35  ;;  %2723 = vmatmul.bf16.gmra.mxu3 %v6716_v0 }
 0x382   :  { %v6933_v59 = vpack.c.bf16 %v1705_v57, %v1701_v12 }
 0x383   :  { %v1492_v36 = vpop.f32.mrf.mxu0  ;;  %v1581_v24 = vpop.f32.mrf.mxu1 }
 0x384   :  { %8412 = vst [vmem:[#allocation27_spill] sm:$0xff] %v6933_v59  ;;  %v1493_v2 = vadd.f32 %v1492_v36, %v6729_v44  ;;  %v2595_v30 = vpop.f32.mrf.mxu2  ;;  %v2684_v22 = vpop.f32.mrf.mxu3  ;;  %v8413_v36 = vld [vmem:[#allocation29_spill] sm:$0xff] }
 0x385   :  { %v2596_v3 = vadd.f32 %v2595_v30, %v6845_v58 }
 0x386   :  { %v1582_v17 = vadd.f32 %v1581_v24, %v1493_v2  ;;  %2777 = vmatmul.bf16.gmra.mxu0 %v6745_v52  ;;  %2866 = vmatmul.bf16.gmra.mxu1 %v6827_v15 }
 0x387   :  { %v6939_v8 = vadd.f32 %v2684_v22, %v2596_v3 }
 0x388   :  { %v1709_v12 = vmax.f32 %v1582_v17, 0.0 }
 0x38b   :  { %v1494_v39 = vpop.f32.mrf.mxu0  ;;  %v1583_v48 = vpop.f32.mrf.mxu1 }
 0x38c   :  { %v1495_v43 = vadd.f32 %v1494_v39, %v6729_v44  ;;  %v2597_v33 = vpop.f32.mrf.mxu2  ;;  %v2686_v7 = vpop.f32.mrf.mxu3 }
 0x38d   :  { %v2598_v51 = vadd.f32 %v2597_v33, %v6845_v58 }
 0x38e   :  { %v1584_v20 = vadd.f32 %v1583_v48, %v1495_v43  ;;  %v5842_v48 = vld [vmem:[#allocation5 + $0x244] sm:$0xf]  ;;  %v5406_v43 = vld [vmem:[#allocation5 + $0x250] sm:$0xf0] }
 0x38f   :  { %v6943_v28 = vadd.f32 %v2686_v7, %v2598_v51  ;;  %v5409_v7 = vor.u32 %v5842_v48, %v5406_v43  ;;  %v5874_v51 = vld [vmem:[#allocation5 + $0x344] sm:$0xf] }
 0x390   :  { %v1713_v57 = vmax.f32 %v1584_v20, 0.0  ;;  %2639 = vmatmul.bf16.gmra.mxu2 %v8413_v36  ;;  %2728 = vmatmul.bf16.gmra.mxu3 %v6731_v18  ;;  %v5534_v20 = vld [vmem:[#allocation5 + $0x350] sm:$0xf0] }
 0x391   :  { %3095 = vmatpush.bf16.msra.mxu0 %v5409_v7 }
 0x392   :  { %v6947_v24 = vpack.c.bf16 %v1713_v57, %v1709_v12  ;;  %v5537_v12 = vor.u32 %v5874_v51, %v5534_v20 }
 0x393   :  { %v2743_v2 = vpop.f32.mrf.mxu0  ;;  %v2832_v30 = vpop.f32.mrf.mxu1 }
 0x394   :  { %8414 = vst [vmem:[#allocation60_spill] sm:$0xff] %v6947_v24  ;;  %v2600_v22 = vpop.f32.mrf.mxu2  ;;  %v2689_v3 = vpop.f32.mrf.mxu3  ;;  %v2744_v44 = vadd.f32 %v2743_v2, %v6855_v41  ;;  %3184 = vmatpush.bf16.msra.mxu1 %v5537_v12 }
 0x395   :  { %v2601_v39 = vadd.f32 %v2600_v22, %v6845_v58 }
 0x396   :  { %v2833_v33 = vadd.f32 %v2832_v30, %v2744_v44  ;;  %2782 = vmatmul.bf16.gmra.mxu0 %v6757_v37  ;;  %2871 = vmatmul.bf16.gmra.mxu1 %v6847_v14 }
 0x397   :  { %v6953_v17 = vadd.f32 %v2689_v3, %v2601_v39 }
 0x398   :  { %v3980_v3 = vmax.f32 %v2833_v33, 0.0 }
 0x39b   :  { %v2745_v57 = vpop.f32.mrf.mxu0  ;;  %v2834_v18 = vpop.f32.mrf.mxu1 }
 0x39c   :  { %v2602_v36 = vpop.f32.mrf.mxu2  ;;  %v2691_v41 = vpop.f32.mrf.mxu3  ;;  %v2746_v2 = vadd.f32 %v2745_v57, %v6859_v10 }
 0x39d   :  { %v2603_v30 = vadd.f32 %v2602_v36, %v6845_v58 }
 0x39e   :  { %v2835_v22 = vadd.f32 %v2834_v18, %v2746_v2 }
 0x39f   :  { %v6957_v44 = vadd.f32 %v2691_v41, %v2603_v30 }
 0x3a0   :  { %v3984_v39 = vmax.f32 %v2835_v22, 0.0  ;;  %2920 = vmatmul.bf16.vlgmr.msrb.gmra.mxu2 %v6431_v40  ;;  %3009 = vmatmul.bf16.vlgmr.msrb.gmra.mxu3 %v6540_v26 }
 0x3a2   :  { %v6961_v48 = vpack.c.bf16 %v3984_v39, %v3980_v3 }
 0x3a3   :  { %v2748_v43 = vpop.f32.mrf.mxu0  ;;  %v2837_v7 = vpop.f32.mrf.mxu1 }
 0x3a4   :  { %8415 = vst [vmem:[#allocation61_spill] sm:$0xff] %v6961_v48  ;;  %v2605_v51 = vpop.f32.mrf.mxu2  ;;  %v2694_v20 = vpop.f32.mrf.mxu3  ;;  %v2749_v10 = vadd.f32 %v2748_v43, %v6869_v6 }
 0x3a5   :  { %v2606_v12 = vadd.f32 %v2605_v51, %v6845_v58 }
 0x3a6   :  { %v2838_v36 = vadd.f32 %v2837_v7, %v2749_v10  ;;  %2787 = vmatmul.bf16.gmra.mxu0 %v6769_v29  ;;  %2876 = vmatmul.bf16.gmra.mxu1 %v6863_v56 }
 0x3a7   :  { %v6967_v18 = vadd.f32 %v2694_v20, %v2606_v12 }
 0x3a8   :  { %v3988_v6 = vmax.f32 %v2838_v36, 0.0 }
 0x3ab   :  { %v2750_v33 = vpop.f32.mrf.mxu0  ;;  %v2839_v57 = vpop.f32.mrf.mxu1 }
 0x3ac   :  { %v2607_v41 = vpop.f32.mrf.mxu2  ;;  %v2696_v2 = vpop.f32.mrf.mxu3  ;;  %v2751_v30 = vadd.f32 %v2750_v33, %v6873_v38 }
 0x3ad   :  { %v2608_v22 = vadd.f32 %v2607_v41, %v6845_v58  ;;  %v5390_v41 = vld [vmem:[#allocation5 + $0x230] sm:$0xf0] }
 0x3ae   :  { %v2840_v3 = vadd.f32 %v2839_v57, %v2751_v30  ;;  %v5838_v57 = vld [vmem:[#allocation5 + $0x224] sm:$0xf] }
 0x3af   :  { %v6971_v39 = vadd.f32 %v2696_v2, %v2608_v22  ;;  %v5393_v2 = vor.u32 %v5838_v57, %v5390_v41  ;;  %v5870_v30 = vld [vmem:[#allocation5 + $0x324] sm:$0xf]  ;;  %v5518_v22 = vld [vmem:[#allocation5 + $0x330] sm:$0xf0] }
 0x3b0   :  { %v3992_v43 = vmax.f32 %v2840_v3, 0.0  ;;  %2925 = vmatmul.bf16.gmra.mxu2 %v6447_v27  ;;  %3014 = vmatmul.bf16.gmra.mxu3 %v6552_v60  ;;  %v5521_v3 = vor.u32 %v5870_v30, %v5518_v22 }
 0x3b1   :  { %3096 = vmatpush.bf16.msra.mxu0 %v5393_v2 }
 0x3b2   :  { %v6975_v7 = vpack.c.bf16 %v3992_v43, %v3988_v6  ;;  %3185 = vmatpush.bf16.msra.mxu1 %v5521_v3 }
 0x3b3   :  { %v2753_v51 = vpop.f32.mrf.mxu0  ;;  %v2842_v20 = vpop.f32.mrf.mxu1 }
 0x3b4   :  { %8416 = vst [vmem:[#allocation62_spill] sm:$0xff] %v6975_v7  ;;  %v2610_v10 = vpop.f32.mrf.mxu2  ;;  %v2699_v12 = vpop.f32.mrf.mxu3  ;;  %v2754_v48 = vadd.f32 %v2753_v51, %v6883_v19 }
 0x3b5   :  { %v2611_v38 = vadd.f32 %v2610_v10, %v6845_v58 }
 0x3b6   :  { %v2843_v33 = vadd.f32 %v2842_v20, %v2754_v48  ;;  %2792 = vmatmul.bf16.gmra.mxu0 %v6781_v11  ;;  %2881 = vmatmul.bf16.gmra.mxu1 %v6877_v1 }
 0x3b7   :  { %v6981_v36 = vadd.f32 %v2699_v12, %v2611_v38 }
 0x3b8   :  { %v3996_v12 = vmax.f32 %v2843_v33, 0.0 }
 0x3bb   :  { %v2755_v6 = vpop.f32.mrf.mxu0  ;;  %v2844_v43 = vpop.f32.mrf.mxu1 }
 0x3bc   :  { %v2612_v7 = vpop.f32.mrf.mxu2  ;;  %v2701_v19 = vpop.f32.mrf.mxu3  ;;  %v2756_v51 = vadd.f32 %v2755_v6, %v6887_v45 }
 0x3bd   :  { %v2613_v48 = vadd.f32 %v2612_v7, %v6845_v58 }
 0x3be   :  { %v2845_v20 = vadd.f32 %v2844_v43, %v2756_v51 }
 0x3bf   :  { %v6985_v10 = vadd.f32 %v2701_v19, %v2613_v48 }
 0x3c0   :  { %v4000_v38 = vmax.f32 %v2845_v20, 0.0  ;;  %2930 = vmatmul.bf16.gmra.mxu2 %v6463_v63  ;;  %3019 = vmatmul.bf16.gmra.mxu3 %v6564_v4 }
 0x3c2   :  { %v6989_v57 = vpack.c.bf16 %v4000_v38, %v3996_v12 }
 0x3c3   :  { %v2758_v41 = vpop.f32.mrf.mxu0  ;;  %v2847_v2 = vpop.f32.mrf.mxu1 }
 0x3c4   :  { %8417 = vst [vmem:[#allocation63_spill] sm:$0xff] %v6989_v57  ;;  %v2615_v30 = vpop.f32.mrf.mxu2  ;;  %v2704_v22 = vpop.f32.mrf.mxu3  ;;  %v2759_v45 = vadd.f32 %v2758_v41, %v6897_v9 }
 0x3c5   :  { %v2616_v3 = vadd.f32 %v2615_v30, %v6845_v58 }
 0x3c6   :  { %v2848_v7 = vadd.f32 %v2847_v2, %v2759_v45  ;;  %2797 = vmatmul.bf16.gmra.mxu0 %v6793_v50  ;;  %2886 = vmatmul.bf16.gmra.mxu1 %v6891_v61 }
 0x3c7   :  { %v6995_v33 = vadd.f32 %v2704_v22, %v2616_v3 }
 0x3c8   :  { %v4004_v9 = vmax.f32 %v2848_v7, 0.0 }
 0x3cb   :  { %v2760_v6 = vpop.f32.mrf.mxu0  ;;  %v2849_v43 = vpop.f32.mrf.mxu1 }
 0x3cc   :  { %v2617_v19 = vpop.f32.mrf.mxu2  ;;  %v2706_v51 = vpop.f32.mrf.mxu3  ;;  %v2761_v48 = vadd.f32 %v2760_v6, %v6901_v13 }
 0x3cd   :  { %v2618_v20 = vadd.f32 %v2617_v19, %v6845_v58  ;;  %v5374_v19 = vld [vmem:[#allocation5 + $0x210] sm:$0xf0] }
 0x3ce   :  { %v2850_v12 = vadd.f32 %v2849_v43, %v2761_v48  ;;  %v5834_v43 = vld [vmem:[#allocation5 + $0x204] sm:$0xf] }
 0x3cf   :  { %v6999_v38 = vadd.f32 %v2706_v51, %v2618_v20  ;;  %v5377_v51 = vor.u32 %v5834_v43, %v5374_v19  ;;  %v5866_v48 = vld [vmem:[#allocation5 + $0x304] sm:$0xf]  ;;  %v5502_v20 = vld [vmem:[#allocation5 + $0x310] sm:$0xf0] }
 0x3d0   :  { %v4008_v41 = vmax.f32 %v2850_v12, 0.0  ;;  %2935 = vmatmul.bf16.gmra.mxu2 %v6479_v62  ;;  %3024 = vmatmul.bf16.gmra.mxu3 %v6576_v5  ;;  %v5505_v12 = vor.u32 %v5866_v48, %v5502_v20 }
 0x3d1   :  { %3097 = vmatpush.bf16.msra.mxu0 %v5377_v51 }
 0x3d2   :  { %v7003_v2 = vpack.c.bf16 %v4008_v41, %v4004_v9  ;;  %3186 = vmatpush.bf16.msra.mxu1 %v5505_v12 }
 0x3d3   :  { %v2763_v30 = vpop.f32.mrf.mxu0  ;;  %v2852_v22 = vpop.f32.mrf.mxu1 }
 0x3d4   :  { %v2620_v45 = vpop.f32.mrf.mxu2  ;;  %v2709_v3 = vpop.f32.mrf.mxu3  ;;  %v2764_v57 = vadd.f32 %v2763_v30, %v6911_v46 }
 0x3d5   :  { %v2621_v13 = vadd.f32 %v2620_v45, %v6845_v58 }
 0x3d6   :  { %v2853_v6 = vadd.f32 %v2852_v22, %v2764_v57  ;;  %2802 = vmatmul.bf16.gmra.mxu0 %v6805_v53  ;;  %2891 = vmatmul.bf16.gmra.mxu1 %v6905_v31 }
 0x3d7   :  { %v7009_v7 = vadd.f32 %v2709_v3, %v2621_v13 }
 0x3d8   :  { %v4012_v3 = vmax.f32 %v2853_v6, 0.0 }
 0x3db   :  { %v2765_v9 = vpop.f32.mrf.mxu0  ;;  %v2854_v41 = vpop.f32.mrf.mxu1 }
 0x3dc   :  { %v2622_v5 = vpop.f32.mrf.mxu2  ;;  %v2711_v46 = vpop.f32.mrf.mxu3  ;;  %v2766_v30 = vadd.f32 %v2765_v9, %v6915_v21 }
 0x3dd   :  { %v2623_v57 = vadd.f32 %v2622_v5, %v6845_v58 }
 0x3de   :  { %v2855_v22 = vadd.f32 %v2854_v41, %v2766_v30 }
 0x3df   :  { %v7013_v45 = vadd.f32 %v2711_v46, %v2623_v57 }
 0x3e0   :  { %v4016_v13 = vmax.f32 %v2855_v22, 0.0  ;;  %2940 = vmatmul.bf16.gmra.mxu2 %v6495_v54  ;;  %3029 = vmatmul.bf16.gmra.mxu3 %v8386_v49 }
 0x3e2   :  { %v7017_v43 = vpack.c.bf16 %v4016_v13, %v4012_v3 }
 0x3e3   :  { %v2768_v19 = vpop.f32.mrf.mxu0  ;;  %v2857_v51 = vpop.f32.mrf.mxu1 }
 0x3e4   :  { %v2625_v48 = vpop.f32.mrf.mxu2  ;;  %v2714_v20 = vpop.f32.mrf.mxu3  ;;  %v2769_v21 = vadd.f32 %v2768_v19, %v6925_v25 }
 0x3e5   :  { %v2626_v12 = vadd.f32 %v2625_v48, %v6845_v58  ;;  %v8419_v48 = vld [vmem:[#allocation22_spill] sm:$0xff] }
 0x3e6   :  { %v2858_v5 = vadd.f32 %v2857_v51, %v2769_v21  ;;  %2807 = vmatmul.bf16.gmra.mxu0 %v6817_v55  ;;  %2896 = vmatmul.bf16.gmra.mxu1 %v6919_v16  ;;  %v8418_v51 = vld [vmem:[#allocation13_spill] sm:$0xff]  ;;  %v5236_v21 = vld [vmem:[#allocation5 + $0xe8] sm:$0xf] }
 0x3e7   :  { %v7023_v6 = vadd.f32 %v2714_v20, %v2626_v12  ;;  %v5801_v20 = vld [vmem:[#allocation5 + $0xf4] sm:$0xf0]  ;;  %v5364_v12 = vld [vmem:[#allocation5 + $0x1e8] sm:$0xf] }
 0x3e8   :  { %v4020_v25 = vmax.f32 %v2858_v5, 0.0  ;;  %v5237_v54 = vor.u32 %v5801_v20, %v5236_v21  ;;  %v5620_v21 = vld [vmem:[#allocation5 + $0x3e8] sm:$0xf]  ;;  %v5897_v20 = vld [vmem:[#allocation5 + $0x3f4] sm:$0xf0] }
 0x3ea   :  { %3268 = vmatpush.bf16.msra.mxu2 %v5237_v54 }
 0x3eb   :  { %v2770_v9 = vpop.f32.mrf.mxu0  ;;  %v2859_v41 = vpop.f32.mrf.mxu1 }
 0x3ec   :  { %v2627_v46 = vpop.f32.mrf.mxu2  ;;  %v2716_v30 = vpop.f32.mrf.mxu3  ;;  %v2771_v57 = vadd.f32 %v2770_v9, %v6929_v32  ;;  %v5833_v32 = vld [vmem:[#allocation5 + $0x1f4] sm:$0xf0] }
 0x3ed   :  { %v2628_v22 = vadd.f32 %v2627_v46, %v6845_v58 }
 0x3ee   :  { %v2860_v3 = vadd.f32 %v2859_v41, %v2771_v57 }
 0x3ef   :  { %v7027_v13 = vadd.f32 %v2716_v30, %v2628_v22  ;;  %v5365_v30 = vor.u32 %v5833_v32, %v5364_v12 }
 0x3f0   :  { %v4024_v19 = vmax.f32 %v2860_v3, 0.0  ;;  %2945 = vmatmul.bf16.gmra.mxu2 %v8418_v51  ;;  %3034 = vmatmul.bf16.gmra.mxu3 %v8419_v48  ;;  %v5492_v3 = vld [vmem:[#allocation5 + $0x2e8] sm:$0xf]  ;;  %v5621_v48 = vor.u32 %v5897_v20, %v5620_v21 }
 0x3f1   :  { %3357 = vmatpush.bf16.msra.mxu3 %v5365_v30  ;;  %v8420_v30 = vld [vmem:[#allocation24_spill] sm:$0xff] }
 0x3f2   :  { %v7031_v16 = vpack.c.bf16 %v4024_v19, %v4020_v25  ;;  %v5865_v25 = vld [vmem:[#allocation5 + $0x2f4] sm:$0xf0]  ;;  %3535 = vmatpush.bf16.msrb.mxu1 %v5621_v48 }
 0x3f3   :  { %v2773_v55 = vpop.f32.mrf.mxu0  ;;  %v2862_v49 = vpop.f32.mrf.mxu1  ;;  %v5493_v19 = vor.u32 %v5865_v25, %v5492_v3 }
 0x3f4   :  { %v2630_v9 = vpop.f32.mrf.mxu2  ;;  %v2719_v46 = vpop.f32.mrf.mxu3  ;;  %v2774_v41 = vadd.f32 %v2773_v55, %v6939_v8 }
 0x3f5   :  { %v2631_v5 = vadd.f32 %v2630_v9, %v6845_v58  ;;  %3446 = vmatpush.bf16.msrb.mxu0 %v5493_v19 }
 0x3f6   :  { %v2863_v57 = vadd.f32 %v2862_v49, %v2774_v41  ;;  %2812 = vmatmul.bf16.gmra.mxu0 %v6829_v23  ;;  %2901 = vmatmul.bf16.gmra.mxu1 %v6933_v59 }
 0x3f7   :  { %v7037_v22 = vadd.f32 %v2719_v46, %v2631_v5 }
 0x3f8   :  { %v4028_v46 = vmax.f32 %v2863_v57, 0.0 }
 0x3fb   :  { %v2775_v51 = vpop.f32.mrf.mxu0  ;;  %v2864_v55 = vpop.f32.mrf.mxu1 }
 0x3fc   :  { %v2632_v8 = vpop.f32.mrf.mxu2  ;;  %v2721_v12 = vpop.f32.mrf.mxu3  ;;  %v2776_v54 = vadd.f32 %v2775_v51, %v6943_v28 }
 0x3fd   :  { %v2633_v49 = vadd.f32 %v2632_v8, %v6845_v58 }
 0x3fe   :  { %v2865_v32 = vadd.f32 %v2864_v55, %v2776_v54 }
 0x3ff   :  { %v7041_v9 = vadd.f32 %v2721_v12, %v2633_v49 }
 0x400   :  { %v4032_v41 = vmax.f32 %v2865_v32, 0.0  ;;  %2950 = vmatmul.bf16.gmra.mxu2 %v8392_v42  ;;  %3039 = vmatmul.bf16.gmra.mxu3 %v8420_v30 }
 0x402   :  { %v7045_v5 = vpack.c.bf16 %v4032_v41, %v4028_v46 }
 0x403   :  { %v2778_v3 = vpop.f32.mrf.mxu0  ;;  %v2867_v25 = vpop.f32.mrf.mxu1 }
 0x404   :  { %v2635_v19 = vpop.f32.mrf.mxu2  ;;  %v2724_v21 = vpop.f32.mrf.mxu3  ;;  %v2779_v28 = vadd.f32 %v2778_v3, %v6953_v17  ;;  %v8421_v3 = vld [vmem:[#allocation15_spill] sm:$0xff] }
 0x405   :  { %v2636_v51 = vadd.f32 %v2635_v19, %v6845_v58  ;;  %v5220_v19 = vld [vmem:[#allocation5 + $0xc8] sm:$0xf] }
 0x406   :  { %v2868_v48 = vadd.f32 %v2867_v25, %v2779_v28  ;;  %2817 = vmatmul.bf16.gmra.mxu0 %v6849_v47  ;;  %2906 = vmatmul.bf16.gmra.mxu1 %v6947_v24  ;;  %v8422_v25 = vld [vmem:[#allocation26_spill] sm:$0xff] }
 0x407   :  { %v7051_v57 = vadd.f32 %v2724_v21, %v2636_v51  ;;  %v5797_v21 = vld [vmem:[#allocation5 + $0xd4] sm:$0xf0]  ;;  %v5348_v51 = vld [vmem:[#allocation5 + $0x1c8] sm:$0xf] }
 0x408   :  { %v4036_v17 = vmax.f32 %v2868_v48, 0.0  ;;  %v5221_v28 = vor.u32 %v5797_v21, %v5220_v19  ;;  %v5829_v24 = vld [vmem:[#allocation5 + $0x1d4] sm:$0xf0]  ;;  %v5604_v19 = vld [vmem:[#allocation5 + $0x3c8] sm:$0xf] }
 0x409   :  { %v5349_v30 = vor.u32 %v5829_v24, %v5348_v51  ;;  %v5893_v21 = vld [vmem:[#allocation5 + $0x3d4] sm:$0xf0] }
 0x40a   :  { %3269 = vmatpush.bf16.msra.mxu2 %v5221_v28  ;;  %v5605_v28 = vor.u32 %v5893_v21, %v5604_v19 }
 0x40b   :  { %v2780_v20 = vpop.f32.mrf.mxu0  ;;  %v2869_v55 = vpop.f32.mrf.mxu1  ;;  %3358 = vmatpush.bf16.msra.mxu3 %v5349_v30 }
 0x40c   :  { %v2637_v8 = vpop.f32.mrf.mxu2  ;;  %v2726_v12 = vpop.f32.mrf.mxu3  ;;  %v2781_v54 = vadd.f32 %v2780_v20, %v6957_v44  ;;  %3536 = vmatpush.bf16.msrb.mxu1 %v5605_v28 }
 0x40d   :  { %v2638_v49 = vadd.f32 %v2637_v8, %v6845_v58 }
 0x40e   :  { %v2870_v32 = vadd.f32 %v2869_v55, %v2781_v54 }
 0x40f   :  { %v7055_v46 = vadd.f32 %v2726_v12, %v2638_v49  ;;  %v8423_v49 = vld [vmem:[#allocation43_spill] sm:$0xff] }
 0x410   :  { %v4040_v41 = vmax.f32 %v2870_v32, 0.0  ;;  %2955 = vmatmul.bf16.gmra.mxu2 %v8421_v3  ;;  %3044 = vmatmul.bf16.gmra.mxu3 %v8422_v25 }
 0x412   :  { %v7059_v47 = vpack.c.bf16 %v4040_v41, %v4036_v17  ;;  %v5476_v17 = vld [vmem:[#allocation5 + $0x2c8] sm:$0xf]  ;;  %v5861_v41 = vld [vmem:[#allocation5 + $0x2d4] sm:$0xf0] }
 0x413   :  { %v2783_v44 = vpop.f32.mrf.mxu0  ;;  %v2872_v20 = vpop.f32.mrf.mxu1  ;;  %v5477_v24 = vor.u32 %v5861_v41, %v5476_v17  ;;  %v8425_v17 = vld [vmem:[#allocation28_spill] sm:$0xff]  ;;  %v8426_v41 = vld [vmem:[#allocation54_spill] sm:$0xff] }
 0x414   :  { %v2640_v55 = vpop.f32.mrf.mxu2  ;;  %v2729_v8 = vpop.f32.mrf.mxu3  ;;  %v2784_v48 = vadd.f32 %v2783_v44, %v6967_v18  ;;  %v7074_v19 = vperm.slane %v8426_v41, 1 }
 0x415   :  { %v2641_v12 = vadd.f32 %v2640_v55, %v6845_v58  ;;  %3447 = vmatpush.bf16.msrb.mxu0 %v5477_v24 }
 0x416   :  { %v2873_v54 = vadd.f32 %v2872_v20, %v2784_v48  ;;  %3098 = vmatmul.bf16.vlgmr.msra.gmra.mxu0 %v6658_v34  ;;  %3187 = vmatmul.bf16.vlgmr.msra.gmra.mxu1 %v8423_v49  ;;  %v8424_v49 = vld [vmem:[#allocation16_spill] sm:$0xff] }
 0x417   :  { %v7065_v32 = vadd.f32 %v2729_v8, %v2641_v12 }
 0x418   :  { %v4044_v8 = vmax.f32 %v2873_v54, 0.0  ;;  %v8428_v54 = vld [vmem:[#allocation33_spill] sm:$0xff] }
 0x41b   :  { %v2785_v51 = vpop.f32.mrf.mxu0  ;;  %v2874_v25 = vpop.f32.mrf.mxu1 }
 0x41c   :  { %v2642_v18 = vpop.f32.mrf.mxu2  ;;  %v2731_v30 = vpop.f32.mrf.mxu3  ;;  %v2786_v44 = vadd.f32 %v2785_v51, %v6971_v39 }
 0x41d   :  { %v2643_v20 = vadd.f32 %v2642_v18, %v6845_v58  ;;  %v8429_v18 = vld [vmem:[#allocation44_spill] sm:$0xff] }
 0x41e   :  { %v2875_v55 = vadd.f32 %v2874_v25, %v2786_v44 }
 0x41f   :  { %v7069_v48 = vadd.f32 %v2731_v30, %v2643_v20 }
 0x420   :  { %v4048_v12 = vmax.f32 %v2875_v55, 0.0  ;;  %2960 = vmatmul.bf16.gmra.mxu2 %v8424_v49  ;;  %3049 = vmatmul.bf16.gmra.mxu3 %v8425_v17  ;;  %v5825_v17 = vld [vmem:[#allocation5 + $0x1b4] sm:$0xf0] }
 0x422   :  { %v7076_v24 = vpack.c.bf16 %v4048_v12, %v4044_v8 }
 0x423   :  { %v2788_v21 = vpop.f32.mrf.mxu0  ;;  %v2877_v34 = vpop.f32.mrf.mxu1 }
 0x424   :  { %8427 = vst [vmem:[#allocation54_spill] sm:$0xff] %v7076_v24  ;;  %v2789_v39 = vadd.f32 %v2788_v21, %v6981_v36  ;;  %v2921_v28 = vpop.f32.mrf.mxu2  ;;  %v3010_v58 = vpop.f32.mrf.mxu3 }
 0x425   :  { %v2922_v25 = vadd.f32 %v2921_v28, %v7074_v19 }
 0x426   :  { %v2878_v51 = vadd.f32 %v2877_v34, %v2789_v39  ;;  %3103 = vmatmul.bf16.gmra.mxu0 %v8428_v54  ;;  %3192 = vmatmul.bf16.gmra.mxu1 %v8429_v18  ;;  %v8430_v34 = vld [vmem:[#allocation17_spill] sm:$0xff]  ;;  %v8431_v39 = vld [vmem:[#allocation30_spill] sm:$0xff]  ;;  %v5204_v18 = vld [vmem:[#allocation5 + $0xa8] sm:$0xf] }
 0x427   :  { %v7082_v30 = vadd.f32 %v3010_v58, %v2922_v25  ;;  %v5793_v58 = vld [vmem:[#allocation5 + $0xb4] sm:$0xf0]  ;;  %v5332_v54 = vld [vmem:[#allocation5 + $0x1a8] sm:$0xf] }
 0x428   :  { %v4052_v24 = vmax.f32 %v2878_v51, 0.0  ;;  %v5205_v25 = vor.u32 %v5793_v58, %v5204_v18  ;;  %v5333_v49 = vor.u32 %v5825_v17, %v5332_v54  ;;  %v5460_v17 = vld [vmem:[#allocation5 + $0x2a8] sm:$0xf]  ;;  %v5889_v58 = vld [vmem:[#allocation5 + $0x3b4] sm:$0xf0] }
 0x42a   :  { %3270 = vmatpush.bf16.msra.mxu2 %v5205_v25  ;;  %3359 = vmatpush.bf16.msra.mxu3 %v5333_v49 }
 0x42b   :  { %v2790_v44 = vpop.f32.mrf.mxu0  ;;  %v2879_v20 = vpop.f32.mrf.mxu1 }
 0x42c   :  { %v2791_v55 = vadd.f32 %v2790_v44, %v6985_v10  ;;  %v2923_v8 = vpop.f32.mrf.mxu2  ;;  %v3012_v12 = vpop.f32.mrf.mxu3 }
 0x42d   :  { %v2924_v41 = vadd.f32 %v2923_v8, %v7074_v19 }
 0x42e   :  { %v2880_v36 = vadd.f32 %v2879_v20, %v2791_v55 }
 0x42f   :  { %v7086_v21 = vadd.f32 %v3012_v12, %v2924_v41  ;;  %v8433_v41 = vld [vmem:[#allocation35_spill] sm:$0xff] }
 0x430   :  { %v4056_v28 = vmax.f32 %v2880_v36, 0.0  ;;  %2965 = vmatmul.bf16.gmra.mxu2 %v8430_v34  ;;  %3054 = vmatmul.bf16.gmra.mxu3 %v8431_v39  ;;  %v8434_v36 = vld [vmem:[#allocation46_spill] sm:$0xff] }
 0x432   :  { %v7090_v10 = vpack.c.bf16 %v4056_v28, %v4052_v24  ;;  %v5857_v24 = vld [vmem:[#allocation5 + $0x2b4] sm:$0xf0]  ;;  %v5588_v28 = vld [vmem:[#allocation5 + $0x3a8] sm:$0xf] }
 0x433   :  { %v2793_v44 = vpop.f32.mrf.mxu0  ;;  %v2882_v3 = vpop.f32.mrf.mxu1  ;;  %v5461_v54 = vor.u32 %v5857_v24, %v5460_v17  ;;  %v5589_v25 = vor.u32 %v5889_v58, %v5588_v28  ;;  %v8436_v17 = vld [vmem:[#allocation32_spill] sm:$0xff] }
 0x434   :  { %8432 = vst [vmem:[#allocation64_spill] sm:$0xff] %v7090_v10  ;;  %v2794_v20 = vadd.f32 %v2793_v44, %v6995_v33  ;;  %v2926_v55 = vpop.f32.mrf.mxu2  ;;  %v3015_v51 = vpop.f32.mrf.mxu3 }
 0x435   :  { %v2927_v8 = vadd.f32 %v2926_v55, %v7074_v19  ;;  %3448 = vmatpush.bf16.msrb.mxu0 %v5461_v54  ;;  %3537 = vmatpush.bf16.msrb.mxu1 %v5589_v25 }
 0x436   :  { %v2883_v12 = vadd.f32 %v2882_v3, %v2794_v20  ;;  %3108 = vmatmul.bf16.gmra.mxu0 %v8433_v41  ;;  %3197 = vmatmul.bf16.gmra.mxu1 %v8434_v36  ;;  %v8435_v41 = vld [vmem:[#allocation19_spill] sm:$0xff] }
 0x437   :  { %v7096_v18 = vadd.f32 %v3015_v51, %v2927_v8 }
 0x438   :  { %v4060_v51 = vmax.f32 %v2883_v12, 0.0 }
 0x43b   :  { %v2795_v10 = vpop.f32.mrf.mxu0  ;;  %v2884_v33 = vpop.f32.mrf.mxu1 }
 0x43c   :  { %v2796_v49 = vadd.f32 %v2795_v10, %v6999_v38  ;;  %v2928_v44 = vpop.f32.mrf.mxu2  ;;  %v3017_v55 = vpop.f32.mrf.mxu3 }
 0x43d   :  { %v2929_v3 = vadd.f32 %v2928_v44, %v7074_v19 }
 0x43e   :  { %v2885_v20 = vadd.f32 %v2884_v33, %v2796_v49  ;;  %v8438_v33 = vld [vmem:[#allocation37_spill] sm:$0xff]  ;;  %v8439_v49 = vld [vmem:[#allocation47_spill] sm:$0xff] }
 0x43f   :  { %v7100_v36 = vadd.f32 %v3017_v55, %v2929_v3 }
 0x440   :  { %v4064_v8 = vmax.f32 %v2885_v20, 0.0  ;;  %2970 = vmatmul.bf16.gmra.mxu2 %v8435_v41  ;;  %3059 = vmatmul.bf16.gmra.mxu3 %v8436_v17  ;;  %v5821_v41 = vld [vmem:[#allocation5 + $0x194] sm:$0xf0] }
 0x442   :  { %v7104_v24 = vpack.c.bf16 %v4064_v8, %v4060_v51 }
 0x443   :  { %v2798_v28 = vpop.f32.mrf.mxu0  ;;  %v2887_v54 = vpop.f32.mrf.mxu1 }
 0x444   :  { %8437 = vst [vmem:[#allocation65_spill] sm:$0xff] %v7104_v24  ;;  %v2799_v38 = vadd.f32 %v2798_v28, %v7009_v7  ;;  %v2931_v10 = vpop.f32.mrf.mxu2  ;;  %v3020_v58 = vpop.f32.mrf.mxu3 }
 0x445   :  { %v2932_v25 = vadd.f32 %v2931_v10, %v7074_v19 }
 0x446   :  { %v2888_v44 = vadd.f32 %v2887_v54, %v2799_v38  ;;  %3113 = vmatmul.bf16.gmra.mxu0 %v8438_v33  ;;  %3202 = vmatmul.bf16.gmra.mxu1 %v8439_v49  ;;  %v8440_v54 = vld [vmem:[#allocation21_spill] sm:$0xff]  ;;  %v8441_v38 = vld [vmem:[#allocation34_spill] sm:$0xff]  ;;  %v5188_v49 = vld [vmem:[#allocation5 + $0x88] sm:$0xf] }
 0x447   :  { %v7110_v12 = vadd.f32 %v3020_v58, %v2932_v25  ;;  %v5789_v58 = vld [vmem:[#allocation5 + $0x94] sm:$0xf0]  ;;  %v5316_v33 = vld [vmem:[#allocation5 + $0x188] sm:$0xf] }
 0x448   :  { %v4068_v17 = vmax.f32 %v2888_v44, 0.0  ;;  %v5189_v25 = vor.u32 %v5789_v58, %v5188_v49  ;;  %v5317_v39 = vor.u32 %v5821_v41, %v5316_v33  ;;  %v8443_v49 = vld [vmem:[#allocation39_spill] sm:$0xff]  ;;  %v8444_v58 = vld [vmem:[#allocation48_spill] sm:$0xff]  ;;  %v5853_v33 = vld [vmem:[#allocation5 + $0x294] sm:$0xf0] }
 0x44a   :  { %3271 = vmatpush.bf16.msra.mxu2 %v5189_v25  ;;  %3360 = vmatpush.bf16.msra.mxu3 %v5317_v39  ;;  %v5885_v25 = vld [vmem:[#allocation5 + $0x394] sm:$0xf0] }
 0x44b   :  { %v2800_v55 = vpop.f32.mrf.mxu0  ;;  %v2889_v3 = vpop.f32.mrf.mxu1 }
 0x44c   :  { %v2801_v20 = vadd.f32 %v2800_v55, %v7013_v45  ;;  %v2933_v51 = vpop.f32.mrf.mxu2  ;;  %v3022_v8 = vpop.f32.mrf.mxu3 }
 0x44d   :  { %v2934_v24 = vadd.f32 %v2933_v51, %v7074_v19  ;;  %v5785_v51 = vld [vmem:[#allocation5 + $0x74] sm:$0xf0] }
 0x44e   :  { %v2890_v7 = vadd.f32 %v2889_v3, %v2801_v20  ;;  %v5172_v20 = vld [vmem:[#allocation5 + $0x68] sm:$0xf] }
 0x44f   :  { %v7114_v28 = vadd.f32 %v3022_v8, %v2934_v24 }
 0x450   :  { %v4072_v10 = vmax.f32 %v2890_v7, 0.0  ;;  %2975 = vmatmul.bf16.gmra.mxu2 %v8440_v54  ;;  %3064 = vmatmul.bf16.gmra.mxu3 %v8441_v38  ;;  %v5173_v7 = vor.u32 %v5785_v51, %v5172_v20  ;;  %v5777_v51 = vld [vmem:[#allocation5 + $0x34] sm:$0xf0] }
 0x452   :  { %v7118_v45 = vpack.c.bf16 %v4072_v10, %v4068_v17  ;;  %3272 = vmatpush.bf16.msra.mxu2 %v5173_v7  ;;  %v5444_v17 = vld [vmem:[#allocation5 + $0x288] sm:$0xf] }
 0x453   :  { %v2803_v55 = vpop.f32.mrf.mxu0  ;;  %v2892_v34 = vpop.f32.mrf.mxu1  ;;  %v5445_v10 = vor.u32 %v5853_v33, %v5444_v17 }
 0x454   :  { %8442 = vst [vmem:[#allocation66_spill] sm:$0xff] %v7118_v45  ;;  %v2804_v24 = vadd.f32 %v2803_v55, %v7023_v6  ;;  %v2936_v3 = vpop.f32.mrf.mxu2  ;;  %v3025_v44 = vpop.f32.mrf.mxu3  ;;  %v5572_v6 = vld [vmem:[#allocation5 + $0x388] sm:$0xf]  ;;  %v5781_v45 = vld [vmem:[#allocation5 + $0x54] sm:$0xf0] }
 0x455   :  { %v2937_v8 = vadd.f32 %v2936_v3, %v7074_v19  ;;  %v5156_v55 = vld [vmem:[#allocation5 + $0x48] sm:$0xf]  ;;  %v5573_v39 = vor.u32 %v5885_v25, %v5572_v6  ;;  %3449 = vmatpush.bf16.msrb.mxu0 %v5445_v10 }
 0x456   :  { %v2893_v38 = vadd.f32 %v2892_v34, %v2804_v24  ;;  %3118 = vmatmul.bf16.gmra.mxu0 %v8443_v49  ;;  %3207 = vmatmul.bf16.gmra.mxu1 %v8444_v58  ;;  %v5157_v3 = vor.u32 %v5781_v45, %v5156_v55  ;;  %v8445_v58 = vld [vmem:[#allocation23_spill] sm:$0xff]  ;;  %v8446_v10 = vld [vmem:[#allocation36_spill] sm:$0xff] }
 0x457   :  { %v7124_v41 = vadd.f32 %v3025_v44, %v2937_v8  ;;  %3538 = vmatpush.bf16.msrb.mxu1 %v5573_v39  ;;  %v5140_v44 = vld [vmem:[#allocation5 + $0x28] sm:$0xf]  ;;  %v5799_v55 = vld [vmem:[#allocation5 + $0xec] sm:$0xf]  ;;  %v5238_v39 = vld [vmem:[#allocation5 + $0xf8] sm:$0xf0] }
 0x458   :  { %3273 = vmatpush.bf16.msra.mxu2 %v5157_v3  ;;  %v5141_v7 = vor.u32 %v5777_v51, %v5140_v44  ;;  %v4076_v6 = vmax.f32 %v2893_v38, 0.0  ;;  %v5124_v45 = vld [vmem:[#allocation5 + $0x8] sm:$0xf]  ;;  %v5241_v44 = vor.u32 %v5799_v55, %v5238_v39  ;;  %v5795_v51 = vld [vmem:[#allocation5 + $0xcc] sm:$0xf] }
 0x45b   :  { %v2805_v54 = vpop.f32.mrf.mxu0  ;;  %v2894_v42 = vpop.f32.mrf.mxu1 }
 0x45c   :  { %v2806_v34 = vadd.f32 %v2805_v54, %v7027_v13  ;;  %v2938_v24 = vpop.f32.mrf.mxu2  ;;  %v3027_v20 = vpop.f32.mrf.mxu3  ;;  %v5773_v13 = vld [vmem:[#allocation5 + $0x14] sm:$0xf0]  ;;  %3274 = vmatpush.bf16.msra.mxu2 %v5141_v7 }
 0x45d   :  { %v2939_v8 = vadd.f32 %v2938_v24, %v7074_v19  ;;  %v5125_v54 = vor.u32 %v5773_v13, %v5124_v45  ;;  %v8449_v7 = vld [vmem:[#allocation49_spill] sm:$0xff]  ;;  %v5206_v13 = vld [vmem:[#allocation5 + $0xb8] sm:$0xf0] }
 0x45e   :  { %v2895_v17 = vadd.f32 %v2894_v42, %v2806_v34 }
 0x45f   :  { %v7128_v33 = vadd.f32 %v3027_v20, %v2939_v8  ;;  %v5222_v8 = vld [vmem:[#allocation5 + $0xd8] sm:$0xf0] }
 0x460   :  { %v4080_v25 = vmax.f32 %v2895_v17, 0.0  ;;  %2980 = vmatmul.bf16.gmra.mxu2 %v8445_v58  ;;  %3069 = vmatmul.bf16.gmra.mxu3 %v8446_v10  ;;  %v8448_v10 = vld [vmem:[#allocation40_spill] sm:$0xff]  ;;  %v8450_v58 = vld [vmem:[#allocation25_spill] sm:$0xff] }
 0x461   :  { %3275 = vmatpush.bf16.msra.mxu2 %v5125_v54 }
 0x462   :  { %v7132_v49 = vpack.c.bf16 %v4080_v25, %v4076_v6  ;;  %v5225_v6 = vor.u32 %v5795_v51, %v5222_v8  ;;  %v5791_v25 = vld [vmem:[#allocation5 + $0xac] sm:$0xf] }
 0x463   :  { %v2808_v24 = vpop.f32.mrf.mxu0  ;;  %v2897_v3 = vpop.f32.mrf.mxu1  ;;  %v5209_v39 = vor.u32 %v5791_v25, %v5206_v13  ;;  %v5783_v25 = vld [vmem:[#allocation5 + $0x6c] sm:$0xf]  ;;  %v5174_v13 = vld [vmem:[#allocation5 + $0x78] sm:$0xf0] }
 0x464   :  { %8447 = vst [vmem:[#allocation67_spill] sm:$0xff] %v7132_v49  ;;  %v2809_v42 = vadd.f32 %v2808_v24, %v7037_v22  ;;  %v2941_v34 = vpop.f32.mrf.mxu2  ;;  %v3030_v38 = vpop.f32.mrf.mxu3  ;;  %v5190_v49 = vld [vmem:[#allocation5 + $0x98] sm:$0xf0] }
 0x465   :  { %v2942_v20 = vadd.f32 %v2941_v34, %v7074_v19  ;;  %3624 = vmatpush.bf16.msrb.mxu2 %v5241_v44  ;;  %v5300_v44 = vld [vmem:[#allocation5 + $0x168] sm:$0xf] }
 0x466   :  { %v2898_v17 = vadd.f32 %v2897_v3, %v2809_v42  ;;  %3123 = vmatmul.bf16.gmra.mxu0 %v8448_v10  ;;  %3212 = vmatmul.bf16.gmra.mxu1 %v8449_v7  ;;  %v5787_v42 = vld [vmem:[#allocation5 + $0x8c] sm:$0xf] }
 0x467   :  { %v7138_v45 = vadd.f32 %v3030_v38, %v2942_v20  ;;  %v5817_v38 = vld [vmem:[#allocation5 + $0x174] sm:$0xf0]  ;;  %v5193_v20 = vor.u32 %v5787_v42, %v5190_v49 }
 0x468   :  { %v4084_v51 = vmax.f32 %v2898_v17, 0.0 }
 0x469   :  { %3625 = vmatpush.bf16.msrb.mxu2 %v5225_v6  ;;  %v8451_v6 = vld [vmem:[#allocation38_spill] sm:$0xff] }
 0x46b   :  { %v2810_v55 = vpop.f32.mrf.mxu0  ;;  %v2899_v22 = vpop.f32.mrf.mxu1 }
 0x46c   :  { %v2811_v24 = vadd.f32 %v2810_v55, %v7041_v9  ;;  %v2943_v54 = vpop.f32.mrf.mxu2  ;;  %v3032_v34 = vpop.f32.mrf.mxu3  ;;  %v5301_v9 = vor.u32 %v5817_v38, %v5300_v44  ;;  %v5158_v44 = vld [vmem:[#allocation5 + $0x58] sm:$0xf0] }
 0x46d   :  { %v2944_v3 = vadd.f32 %v2943_v54, %v7074_v19  ;;  %3626 = vmatpush.bf16.msrb.mxu2 %v5209_v39  ;;  %v5284_v39 = vld [vmem:[#allocation5 + $0x148] sm:$0xf] }
 0x46e   :  { %v2900_v10 = vadd.f32 %v2899_v22, %v2811_v24  ;;  %3361 = vmatpush.bf16.msra.mxu3 %v5301_v9  ;;  %v5177_v24 = vor.u32 %v5783_v25, %v5174_v13  ;;  %v5268_v9 = vld [vmem:[#allocation5 + $0x128] sm:$0xf]  ;;  %v5809_v25 = vld [vmem:[#allocation5 + $0x134] sm:$0xf0] }
 0x46f   :  { %v7142_v7 = vadd.f32 %v3032_v34, %v2944_v3  ;;  %v5813_v34 = vld [vmem:[#allocation5 + $0x154] sm:$0xf0] }
 0x470   :  { %v4088_v8 = vmax.f32 %v2900_v10, 0.0  ;;  %2985 = vmatmul.bf16.gmra.mxu2 %v8450_v58  ;;  %3074 = vmatmul.bf16.gmra.mxu3 %v8451_v6  ;;  %v5285_v3 = vor.u32 %v5813_v34, %v5284_v39  ;;  %v5779_v6 = vld [vmem:[#allocation5 + $0x4c] sm:$0xf]  ;;  %v8453_v58 = vld [vmem:[#allocation42_spill] sm:$0xff]  ;;  %v5556_v34 = vld [vmem:[#allocation5 + $0x368] sm:$0xf] }
 0x471   :  { %3627 = vmatpush.bf16.msrb.mxu2 %v5193_v20  ;;  %v5161_v20 = vor.u32 %v5779_v6, %v5158_v44  ;;  %v5849_v13 = vld [vmem:[#allocation5 + $0x274] sm:$0xf0] }
 0x472   :  { %v7146_v55 = vpack.c.bf16 %v4088_v8, %v4084_v51  ;;  %v8454_v51 = vld [vmem:[#allocation51_spill] sm:$0xff]  ;;  %3362 = vmatpush.bf16.msra.mxu3 %v5285_v3 }
 0x473   :  { %v2813_v54 = vpop.f32.mrf.mxu0  ;;  %v2902_v22 = vpop.f32.mrf.mxu1 }
 0x474   :  { %8452 = vst [vmem:[#allocation68_spill] sm:$0xff] %v7146_v55  ;;  %v2814_v49 = vadd.f32 %v2813_v54, %v7051_v57  ;;  %v2946_v17 = vpop.f32.mrf.mxu2  ;;  %v3035_v10 = vpop.f32.mrf.mxu3  ;;  %v5428_v57 = vld [vmem:[#allocation5 + $0x268] sm:$0xf]  ;;  %v5269_v54 = vor.u32 %v5809_v25, %v5268_v9  ;;  %v5775_v55 = vld [vmem:[#allocation5 + $0x2c] sm:$0xf] }
 0x475   :  { %v2947_v42 = vadd.f32 %v2946_v17, %v7074_v19  ;;  %3628 = vmatpush.bf16.msrb.mxu2 %v5177_v24  ;;  %v5429_v39 = vor.u32 %v5849_v13, %v5428_v57  ;;  %v5881_v17 = vld [vmem:[#allocation5 + $0x374] sm:$0xf0]  ;;  %v5771_v57 = vld [vmem:[#allocation5 + $0xc] sm:$0xf]  ;;  %v5126_v13 = vld [vmem:[#allocation5 + $0x18] sm:$0xf0] }
 0x476   :  { %v2903_v38 = vadd.f32 %v2902_v22, %v2814_v49  ;;  %3128 = vmatmul.bf16.gmra.mxu0 %v8453_v58  ;;  %3217 = vmatmul.bf16.gmra.mxu1 %v8454_v51  ;;  %v5557_v59 = vor.u32 %v5881_v17, %v5556_v34  ;;  %v5142_v22 = vld [vmem:[#allocation5 + $0x38] sm:$0xf0]  ;;  %v5805_v24 = vld [vmem:[#allocation5 + $0x114] sm:$0xf0] }
 0x477   :  { %v7152_v8 = vadd.f32 %v3035_v10, %v2947_v42  ;;  %3450 = vmatpush.bf16.msrb.mxu0 %v5429_v39  ;;  %v5145_v10 = vor.u32 %v5775_v55, %v5142_v22  ;;  %v5252_v42 = vld [vmem:[#allocation5 + $0x108] sm:$0xf]  ;;  %3363 = vmatpush.bf16.msra.mxu3 %v5269_v54  ;;  %v5129_v39 = vor.u32 %v5771_v57, %v5126_v13 }
 0x478   :  { %3539 = vmatpush.bf16.msrb.mxu1 %v5557_v59  ;;  %v5253_v25 = vor.u32 %v5805_v24, %v5252_v42 }
 0x479   :  { %3629 = vmatpush.bf16.msrb.mxu2 %v5161_v20  ;;  %v4092_v20 = vmax.f32 %v2903_v38, 0.0 }
 0x47b   :  { %v2815_v49 = vpop.f32.mrf.mxu0  ;;  %v2904_v58 = vpop.f32.mrf.mxu1  ;;  %3364 = vmatpush.bf16.msra.mxu3 %v5253_v25 }
 0x47c   :  { %v2816_v6 = vadd.f32 %v2815_v49, %v7055_v46  ;;  %v2948_v3 = vpop.f32.mrf.mxu2  ;;  %v3037_v44 = vpop.f32.mrf.mxu3 }
 0x47d   :  { %v2949_v9 = vadd.f32 %v2948_v3, %v7074_v19  ;;  %3630 = vmatpush.bf16.msrb.mxu2 %v5145_v10 }
 0x47e   :  { %v2905_v34 = vadd.f32 %v2904_v58, %v2816_v6 }
 0x47f   :  { %v7156_v17 = vadd.f32 %v3037_v44, %v2949_v9 }
 0x480   :  { %v4096_v55 = vmax.f32 %v2905_v34, 0.0  ;;  %2990 = vmatmul.bf16.gmra.mxu2 %v8411_v35  ;;  %3079 = vmatmul.bf16.gmra.mxu3 %v6716_v0 }
 0x481   :  { %3631 = vmatpush.bf16.msrb.mxu2 %v5129_v39  ;;  %v8456_v39 = vld [vmem:[#allocation29_spill] sm:$0xff] }
 0x482   :  { %v7160_v46 = vpack.c.bf16 %v4096_v55, %v4092_v20  ;;  %v8457_v20 = vld [vmem:[#allocation41_spill] sm:$0xff] }
 0x483   :  { %v2818_v59 = vpop.f32.mrf.mxu0  ;;  %v2907_v54 = vpop.f32.mrf.mxu1 }
 0x484   :  { %8455 = vst [vmem:[#allocation69_spill] sm:$0xff] %v7160_v46  ;;  %v2819_v22 = vadd.f32 %v2818_v59, %v7065_v32  ;;  %v2951_v49 = vpop.f32.mrf.mxu2  ;;  %v3040_v58 = vpop.f32.mrf.mxu3 }
 0x485   :  { %v2952_v42 = vadd.f32 %v2951_v49, %v7074_v19 }
 0x486   :  { %v2908_v10 = vadd.f32 %v2907_v54, %v2819_v22  ;;  %3133 = vmatmul.bf16.gmra.mxu0 %v6745_v52  ;;  %3222 = vmatmul.bf16.gmra.mxu1 %v6827_v15 }
 0x487   :  { %v7166_v38 = vadd.f32 %v3040_v58, %v2952_v42  ;;  %v5412_v42 = vld [vmem:[#allocation5 + $0x248] sm:$0xf] }
 0x488   :  { %v4100_v13 = vmax.f32 %v2908_v10, 0.0  ;;  %v5845_v10 = vld [vmem:[#allocation5 + $0x254] sm:$0xf0] }
 0x48b   :  { %v2820_v24 = vpop.f32.mrf.mxu0  ;;  %v2909_v6 = vpop.f32.mrf.mxu1 }
 0x48c   :  { %v2821_v3 = vadd.f32 %v2820_v24, %v7069_v48  ;;  %v2953_v44 = vpop.f32.mrf.mxu2  ;;  %v3042_v9 = vpop.f32.mrf.mxu3  ;;  %v5413_v24 = vor.u32 %v5845_v10, %v5412_v42 }
 0x48d   :  { %v2954_v25 = vadd.f32 %v2953_v44, %v7074_v19 }
 0x48e   :  { %v2910_v32 = vadd.f32 %v2909_v6, %v2821_v3  ;;  %v5540_v6 = vld [vmem:[#allocation5 + $0x348] sm:$0xf]  ;;  %v5877_v3 = vld [vmem:[#allocation5 + $0x354] sm:$0xf0]  ;;  %3451 = vmatpush.bf16.msrb.mxu0 %v5413_v24 }
 0x48f   :  { %v7170_v57 = vadd.f32 %v3042_v9, %v2954_v25  ;;  %v5541_v44 = vor.u32 %v5877_v3, %v5540_v6 }
 0x490   :  { %v4104_v34 = vmax.f32 %v2910_v32, 0.0  ;;  %2995 = vmatmul.bf16.gmra.mxu2 %v8456_v39  ;;  %3084 = vmatmul.bf16.gmra.mxu3 %v8457_v20 }
 0x491   :  { %3540 = vmatpush.bf16.msrb.mxu1 %v5541_v44 }
 0x492   :  { %v7174_v55 = vpack.c.bf16 %v4104_v34, %v4100_v13 }
 0x493   :  { %v3099_v59 = vpop.f32.mrf.mxu0  ;;  %v3188_v54 = vpop.f32.mrf.mxu1 }
 0x494   :  { %8458 = vst [vmem:[#allocation29_spill] sm:$0xff] %v7174_v55  ;;  %v7176_v22 = vpop.f32.mrf.mxu2  ;;  %v7178_v48 = vpop.f32.mrf.mxu3  ;;  %v3100_v49 = vadd.f32 %v3099_v59, %v7082_v30  ;;  %v5350_v55 = vld [vmem:[#allocation5 + $0x1d8] sm:$0xf0] }
 0x496   :  { %v3189_v58 = vadd.f32 %v3188_v54, %v3100_v49  ;;  %3138 = vmatmul.bf16.gmra.mxu0 %v6757_v37  ;;  %3227 = vmatmul.bf16.gmra.mxu1 %v6847_v14 }
 0x498   :  { %v3981_v59 = vmax.f32 %v3189_v58, 0.0 }
 0x49b   :  { %v3101_v9 = vpop.f32.mrf.mxu0  ;;  %v3190_v25 = vpop.f32.mrf.mxu1 }
 0x49c   :  { %v7183_v32 = vpop.f32.mrf.mxu2  ;;  %v7185_v13 = vpop.f32.mrf.mxu3  ;;  %v3102_v30 = vadd.f32 %v3101_v9, %v7086_v21 }
 0x49e   :  { %v3191_v34 = vadd.f32 %v3190_v25, %v3102_v30 }
 0x4a0   :  { %v3985_v54 = vmax.f32 %v3191_v34, 0.0  ;;  %3276 = vmatmul.bf16.vlgmr.msra.gmra.mxu2 %v6431_v40  ;;  %3365 = vmatmul.bf16.vlgmr.msra.gmra.mxu3 %v6540_v26 }
 0x4a1   :  { %4194 = vmatpush.bf16.xpose.msra.mxu2 %v7059_v47 }
 0x4a2   :  { %v7191_v49 = vpack.c.bf16 %v3985_v54, %v3981_v59 }
 0x4a3   :  { %v3104_v42 = vpop.f32.mrf.mxu0  ;;  %v3193_v10 = vpop.f32.mrf.mxu1 }
 0x4a4   :  { %v2961_v24 = vpop.f32.mrf.mxu2  ;;  %v3050_v6 = vpop.f32.mrf.mxu3  ;;  %v3105_v3 = vadd.f32 %v3104_v42, %v7096_v18 }
 0x4a5   :  { %v2962_v21 = vadd.f32 %v2961_v24, %v7074_v19 }
 0x4a6   :  { %v3194_v44 = vadd.f32 %v3193_v10, %v3105_v3  ;;  %3143 = vmatmul.bf16.gmra.mxu0 %v6769_v29  ;;  %3232 = vmatmul.bf16.gmra.mxu1 %v6863_v56 }
 0x4a7   :  { %v7197_v58 = vadd.f32 %v3050_v6, %v2962_v21 }
 0x4a8   :  { %v3989_v42 = vmax.f32 %v3194_v44, 0.0 }
 0x4a9   :  { %4195 = vmatpush.bf16.xpose.msra.mxu2 %v7045_v5 }
 0x4ab   :  { %v3106_v47 = vpop.f32.mrf.mxu0  ;;  %v3195_v9 = vpop.f32.mrf.mxu1 }
 0x4ac   :  { %v2963_v25 = vpop.f32.mrf.mxu2  ;;  %v3052_v30 = vpop.f32.mrf.mxu3  ;;  %v3107_v34 = vadd.f32 %v3106_v47, %v7100_v36 }
 0x4ad   :  { %v2964_v59 = vadd.f32 %v2963_v25, %v7074_v19  ;;  %v5396_v25 = vld [vmem:[#allocation5 + $0x228] sm:$0xf] }
 0x4ae   :  { %v3196_v18 = vadd.f32 %v3195_v9, %v3107_v34  ;;  %v5524_v34 = vld [vmem:[#allocation5 + $0x328] sm:$0xf] }
 0x4af   :  { %v7202_v54 = vadd.f32 %v3052_v30, %v2964_v59  ;;  %v5841_v30 = vld [vmem:[#allocation5 + $0x234] sm:$0xf0] }
 0x4b0   :  { %v3993_v10 = vmax.f32 %v3196_v18, 0.0  ;;  %3281 = vmatmul.bf16.gmra.mxu2 %v6447_v27  ;;  %3370 = vmatmul.bf16.gmra.mxu3 %v6552_v60  ;;  %v5873_v59 = vld [vmem:[#allocation5 + $0x334] sm:$0xf0] }
 0x4b1   :  { %4196 = vmatpush.bf16.xpose.msra.mxu2 %v7031_v16  ;;  %v5397_v16 = vor.u32 %v5841_v30, %v5396_v25  ;;  %v5525_v18 = vor.u32 %v5873_v59, %v5524_v34 }
 0x4b2   :  { %v7207_v5 = vpack.c.bf16 %v3993_v10, %v3989_v42 }
 0x4b3   :  { %v3109_v24 = vpop.f32.mrf.mxu0  ;;  %v3198_v6 = vpop.f32.mrf.mxu1  ;;  %3452 = vmatpush.bf16.msrb.mxu0 %v5397_v16  ;;  %3541 = vmatpush.bf16.msrb.mxu1 %v5525_v18 }
 0x4b4   :  { %v2966_v3 = vpop.f32.mrf.mxu2  ;;  %v3055_v21 = vpop.f32.mrf.mxu3  ;;  %v3110_v36 = vadd.f32 %v3109_v24, %v7110_v12 }
 0x4b5   :  { %v2967_v47 = vadd.f32 %v2966_v3, %v7074_v19 }
 0x4b6   :  { %v3199_v9 = vadd.f32 %v3198_v6, %v3110_v36  ;;  %3148 = vmatmul.bf16.gmra.mxu0 %v6781_v11  ;;  %3237 = vmatmul.bf16.gmra.mxu1 %v6877_v1 }
 0x4b7   :  { %v7213_v44 = vadd.f32 %v3055_v21, %v2967_v47 }
 0x4b8   :  { %v3997_v47 = vmax.f32 %v3199_v9, 0.0 }
 0x4b9   :  { %4197 = vmatpush.bf16.xpose.msra.mxu2 %v7017_v43 }
 0x4bb   :  { %v3111_v42 = vpop.f32.mrf.mxu0  ;;  %v3200_v10 = vpop.f32.mrf.mxu1 }
 0x4bc   :  { %v2968_v12 = vpop.f32.mrf.mxu2  ;;  %v3057_v24 = vpop.f32.mrf.mxu3  ;;  %v3112_v6 = vadd.f32 %v3111_v42, %v7114_v28  ;;  %v8459_v42 = vld [vmem:[#allocation63_spill] sm:$0xff] }
 0x4bd   :  { %v2969_v3 = vadd.f32 %v2968_v12, %v7074_v19 }
 0x4be   :  { %v3201_v21 = vadd.f32 %v3200_v10, %v3112_v6 }
 0x4bf   :  { %v7218_v36 = vadd.f32 %v3057_v24, %v2969_v3 }
 0x4c0   :  { %v4001_v46 = vmax.f32 %v3201_v21, 0.0  ;;  %3286 = vmatmul.bf16.gmra.mxu2 %v6463_v63  ;;  %3375 = vmatmul.bf16.gmra.mxu3 %v6564_v4 }
 0x4c1   :  { %4198 = vmatpush.bf16.xpose.msra.mxu2 %v7003_v2 }
 0x4c2   :  { %v7223_v43 = vpack.c.bf16 %v4001_v46, %v3997_v47 }
 0x4c3   :  { %v3114_v25 = vpop.f32.mrf.mxu0  ;;  %v3203_v30 = vpop.f32.mrf.mxu1 }
 0x4c4   :  { %v2971_v16 = vpop.f32.mrf.mxu2  ;;  %v3060_v28 = vpop.f32.mrf.mxu3  ;;  %v3115_v34 = vadd.f32 %v3114_v25, %v7124_v41  ;;  %v8460_v25 = vld [vmem:[#allocation18_spill] sm:$0xff] }
 0x4c5   :  { %v2972_v59 = vadd.f32 %v2971_v16, %v7074_v19 }
 0x4c6   :  { %v3204_v18 = vadd.f32 %v3203_v30, %v3115_v34  ;;  %3153 = vmatmul.bf16.gmra.mxu0 %v6793_v50  ;;  %3242 = vmatmul.bf16.gmra.mxu1 %v6891_v61  ;;  %v8461_v30 = vld [vmem:[#allocation62_spill] sm:$0xff] }
 0x4c7   :  { %v7229_v9 = vadd.f32 %v3060_v28, %v2972_v59 }
 0x4c8   :  { %v4005_v21 = vmax.f32 %v3204_v18, 0.0 }
 0x4c9   :  { %4199 = vmatpush.bf16.xpose.msra.mxu2 %v8459_v42 }
 0x4cb   :  { %v3116_v2 = vpop.f32.mrf.mxu0  ;;  %v3205_v46 = vpop.f32.mrf.mxu1 }
 0x4cc   :  { %v2973_v10 = vpop.f32.mrf.mxu2  ;;  %v3062_v12 = vpop.f32.mrf.mxu3  ;;  %v3117_v24 = vadd.f32 %v3116_v2, %v7128_v33 }
 0x4cd   :  { %v2974_v6 = vadd.f32 %v2973_v10, %v7074_v19  ;;  %v5366_v10 = vld [vmem:[#allocation5 + $0x1f8] sm:$0xf0] }
 0x4ce   :  { %v3206_v41 = vadd.f32 %v3205_v46, %v3117_v24  ;;  %v5831_v46 = vld [vmem:[#allocation5 + $0x1ec] sm:$0xf] }
 0x4cf   :  { %v7234_v3 = vadd.f32 %v3062_v12, %v2974_v6  ;;  %v5369_v12 = vor.u32 %v5831_v46, %v5366_v10  ;;  %v5380_v6 = vld [vmem:[#allocation5 + $0x208] sm:$0xf]  ;;  %v5823_v46 = vld [vmem:[#allocation5 + $0x1ac] sm:$0xf]  ;;  %v5334_v10 = vld [vmem:[#allocation5 + $0x1b8] sm:$0xf0] }
 0x4d0   :  { %v4009_v47 = vmax.f32 %v3206_v41, 0.0  ;;  %3291 = vmatmul.bf16.gmra.mxu2 %v6479_v62  ;;  %3380 = vmatmul.bf16.gmra.mxu3 %v8460_v25  ;;  %v5837_v41 = vld [vmem:[#allocation5 + $0x214] sm:$0xf0] }
 0x4d1   :  { %4200 = vmatpush.bf16.xpose.msra.mxu2 %v8461_v30  ;;  %3713 = vmatpush.bf16.msrb.mxu3 %v5369_v12  ;;  %v5508_v30 = vld [vmem:[#allocation5 + $0x308] sm:$0xf] }
 0x4d2   :  { %v7239_v16 = vpack.c.bf16 %v4009_v47, %v4005_v21  ;;  %v8462_v21 = vld [vmem:[#allocation61_spill] sm:$0xff]  ;;  %v5381_v47 = vor.u32 %v5837_v41, %v5380_v6  ;;  %v5337_v6 = vor.u32 %v5823_v46, %v5334_v10 }
 0x4d3   :  { %v3119_v28 = vpop.f32.mrf.mxu0  ;;  %v3208_v34 = vpop.f32.mrf.mxu1 }
 0x4d4   :  { %v2976_v59 = vpop.f32.mrf.mxu2  ;;  %v3065_v42 = vpop.f32.mrf.mxu3  ;;  %v3120_v33 = vadd.f32 %v3119_v28, %v7138_v45  ;;  %v5869_v45 = vld [vmem:[#allocation5 + $0x314] sm:$0xf0]  ;;  %v5827_v28 = vld [vmem:[#allocation5 + $0x1cc] sm:$0xf]  ;;  %3453 = vmatpush.bf16.msrb.mxu0 %v5381_v47 }
 0x4d5   :  { %v2977_v2 = vadd.f32 %v2976_v59, %v7074_v19  ;;  %v5509_v59 = vor.u32 %v5869_v45, %v5508_v30  ;;  %v8463_v45 = vld [vmem:[#allocation12_spill] sm:$0xff] }
 0x4d6   :  { %v3209_v18 = vadd.f32 %v3208_v34, %v3120_v33  ;;  %3158 = vmatmul.bf16.gmra.mxu0 %v6805_v53  ;;  %3247 = vmatmul.bf16.gmra.mxu1 %v6905_v31  ;;  %v5353_v33 = vor.u32 %v5827_v28, %v5350_v55  ;;  %v8464_v47 = vld [vmem:[#allocation20_spill] sm:$0xff]  ;;  %v5318_v28 = vld [vmem:[#allocation5 + $0x198] sm:$0xf0] }
 0x4d7   :  { %v7245_v24 = vadd.f32 %v3065_v42, %v2977_v2  ;;  %3542 = vmatpush.bf16.msrb.mxu1 %v5509_v59  ;;  %v5819_v55 = vld [vmem:[#allocation5 + $0x18c] sm:$0xf] }
 0x4d8   :  { %3714 = vmatpush.bf16.msrb.mxu3 %v5353_v33 }
 0x4d9   :  { %4201 = vmatpush.bf16.xpose.msra.mxu2 %v8462_v21  ;;  %v4013_v21 = vmax.f32 %v3209_v18, 0.0  ;;  %v5302_v18 = vld [vmem:[#allocation5 + $0x178] sm:$0xf0] }
 0x4db   :  { %v3121_v25 = vpop.f32.mrf.mxu0  ;;  %v3210_v34 = vpop.f32.mrf.mxu1 }
 0x4dc   :  { %v2978_v53 = vpop.f32.mrf.mxu2  ;;  %v3067_v31 = vpop.f32.mrf.mxu3  ;;  %v3122_v42 = vadd.f32 %v3121_v25, %v7142_v7  ;;  %3715 = vmatpush.bf16.msrb.mxu3 %v5337_v6  ;;  %v5321_v7 = vor.u32 %v5819_v55, %v5318_v28  ;;  %v5811_v6 = vld [vmem:[#allocation5 + $0x14c] sm:$0xf] }
 0x4dd   :  { %v2979_v2 = vadd.f32 %v2978_v53, %v7074_v19 }
 0x4de   :  { %v3211_v12 = vadd.f32 %v3210_v34, %v3122_v42  ;;  %v8465_v42 = vld [vmem:[#allocation52_spill] sm:$0xff] }
 0x4df   :  { %v7250_v41 = vadd.f32 %v3067_v31, %v2979_v2  ;;  %v5815_v31 = vld [vmem:[#allocation5 + $0x16c] sm:$0xf]  ;;  %v8466_v2 = vld [vmem:[#allocation59_spill] sm:$0xff] }
 0x4e0   :  { %v4017_v30 = vmax.f32 %v3211_v12, 0.0  ;;  %3296 = vmatmul.bf16.gmra.mxu2 %v8463_v45  ;;  %3385 = vmatmul.bf16.gmra.mxu3 %v8464_v47  ;;  %v5305_v46 = vor.u32 %v5815_v31, %v5302_v18  ;;  %v5270_v31 = vld [vmem:[#allocation5 + $0x138] sm:$0xf0] }
 0x4e1   :  { %3716 = vmatpush.bf16.msrb.mxu3 %v5321_v7 }
 0x4e2   :  { %v7254_v25 = vpack.c.bf16 %v4017_v30, %v4013_v21  ;;  %v5286_v21 = vld [vmem:[#allocation5 + $0x158] sm:$0xf0] }
 0x4e3   :  { %v3124_v53 = vpop.f32.mrf.mxu0  ;;  %v3213_v59 = vpop.f32.mrf.mxu1  ;;  %v5289_v30 = vor.u32 %v5811_v6, %v5286_v21  ;;  %v8468_v6 = vld [vmem:[#allocation22_spill] sm:$0xff] }
 0x4e4   :  { %v2981_v33 = vpop.f32.mrf.mxu2  ;;  %v3070_v62 = vpop.f32.mrf.mxu3  ;;  %v3125_v12 = vadd.f32 %v3124_v53, %v7152_v8 }
 0x4e5   :  { %v2982_v34 = vadd.f32 %v2981_v33, %v7074_v19  ;;  %3717 = vmatpush.bf16.msrb.mxu3 %v5305_v46  ;;  %v8467_v46 = vld [vmem:[#allocation13_spill] sm:$0xff] }
 0x4e6   :  { %3163 = vmatmul.bf16.gmra.mxu0 %v8465_v42  ;;  %3252 = vmatmul.bf16.gmra.mxu1 %v8466_v2  ;;  %v3214_v47 = vadd.f32 %v3213_v59, %v3125_v12  ;;  %v5807_v2 = vld [vmem:[#allocation5 + $0x12c] sm:$0xf]  ;;  %v5254_v12 = vld [vmem:[#allocation5 + $0x118] sm:$0xf0] }
 0x4e7   :  { %v7259_v10 = vadd.f32 %v3070_v62, %v2982_v34  ;;  %v5273_v34 = vor.u32 %v5807_v2, %v5270_v31  ;;  %v5803_v59 = vld [vmem:[#allocation5 + $0x10c] sm:$0xf] }
 0x4e8   :  { %v4021_v8 = vmax.f32 %v3214_v47, 0.0  ;;  %v5257_v21 = vor.u32 %v5803_v59, %v5254_v12  ;;  %v8469_v47 = vld [vmem:[#allocation27_spill] sm:$0xff] }
 0x4e9   :  { %3718 = vmatpush.bf16.msrb.mxu3 %v5289_v30 }
 0x4eb   :  { %v3126_v55 = vpop.f32.mrf.mxu0  ;;  %v3215_v28 = vpop.f32.mrf.mxu1 }
 0x4ec   :  { %v2983_v33 = vpop.f32.mrf.mxu2  ;;  %v3072_v7 = vpop.f32.mrf.mxu3  ;;  %v3127_v45 = vadd.f32 %v3126_v55, %v7156_v17 }
 0x4ed   :  { %v2984_v42 = vadd.f32 %v2983_v33, %v7074_v19  ;;  %3719 = vmatpush.bf16.msrb.mxu3 %v5273_v34  ;;  %v5622_v34 = vld [vmem:[#allocation5 + $0x3f8] sm:$0xf0] }
 0x4ee   :  { %v3216_v62 = vadd.f32 %v3215_v28, %v3127_v45  ;;  %v5863_v28 = vld [vmem:[#allocation5 + $0x2ec] sm:$0xf] }
 0x4ef   :  { %v7264_v18 = vadd.f32 %v3072_v7, %v2984_v42  ;;  %v5494_v7 = vld [vmem:[#allocation5 + $0x2f8] sm:$0xf0] }
 0x4f0   :  { %v4025_v53 = vmax.f32 %v3216_v62, 0.0  ;;  %3301 = vmatmul.bf16.gmra.mxu2 %v8467_v46  ;;  %3390 = vmatmul.bf16.gmra.mxu3 %v8468_v6  ;;  %v5497_v31 = vor.u32 %v5863_v28, %v5494_v7  ;;  %v5895_v62 = vld [vmem:[#allocation5 + $0x3ec] sm:$0xf]  ;;  %v8470_v28 = vld [vmem:[#allocation14_spill] sm:$0xff]  ;;  %v8474_v6 = vld [vmem:[#allocation15_spill] sm:$0xff] }
 0x4f1   :  { %3720 = vmatpush.bf16.msrb.mxu3 %v5257_v21  ;;  %v8471_v7 = vld [vmem:[#allocation24_spill] sm:$0xff] }
 0x4f2   :  { %v7268_v17 = vpack.c.bf16 %v4025_v53, %v4021_v8  ;;  %v5625_v8 = vor.u32 %v5895_v62, %v5622_v34  ;;  %3802 = vmatpush.bf16.msra.mxu0 %v5497_v31  ;;  %v2957_v31 = vadd.f32 %v7176_v22, %v7074_v19 }
 0x4f3   :  { %v3129_v55 = vpop.f32.mrf.mxu0  ;;  %v3218_v30 = vpop.f32.mrf.mxu1 }
 0x4f4   :  { %v2986_v33 = vpop.f32.mrf.mxu2  ;;  %v3075_v61 = vpop.f32.mrf.mxu3  ;;  %v3130_v2 = vadd.f32 %v3129_v55, %v7166_v38  ;;  %3891 = vmatpush.bf16.msra.mxu1 %v5625_v8 }
 0x4f5   :  { %v2987_v45 = vadd.f32 %v2986_v33, %v7074_v19 }
 0x4f6   :  { %3168 = vmatmul.bf16.gmra.mxu0 %v6829_v23  ;;  %3257 = vmatmul.bf16.gmra.mxu1 %v8469_v47  ;;  %v3219_v12 = vadd.f32 %v3218_v30, %v3130_v2 }
 0x4f7   :  { %v7273_v42 = vadd.f32 %v3075_v61, %v2987_v45 }
 0x4f8   :  { %v4029_v38 = vmax.f32 %v3219_v12, 0.0  ;;  %v8473_v12 = vld [vmem:[#allocation60_spill] sm:$0xff] }
 0x4fb   :  { %v3131_v53 = vpop.f32.mrf.mxu0  ;;  %v3220_v59 = vpop.f32.mrf.mxu1 }
 0x4fc   :  { %v2988_v33 = vpop.f32.mrf.mxu2  ;;  %v3077_v21 = vpop.f32.mrf.mxu3  ;;  %v3132_v23 = vadd.f32 %v3131_v53, %v7170_v57  ;;  %v2959_v53 = vadd.f32 %v7183_v32, %v7074_v19 }
 0x4fd   :  { %v2989_v61 = vadd.f32 %v2988_v33, %v7074_v19 }
 0x4fe   :  { %v3221_v45 = vadd.f32 %v3220_v59, %v3132_v23  ;;  %v3046_v23 = vadd.f32 %v7178_v48, %v2957_v31  ;;  %v8472_v59 = vld [vmem:[#allocation56_spill] sm:$0xff]  ;;  %v3048_v22 = vadd.f32 %v7185_v13, %v2959_v53 }
 0x4ff   :  { %v7278_v47 = vadd.f32 %v3077_v21, %v2989_v61 }
 0x500   :  { %v4033_v55 = vmax.f32 %v3221_v45, 0.0  ;;  %3306 = vmatmul.bf16.gmra.mxu2 %v8470_v28  ;;  %3395 = vmatmul.bf16.gmra.mxu3 %v8471_v7 }
 0x502   :  { %v4135_v30 = vpack.c.bf16 %v4033_v55, %v4029_v38 }
 0x503   :  { %v3134_v2 = vpop.f32.mrf.mxu0  ;;  %v3223_v62 = vpop.f32.mrf.mxu1 }
 0x504   :  { %v2991_v34 = vpop.f32.mrf.mxu2  ;;  %v3080_v57 = vpop.f32.mrf.mxu3  ;;  %v3135_v21 = vadd.f32 %v3134_v2, %v3046_v23 }
 0x505   :  { %v2992_v8 = vadd.f32 %v2991_v34, %v7074_v19 }
 0x506   :  { %3173 = vmatmul.bf16.gmra.mxu0 %v8472_v59  ;;  %3262 = vmatmul.bf16.gmra.mxu1 %v8473_v12  ;;  %v3224_v38 = vadd.f32 %v3223_v62, %v3135_v21 }
 0x507   :  { %v7290_v33 = vadd.f32 %v3080_v57, %v2992_v8  ;;  %v8475_v57 = vld [vmem:[#allocation26_spill] sm:$0xff] }
 0x508   :  { %v4037_v32 = vmax.f32 %v3224_v38, 0.0  ;;  %v5859_v38 = vld [vmem:[#allocation5 + $0x2cc] sm:$0xf] }
 0x50b   :  { %v3136_v61 = vpop.f32.mrf.mxu0  ;;  %v3225_v45 = vpop.f32.mrf.mxu1 }
 0x50c   :  { %v2993_v55 = vpop.f32.mrf.mxu2  ;;  %v3082_v7 = vpop.f32.mrf.mxu3  ;;  %v3137_v34 = vadd.f32 %v3136_v61, %v3048_v22  ;;  %v8476_v61 = vld [vmem:[#allocation31_spill] sm:$0xff] }
 0x50d   :  { %v2994_v48 = vadd.f32 %v2993_v55, %v7074_v19  ;;  %v5478_v55 = vld [vmem:[#allocation5 + $0x2d8] sm:$0xf0] }
 0x50e   :  { %v3226_v31 = vadd.f32 %v3225_v45, %v3137_v34  ;;  %v5481_v34 = vor.u32 %v5859_v38, %v5478_v55  ;;  %v8478_v38 = vld [vmem:[#allocation16_spill] sm:$0xff] }
 0x50f   :  { %v7294_v28 = vadd.f32 %v3082_v7, %v2994_v48  ;;  %v8477_v7 = vld [vmem:[#allocation43_spill] sm:$0xff]  ;;  %v5606_v48 = vld [vmem:[#allocation5 + $0x3d8] sm:$0xf0]  ;;  %v8479_v55 = vld [vmem:[#allocation28_spill] sm:$0xff] }
 0x510   :  { %v4041_v59 = vmax.f32 %v3226_v31, 0.0  ;;  %3311 = vmatmul.bf16.gmra.mxu2 %v8474_v6  ;;  %3400 = vmatmul.bf16.gmra.mxu3 %v8475_v57 }
 0x511   :  { %3803 = vmatpush.bf16.msra.mxu0 %v5481_v34  ;;  %v7313_v34 = vld [vmem:[%s8256_s9] sm:$0xf] }
 0x512   :  { %v4139_v2 = vpack.c.bf16 %v4041_v59, %v4037_v32  ;;  %v5891_v59 = vld [vmem:[#allocation5 + $0x3cc] sm:$0xf]  ;;  %8480 = vst [vmem:[#allocation41_spill] sm:$0xff] %v7313_v34 }
 0x513   :  { %v3139_v8 = vpop.f32.mrf.mxu0  ;;  %v3228_v13 = vpop.f32.mrf.mxu1  ;;  %v5609_v31 = vor.u32 %v5891_v59, %v5606_v48 }
 0x514   :  { %v2996_v23 = vpop.f32.mrf.mxu2  ;;  %v3085_v53 = vpop.f32.mrf.mxu3  ;;  %v3140_v62 = vadd.f32 %v3139_v8, %v7197_v58  ;;  %4207 = vmatpush.bf16.xpose.msra.mxu3 %v4139_v2 }
 0x515   :  { %v2997_v21 = vadd.f32 %v2996_v23, %v7074_v19  ;;  %3892 = vmatpush.bf16.msra.mxu1 %v5609_v31 }
 0x516   :  { %v3229_v22 = vadd.f32 %v3228_v13, %v3140_v62  ;;  %3454 = vmatmul.bf16.vlgmr.msrb.gmra.mxu0 %v8476_v61  ;;  %3543 = vmatmul.bf16.vlgmr.msrb.gmra.mxu1 %v8477_v7 }
 0x517   :  { %v7302_v45 = vadd.f32 %v3085_v53, %v2997_v21 }
 0x518   :  { %v4045_v62 = vmax.f32 %v3229_v22, 0.0 }
 0x51b   :  { %v3141_v32 = vpop.f32.mrf.mxu0  ;;  %v3230_v57 = vpop.f32.mrf.mxu1 }
 0x51c   :  { %v2998_v58 = vpop.f32.mrf.mxu2  ;;  %v3087_v2 = vpop.f32.mrf.mxu3  ;;  %v3142_v8 = vadd.f32 %v3141_v32, %v7202_v54  ;;  %4208 = vmatpush.bf16.xpose.msra.mxu3 %v4135_v30  ;;  %v7316_v54 = vperm.slane %v7313_v34, 2 }
 0x51d   :  { %v2999_v13 = vadd.f32 %v2998_v58, %v7074_v19  ;;  %v8482_v58 = vld [vmem:[#allocation33_spill] sm:$0xff] }
 0x51e   :  { %v3231_v23 = vadd.f32 %v3230_v57, %v3142_v8 }
 0x51f   :  { %v7306_v53 = vadd.f32 %v3087_v2, %v2999_v13  ;;  %v8483_v2 = vld [vmem:[#allocation44_spill] sm:$0xff] }
 0x520   :  { %v4049_v21 = vmax.f32 %v3231_v23, 0.0  ;;  %3316 = vmatmul.bf16.gmra.mxu2 %v8478_v38  ;;  %3405 = vmatmul.bf16.gmra.mxu3 %v8479_v55 }
 0x522   :  { %v7318_v30 = vpack.c.bf16 %v4049_v21, %v4045_v62 }
 0x523   :  { %v3144_v19 = vpop.f32.mrf.mxu0  ;;  %v3233_v57 = vpop.f32.mrf.mxu1 }
 0x524   :  { %8481 = vst [vmem:[#allocation63_spill] sm:$0xff] %v7318_v30  ;;  %v3145_v59 = vadd.f32 %v3144_v19, %v7213_v44  ;;  %v3277_v22 = vpop.f32.mrf.mxu2  ;;  %v3366_v48 = vpop.f32.mrf.mxu3  ;;  %4209 = vmatpush.bf16.xpose.msra.mxu3 %v7268_v17 }
 0x525   :  { %v3278_v31 = vadd.f32 %v3277_v22, %v7316_v54  ;;  %v8484_v22 = vld [vmem:[#allocation17_spill] sm:$0xff] }
 0x526   :  { %v3234_v32 = vadd.f32 %v3233_v57, %v3145_v59  ;;  %3459 = vmatmul.bf16.gmra.mxu0 %v8482_v58  ;;  %3548 = vmatmul.bf16.gmra.mxu1 %v8483_v2  ;;  %v8485_v2 = vld [vmem:[#allocation30_spill] sm:$0xff] }
 0x527   :  { %v7325_v8 = vadd.f32 %v3366_v48, %v3278_v31 }
 0x528   :  { %v4053_v57 = vmax.f32 %v3234_v32, 0.0  ;;  %v8488_v32 = vld [vmem:[#allocation46_spill] sm:$0xff] }
 0x52b   :  { %v3146_v13 = vpop.f32.mrf.mxu0  ;;  %v3235_v23 = vpop.f32.mrf.mxu1 }
 0x52c   :  { %v3147_v62 = vadd.f32 %v3146_v13, %v7218_v36  ;;  %v3279_v21 = vpop.f32.mrf.mxu2  ;;  %v3368_v30 = vpop.f32.mrf.mxu3  ;;  %4210 = vmatpush.bf16.xpose.msra.mxu3 %v7254_v25 }
 0x52d   :  { %v3280_v44 = vadd.f32 %v3279_v21, %v7316_v54  ;;  %v5855_v21 = vld [vmem:[#allocation5 + $0x2ac] sm:$0xf] }
 0x52e   :  { %v3236_v17 = vadd.f32 %v3235_v23, %v3147_v62  ;;  %v8487_v23 = vld [vmem:[#allocation35_spill] sm:$0xff] }
 0x52f   :  { %v7330_v19 = vadd.f32 %v3368_v30, %v3280_v44  ;;  %v5462_v44 = vld [vmem:[#allocation5 + $0x2b8] sm:$0xf0] }
 0x530   :  { %v4057_v59 = vmax.f32 %v3236_v17, 0.0  ;;  %3321 = vmatmul.bf16.gmra.mxu2 %v8484_v22  ;;  %3410 = vmatmul.bf16.gmra.mxu3 %v8485_v2  ;;  %v5465_v17 = vor.u32 %v5855_v21, %v5462_v44  ;;  %v8489_v44 = vld [vmem:[#allocation19_spill] sm:$0xff] }
 0x532   :  { %v7334_v48 = vpack.c.bf16 %v4057_v59, %v4053_v57  ;;  %v5887_v57 = vld [vmem:[#allocation5 + $0x3ac] sm:$0xf]  ;;  %v5590_v59 = vld [vmem:[#allocation5 + $0x3b8] sm:$0xf0]  ;;  %3804 = vmatpush.bf16.msra.mxu0 %v5465_v17 }
 0x533   :  { %v3149_v31 = vpop.f32.mrf.mxu0  ;;  %v3238_v58 = vpop.f32.mrf.mxu1 }
 0x534   :  { %8486 = vst [vmem:[#allocation62_spill] sm:$0xff] %v7334_v48  ;;  %v3150_v36 = vadd.f32 %v3149_v31, %v7229_v9  ;;  %v3282_v13 = vpop.f32.mrf.mxu2  ;;  %v3371_v34 = vpop.f32.mrf.mxu3  ;;  %4211 = vmatpush.bf16.xpose.msra.mxu3 %v7239_v16  ;;  %v5593_v48 = vor.u32 %v5887_v57, %v5590_v59  ;;  %v8490_v57 = vld [vmem:[#allocation32_spill] sm:$0xff] }
 0x535   :  { %v3283_v25 = vadd.f32 %v3282_v13, %v7316_v54 }
 0x536   :  { %v3239_v30 = vadd.f32 %v3238_v58, %v3150_v36  ;;  %3464 = vmatmul.bf16.gmra.mxu0 %v8487_v23  ;;  %3553 = vmatmul.bf16.gmra.mxu1 %v8488_v32 }
 0x537   :  { %v7341_v62 = vadd.f32 %v3371_v34, %v3283_v25  ;;  %3893 = vmatpush.bf16.msra.mxu1 %v5593_v48 }
 0x538   :  { %v4061_v25 = vmax.f32 %v3239_v30, 0.0  ;;  %v8493_v30 = vld [vmem:[#allocation47_spill] sm:$0xff] }
 0x53b   :  { %v3151_v9 = vpop.f32.mrf.mxu0  ;;  %v3240_v31 = vpop.f32.mrf.mxu1 }
 0x53c   :  { %v3152_v16 = vadd.f32 %v3151_v9, %v7234_v3  ;;  %v3284_v2 = vpop.f32.mrf.mxu2  ;;  %v3373_v13 = vpop.f32.mrf.mxu3  ;;  %4212 = vmatpush.bf16.xpose.msra.mxu3 %v7223_v43 }
 0x53d   :  { %v3285_v58 = vadd.f32 %v3284_v2, %v7316_v54 }
 0x53e   :  { %v3241_v34 = vadd.f32 %v3240_v31, %v3152_v16  ;;  %v8492_v31 = vld [vmem:[#allocation37_spill] sm:$0xff] }
 0x53f   :  { %v7346_v36 = vadd.f32 %v3373_v13, %v3285_v58 }
 0x540   :  { %v4065_v21 = vmax.f32 %v3241_v34, 0.0  ;;  %3326 = vmatmul.bf16.gmra.mxu2 %v8489_v44  ;;  %3415 = vmatmul.bf16.gmra.mxu3 %v8490_v57 }
 0x542   :  { %v7350_v59 = vpack.c.bf16 %v4065_v21, %v4061_v25 }
 0x543   :  { %v3154_v17 = vpop.f32.mrf.mxu0  ;;  %v3243_v3 = vpop.f32.mrf.mxu1 }
 0x544   :  { %8491 = vst [vmem:[#allocation61_spill] sm:$0xff] %v7350_v59  ;;  %v3155_v9 = vadd.f32 %v3154_v17, %v7245_v24  ;;  %v3287_v32 = vpop.f32.mrf.mxu2  ;;  %v3376_v43 = vpop.f32.mrf.mxu3  ;;  %4213 = vmatpush.bf16.xpose.msra.mxu3 %v7207_v5  ;;  %v8495_v59 = vld [vmem:[#allocation34_spill] sm:$0xff] }
 0x545   :  { %v3288_v2 = vadd.f32 %v3287_v32, %v7316_v54 }
 0x546   :  { %v3244_v48 = vadd.f32 %v3243_v3, %v3155_v9  ;;  %3469 = vmatmul.bf16.gmra.mxu0 %v8492_v31  ;;  %3558 = vmatmul.bf16.gmra.mxu1 %v8493_v30  ;;  %v8494_v9 = vld [vmem:[#allocation21_spill] sm:$0xff] }
 0x547   :  { %v7357_v16 = vadd.f32 %v3376_v43, %v3288_v2 }
 0x548   :  { %v4069_v32 = vmax.f32 %v3244_v48, 0.0 }
 0x54b   :  { %v3156_v13 = vpop.f32.mrf.mxu0  ;;  %v3245_v58 = vpop.f32.mrf.mxu1 }
 0x54c   :  { %v3157_v34 = vadd.f32 %v3156_v13, %v7250_v41  ;;  %v3289_v25 = vpop.f32.mrf.mxu2  ;;  %v3378_v21 = vpop.f32.mrf.mxu3  ;;  %4214 = vmatpush.bf16.xpose.msra.mxu3 %v7191_v49 }
 0x54d   :  { %v3290_v24 = vadd.f32 %v3289_v25, %v7316_v54 }
 0x54e   :  { %v3246_v5 = vadd.f32 %v3245_v58, %v3157_v34  ;;  %v8497_v58 = vld [vmem:[#allocation39_spill] sm:$0xff]  ;;  %v8498_v34 = vld [vmem:[#allocation48_spill] sm:$0xff] }
 0x54f   :  { %v7362_v17 = vadd.f32 %v3378_v21, %v3290_v24  ;;  %v5851_v21 = vld [vmem:[#allocation5 + $0x28c] sm:$0xf]  ;;  %v5446_v24 = vld [vmem:[#allocation5 + $0x298] sm:$0xf0] }
 0x550   :  { %v4073_v3 = vmax.f32 %v3246_v5, 0.0  ;;  %3331 = vmatmul.bf16.gmra.mxu2 %v8494_v9  ;;  %3420 = vmatmul.bf16.gmra.mxu3 %v8495_v59  ;;  %v5449_v5 = vor.u32 %v5851_v21, %v5446_v24  ;;  %v8500_v21 = vld [vmem:[#allocation36_spill] sm:$0xff] }
 0x552   :  { %v7366_v43 = vpack.c.bf16 %v4073_v3, %v4069_v32  ;;  %v5883_v32 = vld [vmem:[#allocation5 + $0x38c] sm:$0xf]  ;;  %v5574_v3 = vld [vmem:[#allocation5 + $0x398] sm:$0xf0]  ;;  %3805 = vmatpush.bf16.msra.mxu0 %v5449_v5 }
 0x553   :  { %v3159_v2 = vpop.f32.mrf.mxu0  ;;  %v3248_v30 = vpop.f32.mrf.mxu1 }
 0x554   :  { %8496 = vst [vmem:[#allocation13_spill] sm:$0xff] %v7366_v43  ;;  %v3160_v41 = vadd.f32 %v3159_v2, %v7259_v10  ;;  %v3292_v13 = vpop.f32.mrf.mxu2  ;;  %v3381_v31 = vpop.f32.mrf.mxu3  ;;  %v5577_v43 = vor.u32 %v5883_v32, %v5574_v3 }
 0x555   :  { %v3293_v49 = vadd.f32 %v3292_v13, %v7316_v54 }
 0x556   :  { %v3249_v25 = vadd.f32 %v3248_v30, %v3160_v41  ;;  %3474 = vmatmul.bf16.gmra.mxu0 %v8497_v58  ;;  %3563 = vmatmul.bf16.gmra.mxu1 %v8498_v34  ;;  %v8499_v58 = vld [vmem:[#allocation23_spill] sm:$0xff] }
 0x557   :  { %v7372_v48 = vadd.f32 %v3381_v31, %v3293_v49  ;;  %3894 = vmatpush.bf16.msra.mxu1 %v5577_v43 }
 0x558   :  { %v4077_v31 = vmax.f32 %v3249_v25, 0.0 }
 0x55b   :  { %v3161_v59 = vpop.f32.mrf.mxu0  ;;  %v3250_v9 = vpop.f32.mrf.mxu1 }
 0x55c   :  { %v3162_v10 = vadd.f32 %v3161_v59, %v7264_v18  ;;  %v3294_v2 = vpop.f32.mrf.mxu2  ;;  %v3383_v13 = vpop.f32.mrf.mxu3 }
 0x55d   :  { %v3295_v30 = vadd.f32 %v3294_v2, %v7316_v54 }
 0x55e   :  { %v3251_v41 = vadd.f32 %v3250_v9, %v3162_v10  ;;  %v8502_v9 = vld [vmem:[#allocation40_spill] sm:$0xff]  ;;  %v8503_v10 = vld [vmem:[#allocation49_spill] sm:$0xff] }
 0x55f   :  { %v7376_v34 = vadd.f32 %v3383_v13, %v3295_v30 }
 0x560   :  { %v4081_v49 = vmax.f32 %v3251_v41, 0.0  ;;  %3336 = vmatmul.bf16.gmra.mxu2 %v8499_v58  ;;  %3425 = vmatmul.bf16.gmra.mxu3 %v8500_v21 }
 0x562   :  { %v7380_v24 = vpack.c.bf16 %v4081_v49, %v4077_v31 }
 0x563   :  { %v3164_v32 = vpop.f32.mrf.mxu0  ;;  %v3253_v5 = vpop.f32.mrf.mxu1 }
 0x564   :  { %8501 = vst [vmem:[#allocation60_spill] sm:$0xff] %v7380_v24  ;;  %v3165_v18 = vadd.f32 %v3164_v32, %v7273_v42  ;;  %v3297_v59 = vpop.f32.mrf.mxu2  ;;  %v3386_v3 = vpop.f32.mrf.mxu3 }
 0x565   :  { %v3298_v43 = vadd.f32 %v3297_v59, %v7316_v54 }
 0x566   :  { %v3254_v2 = vadd.f32 %v3253_v5, %v3165_v18  ;;  %3479 = vmatmul.bf16.gmra.mxu0 %v8502_v9  ;;  %3568 = vmatmul.bf16.gmra.mxu1 %v8503_v10  ;;  %v8504_v5 = vld [vmem:[#allocation25_spill] sm:$0xff]  ;;  %v8505_v18 = vld [vmem:[#allocation38_spill] sm:$0xff] }
 0x567   :  { %v7386_v25 = vadd.f32 %v3386_v3, %v3298_v43 }
 0x568   :  { %v4085_v21 = vmax.f32 %v3254_v2, 0.0  ;;  %v5847_v2 = vld [vmem:[#allocation5 + $0x26c] sm:$0xf] }
 0x56b   :  { %v3166_v13 = vpop.f32.mrf.mxu0  ;;  %v3255_v30 = vpop.f32.mrf.mxu1 }
 0x56c   :  { %v3167_v41 = vadd.f32 %v3166_v13, %v7278_v47  ;;  %v3299_v31 = vpop.f32.mrf.mxu2  ;;  %v3388_v49 = vpop.f32.mrf.mxu3 }
 0x56d   :  { %v3300_v24 = vadd.f32 %v3299_v31, %v7316_v54 }
 0x56e   :  { %v3256_v42 = vadd.f32 %v3255_v30, %v3167_v41  ;;  %v8507_v30 = vld [vmem:[#allocation42_spill] sm:$0xff] }
 0x56f   :  { %v7390_v32 = vadd.f32 %v3388_v49, %v3300_v24  ;;  %v5430_v41 = vld [vmem:[#allocation5 + $0x278] sm:$0xf0] }
 0x570   :  { %v4089_v59 = vmax.f32 %v3256_v42, 0.0  ;;  %3341 = vmatmul.bf16.gmra.mxu2 %v8504_v5  ;;  %3430 = vmatmul.bf16.gmra.mxu3 %v8505_v18  ;;  %v5433_v49 = vor.u32 %v5847_v2, %v5430_v41  ;;  %v5558_v42 = vld [vmem:[#allocation5 + $0x378] sm:$0xf0] }
 0x572   :  { %v7394_v10 = vpack.c.bf16 %v4089_v59, %v4085_v21  ;;  %v5879_v21 = vld [vmem:[#allocation5 + $0x36c] sm:$0xf]  ;;  %3806 = vmatpush.bf16.msra.mxu0 %v5433_v49 }
 0x573   :  { %v3169_v3 = vpop.f32.mrf.mxu0  ;;  %v3258_v43 = vpop.f32.mrf.mxu1  ;;  %v5561_v59 = vor.u32 %v5879_v21, %v5558_v42 }
 0x574   :  { %8506 = vst [vmem:[#allocation15_spill] sm:$0xff] %v7394_v10  ;;  %v3170_v9 = vadd.f32 %v3169_v3, %v7290_v33  ;;  %v3302_v47 = vpop.f32.mrf.mxu2  ;;  %v3391_v13 = vpop.f32.mrf.mxu3 }
 0x575   :  { %v3303_v58 = vadd.f32 %v3302_v47, %v7316_v54  ;;  %3895 = vmatpush.bf16.msra.mxu1 %v5561_v59 }
 0x576   :  { %v3259_v31 = vadd.f32 %v3258_v43, %v3170_v9  ;;  %3484 = vmatmul.bf16.gmra.mxu0 %v8507_v30  ;;  %3573 = vmatmul.bf16.gmra.mxu1 %v8454_v51 }
 0x577   :  { %v7400_v24 = vadd.f32 %v3391_v13, %v3303_v58 }
 0x578   :  { %v4093_v58 = vmax.f32 %v3259_v31, 0.0 }
 0x57b   :  { %v3171_v10 = vpop.f32.mrf.mxu0  ;;  %v3260_v18 = vpop.f32.mrf.mxu1 }
 0x57c   :  { %v3172_v33 = vadd.f32 %v3171_v10, %v7294_v28  ;;  %v3304_v3 = vpop.f32.mrf.mxu2  ;;  %v3393_v47 = vpop.f32.mrf.mxu3 }
 0x57d   :  { %v3305_v9 = vadd.f32 %v3304_v3, %v7316_v54 }
 0x57e   :  { %v3261_v43 = vadd.f32 %v3260_v18, %v3172_v33 }
 0x57f   :  { %v7404_v51 = vadd.f32 %v3393_v47, %v3305_v9 }
 0x580   :  { %v4097_v13 = vmax.f32 %v3261_v43, 0.0  ;;  %3346 = vmatmul.bf16.gmra.mxu2 %v8411_v35  ;;  %3435 = vmatmul.bf16.gmra.mxu3 %v6716_v0 }
 0x582   :  { %v7408_v2 = vpack.c.bf16 %v4097_v13, %v4093_v58 }
 0x583   :  { %v3174_v41 = vpop.f32.mrf.mxu0  ;;  %v3263_v49 = vpop.f32.mrf.mxu1 }
 0x584   :  { %8508 = vst [vmem:[#allocation31_spill] sm:$0xff] %v7408_v2  ;;  %v3175_v28 = vadd.f32 %v3174_v41, %v7302_v45  ;;  %v3307_v10 = vpop.f32.mrf.mxu2  ;;  %v3396_v21 = vpop.f32.mrf.mxu3 }
 0x585   :  { %v3308_v42 = vadd.f32 %v3307_v10, %v7316_v54 }
 0x586   :  { %v3264_v59 = vadd.f32 %v3263_v49, %v3175_v28  ;;  %3489 = vmatmul.bf16.gmra.mxu0 %v6745_v52  ;;  %3578 = vmatmul.bf16.gmra.mxu1 %v6827_v15 }
 0x587   :  { %v7414_v18 = vadd.f32 %v3396_v21, %v3308_v42 }
 0x588   :  { %v4101_v13 = vmax.f32 %v3264_v59, 0.0  ;;  %v5843_v59 = vld [vmem:[#allocation5 + $0x24c] sm:$0xf] }
 0x58b   :  { %v3176_v31 = vpop.f32.mrf.mxu0  ;;  %v3265_v33 = vpop.f32.mrf.mxu1 }
 0x58c   :  { %v3177_v3 = vadd.f32 %v3176_v31, %v7306_v53  ;;  %v3309_v47 = vpop.f32.mrf.mxu2  ;;  %v3398_v9 = vpop.f32.mrf.mxu3 }
 0x58d   :  { %v3310_v43 = vadd.f32 %v3309_v47, %v7316_v54  ;;  %v5875_v47 = vld [vmem:[#allocation5 + $0x34c] sm:$0xf] }
 0x58e   :  { %v3266_v45 = vadd.f32 %v3265_v33, %v3177_v3  ;;  %v5414_v33 = vld [vmem:[#allocation5 + $0x258] sm:$0xf0] }
 0x58f   :  { %v7418_v58 = vadd.f32 %v3398_v9, %v3310_v43  ;;  %v5417_v3 = vor.u32 %v5843_v59, %v5414_v33  ;;  %v5542_v9 = vld [vmem:[#allocation5 + $0x358] sm:$0xf0] }
 0x590   :  { %v4105_v41 = vmax.f32 %v3266_v45, 0.0  ;;  %3351 = vmatmul.bf16.gmra.mxu2 %v8456_v39  ;;  %3440 = vmatmul.bf16.gmra.mxu3 %v8457_v20  ;;  %v5545_v43 = vor.u32 %v5875_v47, %v5542_v9 }
 0x591   :  { %3807 = vmatpush.bf16.msra.mxu0 %v5417_v3 }
 0x592   :  { %v7422_v49 = vpack.c.bf16 %v4105_v41, %v4101_v13  ;;  %3896 = vmatpush.bf16.msra.mxu1 %v5545_v43 }
 0x593   :  { %v3455_v28 = vpop.f32.mrf.mxu0  ;;  %v3544_v10 = vpop.f32.mrf.mxu1 }
 0x594   :  { %8509 = vst [vmem:[#allocation43_spill] sm:$0xff] %v7422_v49  ;;  %v7424_v21 = vpop.f32.mrf.mxu2  ;;  %v7426_v53 = vpop.f32.mrf.mxu3  ;;  %v3456_v42 = vadd.f32 %v3455_v28, %v7325_v8 }
 0x596   :  { %v3545_v31 = vadd.f32 %v3544_v10, %v3456_v42  ;;  %3494 = vmatmul.bf16.gmra.mxu0 %v6757_v37  ;;  %3583 = vmatmul.bf16.gmra.mxu1 %v6847_v14 }
 0x598   :  { %v3982_v10 = vmax.f32 %v3545_v31, 0.0 }
 0x59b   :  { %v3457_v45 = vpop.f32.mrf.mxu0  ;;  %v3546_v13 = vpop.f32.mrf.mxu1 }
 0x59c   :  { %v7431_v41 = vpop.f32.mrf.mxu2  ;;  %v7433_v2 = vpop.f32.mrf.mxu3  ;;  %v3458_v8 = vadd.f32 %v3457_v45, %v7330_v19 }
 0x59e   :  { %v3547_v28 = vadd.f32 %v3546_v13, %v3458_v8 }
 0x5a0   :  { %v3986_v42 = vmax.f32 %v3547_v28, 0.0  ;;  %3632 = vmatmul.bf16.vlgmr.msrb.gmra.mxu2 %v6431_v40  ;;  %3721 = vmatmul.bf16.vlgmr.msrb.gmra.mxu3 %v6540_v26 }
 0x5a2   :  { %v7438_v59 = vpack.c.bf16 %v3986_v42, %v3982_v10 }
 0x5a3   :  { %v3460_v33 = vpop.f32.mrf.mxu0  ;;  %v3549_v47 = vpop.f32.mrf.mxu1 }
 0x5a4   :  { %v3317_v9 = vpop.f32.mrf.mxu2  ;;  %v3406_v3 = vpop.f32.mrf.mxu3  ;;  %v3461_v49 = vadd.f32 %v3460_v33, %v7341_v62 }
 0x5a5   :  { %v3318_v14 = vadd.f32 %v3317_v9, %v7316_v54 }
 0x5a6   :  { %v3550_v37 = vadd.f32 %v3549_v47, %v3461_v49  ;;  %3499 = vmatmul.bf16.gmra.mxu0 %v6769_v29  ;;  %3588 = vmatmul.bf16.gmra.mxu1 %v6863_v56 }
 0x5a7   :  { %v7444_v19 = vadd.f32 %v3406_v3, %v3318_v14 }
 0x5a8   :  { %v3990_v62 = vmax.f32 %v3550_v37, 0.0 }
 0x5ab   :  { %v3462_v40 = vpop.f32.mrf.mxu0  ;;  %v3551_v31 = vpop.f32.mrf.mxu1 }
 0x5ac   :  { %v3319_v26 = vpop.f32.mrf.mxu2  ;;  %v3408_v43 = vpop.f32.mrf.mxu3  ;;  %v3463_v45 = vadd.f32 %v3462_v40, %v7346_v36  ;;  %v5398_v40 = vld [vmem:[#allocation5 + $0x238] sm:$0xf0] }
 0x5ad   :  { %v3320_v13 = vadd.f32 %v3319_v26, %v7316_v54  ;;  %v5526_v26 = vld [vmem:[#allocation5 + $0x338] sm:$0xf0] }
 0x5ae   :  { %v3552_v8 = vadd.f32 %v3551_v31, %v3463_v45  ;;  %v5871_v31 = vld [vmem:[#allocation5 + $0x32c] sm:$0xf] }
 0x5af   :  { %v7448_v28 = vadd.f32 %v3408_v43, %v3320_v13  ;;  %v5529_v43 = vor.u32 %v5871_v31, %v5526_v26 }
 0x5b0   :  { %v3994_v10 = vmax.f32 %v3552_v8, 0.0  ;;  %3637 = vmatmul.bf16.gmra.mxu2 %v6447_v27  ;;  %3726 = vmatmul.bf16.gmra.mxu3 %v6552_v60  ;;  %v5839_v27 = vld [vmem:[#allocation5 + $0x22c] sm:$0xf] }
 0x5b1   :  { %v5401_v60 = vor.u32 %v5839_v27, %v5398_v40  ;;  %3897 = vmatpush.bf16.msra.mxu1 %v5529_v43  ;;  %v8510_v43 = vld [vmem:[#allocation57_spill] sm:$0xff] }
 0x5b2   :  { %v7452_v49 = vpack.c.bf16 %v3994_v10, %v3990_v62 }
 0x5b3   :  { %v3465_v14 = vpop.f32.mrf.mxu0  ;;  %v3554_v42 = vpop.f32.mrf.mxu1  ;;  %3808 = vmatpush.bf16.msra.mxu0 %v5401_v60 }
 0x5b4   :  { %v3322_v33 = vpop.f32.mrf.mxu2  ;;  %v3411_v47 = vpop.f32.mrf.mxu3  ;;  %v3466_v9 = vadd.f32 %v3465_v14, %v7357_v16 }
 0x5b5   :  { %v3323_v36 = vadd.f32 %v3322_v33, %v7316_v54 }
 0x5b6   :  { %v3555_v3 = vadd.f32 %v3554_v42, %v3466_v9  ;;  %3504 = vmatmul.bf16.gmra.mxu0 %v6781_v11  ;;  %3593 = vmatmul.bf16.gmra.mxu1 %v6877_v1 }
 0x5b7   :  { %v7458_v37 = vadd.f32 %v3411_v47, %v3323_v36 }
 0x5b8   :  { %v3998_v33 = vmax.f32 %v3555_v3, 0.0 }
 0x5bb   :  { %v3467_v45 = vpop.f32.mrf.mxu0  ;;  %v3556_v13 = vpop.f32.mrf.mxu1 }
 0x5bc   :  { %v3324_v8 = vpop.f32.mrf.mxu2  ;;  %v3413_v16 = vpop.f32.mrf.mxu3  ;;  %v3468_v62 = vadd.f32 %v3467_v45, %v7362_v17 }
 0x5bd   :  { %v3325_v10 = vadd.f32 %v3324_v8, %v7316_v54 }
 0x5be   :  { %v3557_v14 = vadd.f32 %v3556_v13, %v3468_v62 }
 0x5bf   :  { %v7462_v42 = vadd.f32 %v3413_v16, %v3325_v10 }
 0x5c0   :  { %v4002_v47 = vmax.f32 %v3557_v14, 0.0  ;;  %3642 = vmatmul.bf16.gmra.mxu2 %v6463_v63  ;;  %3731 = vmatmul.bf16.gmra.mxu3 %v6564_v4 }
 0x5c2   :  { %v7466_v9 = vpack.c.bf16 %v4002_v47, %v3998_v33  ;;  %v8511_v33 = vld [vmem:[#allocation11_spill] sm:$0xff]  ;;  %v8512_v47 = vld [vmem:[#allocation18_spill] sm:$0xff] }
 0x5c3   :  { %v3470_v36 = vpop.f32.mrf.mxu0  ;;  %v3559_v27 = vpop.f32.mrf.mxu1 }
 0x5c4   :  { %v3327_v40 = vpop.f32.mrf.mxu2  ;;  %v3416_v60 = vpop.f32.mrf.mxu3  ;;  %v3471_v17 = vadd.f32 %v3470_v36, %v7372_v48 }
 0x5c5   :  { %v3328_v31 = vadd.f32 %v3327_v40, %v7316_v54 }
 0x5c6   :  { %v3560_v26 = vadd.f32 %v3559_v27, %v3471_v17  ;;  %3509 = vmatmul.bf16.gmra.mxu0 %v6793_v50  ;;  %3598 = vmatmul.bf16.gmra.mxu1 %v8510_v43 }
 0x5c7   :  { %v7472_v3 = vadd.f32 %v3416_v60, %v3328_v31 }
 0x5c8   :  { %v4006_v48 = vmax.f32 %v3560_v26, 0.0 }
 0x5cb   :  { %v3472_v63 = vpop.f32.mrf.mxu0  ;;  %v3561_v45 = vpop.f32.mrf.mxu1 }
 0x5cc   :  { %v3329_v4 = vpop.f32.mrf.mxu2  ;;  %v3418_v13 = vpop.f32.mrf.mxu3  ;;  %v3473_v8 = vadd.f32 %v3472_v63, %v7376_v34 }
 0x5cd   :  { %v3330_v16 = vadd.f32 %v3329_v4, %v7316_v54  ;;  %v8514_v4 = vld [vmem:[#allocation58_spill] sm:$0xff] }
 0x5ce   :  { %v3562_v62 = vadd.f32 %v3561_v45, %v3473_v8  ;;  %v8513_v45 = vld [vmem:[#allocation50_spill] sm:$0xff] }
 0x5cf   :  { %v7476_v10 = vadd.f32 %v3418_v13, %v3330_v16  ;;  %v5835_v13 = vld [vmem:[#allocation5 + $0x20c] sm:$0xf]  ;;  %v5382_v8 = vld [vmem:[#allocation5 + $0x218] sm:$0xf0] }
 0x5d0   :  { %v4010_v14 = vmax.f32 %v3562_v62, 0.0  ;;  %3647 = vmatmul.bf16.gmra.mxu2 %v8511_v33  ;;  %3736 = vmatmul.bf16.gmra.mxu3 %v8512_v47  ;;  %v5385_v16 = vor.u32 %v5835_v13, %v5382_v8  ;;  %v5867_v62 = vld [vmem:[#allocation5 + $0x30c] sm:$0xf] }
 0x5d1   :  { %v8515_v8 = vld [vmem:[#allocation12_spill] sm:$0xff] }
 0x5d2   :  { %v7480_v36 = vpack.c.bf16 %v4010_v14, %v4006_v48  ;;  %v5510_v48 = vld [vmem:[#allocation5 + $0x318] sm:$0xf0]  ;;  %3809 = vmatpush.bf16.msra.mxu0 %v5385_v16  ;;  %v8516_v16 = vld [vmem:[#allocation20_spill] sm:$0xff] }
 0x5d3   :  { %v3475_v27 = vpop.f32.mrf.mxu0  ;;  %v3564_v40 = vpop.f32.mrf.mxu1  ;;  %v5513_v14 = vor.u32 %v5867_v62, %v5510_v48  ;;  %v5955_v62 = vld [vmem:[%s8247_s0 + $0x70] sm:$0xff] }
 0x5d4   :  { %v3332_v60 = vpop.f32.mrf.mxu2  ;;  %v3421_v17 = vpop.f32.mrf.mxu3  ;;  %v3476_v31 = vadd.f32 %v3475_v27, %v7386_v25 }
 0x5d5   :  { %v3333_v34 = vadd.f32 %v3332_v60, %v7316_v54  ;;  %3898 = vmatpush.bf16.msra.mxu1 %v5513_v14 }
 0x5d6   :  { %v3565_v63 = vadd.f32 %v3564_v40, %v3476_v31  ;;  %3514 = vmatmul.bf16.gmra.mxu0 %v8513_v45  ;;  %3603 = vmatmul.bf16.gmra.mxu1 %v8514_v4  ;;  %v5953_v40 = vld [vmem:[%s8247_s0 + $0x78] sm:$0xff] }
 0x5d7   :  { %v7486_v26 = vadd.f32 %v3421_v17, %v3333_v34  ;;  %5654 = vmatpush.xpose.msk.msrb.mxu0 %vm120_vm1, %v5953_v40  ;;  %v5954_v17 = vld [vmem:[%s8247_s0 + $0xf8] sm:$0xff]  ;;  %v5958_v40 = vld [vmem:[%s8247_s0 + $0xe8] sm:$0xff] }
 0x5d8   :  { %v4014_v13 = vmax.f32 %v3565_v63, 0.0 }
 0x5d9   :  { %5671 = vmatpush.xpose.msk.msrb.mxu1 %vm120_vm1, %v5954_v17  ;;  %v8518_v17 = vld [vmem:[#allocation59_spill] sm:$0xff] }
 0x5db   :  { %v3477_v33 = vpop.f32.mrf.mxu0  ;;  %v3566_v47 = vpop.f32.mrf.mxu1  ;;  %5655 = vmatpush.xpose.msk.msrb.mxu0 %vm120_vm1, %v5955_v62 }
 0x5dc   :  { %v3334_v43 = vpop.f32.mrf.mxu2  ;;  %v3423_v25 = vpop.f32.mrf.mxu3  ;;  %v3478_v27 = vadd.f32 %v3477_v33, %v7390_v32 }
 0x5dd   :  { %v3335_v60 = vadd.f32 %v3334_v43, %v7316_v54  ;;  %v5956_v43 = vld [vmem:[%s8247_s0 + $0xf0] sm:$0xff] }
 0x5de   :  { %v3567_v31 = vadd.f32 %v3566_v47, %v3478_v27  ;;  %5672 = vmatpush.xpose.msk.msrb.mxu1 %vm120_vm1, %v5956_v43  ;;  %v5957_v27 = vld [vmem:[%s8247_s0 + $0x68] sm:$0xff] }
 0x5df   :  { %v7498_v34 = vadd.f32 %v3423_v25, %v3335_v60  ;;  %5656 = vmatpush.xpose.msk.msrb.mxu0 %vm120_vm1, %v5957_v27  ;;  %v8517_v60 = vld [vmem:[#allocation52_spill] sm:$0xff] }
 0x5e0   :  { %v4018_v32 = vmax.f32 %v3567_v31, 0.0  ;;  %3652 = vmatmul.bf16.gmra.mxu2 %v8515_v8  ;;  %3741 = vmatmul.bf16.gmra.mxu3 %v8516_v16  ;;  %v5960_v8 = vld [vmem:[%s8247_s0 + $0xe0] sm:$0xff]  ;;  %v5962_v27 = vld [vmem:[%s8247_s0 + $0xd8] sm:$0xff] }
 0x5e2   :  { %v7510_v48 = vpack.c.bf16 %v4018_v32, %v4014_v13  ;;  %5673 = vmatpush.xpose.msk.msrb.mxu1 %vm120_vm1, %v5958_v40  ;;  %v5959_v32 = vld [vmem:[%s8247_s0 + $0x60] sm:$0xff] }
 0x5e3   :  { %v3480_v63 = vpop.f32.mrf.mxu0  ;;  %v3569_v14 = vpop.f32.mrf.mxu1  ;;  %5657 = vmatpush.xpose.msk.msrb.mxu0 %vm120_vm1, %v5959_v32 }
 0x5e4   :  { %v3337_v33 = vpop.f32.mrf.mxu2  ;;  %v3426_v47 = vpop.f32.mrf.mxu3  ;;  %v3481_v13 = vadd.f32 %v3480_v63, %v7400_v24  ;;  %v5961_v63 = vld [vmem:[%s8247_s0 + $0x58] sm:$0xff] }
 0x5e5   :  { %v3338_v25 = vadd.f32 %v3337_v33, %v7316_v54 }
 0x5e6   :  { %3519 = vmatmul.bf16.gmra.mxu0 %v8517_v60  ;;  %3608 = vmatmul.bf16.gmra.mxu1 %v8518_v17  ;;  %v3570_v43 = vadd.f32 %v3569_v14, %v3481_v13 }
 0x5e7   :  { %v7523_v31 = vadd.f32 %v3426_v47, %v3338_v25  ;;  %5674 = vmatpush.xpose.msk.msrb.mxu1 %vm120_vm1, %v5960_v8  ;;  %5658 = vmatpush.xpose.msk.msrb.mxu0 %vm120_vm1, %v5961_v63  ;;  %v5963_v8 = vld [vmem:[%s8247_s0 + $0x50] sm:$0xff]  ;;  %v5966_v63 = vld [vmem:[%s8247_s0 + $0xc8] sm:$0xff] }
 0x5e8   :  { %v4022_v13 = vmax.f32 %v3570_v43, 0.0 }
 0x5eb   :  { %v3482_v16 = vpop.f32.mrf.mxu0  ;;  %v3571_v62 = vpop.f32.mrf.mxu1  ;;  %5675 = vmatpush.xpose.msk.msrb.mxu1 %vm120_vm1, %v5962_v27  ;;  %5659 = vmatpush.xpose.msk.msrb.mxu0 %vm120_vm1, %v5963_v8  ;;  %v8520_v27 = vld [vmem:[#allocation53_spill] sm:$0xff] }
 0x5ec   :  { %v3339_v33 = vpop.f32.mrf.mxu2  ;;  %v3428_v47 = vpop.f32.mrf.mxu3  ;;  %v3483_v25 = vadd.f32 %v3482_v16, %v7404_v51  ;;  %v8519_v51 = vld [vmem:[#allocation22_spill] sm:$0xff]  ;;  %v5964_v16 = vld [vmem:[%s8247_s0 + $0xd0] sm:$0xff] }
 0x5ed   :  { %v3340_v24 = vadd.f32 %v3339_v33, %v7316_v54  ;;  %v5968_v8 = vld [vmem:[%s8247_s0 + $0xc0] sm:$0xff] }
 0x5ee   :  { %v3572_v40 = vadd.f32 %v3571_v62, %v3483_v25 }
 0x5ef   :  { %v7544_v14 = vadd.f32 %v3428_v47, %v3340_v24  ;;  %5676 = vmatpush.xpose.msk.msrb.mxu1 %vm120_vm1, %v5964_v16  ;;  %v5965_v24 = vld [vmem:[%s8247_s0 + $0x48] sm:$0xff] }
 0x5f0   :  { %v4026_v32 = vmax.f32 %v3572_v40, 0.0  ;;  %3657 = vmatmul.bf16.gmra.mxu2 %v8467_v46  ;;  %3746 = vmatmul.bf16.gmra.mxu3 %v8519_v51  ;;  %v8521_v40 = vld [vmem:[#allocation27_spill] sm:$0xff]  ;;  %v5967_v51 = vld [vmem:[%s8247_s0 + $0x40] sm:$0xff] }
 0x5f1   :  { %5660 = vmatpush.xpose.msk.msrb.mxu0 %vm120_vm1, %v5965_v24 }
 0x5f2   :  { %v7556_v62 = vpack.c.bf16 %v4026_v32, %v4022_v13 }
 0x5f3   :  { %v3485_v43 = vpop.f32.mrf.mxu0  ;;  %v3574_v33 = vpop.f32.mrf.mxu1  ;;  %5677 = vmatpush.xpose.msk.msrb.mxu1 %vm120_vm1, %v5966_v63 }
 0x5f4   :  { %v3342_v47 = vpop.f32.mrf.mxu2  ;;  %v3431_v46 = vpop.f32.mrf.mxu3  ;;  %v3486_v32 = vadd.f32 %v3485_v43, %v7414_v18  ;;  %v5969_v43 = vld [vmem:[%s8247_s0 + $0x38] sm:$0xff] }
 0x5f5   :  { %v3343_v25 = vadd.f32 %v3342_v47, %v7316_v54  ;;  %5661 = vmatpush.xpose.msk.msrb.mxu0 %vm120_vm1, %v5967_v51  ;;  %v5970_v51 = vld [vmem:[%s8247_s0 + $0xb8] sm:$0xff] }
 0x5f6   :  { %3524 = vmatmul.bf16.gmra.mxu0 %v8520_v27  ;;  %3613 = vmatmul.bf16.gmra.mxu1 %v8521_v40  ;;  %v3575_v24 = vadd.f32 %v3574_v33, %v3486_v32 }
 0x5f7   :  { %v7569_v13 = vadd.f32 %v3431_v46, %v3343_v25  ;;  %5678 = vmatpush.xpose.msk.msrb.mxu1 %vm120_vm1, %v5968_v8 }
 0x5f8   :  { %v4030_v32 = vmax.f32 %v3575_v24, 0.0 }
 0x5f9   :  { %5662 = vmatpush.xpose.msk.msrb.mxu0 %vm120_vm1, %v5969_v43  ;;  %v5972_v43 = vld [vmem:[%s8247_s0 + $0xb0] sm:$0xff] }
 0x5fb   :  { %v3487_v16 = vpop.f32.mrf.mxu0  ;;  %v3576_v47 = vpop.f32.mrf.mxu1  ;;  %5679 = vmatpush.xpose.msk.msrb.mxu1 %vm120_vm1, %v5970_v51 }
 0x5fc   :  { %v3344_v63 = vpop.f32.mrf.mxu2  ;;  %v3433_v46 = vpop.f32.mrf.mxu3  ;;  %v3488_v25 = vadd.f32 %v3487_v16, %v7418_v58  ;;  %v8522_v58 = vld [vmem:[#allocation14_spill] sm:$0xff]  ;;  %v8523_v16 = vld [vmem:[#allocation24_spill] sm:$0xff] }
 0x5fd   :  { %v3345_v18 = vadd.f32 %v3344_v63, %v7316_v54  ;;  %v5971_v63 = vld [vmem:[%s8247_s0 + $0x30] sm:$0xff] }
 0x5fe   :  { %v3577_v8 = vadd.f32 %v3576_v47, %v3488_v25  ;;  %5663 = vmatpush.xpose.msk.msrb.mxu0 %vm120_vm1, %v5971_v63  ;;  %v3313_v47 = vadd.f32 %v7424_v21, %v7316_v54 }
 0x5ff   :  { %v7590_v33 = vadd.f32 %v3433_v46, %v3345_v18  ;;  %5680 = vmatpush.xpose.msk.msrb.mxu1 %vm120_vm1, %v5972_v43 }
 0x600   :  { %v4034_v40 = vmax.f32 %v3577_v8, 0.0  ;;  %3662 = vmatmul.bf16.gmra.mxu2 %v8522_v58  ;;  %3751 = vmatmul.bf16.gmra.mxu3 %v8523_v16  ;;  %v5973_v58 = vld [vmem:[%s8247_s0 + $0x28] sm:$0xff]  ;;  %v3402_v21 = vadd.f32 %v7426_v53, %v3313_v47  ;;  %v5976_v53 = vld [vmem:[%s8247_s0 + $0xa0] sm:$0xff] }
 0x601   :  { %v5974_v16 = vld [vmem:[%s8247_s0 + $0xa8] sm:$0xff] }
 0x602   :  { %v7604_v24 = vpack.c.bf16 %v4034_v40, %v4030_v32  ;;  %5664 = vmatpush.xpose.msk.msrb.mxu0 %vm120_vm1, %v5973_v58  ;;  %v3315_v40 = vadd.f32 %v7431_v41, %v7316_v54  ;;  %v8524_v32 = vld [vmem:[#allocation56_spill] sm:$0xff] }
 0x603   :  { %v3490_v46 = vpop.f32.mrf.mxu0  ;;  %v3579_v25 = vpop.f32.mrf.mxu1  ;;  %5681 = vmatpush.xpose.msk.msrb.mxu1 %vm120_vm1, %v5974_v16 }
 0x604   :  { %v3347_v18 = vpop.f32.mrf.mxu2  ;;  %v3436_v51 = vpop.f32.mrf.mxu3  ;;  %v3491_v43 = vadd.f32 %v3490_v46, %v3402_v21  ;;  %v3404_v41 = vadd.f32 %v7433_v2, %v3315_v40 }
 0x605   :  { %v3348_v8 = vadd.f32 %v3347_v18, %v7316_v54  ;;  %v5975_v18 = vld [vmem:[%s8247_s0 + $0x20] sm:$0xff] }
 0x606   :  { %3529 = vmatmul.bf16.gmra.mxu0 %v8524_v32  ;;  %3618 = vmatmul.bf16.gmra.mxu1 %v8473_v12  ;;  %v3580_v16 = vadd.f32 %v3579_v25, %v3491_v43 }
 0x607   :  { %v7620_v63 = vadd.f32 %v3436_v51, %v3348_v8  ;;  %5665 = vmatpush.xpose.msk.msrb.mxu0 %vm120_vm1, %v5975_v18  ;;  %5682 = vmatpush.xpose.msk.msrb.mxu1 %vm120_vm1, %v5976_v53  ;;  %v5977_v18 = vld [vmem:[%s8247_s0 + $0x18] sm:$0xff] }
 0x608   :  { %v5978_v53 = vld [vmem:[%s8247_s0 + $0x98] sm:$0xff]  ;;  %v4038_v25 = vmax.f32 %v3580_v16, 0.0 }
 0x60b   :  { %v3492_v47 = vpop.f32.mrf.mxu0  ;;  %v3581_v58 = vpop.f32.mrf.mxu1  ;;  %5666 = vmatpush.xpose.msk.msrb.mxu0 %vm120_vm1, %v5977_v18  ;;  %5683 = vmatpush.xpose.msk.msrb.mxu1 %vm120_vm1, %v5978_v53  ;;  %v5981_v53 = vld [vmem:[%s8247_s0 + $0x8] sm:$0xff] }
 0x60c   :  { %v3349_v51 = vpop.f32.mrf.mxu2  ;;  %v3438_v8 = vpop.f32.mrf.mxu3  ;;  %v3493_v46 = vadd.f32 %v3492_v47, %v3404_v41  ;;  %v8525_v41 = vld [vmem:[#allocation26_spill] sm:$0xff]  ;;  %v5979_v47 = vld [vmem:[%s8247_s0 + $0x10] sm:$0xff] }
 0x60d   :  { %v3350_v21 = vadd.f32 %v3349_v51, %v7316_v54  ;;  %v5980_v51 = vld [vmem:[%s8247_s0 + $0x90] sm:$0xff] }
 0x60e   :  { %v3582_v2 = vadd.f32 %v3581_v58, %v3493_v46 }
 0x60f   :  { %v7640_v40 = vadd.f32 %v3438_v8, %v3350_v21  ;;  %5667 = vmatpush.xpose.msk.msrb.mxu0 %vm120_vm1, %v5979_v47  ;;  %5684 = vmatpush.xpose.msk.msrb.mxu1 %vm120_vm1, %v5980_v51 }
 0x610   :  { %v4042_v43 = vmax.f32 %v3582_v2, 0.0  ;;  %3667 = vmatmul.bf16.gmra.mxu2 %v8474_v6  ;;  %3756 = vmatmul.bf16.gmra.mxu3 %v8525_v41  ;;  %v5982_v2 = vld [vmem:[%s8247_s0 + $0x88] sm:$0xff]  ;;  %v5984_v41 = vld [vmem:[%s8247_s0 + $0x80] sm:$0xff] }
 0x612   :  { %v4140_v58 = vpack.c.bf16 %v4042_v43, %v4038_v25  ;;  %v5983_v43 = vld [vmem:[%s8247_s0] sm:$0xff] }
 0x613   :  { %v3495_v8 = vpop.f32.mrf.mxu0  ;;  %v3584_v16 = vpop.f32.mrf.mxu1  ;;  %5668 = vmatpush.xpose.msk.msrb.mxu0 %vm120_vm1, %v5981_v53  ;;  %5685 = vmatpush.xpose.msk.msrb.mxu1 %vm120_vm1, %v5982_v2 }
 0x614   :  { %v3352_v46 = vpop.f32.mrf.mxu2  ;;  %v3441_v21 = vpop.f32.mrf.mxu3  ;;  %v3496_v6 = vadd.f32 %v3495_v8, %v7444_v19  ;;  %4220 = vmatpush.bf16.xpose.msrb.mxu2 %v4140_v58 }
 0x615   :  { %v3353_v18 = vadd.f32 %v3352_v46, %v7316_v54 }
 0x616   :  { %v3585_v25 = vadd.f32 %v3584_v16, %v3496_v6  ;;  %3810 = vmatmul.bf16.vlgmr.msra.gmra.mxu0 %v8476_v61  ;;  %3899 = vmatmul.bf16.vlgmr.msra.gmra.mxu1 %v8477_v7 }
 0x617   :  { %v7664_v19 = vadd.f32 %v3441_v21, %v3353_v18  ;;  %5669 = vmatpush.xpose.msk.msrb.mxu0 %vm120_vm1, %v5983_v43  ;;  %5686 = vmatpush.xpose.msk.msrb.mxu1 %vm120_vm1, %v5984_v41  ;;  %v8526_v18 = vld [vmem:[#allocation41_spill] sm:$0xff] }
 0x618   :  { %v4046_v21 = vmax.f32 %v3585_v25, 0.0  ;;  %v7682_v53 = vperm.slane %v8526_v18, 3 }
 0x61b   :  { %v3497_v47 = vpop.f32.mrf.mxu0  ;;  %v3586_v51 = vpop.f32.mrf.mxu1 }
 0x61c   :  { %v3354_v58 = vpop.f32.mrf.mxu2  ;;  %v3443_v61 = vpop.f32.mrf.mxu3  ;;  %v3498_v7 = vadd.f32 %v3497_v47, %v7448_v28  ;;  %4221 = vmatpush.bf16.xpose.msrb.mxu2 %v7604_v24 }
 0x61d   :  { %v3355_v8 = vadd.f32 %v3354_v58, %v7316_v54 }
 0x61e   :  { %v3587_v16 = vadd.f32 %v3586_v51, %v3498_v7  ;;  %v8527_v51 = vld [vmem:[#allocation33_spill] sm:$0xff] }
 0x61f   :  { %v7677_v46 = vadd.f32 %v3443_v61, %v3355_v8 }
 0x620   :  { %v4050_v6 = vmax.f32 %v3587_v16, 0.0  ;;  %3672 = vmatmul.bf16.gmra.mxu2 %v8478_v38  ;;  %3761 = vmatmul.bf16.gmra.mxu3 %v8479_v55  ;;  %v8528_v38 = vld [vmem:[#allocation44_spill] sm:$0xff] }
 0x622   :  { %v7684_v2 = vpack.c.bf16 %v4050_v6, %v4046_v21 }
 0x623   :  { %v3500_v43 = vpop.f32.mrf.mxu0  ;;  %v3589_v28 = vpop.f32.mrf.mxu1 }
 0x624   :  { %v3501_v24 = vadd.f32 %v3500_v43, %v7458_v37  ;;  %v3633_v41 = vpop.f32.mrf.mxu2  ;;  %v3722_v54 = vpop.f32.mrf.mxu3  ;;  %4222 = vmatpush.bf16.xpose.msrb.mxu2 %v7556_v62  ;;  %v8529_v43 = vld [vmem:[#allocation30_spill] sm:$0xff] }
 0x625   :  { %v3634_v25 = vadd.f32 %v3633_v41, %v7682_v53 }
 0x626   :  { %v3590_v47 = vadd.f32 %v3589_v28, %v3501_v24  ;;  %3815 = vmatmul.bf16.gmra.mxu0 %v8527_v51  ;;  %3904 = vmatmul.bf16.gmra.mxu1 %v8528_v38 }
 0x627   :  { %v7691_v55 = vadd.f32 %v3722_v54, %v3634_v25 }
 0x628   :  { %v4054_v6 = vmax.f32 %v3590_v47, 0.0  ;;  %v8530_v47 = vld [vmem:[#allocation46_spill] sm:$0xff] }
 0x62b   :  { %v3502_v58 = vpop.f32.mrf.mxu0  ;;  %v3591_v61 = vpop.f32.mrf.mxu1 }
 0x62c   :  { %v3503_v7 = vadd.f32 %v3502_v58, %v7462_v42  ;;  %v3635_v8 = vpop.f32.mrf.mxu2  ;;  %v3724_v16 = vpop.f32.mrf.mxu3  ;;  %4223 = vmatpush.bf16.xpose.msrb.mxu2 %v7510_v48 }
 0x62d   :  { %v3636_v37 = vadd.f32 %v3635_v8, %v7682_v53 }
 0x62e   :  { %v3592_v62 = vadd.f32 %v3591_v61, %v3503_v7 }
 0x62f   :  { %v7696_v21 = vadd.f32 %v3724_v16, %v3636_v37 }
 0x630   :  { %v4058_v18 = vmax.f32 %v3592_v62, 0.0  ;;  %3677 = vmatmul.bf16.gmra.mxu2 %v8484_v22  ;;  %3766 = vmatmul.bf16.gmra.mxu3 %v8529_v43 }
 0x632   :  { %v7700_v28 = vpack.c.bf16 %v4058_v18, %v4054_v6 }
 0x633   :  { %v3505_v24 = vpop.f32.mrf.mxu0  ;;  %v3594_v41 = vpop.f32.mrf.mxu1 }
 0x634   :  { %v3506_v42 = vadd.f32 %v3505_v24, %v7472_v3  ;;  %v3638_v54 = vpop.f32.mrf.mxu2  ;;  %v3727_v25 = vpop.f32.mrf.mxu3  ;;  %4224 = vmatpush.bf16.xpose.msrb.mxu2 %v7480_v36 }
 0x635   :  { %v3639_v48 = vadd.f32 %v3638_v54, %v7682_v53  ;;  %v8532_v54 = vld [vmem:[#allocation47_spill] sm:$0xff] }
 0x636   :  { %v3595_v51 = vadd.f32 %v3594_v41, %v3506_v42  ;;  %3820 = vmatmul.bf16.gmra.mxu0 %v8487_v23  ;;  %3909 = vmatmul.bf16.gmra.mxu1 %v8530_v47  ;;  %v8531_v42 = vld [vmem:[#allocation37_spill] sm:$0xff] }
 0x637   :  { %v7707_v22 = vadd.f32 %v3727_v25, %v3639_v48 }
 0x638   :  { %v4062_v37 = vmax.f32 %v3595_v51, 0.0 }
 0x63b   :  { %v3507_v38 = vpop.f32.mrf.mxu0  ;;  %v3596_v58 = vpop.f32.mrf.mxu1 }
 0x63c   :  { %v3508_v61 = vadd.f32 %v3507_v38, %v7476_v10  ;;  %v3640_v7 = vpop.f32.mrf.mxu2  ;;  %v3729_v8 = vpop.f32.mrf.mxu3  ;;  %4225 = vmatpush.bf16.xpose.msrb.mxu2 %v7466_v9 }
 0x63d   :  { %v3641_v3 = vadd.f32 %v3640_v7, %v7682_v53  ;;  %v8533_v7 = vld [vmem:[#allocation21_spill] sm:$0xff] }
 0x63e   :  { %v3597_v36 = vadd.f32 %v3596_v58, %v3508_v61 }
 0x63f   :  { %v7712_v16 = vadd.f32 %v3729_v8, %v3641_v3  ;;  %v8534_v8 = vld [vmem:[#allocation34_spill] sm:$0xff] }
 0x640   :  { %v4066_v62 = vmax.f32 %v3597_v36, 0.0  ;;  %3682 = vmatmul.bf16.gmra.mxu2 %v8489_v44  ;;  %3771 = vmatmul.bf16.gmra.mxu3 %v8490_v57 }
 0x642   :  { %v7716_v23 = vpack.c.bf16 %v4066_v62, %v4062_v37 }
 0x643   :  { %v3510_v6 = vpop.f32.mrf.mxu0  ;;  %v3599_v18 = vpop.f32.mrf.mxu1 }
 0x644   :  { %v3511_v10 = vadd.f32 %v3510_v6, %v7486_v26  ;;  %v3643_v43 = vpop.f32.mrf.mxu2  ;;  %v3732_v24 = vpop.f32.mrf.mxu3  ;;  %4226 = vmatpush.bf16.xpose.msrb.mxu2 %v7452_v49 }
 0x645   :  { %v3644_v9 = vadd.f32 %v3643_v43, %v7682_v53  ;;  %v8536_v43 = vld [vmem:[#allocation48_spill] sm:$0xff] }
 0x646   :  { %v3600_v41 = vadd.f32 %v3599_v18, %v3511_v10  ;;  %3825 = vmatmul.bf16.gmra.mxu0 %v8531_v42  ;;  %3914 = vmatmul.bf16.gmra.mxu1 %v8532_v54  ;;  %v8535_v10 = vld [vmem:[#allocation39_spill] sm:$0xff] }
 0x647   :  { %v7723_v44 = vadd.f32 %v3732_v24, %v3644_v9 }
 0x648   :  { %v4070_v58 = vmax.f32 %v3600_v41, 0.0 }
 0x64b   :  { %v3512_v57 = vpop.f32.mrf.mxu0  ;;  %v3601_v25 = vpop.f32.mrf.mxu1 }
 0x64c   :  { %v3513_v48 = vadd.f32 %v3512_v57, %v7498_v34  ;;  %v3645_v51 = vpop.f32.mrf.mxu2  ;;  %v3734_v47 = vpop.f32.mrf.mxu3  ;;  %4227 = vmatpush.bf16.xpose.msrb.mxu2 %v7438_v59 }
 0x64d   :  { %v3646_v26 = vadd.f32 %v3645_v51, %v7682_v53 }
 0x64e   :  { %v3602_v49 = vadd.f32 %v3601_v25, %v3513_v48 }
 0x64f   :  { %v7728_v38 = vadd.f32 %v3734_v47, %v3646_v26  ;;  %v8537_v26 = vld [vmem:[#allocation23_spill] sm:$0xff] }
 0x650   :  { %v4074_v61 = vmax.f32 %v3602_v49, 0.0  ;;  %3687 = vmatmul.bf16.gmra.mxu2 %v8533_v7  ;;  %3776 = vmatmul.bf16.gmra.mxu3 %v8534_v8  ;;  %v8538_v49 = vld [vmem:[#allocation36_spill] sm:$0xff] }
 0x652   :  { %v7732_v3 = vpack.c.bf16 %v4074_v61, %v4070_v58 }
 0x653   :  { %v3515_v36 = vpop.f32.mrf.mxu0  ;;  %v3604_v37 = vpop.f32.mrf.mxu1 }
 0x654   :  { %v3516_v34 = vadd.f32 %v3515_v36, %v7523_v31  ;;  %v3648_v62 = vpop.f32.mrf.mxu2  ;;  %v3737_v6 = vpop.f32.mrf.mxu3 }
 0x655   :  { %v3649_v59 = vadd.f32 %v3648_v62, %v7682_v53  ;;  %v8539_v62 = vld [vmem:[#allocation40_spill] sm:$0xff] }
 0x656   :  { %v3605_v18 = vadd.f32 %v3604_v37, %v3516_v34  ;;  %3830 = vmatmul.bf16.gmra.mxu0 %v8535_v10  ;;  %3919 = vmatmul.bf16.gmra.mxu1 %v8536_v43 }
 0x657   :  { %v7738_v24 = vadd.f32 %v3737_v6, %v3649_v59  ;;  %v8540_v6 = vld [vmem:[#allocation49_spill] sm:$0xff] }
 0x658   :  { %v4078_v51 = vmax.f32 %v3605_v18, 0.0 }
 0x65b   :  { %v3517_v9 = vpop.f32.mrf.mxu0  ;;  %v3606_v41 = vpop.f32.mrf.mxu1 }
 0x65c   :  { %v3518_v42 = vadd.f32 %v3517_v9, %v7544_v14  ;;  %v3650_v54 = vpop.f32.mrf.mxu2  ;;  %v3739_v57 = vpop.f32.mrf.mxu3 }
 0x65d   :  { %v3651_v25 = vadd.f32 %v3650_v54, %v7682_v53 }
 0x65e   :  { %v3607_v31 = vadd.f32 %v3606_v41, %v3518_v42 }
 0x65f   :  { %v7742_v48 = vadd.f32 %v3739_v57, %v3651_v25  ;;  %v8541_v57 = vld [vmem:[#allocation38_spill] sm:$0xff] }
 0x660   :  { %v4082_v47 = vmax.f32 %v3607_v31, 0.0  ;;  %3692 = vmatmul.bf16.gmra.mxu2 %v8537_v26  ;;  %3781 = vmatmul.bf16.gmra.mxu3 %v8538_v49 }
 0x662   :  { %v7746_v58 = vpack.c.bf16 %v4082_v47, %v4078_v51 }
 0x663   :  { %v3520_v61 = vpop.f32.mrf.mxu0  ;;  %v3609_v7 = vpop.f32.mrf.mxu1 }
 0x664   :  { %v3521_v8 = vadd.f32 %v3520_v61, %v7569_v13  ;;  %v3653_v14 = vpop.f32.mrf.mxu2  ;;  %v3742_v36 = vpop.f32.mrf.mxu3  ;;  %v8542_v61 = vld [vmem:[#allocation51_spill] sm:$0xff] }
 0x665   :  { %v3654_v37 = vadd.f32 %v3653_v14, %v7682_v53 }
 0x666   :  { %v3610_v34 = vadd.f32 %v3609_v7, %v3521_v8  ;;  %3835 = vmatmul.bf16.gmra.mxu0 %v8539_v62  ;;  %3924 = vmatmul.bf16.gmra.mxu1 %v8540_v6 }
 0x667   :  { %v7752_v59 = vadd.f32 %v3742_v36, %v3654_v37 }
 0x668   :  { %v4086_v42 = vmax.f32 %v3610_v34, 0.0 }
 0x66b   :  { %v3522_v18 = vpop.f32.mrf.mxu0  ;;  %v3611_v10 = vpop.f32.mrf.mxu1 }
 0x66c   :  { %v3523_v43 = vadd.f32 %v3522_v18, %v7590_v33  ;;  %v7755_v9 = vpop.f32.mrf.mxu2  ;;  %v7757_v41 = vpop.f32.mrf.mxu3 }
 0x66e   :  { %v3612_v13 = vadd.f32 %v3611_v10, %v3523_v43 }
 0x670   :  { %v4090_v54 = vmax.f32 %v3612_v13, 0.0  ;;  %3697 = vmatmul.bf16.gmra.mxu2 %v8504_v5  ;;  %3786 = vmatmul.bf16.gmra.mxu3 %v8541_v57 }
 0x672   :  { %v7761_v25 = vpack.c.bf16 %v4090_v54, %v4086_v42 }
 0x673   :  { %v3525_v31 = vpop.f32.mrf.mxu0  ;;  %v3614_v51 = vpop.f32.mrf.mxu1 }
 0x674   :  { %v3526_v47 = vadd.f32 %v3525_v31, %v7620_v63  ;;  %v7764_v26 = vpop.f32.mrf.mxu2  ;;  %v7766_v33 = vpop.f32.mrf.mxu3 }
 0x676   :  { %v3615_v49 = vadd.f32 %v3614_v51, %v3526_v47  ;;  %3840 = vmatmul.bf16.gmra.mxu0 %v8507_v30  ;;  %3929 = vmatmul.bf16.gmra.mxu1 %v8542_v61  ;;  %v7803_v61 = vld [vmem:[%s8257_s10] sm:$0xff] }
 0x678   :  { %v4094_v34 = vmax.f32 %v3615_v49, 0.0 }
 0x67b   :  { %v3527_v7 = vpop.f32.mrf.mxu0  ;;  %v3616_v8 = vpop.f32.mrf.mxu1 }
 0x67c   :  { %v3528_v5 = vadd.f32 %v3527_v7, %v7640_v40  ;;  %v7771_v14 = vpop.f32.mrf.mxu2  ;;  %v7773_v36 = vpop.f32.mrf.mxu3 }
 0x67e   :  { %v3617_v37 = vadd.f32 %v3616_v8, %v3528_v5  ;;  %v8543_v8 = vld [vmem:[#allocation45_spill] sm:$0xff] }
 0x680   :  { %v4098_v63 = vmax.f32 %v3617_v37, 0.0  ;;  %3702 = vmatmul.bf16.gmra.mxu2 %v8411_v35  ;;  %3791 = vmatmul.bf16.gmra.mxu3 %v6716_v0 }
 0x682   :  { %v7777_v62 = vpack.c.bf16 %v4098_v63, %v4094_v34 }
 0x683   :  { %v3530_v30 = vpop.f32.mrf.mxu0  ;;  %v3619_v6 = vpop.f32.mrf.mxu1 }
 0x684   :  { %v3531_v18 = vadd.f32 %v3530_v30, %v7664_v19  ;;  %v7780_v10 = vpop.f32.mrf.mxu2  ;;  %v7782_v40 = vpop.f32.mrf.mxu3 }
 0x686   :  { %v3620_v43 = vadd.f32 %v3619_v6, %v3531_v18  ;;  %3845 = vmatmul.bf16.gmra.mxu0 %v6745_v52  ;;  %3934 = vmatmul.bf16.gmra.mxu1 %v6827_v15 }
 0x688   :  { %v4102_v31 = vmax.f32 %v3620_v43, 0.0 }
 0x68b   :  { %v3532_v13 = vpop.f32.mrf.mxu0  ;;  %v3621_v42 = vpop.f32.mrf.mxu1 }
 0x68c   :  { %v3533_v35 = vadd.f32 %v3532_v13, %v7677_v46  ;;  %v7787_v0 = vpop.f32.mrf.mxu2  ;;  %v7789_v54 = vpop.f32.mrf.mxu3  ;;  %v8545_v13 = vld [vmem:[#allocation29_spill] sm:$0xff] }
 0x68e   :  { %v3622_v57 = vadd.f32 %v3621_v42, %v3533_v35 }
 0x690   :  { %v4106_v19 = vmax.f32 %v3622_v57, 0.0  ;;  %3707 = vmatmul.bf16.gmra.mxu2 %v8456_v39  ;;  %3796 = vmatmul.bf16.gmra.mxu3 %v8457_v20  ;;  %v8544_v39 = vld [vmem:[#allocation55_spill] sm:$0xff]  ;;  %v4182_v20 = vunpack.c.l.b16 %v7803_v61 }
 0x692   :  { %v7793_v51 = vpack.c.bf16 %v4106_v19, %v4102_v31  ;;  %v7813_v30 = vpack.c.b16 %v4182_v20, %v4182_v20 }
 0x693   :  { %v3811_v52 = vpop.f32.mrf.mxu0  ;;  %v3900_v47 = vpop.f32.mrf.mxu1 }
 0x694   :  { %v7795_v15 = vpop.f32.mrf.mxu2  ;;  %v7797_v49 = vpop.f32.mrf.mxu3  ;;  %v3812_v46 = vadd.f32 %v3811_v52, %v7691_v55 }
 0x696   :  { %v3901_v7 = vadd.f32 %v3900_v47, %v3812_v46  ;;  %3850 = vmatmul.bf16.gmra.mxu0 %v8543_v8  ;;  %3939 = vmatmul.bf16.gmra.mxu1 %v8544_v39  ;;  %v8547_v47 = vld [vmem:[#allocation69_spill] sm:$0xff] }
 0x698   :  { %v3983_v18 = vmax.f32 %v3901_v7, 0.0 }
 0x69b   :  { %v3813_v5 = vpop.f32.mrf.mxu0  ;;  %v3902_v37 = vpop.f32.mrf.mxu1 }
 0x69c   :  { %v7808_v34 = vpop.f32.mrf.mxu2  ;;  %v7810_v63 = vpop.f32.mrf.mxu3  ;;  %v3814_v55 = vadd.f32 %v3813_v5, %v7696_v21 }
 0x69e   :  { %v3903_v6 = vadd.f32 %v3902_v37, %v3814_v55 }
 0x6a0   :  { %v3987_v43 = vmax.f32 %v3903_v6, 0.0  ;;  %4202 = vmatmul.bf16.vlgmr.msra.gmra.mxu2 %v7813_v30  ;;  %v8548_v6 = vld [vmem:[#allocation68_spill] sm:$0xff] }
 0x6a1   :  { %4246 = vmatpush.bf16.xpose.msra.mxu2 %v8545_v13 }
 0x6a2   :  { %v7817_v42 = vpack.c.bf16 %v3987_v43, %v3983_v18 }
 0x6a3   :  { %v3816_v35 = vpop.f32.mrf.mxu0  ;;  %v3905_v57 = vpop.f32.mrf.mxu1 }
 0x6a4   :  { %8546 = vst [vmem:[#allocation16_spill] sm:$0xff] %v7817_v42  ;;  %v7819_v31 = vpop.f32.mrf.mxu2  ;;  %v7821_v19 = vpop.f32.mrf.mxu3  ;;  %v3817_v52 = vadd.f32 %v3816_v35, %v7707_v22  ;;  %v7843_v35 = vld [vmem:[%s8257_s10 + $0x8] sm:$0xff] }
 0x6a5   :  { %8549 = vst [vmem:[#allocation28_spill] sm:$0xff] %v7843_v35 }
 0x6a6   :  { %v3906_v21 = vadd.f32 %v3905_v57, %v3817_v52  ;;  %3855 = vmatmul.bf16.gmra.mxu0 %v6769_v29  ;;  %3944 = vmatmul.bf16.gmra.mxu1 %v6863_v56  ;;  %v4184_v57 = vunpack.c.l.b16 %v7843_v35  ;;  %v8552_v35 = vld [vmem:[#allocation57_spill] sm:$0xff] }
 0x6a8   :  { %v3991_v37 = vmax.f32 %v3906_v21, 0.0  ;;  %v7848_v52 = vpack.c.b16 %v4184_v57, %v4184_v57  ;;  %v8550_v21 = vld [vmem:[#allocation67_spill] sm:$0xff] }
 0x6a9   :  { %4247 = vmatpush.bf16.xpose.msra.mxu2 %v8547_v47 }
 0x6ab   :  { %v3818_v46 = vpop.f32.mrf.mxu0  ;;  %v3907_v7 = vpop.f32.mrf.mxu1 }
 0x6ac   :  { %v7827_v8 = vpop.f32.mrf.mxu2  ;;  %v7829_v39 = vpop.f32.mrf.mxu3  ;;  %v3819_v20 = vadd.f32 %v3818_v46, %v7712_v16 }
 0x6ae   :  { %v3908_v5 = vadd.f32 %v3907_v7, %v3819_v20 }
 0x6b0   :  { %v3995_v55 = vmax.f32 %v3908_v5, 0.0  ;;  %4228 = vmatmul.bf16.vlgmr.msrb.gmra.mxu2 %v7848_v52 }
 0x6b1   :  { %4248 = vmatpush.bf16.xpose.msra.mxu2 %v8548_v6 }
 0x6b2   :  { %v7833_v22 = vpack.c.bf16 %v3995_v55, %v3991_v37 }
 0x6b3   :  { %v3821_v29 = vpop.f32.mrf.mxu0  ;;  %v3910_v18 = vpop.f32.mrf.mxu1 }
 0x6b4   :  { %v7835_v56 = vpop.f32.mrf.mxu2  ;;  %v7837_v43 = vpop.f32.mrf.mxu3  ;;  %v3822_v13 = vadd.f32 %v3821_v29, %v7723_v44 }
 0x6b6   :  { %v3911_v16 = vadd.f32 %v3910_v18, %v3822_v13  ;;  %3860 = vmatmul.bf16.gmra.mxu0 %v6781_v11  ;;  %3949 = vmatmul.bf16.gmra.mxu1 %v6877_v1  ;;  %v8551_v1 = vld [vmem:[#allocation66_spill] sm:$0xff] }
 0x6b8   :  { %v3999_v11 = vmax.f32 %v3911_v16, 0.0  ;;  %v8553_v16 = vld [vmem:[#allocation65_spill] sm:$0xff] }
 0x6b9   :  { %4249 = vmatpush.bf16.xpose.msra.mxu2 %v8550_v21 }
 0x6bb   :  { %v3823_v47 = vpop.f32.mrf.mxu0  ;;  %v3912_v44 = vpop.f32.mrf.mxu1 }
 0x6bc   :  { %v7852_v46 = vpop.f32.mrf.mxu2  ;;  %v7854_v7 = vpop.f32.mrf.mxu3  ;;  %v3824_v20 = vadd.f32 %v3823_v47, %v7728_v38 }
 0x6be   :  { %v3913_v5 = vadd.f32 %v3912_v44, %v3824_v20 }
 0x6c0   :  { %v4003_v37 = vmax.f32 %v3913_v5, 0.0 }
 0x6c1   :  { %4250 = vmatpush.bf16.xpose.msra.mxu2 %v8551_v1 }
 0x6c2   :  { %v7858_v55 = vpack.c.bf16 %v4003_v37, %v3999_v11 }
 0x6c3   :  { %v3826_v6 = vpop.f32.mrf.mxu0  ;;  %v3915_v29 = vpop.f32.mrf.mxu1 }
 0x6c4   :  { %v3683_v18 = vpop.f32.mrf.mxu2  ;;  %v3772_v13 = vpop.f32.mrf.mxu3  ;;  %v3827_v57 = vadd.f32 %v3826_v6, %v7738_v24 }
 0x6c5   :  { %v3684_v21 = vadd.f32 %v3683_v18, %v7682_v53 }
 0x6c6   :  { %v3916_v42 = vadd.f32 %v3915_v29, %v3827_v57  ;;  %3865 = vmatmul.bf16.gmra.mxu0 %v6793_v50  ;;  %3954 = vmatmul.bf16.gmra.mxu1 %v8552_v35  ;;  %v8554_v50 = vld [vmem:[#allocation64_spill] sm:$0xff] }
 0x6c7   :  { %v7864_v38 = vadd.f32 %v3772_v13, %v3684_v21 }
 0x6c8   :  { %v4007_v6 = vmax.f32 %v3916_v42, 0.0 }
 0x6c9   :  { %4251 = vmatpush.bf16.xpose.msra.mxu2 %v8553_v16 }
 0x6cb   :  { %v3828_v47 = vpop.f32.mrf.mxu0  ;;  %v3917_v44 = vpop.f32.mrf.mxu1 }
 0x6cc   :  { %v3685_v20 = vpop.f32.mrf.mxu2  ;;  %v3774_v5 = vpop.f32.mrf.mxu3  ;;  %v3829_v11 = vadd.f32 %v3828_v47, %v7742_v48  ;;  %v3656_v48 = vadd.f32 %v7755_v9, %v7682_v53 }
 0x6cd   :  { %v3686_v37 = vadd.f32 %v3685_v20, %v7682_v53 }
 0x6ce   :  { %v3918_v24 = vadd.f32 %v3917_v44, %v3829_v11  ;;  %v8555_v44 = vld [vmem:[#allocation54_spill] sm:$0xff]  ;;  %v3745_v20 = vadd.f32 %v7757_v41, %v3656_v48 }
 0x6cf   :  { %v7869_v1 = vadd.f32 %v3774_v5, %v3686_v37 }
 0x6d0   :  { %v4011_v29 = vmax.f32 %v3918_v24, 0.0 }
 0x6d1   :  { %4252 = vmatpush.bf16.xpose.msra.mxu2 %v8554_v50 }
 0x6d2   :  { %v7872_v35 = vpack.c.bf16 %v4011_v29, %v4007_v6 }
 0x6d3   :  { %v3831_v18 = vpop.f32.mrf.mxu0  ;;  %v3920_v13 = vpop.f32.mrf.mxu1 }
 0x6d4   :  { %v3688_v57 = vpop.f32.mrf.mxu2  ;;  %v3777_v21 = vpop.f32.mrf.mxu3  ;;  %v3832_v42 = vadd.f32 %v3831_v18, %v7752_v59  ;;  %v3659_v59 = vadd.f32 %v7764_v26, %v7682_v53 }
 0x6d5   :  { %v3689_v16 = vadd.f32 %v3688_v57, %v7682_v53 }
 0x6d6   :  { %3870 = vmatmul.bf16.gmra.mxu0 %v8513_v45  ;;  %3959 = vmatmul.bf16.gmra.mxu1 %v8514_v4  ;;  %v3921_v37 = vadd.f32 %v3920_v13, %v3832_v42  ;;  %v3748_v48 = vadd.f32 %v7766_v33, %v3659_v59  ;;  %v3661_v42 = vadd.f32 %v7771_v14, %v7682_v53 }
 0x6d7   :  { %v7879_v47 = vadd.f32 %v3777_v21, %v3689_v16 }
 0x6d8   :  { %v4015_v50 = vmax.f32 %v3921_v37, 0.0 }
 0x6d9   :  { %4253 = vmatpush.bf16.xpose.msra.mxu2 %v8555_v44 }
 0x6db   :  { %v3833_v5 = vpop.f32.mrf.mxu0  ;;  %v3922_v11 = vpop.f32.mrf.mxu1 }
 0x6dc   :  { %v3690_v24 = vpop.f32.mrf.mxu2  ;;  %v3779_v6 = vpop.f32.mrf.mxu3  ;;  %v3834_v9 = vadd.f32 %v3833_v5, %v3745_v20 }
 0x6dd   :  { %v3691_v45 = vadd.f32 %v3690_v24, %v7682_v53 }
 0x6de   :  { %v3923_v29 = vadd.f32 %v3922_v11, %v3834_v9 }
 0x6df   :  { %v7886_v4 = vadd.f32 %v3779_v6, %v3691_v45 }
 0x6e0   :  { %v4019_v57 = vmax.f32 %v3923_v29, 0.0  ;;  %4254 = vmatmul.bf16.vlgmr.msra.gmra.mxu2 %v7813_v30  ;;  %v3750_v30 = vadd.f32 %v7773_v36, %v3661_v42 }
 0x6e1   :  { %4272 = vmatpush.bf16.xpose.msrb.mxu2 %v7793_v51 }
 0x6e2   :  { %v7892_v41 = vpack.c.bf16 %v4019_v57, %v4015_v50  ;;  %v3669_v57 = vadd.f32 %v7795_v15, %v7682_v53  ;;  %v3664_v15 = vadd.f32 %v7780_v10, %v7682_v53 }
 0x6e3   :  { %v3836_v51 = vpop.f32.mrf.mxu0  ;;  %v3925_v18 = vpop.f32.mrf.mxu1 }
 0x6e4   :  { %v3693_v13 = vpop.f32.mrf.mxu2  ;;  %v3782_v21 = vpop.f32.mrf.mxu3 }
 0x6e5   :  { %v3694_v16 = vadd.f32 %v3693_v13, %v7682_v53 }
 0x6e6   :  { %3875 = vmatmul.bf16.gmra.mxu0 %v8517_v60  ;;  %3964 = vmatmul.bf16.gmra.mxu1 %v8518_v17 }
 0x6e7   :  { %v7900_v26 = vadd.f32 %v3782_v21, %v3694_v16 }
 0x6e9   :  { %4273 = vmatpush.bf16.xpose.msrb.mxu2 %v7777_v62  ;;  %v3837_v62 = vadd.f32 %v3836_v51, %v3748_v48 }
 0x6eb   :  { %v3838_v44 = vpop.f32.mrf.mxu0  ;;  %v3927_v20 = vpop.f32.mrf.mxu1  ;;  %v3926_v5 = vadd.f32 %v3925_v18, %v3837_v62  ;;  %v3758_v18 = vadd.f32 %v7797_v49, %v3669_v57 }
 0x6ec   :  { %v3695_v11 = vpop.f32.mrf.mxu2  ;;  %v3839_v37 = vadd.f32 %v3838_v44, %v3750_v30  ;;  %v3784_v24 = vpop.f32.mrf.mxu3 }
 0x6ed   :  { %v3696_v33 = vadd.f32 %v3695_v11, %v7682_v53  ;;  %v4023_v60 = vmax.f32 %v3926_v5, 0.0 }
 0x6ee   :  { %v3928_v14 = vadd.f32 %v3927_v20, %v3839_v37 }
 0x6ef   :  { %v7905_v6 = vadd.f32 %v3784_v24, %v3696_v33 }
 0x6f0   :  { %v4027_v17 = vmax.f32 %v3928_v14, 0.0 }
 0x6f1   :  { %4274 = vmatpush.bf16.xpose.msrb.mxu2 %v7761_v25  ;;  %v8556_v25 = vld [vmem:[#allocation27_spill] sm:$0xff] }
 0x6f2   :  { %v7907_v9 = vpack.c.bf16 %v4027_v17, %v4023_v60 }
 0x6f3   :  { %v3841_v36 = vpop.f32.mrf.mxu0  ;;  %v3930_v45 = vpop.f32.mrf.mxu1 }
 0x6f6   :  { %3880 = vmatmul.bf16.gmra.mxu0 %v8520_v27  ;;  %3969 = vmatmul.bf16.gmra.mxu1 %v8556_v25  ;;  %v3666_v27 = vadd.f32 %v7787_v0, %v7682_v53 }
 0x6f8   :  { %v3755_v21 = vadd.f32 %v7789_v54, %v3666_v27 }
 0x6f9   :  { %4275 = vmatpush.bf16.xpose.msrb.mxu2 %v7746_v58  ;;  %v3671_v58 = vadd.f32 %v7808_v34, %v7682_v53 }
 0x6fb   :  { %v3843_v29 = vpop.f32.mrf.mxu0  ;;  %v3932_v50 = vpop.f32.mrf.mxu1 }
 0x6fc   :  { %v3844_v0 = vadd.f32 %v3843_v29, %v3755_v21 }
 0x6fe   :  { %v3933_v30 = vadd.f32 %v3932_v50, %v3844_v0 }
 0x701   :  { %4276 = vmatpush.bf16.xpose.msrb.mxu2 %v7732_v3 }
 0x703   :  { %v3846_v59 = vpop.f32.mrf.mxu0  ;;  %v3935_v51 = vpop.f32.mrf.mxu1 }
 0x704   :  { %v3847_v3 = vadd.f32 %v3846_v59, %v3758_v18 }
 0x706   :  { %3885 = vmatmul.bf16.gmra.mxu0 %v8524_v32  ;;  %3974 = vmatmul.bf16.gmra.mxu1 %v8473_v12  ;;  %v3936_v34 = vadd.f32 %v3935_v51, %v3847_v3  ;;  %v3753_v32 = vadd.f32 %v7782_v40, %v3664_v15  ;;  %v3674_v12 = vadd.f32 %v7819_v31, %v7682_v53  ;;  %v4035_v31 = vmax.f32 %v3933_v30, 0.0 }
 0x707   :  { %v3676_v40 = vadd.f32 %v7827_v8, %v7682_v53  ;;  %v4183_v8 = vunpack.c.h.b16 %v7803_v61  ;;  %v4318_v51 = vlaneseq }
 0x708   :  { %v3842_v42 = vadd.f32 %v3841_v36, %v3753_v32  ;;  %v4039_v62 = vmax.f32 %v3936_v34, 0.0 }
 0x709   :  { %4277 = vmatpush.bf16.xpose.msrb.mxu2 %v7716_v23  ;;  %v3760_v23 = vadd.f32 %v7810_v63, %v3671_v58  ;;  %v3763_v63 = vadd.f32 %v7821_v19, %v3674_v12  ;;  %v3765_v33 = vadd.f32 %v7829_v39, %v3676_v40  ;;  %v7950_v18 = vshrl.u32 %v4318_v51, 7 }
 0x70a   :  { %v3931_v20 = vadd.f32 %v3930_v45, %v3842_v42 }
 0x70b   :  { %v3848_v13 = vpop.f32.mrf.mxu0  ;;  %v3937_v49 = vpop.f32.mrf.mxu1  ;;  %v7954_v3 = vadd.s32 24, %v7950_v18  ;;  %v7970_v34 = vadd.s32 8, %v7950_v18  ;;  %v7996_v30 = vadd.s32 1, %v7950_v18 }
 0x70c   :  { %v3849_v16 = vadd.f32 %v3848_v13, %v3760_v23  ;;  %v4031_v37 = vmax.f32 %v3931_v20, 0.0 }
 0x70d   :  { %v7957_v15 = vadd.s32 1, %v7954_v3  ;;  %v7983_v42 = vadd.s32 1, %v7970_v34  ;;  %v4342_v20 = vmul.u32 8, %v7996_v30 }
 0x70e   :  { %v3938_v48 = vadd.f32 %v3937_v49, %v3849_v16  ;;  %v4137_v19 = vpack.c.bf16 %v4035_v31, %v4031_v37  ;;  %v4329_v49 = vmul.u32 8, %v7954_v3  ;;  %v8043_v31 = vld [vmem:[%s8249_s2] sm:$0xff] }
 0x70f   :  { %v4345_v21 = vmul.u32 8, %v7957_v15 }
 0x710   :  { %v4043_v10 = vmax.f32 %v3938_v48, 0.0 }
 0x711   :  { %4278 = vmatpush.bf16.xpose.msrb.mxu2 %v7700_v28 }
 0x712   :  { %v4141_v28 = vpack.c.bf16 %v4043_v10, %v4039_v62 }
 0x713   :  { %v3851_v44 = vpop.f32.mrf.mxu0  ;;  %v3940_v54 = vpop.f32.mrf.mxu1 }
 0x714   :  { %v3852_v5 = vadd.f32 %v3851_v44, %v3763_v63  ;;  %4233 = vmatpush.bf16.xpose.msrb.mxu3 %v4141_v28  ;;  %v4327_v63 = vmul.u32 8, %v7970_v34  ;;  %v6067_v28 = vmov 1.0  }
 0x716   :  { %v3941_v11 = vadd.f32 %v3940_v54, %v3852_v5  ;;  %v4326_v54 = vmul.u32 8, %v7950_v18 }
 0x718   :  { %v4047_v36 = vmax.f32 %v3941_v11, 0.0 }
 0x719   :  { %4279 = vmatpush.bf16.xpose.msrb.mxu2 %v7684_v2  ;;  %v3679_v2 = vadd.f32 %v7835_v56, %v7682_v53  ;;  %v3681_v56 = vadd.f32 %v7852_v46, %v7682_v53  ;;  %v7960_v46 = vadd.s32 16, %v7950_v18 }
 0x71b   :  { %v3853_v24 = vpop.f32.mrf.mxu0  ;;  %v3942_v14 = vpop.f32.mrf.mxu1  ;;  %v3768_v25 = vadd.f32 %v7837_v43, %v3679_v2  ;;  %v3770_v61 = vadd.f32 %v7854_v7, %v3681_v56  ;;  %v7962_v7 = vand.u32 127, %v4318_v51  ;;  %v4328_v32 = vmul.u32 8, %v7960_v46  ;;  %v8566_v51 = vld [vmem:[#allocation16_spill] sm:$0xff] }
 0x71c   :  { %v3854_v60 = vadd.f32 %v3853_v24, %v3765_v33  ;;  %4234 = vmatpush.bf16.xpose.msrb.mxu3 %v4137_v19  ;;  %v6068_v24 = vmov 0  }
 0x71d   :  { %vm4336_vm2 = vcmp.ge.s32.totalorder %v7962_v7, %v4329_v49  ;;  %vm4352_vm3 = vcmp.lt.s32.totalorder %v7962_v7, %v4345_v21  ;;  %vm4334_vm5 = vcmp.ge.s32.totalorder %v7962_v7, %v4328_v32  ;;  %vm4332_vm8 = vcmp.ge.s32.totalorder %v7962_v7, %v4327_v63  ;;  %5906 = vset.pattern.permute.xlu0 %v6068_v24 }
 0x71e   :  { %v3943_v17 = vadd.f32 %v3942_v14, %v3854_v60  ;;  %vm7987_vm4 = vmand %vm4336_vm2, %vm4352_vm3  ;;  %vm4330_vm11 = vcmp.ge.s32.totalorder %v7962_v7, %v4326_v54  ;;  %vm4346_vm12 = vcmp.lt.s32.totalorder %v7962_v7, %v4342_v20  ;;  %v3698_v60 = vpop.f32.mrf.mxu2 }
 0x71f   :  { %5698 = vmatpush.xpose.msk.msra.mxu0 %vm7987_vm4, %v6067_v28  ;;  %vm8036_vm13 = vmand %vm4330_vm11, %vm4346_vm12 }
 0x720   :  { %4280 = vmatmul.bf16.vlgmr.msrb.gmra.mxu2 %v7848_v52  ;;  %v4051_v45 = vmax.f32 %v3943_v17, 0.0  ;;  %v7943_v52 = vpack.c.b16 %v4183_v8, %v4183_v8  ;;  %v8075_v17 = vld [vmem:[%s8249_s2 + $0x8] sm:$0xff] }
 0x721   :  { %5634 = vmatpush.msk.msra.mxu2 %vm7987_vm4, %v6067_v28 }
 0x722   :  { %v7941_v29 = vpack.c.bf16 %v4051_v45, %v4047_v36  ;;  %4215 = vmatmul.bf16.vlgmr.msra.gmra.mxu3 %v7943_v52 }
 0x723   :  { %v3856_v39 = vpop.f32.mrf.mxu0  ;;  %v3945_v50 = vpop.f32.mrf.mxu1 }
 0x724   :  { %v3857_v57 = vadd.f32 %v3856_v39, %v3768_v25  ;;  %4235 = vmatpush.bf16.xpose.msrb.mxu3 %v7907_v9  ;;  %v8087_v39 = vld [vmem:[%s8249_s2 + $0x10] sm:$0xff] }
 0x726   :  { %v3946_v59 = vadd.f32 %v3945_v50, %v3857_v57  ;;  %v3700_v56 = vpop.f32.mrf.mxu2 }
 0x728   :  { %v4055_v23 = vmax.f32 %v3946_v59, 0.0 }
 0x72b   :  { %v3858_v43 = vpop.f32.mrf.mxu0  ;;  %v3947_v58 = vpop.f32.mrf.mxu1 }
 0x72c   :  { %v3859_v27 = vadd.f32 %v3858_v43, %v3770_v61  ;;  %4236 = vmatpush.bf16.xpose.msrb.mxu3 %v7892_v41  ;;  %v7967_v41 = vadd.s32 1, %v7960_v46  ;;  %v8567_v61 = vld [vmem:[#allocation43_spill] sm:$0xff] }
 0x72e   :  { %v3948_v9 = vadd.f32 %v3947_v58, %v3859_v27  ;;  %v4344_v48 = vmul.u32 8, %v7967_v41  ;;  %v3703_v10 = vpop.f32.mrf.mxu2 }
 0x730   :  { %v4059_v13 = vmax.f32 %v3948_v9, 0.0  ;;  %vm4350_vm6 = vcmp.lt.s32.totalorder %v7962_v7, %v4344_v48 }
 0x731   :  { %vm8008_vm7 = vmand %vm4334_vm5, %vm4350_vm6 }
 0x732   :  { %v7972_v16 = vpack.c.bf16 %v4059_v13, %v4055_v23  ;;  %5635 = vmatpush.msk.msra.mxu2 %vm8008_vm7, %v6067_v28  ;;  %5699 = vmatpush.xpose.msk.msra.mxu0 %vm8008_vm7, %v6067_v28 }
 0x733   :  { %v3861_v12 = vpop.f32.mrf.mxu0  ;;  %v3950_v0 = vpop.f32.mrf.mxu1 }
 0x734   :  { %v3862_v62 = vadd.f32 %v3861_v12, %v7864_v38  ;;  %4237 = vmatpush.bf16.xpose.msrb.mxu3 %v7872_v35  ;;  %v4343_v38 = vmul.u32 8, %v7983_v42 }
 0x736   :  { %v3951_v35 = vadd.f32 %v3950_v0, %v3862_v62  ;;  %vm4348_vm9 = vcmp.lt.s32.totalorder %v7962_v7, %v4343_v38  ;;  %v8568_v0 = vld [vmem:[#allocation31_spill] sm:$0xff]  ;;  %v3787_v62 = vpop.f32.mrf.mxu3 }
 0x737   :  { %vm8023_vm10 = vmand %vm4332_vm8, %vm4348_vm9 }
 0x738   :  { %5636 = vmatpush.msk.msra.mxu2 %vm8023_vm10, %v6067_v28  ;;  %5700 = vmatpush.xpose.msk.msra.mxu0 %vm8023_vm10, %v6067_v28 }
 0x73a   :  { %5637 = vmatpush.msk.msra.mxu2 %vm8036_vm13, %v6067_v28 }
 0x73b   :  { %v3863_v11 = vpop.f32.mrf.mxu0  ;;  %v3952_v37 = vpop.f32.mrf.mxu1  ;;  %5638 = vmatmul.msk.f32.vlgmr.msra.gmra.mxu2 %vm4381_vm14, %v8043_v31 }
 0x73c   :  { %v3864_v33 = vadd.f32 %v3863_v11, %v7869_v1  ;;  %4238 = vmatpush.bf16.xpose.msrb.mxu3 %v7858_v55  ;;  %5688 = vmatpush.xpose.msk.msrb.mxu2 %vm7987_vm4, %v6067_v28  ;;  %v4174_v1 = vld [vmem:[%s8258_s11] sm:$0xff]  ;;  %v4063_v55 = vmax.f32 %v3951_v35, 0.0  ;;  %v8569_v11 = vld [vmem:[#allocation15_spill] sm:$0xff] }
 0x73d   :  { %4177 = vperm.xlu0 %5906, %v4174_v1   ;;  %5701 = vmatpush.xpose.msk.msra.mxu0 %vm8036_vm13, %v6067_v28 }
 0x73e   :  { %v3953_v19 = vadd.f32 %v3952_v37, %v3864_v33  ;;  %v3789_v33 = vpop.f32.mrf.mxu3 }
 0x740   :  { %v4067_v14 = vmax.f32 %v3953_v19, 0.0  ;;  %5689 = vmatpush.xpose.msk.msrb.mxu2 %vm8008_vm7, %v6067_v28  ;;  %v3705_v19 = vpop.f32.mrf.mxu2 }
 0x742   :  { %v8070_v2 = vpack.c.bf16 %v4067_v14, %v4063_v55  ;;  %v3699_v55 = vadd.f32 %v3698_v60, %v7682_v53 }
 0x743   :  { %v3866_v36 = vpop.f32.mrf.mxu0  ;;  %v3955_v45 = vpop.f32.mrf.mxu1  ;;  %5639 = vmatmul.msk.f32.gmra.mxu2 %vm4381_vm14, %v8075_v17 }
 0x744   :  { %v3867_v8 = vadd.f32 %v3866_v36, %v7879_v47  ;;  %4239 = vmatpush.bf16.xpose.msrb.mxu3 %v7833_v22  ;;  %5690 = vmatpush.xpose.msk.msrb.mxu2 %vm8023_vm10, %v6067_v28  ;;  %v8565_v22 = vld [vmem:[#allocation28_spill] sm:$0xff] }
 0x745   :  { %v4185_v57 = vunpack.c.h.b16 %v8565_v22 }
 0x746   :  { %v3956_v25 = vadd.f32 %v3955_v45, %v3867_v8  ;;  %v8570_v45 = vld [vmem:[#allocation60_spill] sm:$0xff]  ;;  %v3788_v8 = vadd.f32 %v3787_v62, %v3699_v55  ;;  %v8574_v55 = vld [vmem:[#allocation63_spill] sm:$0xff] }
 0x747   :  { %v8098_v58 = vpack.c.b16 %v4185_v57, %v4185_v57 }
 0x748   :  { %5691 = vmatpush.xpose.msk.msrb.mxu2 %vm8036_vm13, %v6067_v28  ;;  %v4071_v27 = vmax.f32 %v3956_v25, 0.0  ;;  %v3701_v25 = vadd.f32 %v3700_v56, %v7682_v53  ;;  %v3708_v22 = vpop.f32.mrf.mxu2 }
 0x74b   :  { %v3868_v47 = vpop.f32.mrf.mxu0  ;;  %v3957_v50 = vpop.f32.mrf.mxu1  ;;  %5640 = vmatmul.msk.f32.gmra.mxu2 %vm4381_vm14, %v8087_v39 }
 0x74c   :  { %v3869_v59 = vadd.f32 %v3868_v47, %v7886_v4  ;;  %4240 = vmatpush.bf16.xpose.msrb.mxu3 %v8566_v51 }
 0x74e   :  { %v3958_v43 = vadd.f32 %v3957_v50, %v3869_v59  ;;  %v3792_v50 = vpop.f32.mrf.mxu3 }
 0x750   :  { %v4075_v9 = vmax.f32 %v3958_v43, 0.0  ;;  %v8571_v43 = vld [vmem:[#allocation13_spill] sm:$0xff] }
 0x752   :  { %v8100_v23 = vpack.c.bf16 %v4075_v9, %v4071_v27 }
 0x753   :  { %v3871_v13 = vpop.f32.mrf.mxu0  ;;  %v3960_v12 = vpop.f32.mrf.mxu1  ;;  %4241 = vmatmul.bf16.vlgmr.msrb.gmra.mxu3 %v8098_v58 }
 0x754   :  { %4259 = vmatpush.bf16.xpose.msra.mxu3 %v8567_v61  ;;  %v3872_v4 = vadd.f32 %v3871_v13, %v7900_v26 }
 0x756   :  { %v3961_v35 = vadd.f32 %v3960_v12, %v3872_v4  ;;  %v3794_v62 = vpop.f32.mrf.mxu3 }
 0x758   :  { %v4079_v24 = vmax.f32 %v3961_v35, 0.0  ;;  %v8572_v35 = vld [vmem:[#allocation61_spill] sm:$0xff] }
 0x75b   :  { %v3873_v44 = vpop.f32.mrf.mxu0  ;;  %v3962_v5 = vpop.f32.mrf.mxu1 }
 0x75c   :  { %4260 = vmatpush.bf16.xpose.msra.mxu3 %v8568_v0  ;;  %v3874_v40 = vadd.f32 %v3873_v44, %v7905_v6  ;;  %v3790_v6 = vadd.f32 %v3789_v33, %v3701_v25  ;;  %v3710_v0 = vpop.f32.mrf.mxu2 }
 0x75e   :  { %v3963_v37 = vadd.f32 %v3962_v5, %v3874_v40  ;;  %v8573_v40 = vld [vmem:[#allocation62_spill] sm:$0xff] }
 0x760   :  { %v4083_v1 = vmax.f32 %v3963_v37, 0.0  ;;  %v3709_v37 = vadd.f32 %v3708_v22, %v7682_v53 }
 0x762   :  { %v8108_v14 = vpack.c.bf16 %v4083_v1, %v4079_v24 }
 0x763   :  { %v3876_v26 = vpop.f32.mrf.mxu0  ;;  %v3965_v36 = vpop.f32.mrf.mxu1 }
 0x764   :  { %4261 = vmatpush.bf16.xpose.msra.mxu3 %v8569_v11  ;;  %v3877_v47 = vadd.f32 %v3876_v26, %v3788_v8  ;;  %v4203_v5 = vpop.f32.mrf.mxu2  ;;  %v3797_v11 = vpop.f32.mrf.mxu3 }
 0x765   :  { %v3798_v26 = vadd.f32 %v3797_v11, %v3709_v37 }
 0x766   :  { %v3966_v51 = vadd.f32 %v3965_v36, %v3877_v47  ;;  %v3711_v36 = vadd.f32 %v3710_v0, %v7682_v53  ;;  %v3704_v47 = vadd.f32 %v3703_v10, %v7682_v53 }
 0x768   :  { %v4087_v27 = vmax.f32 %v3966_v51, 0.0 }
 0x76b   :  { %v3878_v57 = vpop.f32.mrf.mxu0  ;;  %v3967_v59 = vpop.f32.mrf.mxu1 }
 0x76c   :  { %4262 = vmatpush.bf16.xpose.msra.mxu3 %v8570_v45  ;;  %v3879_v61 = vadd.f32 %v3878_v57, %v3790_v6  ;;  %v4205_v1 = vpop.f32.mrf.mxu2  ;;  %v3706_v45 = vadd.f32 %v3705_v19, %v7682_v53  ;;  %v3799_v25 = vpop.f32.mrf.mxu3 }
 0x76d   :  { %v3800_v6 = vadd.f32 %v3799_v25, %v3711_v36 }
 0x76e   :  { %v3968_v60 = vadd.f32 %v3967_v59, %v3879_v61  ;;  %v3795_v59 = vadd.f32 %v3794_v62, %v3706_v45 }
 0x770   :  { %v4091_v9 = vmax.f32 %v3968_v60, 0.0  ;;  %v3793_v60 = vadd.f32 %v3792_v50, %v3704_v47 }
 0x772   :  { %v4165_v13 = vpack.c.bf16 %v4091_v9, %v4087_v27 }
 0x773   :  { %v3881_v12 = vpop.f32.mrf.mxu0  ;;  %v3970_v4 = vpop.f32.mrf.mxu1 }
 0x774   :  { %4263 = vmatpush.bf16.xpose.msra.mxu3 %v8571_v43  ;;  %v4229_v22 = vpop.f32.mrf.mxu2 }
 0x77b   :  { %v3883_v56 = vpop.f32.mrf.mxu0  ;;  %v3972_v44 = vpop.f32.mrf.mxu1 }
 0x77c   :  { %4264 = vmatpush.bf16.xpose.msra.mxu3 %v8572_v35  ;;  %v3884_v27 = vadd.f32 %v3883_v56, %v3795_v59  ;;  %v3882_v35 = vadd.f32 %v3881_v12, %v3793_v60  ;;  %v4231_v53 = vpop.f32.mrf.mxu2 }
 0x77e   :  { %v3973_v19 = vadd.f32 %v3972_v44, %v3884_v27  ;;  %v3971_v37 = vadd.f32 %v3970_v4, %v3882_v35  ;;  %v4325_v4 = vadd.s32 128, %v7962_v7  ;;  %v4593_v7 = vld [vmem:[%s8259_s12] sm:$0x1] }
 0x77f   :  { %5670 = vmatmul.msk.f32.vlgmr.msrb.gmra.mxu0 %vm120_vm1, %v4593_v7  ;;  %5687 = vmatmul.msk.f32.vlgmr.msrb.gmra.mxu1 %vm120_vm1, %v4593_v7 }
 0x780   :  { %v4099_v10 = vmax.f32 %v3973_v19, 0.0  ;;  %vm4337_vm15 = vcmp.ge.s32.totalorder %v4325_v4, %v4329_v49  ;;  %vm4353_vm0 = vcmp.lt.s32.totalorder %v4325_v4, %v4345_v21  ;;  %vm4335_vm3 = vcmp.ge.s32.totalorder %v4325_v4, %v4328_v32 }
 0x781   :  { %vm8132_vm2 = vmand %vm4337_vm15, %vm4353_vm0  ;;  %vm4351_vm4 = vcmp.lt.s32.totalorder %v4325_v4, %v4344_v48  ;;  %vm4333_vm6 = vcmp.ge.s32.totalorder %v4325_v4, %v4327_v63  ;;  %vm4349_vm7 = vcmp.lt.s32.totalorder %v4325_v4, %v4343_v38  ;;  %vm4331_vm1 = vcmp.ge.s32.totalorder %v4325_v4, %v4326_v54 }
 0x782   :  { %5702 = vmatpush.xpose.msk.msra.mxu1 %vm8132_vm2, %v6067_v28  ;;  %vm8149_vm5 = vmand %vm4335_vm3, %vm4351_vm4  ;;  %vm4347_vm9 = vcmp.lt.s32.totalorder %v4325_v4, %v4342_v20 }
 0x783   :  { %v3886_v33 = vpop.f32.mrf.mxu0  ;;  %v3975_v24 = vpop.f32.mrf.mxu1  ;;  %vm8160_vm8 = vmand %vm4333_vm6, %vm4349_vm7 }
 0x784   :  { %4265 = vmatpush.bf16.xpose.msra.mxu3 %v8573_v40  ;;  %v3887_v8 = vadd.f32 %v3886_v33, %v3798_v26  ;;  %v4095_v33 = vmax.f32 %v3971_v37, 0.0  ;;  %vm8172_vm10 = vmand %vm4331_vm1, %vm4347_vm9 }
 0x786   :  { %v3976_v51 = vadd.f32 %v3975_v24, %v3887_v8  ;;  %v4169_v62 = vpack.c.bf16 %v4099_v10, %v4095_v33  ;;  %v4255_v24 = vpop.f32.mrf.mxu2  ;;  %5703 = vmatpush.xpose.msk.msra.mxu1 %vm8149_vm5, %v6067_v28 }
 0x788   :  { %v4103_v0 = vmax.f32 %v3976_v51, 0.0 }
 0x78a   :  { %5704 = vmatpush.xpose.msk.msra.mxu1 %vm8160_vm8, %v6067_v28 }
 0x78b   :  { %v3888_v57 = vpop.f32.mrf.mxu0  ;;  %v3977_v43 = vpop.f32.mrf.mxu1 }
 0x78c   :  { %4266 = vmatpush.bf16.xpose.msra.mxu3 %v8574_v55  ;;  %v3889_v61 = vadd.f32 %v3888_v57, %v3800_v6 }
 0x78e   :  { %v3978_v9 = vadd.f32 %v3977_v43, %v3889_v61  ;;  %v4257_v1 = vpop.f32.mrf.mxu2  ;;  %5705 = vmatpush.xpose.msk.msra.mxu1 %vm8172_vm10, %v6067_v28 }
 0x790   :  { %v4107_v40 = vmax.f32 %v3978_v9, 0.0 }
 0x792   :  { %v4173_v11 = vpack.c.bf16 %v4107_v40, %v4103_v0 }
 0x793   :  { %4267 = vmatmul.bf16.vlgmr.msra.gmra.mxu3 %v7943_v52 }
 0x794   :  { %4285 = vmatpush.bf16.xpose.msrb.mxu3 %v4173_v11 }
 0x79c   :  { %4286 = vmatpush.bf16.xpose.msrb.mxu3 %v4169_v62 }
 0x7a3   :  { %v8122_v50 = vpop.f32.mrf.mxu2 }
 0x7a4   :  { %4287 = vmatpush.bf16.xpose.msrb.mxu3 %v4165_v13 }
 0x7a5   :  { %v4216_v52 = vpop.f32.mrf.mxu3 }
 0x7ab   :  { %v4283_v36 = vpop.f32.mrf.mxu2 }
 0x7ac   :  { %4288 = vmatpush.bf16.xpose.msrb.mxu3 %v8108_v14 }
 0x7ad   :  { %v4218_v12 = vpop.f32.mrf.mxu3 }
 0x7af   :  { %v4178_v56 = vpop.permute.xlu0 %4177 }
 0x7b0   :  { %v4204_v55 = vadd.f32 %v4203_v5, %v4178_v56  ;;  %v8124_v44 = vadd.f32 %v4255_v24, %v4178_v56 }
 0x7b2   :  { %v4217_v26 = vadd.f32 %v4216_v52, %v4204_v55 }
 0x7b4   :  { %4289 = vmatpush.bf16.xpose.msrb.mxu3 %v8100_v23  ;;  %v4230_v13 = vadd.f32 %v4229_v22, %v4217_v26 }
 0x7bc   :  { %4290 = vmatpush.bf16.xpose.msrb.mxu3 %v8070_v2 }
 0x7be   :  { %v4408_v42 = vpop.f32.mrf.mxu2 }
 0x7c4   :  { %4291 = vmatpush.bf16.xpose.msrb.mxu3 %v7972_v16 }
 0x7c6   :  { %v4411_v2 = vpop.f32.mrf.mxu2 }
 0x7cc   :  { %4292 = vmatpush.bf16.xpose.msrb.mxu3 %v7941_v29 }
 0x7ce   :  { %v4414_v35 = vpop.f32.mrf.mxu2 }
 0x7d3   :  { %4293 = vmatmul.bf16.vlgmr.msrb.gmra.mxu3 %v8098_v58 }
 0x7d4   :  { %5641 = vmatpush.msk.msra.mxu3 %vm8132_vm2, %v6067_v28 }
 0x7d6   :  { %5642 = vmatpush.msk.msra.mxu3 %vm8149_vm5, %v6067_v28  ;;  %v4242_v29 = vpop.f32.mrf.mxu3 }
 0x7d7   :  { %v8196_v18 = vadd.f32 %v4242_v29, %v4230_v13 }
 0x7d8   :  { %5643 = vmatpush.msk.msra.mxu3 %vm8160_vm8, %v6067_v28 }
 0x7d9   :  { %v5696_v49 = vmul.f32 -1.442695, %v8196_v18  ;;  %v4300_v21 = vand.u32 2147483647, %v8196_v18 }
 0x7da   :  { %5644 = vmatpush.msk.msra.mxu3 %vm8172_vm10, %v6067_v28 }
 0x7db   :  { %5907 = vpow2.f32 %v5696_v49  ;;  %v4302_v41 = vsub.f32 0.0, %v4300_v21 }
 0x7dc   :  { %5692 = vmatpush.xpose.msk.msrb.mxu3 %vm8132_vm2, %v6067_v28 }
 0x7dd   :  { %v4304_v34 = vmul.f32 1.442695, %v4302_v41 }
 0x7de   :  { %v4244_v16 = vpop.f32.mrf.mxu3 }
 0x7df   :  { %5909 = vpow2.f32 %v4304_v34 }
 0x7e0   :  { %5693 = vmatpush.xpose.msk.msrb.mxu3 %vm8149_vm5, %v6067_v28 }
 0x7e1   :  { %v5908_v32 = vpop.eup %5907 }
 0x7e2   :  { %v4695_v48 = vadd.f32 1.0, %v5908_v32 }
 0x7e3   :  { %5645 = vmatmul.msk.f32.vlgmr.msra.gmra.mxu3 %vm4381_vm14, %v8043_v31  ;;  %v4298_v31 = vmax.f32 %v8196_v18, 0.0 }
 0x7e4   :  { %5694 = vmatpush.xpose.msk.msrb.mxu3 %vm8160_vm8, %v6067_v28  ;;  %5911 = vrcp.f32 %v4695_v48  ;;  %v4708_v20 = vand.u32 2147483648, %v4695_v48  ;;  %vm4702_vm11 = vweird.f32 %v4695_v48  ;;  %v4706_v23 = vand.u32 2147483647, %v4695_v48 }
 0x7e5   :  { %v5910_v63 = vpop.eup %5909  ;;  %5913 = vtanh.f32 %v8196_v18 }
 0x7e6   :  { %v4308_v30 = vadd.f32 1.0, %v5910_v63  ;;  %v4709_v25 = vor.u32 1.1754944e-38, %v4708_v20  ;;  %vm4707_vm15 = vcmp.eq.f32.partialorder %v4706_v23, 8.507059e+37 }
 0x7e8   :  { %5695 = vmatpush.xpose.msk.msrb.mxu3 %vm8172_vm10, %v6067_v28  ;;  %5915 = vlog2.f32 %v4308_v30  ;;  %v5648_v30 = vclamps-f32 %v8196_v18, 27.631021 }
 0x7ea   :  { %v5912_v38 = vpop.eup %5911  ;;  %v4527_v20 = vperm.slane %v5648_v30, 0 }
 0x7eb   :  { %v4698_v54 = vmul.f32 %v5912_v38, %v4695_v48  ;;  %5646 = vmatmul.msk.f32.gmra.mxu3 %vm4381_vm14, %v8075_v17  ;;  %v5914_v58 = vpop.eup %5913  ;;  %vm4703_vm12 = vweird.f32 %v5912_v38  ;;  %v4443_v17 = vld [vmem:[%s8248_s1] sm:$0xff] }
 0x7ec   :  { %vm4704_vm13 = vmor %vm4702_vm11, %vm4703_vm12  ;;  %v4449_v6 = vperm.slane %v5914_v58, 2  ;;  %v4455_v61 = vperm.slane %v5914_v58, 3  ;;  %v4461_v9 = vperm.slane %v5914_v58, 4 }
 0x7ed   :  { %v4699_v28 = vsub.f32 1.0, %v4698_v54 }
 0x7ee   :  { %v5916_v5 = vpop.eup %5915  ;;  %v4451_v60 = vmul.f32 %v4449_v6, %v4408_v42  ;;  %v4457_v19 = vmul.f32 %v4455_v61, %v4411_v2  ;;  %v4463_v37 = vmul.f32 %v4461_v9, %v4414_v35 }
 0x7ef   :  { %v4311_v45 = vmul.f32 0.6931472, %v5916_v5  ;;  %v4700_v8 = vmul.f32 %v5912_v38, %v4699_v28 }
 0x7f1   :  { %v4314_v47 = vadd.f32 %v4311_v45, %v4298_v31  ;;  %v4701_v57 = vadd.f32 %v5912_v38, %v4700_v8 }
 0x7f3   :  { %v4445_v59 = vperm.slane %v4314_v47, 1  ;;  %v4705_v51 = vsel %vm4704_vm13, %v5912_v38, %v4701_v57  ;;  %5647 = vmatmul.msk.f32.gmra.mxu3 %vm4381_vm14, %v8087_v39 }
 0x7f4   :  { %v4710_v22 = vsel %vm4707_vm15, %v4709_v25, %v4705_v51 }
 0x7f5   :  { %v4447_v43 = vmul.f32 %v4445_v59, %v4443_v17  ;;  %v4727_v27 = vmul.f32 %v4710_v22, %v8196_v18  ;;  %v4581_v22 = vld [vmem:[%s8250_s3] sm:$0xff] }
 0x7f7   :  { %v4453_v0 = vadd.f32 %v4451_v60, %v4447_v43  ;;  %v4729_v40 = vsub.f32 %v4314_v47, %v4727_v27 }
 0x7f9   :  { %v4459_v11 = vadd.f32 %v4457_v19, %v4453_v0  ;;  %4747 = vmatmul.f32.vlgmr.msra.gmra.mxu0 %v4729_v40  ;;  %v6069_v40 = vmov 0.0  }
 0x7fb   :  { %v4465_v53 = vadd.f32 %v4463_v37, %v4459_v11 }
 0x7fc   :  { %v4614_v9 = vpop.f32.mrf.mxu0 }
 0x7fd   :  { %v4467_v10 = vmul.f32 0.70710677, %v4465_v53  ;;  %v4637_v11 = vperm.slane %v4614_v9, 0 }
 0x7ff   :  { %v4469_v33 = vand.u32 2147483647, %v4467_v10  ;;  %vm4507_vm0 = vcmp.ge.f32.partialorder %v4467_v10, 0.0 }
 0x801   :  { %v4471_v62 = vmul.f32 0.3275911, %v4469_v33  ;;  %v4495_v1 = vsub.f32 0.0, %v4469_v33 }
 0x803   :  { %v4473_v24 = vadd.f32 1.0, %v4471_v62  ;;  %v4497_v56 = vmul.f32 %v4495_v1, %v4469_v33 }
 0x805   :  { %5917 = vrcp.f32 %v4473_v24  ;;  %v4499_v26 = vmul.f32 1.442695, %v4497_v56 }
 0x807   :  { %5919 = vpow2.f32 %v4499_v26 }
 0x80b   :  { %v5918_v39 = vpop.eup %5917 }
 0x80c   :  { %v4477_v52 = vmul.f32 1.0614054, %v5918_v39 }
 0x80d   :  { %v5920_v15 = vpop.eup %5919 }
 0x80e   :  { %v4479_v12 = vadd.f32 -1.4531521, %v4477_v52 }
 0x810   :  { %v4481_v55 = vmul.f32 %v5918_v39, %v4479_v12 }
 0x812   :  { %v4483_v4 = vadd.f32 1.4214138, %v4481_v55 }
 0x814   :  { %v4485_v36 = vmul.f32 %v5918_v39, %v4483_v4 }
 0x816   :  { %v4487_v14 = vadd.f32 -0.28449672, %v4485_v36  ;;  %v4268_v29 = vpop.f32.mrf.mxu3 }
 0x817   :  { %v4269_v59 = vadd.f32 %v4268_v29, %v8124_v44 }
 0x818   :  { %v4489_v13 = vmul.f32 %v5918_v39, %v4487_v14 }
 0x819   :  { %v4282_v60 = vadd.f32 %v8122_v50, %v4269_v59 }
 0x81a   :  { %v4491_v7 = vadd.f32 0.2548296, %v4489_v13 }
 0x81c   :  { %v4493_v3 = vmul.f32 %v5918_v39, %v4491_v7 }
 0x81e   :  { %v4503_v46 = vmul.f32 %v5920_v15, %v4493_v3  ;;  %v4270_v32 = vpop.f32.mrf.mxu3 }
 0x820   :  { %v4505_v49 = vsub.f32 1.0, %v4503_v46 }
 0x822   :  { %v4509_v21 = vsub.f32 0.0, %v4505_v49 }
 0x824   :  { %v4511_v41 = vsel %vm4507_vm0, %v4505_v49, %v4509_v21 }
 0x825   :  { %v4513_v34 = vadd.f32 1.0, %v4511_v41  ;;  %v4444_v41 = vld [vmem:[%s8248_s1 + $0x8] sm:$0xff] }
 0x827   :  { %v4515_v16 = vmul.f32 0.5, %v4513_v34 }
 0x829   :  { %v4521_v48 = vadd.f32 1e-12, %v4515_v16  ;;  %v4531_v42 = vsub.f32 1.0, %v4515_v16 }
 0x82b   :  { %5921 = vlog2.f32 %v4521_v48  ;;  %v4533_v63 = vadd.f32 1e-12, %v4531_v42 }
 0x82d   :  { %5923 = vlog2.f32 %v4533_v63 }
 0x831   :  { %v5922_v38 = vpop.eup %5921 }
 0x832   :  { %v4524_v54 = vmul.f32 0.6931472, %v5922_v38 }
 0x833   :  { %v5924_v2 = vpop.eup %5923 }
 0x834   :  { %v4529_v58 = vadd.f32 %v4527_v20, %v4524_v54  ;;  %v4536_v28 = vmul.f32 0.6931472, %v5924_v2 }
 0x836   :  { %v4539_v23 = vsub.f32 %v4529_v58, %v4536_v28 }
 0x838   :  { %v5650_v5 = vmul.f32 -10.0, %v4539_v23 }
 0x83a   :  { %v4545_v31 = vmul.f32 1.442695, %v5650_v5 }
 0x83c   :  { %5925 = vpow2.f32 %v4545_v31 }
 0x842   :  { %v5926_v45 = vpop.eup %5925 }
 0x843   :  { %v4549_v8 = vadd.f32 1.0, %v5926_v45 }
 0x845   :  { %5927 = vrcp.f32 %v4549_v8  ;;  %v4562_v57 = vand.u32 2147483648, %v4549_v8  ;;  %v4560_v18 = vand.u32 2147483647, %v4549_v8  ;;  %vm4556_vm3 = vweird.f32 %v4549_v8 }
 0x847   :  { %v4563_v61 = vor.u32 1.1754944e-38, %v4562_v57  ;;  %vm4561_vm5 = vcmp.eq.f32.partialorder %v4560_v18, 8.507059e+37 }
 0x84b   :  { %v5928_v25 = vpop.eup %5927 }
 0x84c   :  { %v4552_v47 = vmul.f32 %v5928_v25, %v4549_v8  ;;  %vm4557_vm2 = vweird.f32 %v5928_v25 }
 0x84d   :  { %vm4558_vm4 = vmor %vm4556_vm3, %vm4557_vm2  ;;  %vm4772_vm2 = vcmask 253952  }
 0x84e   :  { %v4553_v6 = vsub.f32 1.0, %v4552_v47 }
 0x850   :  { %v4554_v17 = vmul.f32 %v5928_v25, %v4553_v6 }
 0x852   :  { %v4555_v51 = vadd.f32 %v5928_v25, %v4554_v17 }
 0x854   :  { %v4559_v43 = vsel %vm4558_vm4, %v5928_v25, %v4555_v51 }
 0x855   :  { %v4564_v27 = vsel %vm4561_vm5, %v4563_v61, %v4559_v43 }
 0x856   :  { %v4294_v35 = vpop.f32.mrf.mxu3  ;;  %vm4583_vm6 = vcmp.lt.f32.partialorder %v4581_v22, %v4564_v27 }
 0x857   :  { %v8227_v0 = vadd.f32 %v4294_v35, %v4282_v60  ;;  %v5652_v44 = vsel %vm4583_vm6, 1.0, %v6069_v40 }
 0x858   :  { %v4589_v19 = vsub.f32 %v5652_v44, %v4564_v27 }
 0x859   :  { %v5697_v37 = vmul.f32 -1.442695, %v8227_v0  ;;  %v4301_v53 = vand.u32 2147483647, %v8227_v0  ;;  %v4299_v14 = vmax.f32 %v8227_v0, 0.0 }
 0x85a   :  { %v4591_v10 = vadd.f32 %v4589_v19, %v4564_v27 }
 0x85b   :  { %5929 = vpow2.f32 %v5697_v37  ;;  %v4303_v33 = vsub.f32 0.0, %v4301_v53 }
 0x85c   :  { %v4639_v62 = vmul.f32 %v4637_v11, %v4591_v10 }
 0x85d   :  { %v4306_v50 = vmul.f32 1.442695, %v4303_v33 }
 0x85e   :  { %v4296_v24 = vpop.f32.mrf.mxu3  ;;  %4657 = vmatmul.f32.vlgmr.msrb.gmra.mxu2 %v4639_v62 }
 0x85f   :  { %5931 = vpow2.f32 %v4306_v50 }
 0x861   :  { %v5930_v39 = vpop.eup %5929 }
 0x862   :  { %v4696_v1 = vadd.f32 1.0, %v5930_v39 }
 0x864   :  { %5933 = vrcp.f32 %v4696_v1  ;;  %v4723_v13 = vand.u32 2147483648, %v4696_v1  ;;  %v4721_v46 = vand.u32 2147483647, %v4696_v1  ;;  %vm4717_vm8 = vweird.f32 %v4696_v1 }
 0x865   :  { %v5932_v52 = vpop.eup %5931 }
 0x866   :  { %v4309_v12 = vadd.f32 1.0, %v5932_v52  ;;  %v4434_v56 = vpop.f32.mrf.mxu3  ;;  %v4724_v34 = vor.u32 1.1754944e-38, %v4723_v13  ;;  %vm4722_vm9 = vcmp.eq.f32.partialorder %v4721_v46, 8.507059e+37 }
 0x868   :  { %5935 = vlog2.f32 %v4309_v12 }
 0x869   :  { %5937 = vtanh.f32 %v8227_v0 }
 0x86a   :  { %v5934_v55 = vpop.eup %5933 }
 0x86b   :  { %v4713_v4 = vmul.f32 %v5934_v55, %v4696_v1  ;;  %vm4718_vm7 = vweird.f32 %v5934_v55  ;;  %v5649_v1 = vclamps-f32 %v8227_v0, 27.631021 }
 0x86c   :  { %vm4719_vm1 = vmor %vm4717_vm8, %vm4718_vm7 }
 0x86d   :  { %v4714_v26 = vsub.f32 1.0, %v4713_v4 }
 0x86e   :  { %v5936_v36 = vpop.eup %5935  ;;  %v4437_v7 = vpop.f32.mrf.mxu3 }
 0x86f   :  { %v4313_v3 = vmul.f32 0.6931472, %v5936_v36  ;;  %v4715_v15 = vmul.f32 %v5934_v55, %v4714_v26  ;;  %v5938_v29 = vpop.eup %5937 }
 0x870   :  { %v4450_v32 = vperm.slane %v5938_v29, 2  ;;  %v4456_v54 = vperm.slane %v5938_v29, 3  ;;  %v4462_v23 = vperm.slane %v5938_v29, 4 }
 0x871   :  { %v4315_v49 = vadd.f32 %v4313_v3, %v4299_v14  ;;  %v4716_v21 = vadd.f32 %v5934_v55, %v4715_v15 }
 0x872   :  { %v4452_v30 = vmul.f32 %v4450_v32, %v4434_v56  ;;  %v4458_v28 = vmul.f32 %v4456_v54, %v4437_v7  ;;  %v4528_v56 = vperm.slane %v5649_v1, 0 }
 0x873   :  { %v4446_v16 = vperm.slane %v4315_v49, 1  ;;  %v4720_v48 = vsel %vm4719_vm1, %v5934_v55, %v4716_v21 }
 0x874   :  { %v4725_v42 = vsel %vm4722_vm9, %v4724_v34, %v4720_v48 }
 0x875   :  { %v4448_v63 = vmul.f32 %v4446_v16, %v4444_v41  ;;  %v4728_v38 = vmul.f32 %v4725_v42, %v8227_v0  ;;  %v4582_v16 = vld [vmem:[%s8250_s3 + $0x8] sm:$0xff]  ;;  %v4634_v42 = vpop.f32.mrf.mxu1  ;;  %s6070_s3 = smov [#allocation7]  }
 0x876   :  { %v4440_v20 = vpop.f32.mrf.mxu3  ;;  %s4779_s8 = sshll.u32 %s6070_s3, 4  ;;  %s4780_s8 = int_to_ptr.vmem [resolvable:$true] %s4779_s8 }
 0x877   :  { %v4454_v2 = vadd.f32 %v4452_v30, %v4448_v63  ;;  %v4730_v58 = vsub.f32 %v4315_v49, %v4728_v38  ;;  %v4464_v31 = vmul.f32 %v4462_v23, %v4440_v20  ;;  %v4638_v38 = vperm.slane %v4634_v42, 0 }
 0x879   :  { %v4460_v5 = vadd.f32 %v4458_v28, %v4454_v2  ;;  %4767 = vmatmul.f32.vlgmr.msra.gmra.mxu1 %v4730_v58 }
 0x87b   :  { %v4466_v45 = vadd.f32 %v4464_v31, %v4460_v5 }
 0x87d   :  { %v4468_v8 = vmul.f32 0.70710677, %v4466_v45 }
 0x87f   :  { %v4470_v25 = vand.u32 2147483647, %v4468_v8  ;;  %vm4508_vm10 = vcmp.ge.f32.partialorder %v4468_v8, 0.0 }
 0x881   :  { %v4472_v47 = vmul.f32 0.3275911, %v4470_v25  ;;  %v4496_v17 = vsub.f32 0.0, %v4470_v25 }
 0x883   :  { %v4474_v6 = vadd.f32 1.0, %v4472_v47  ;;  %v4498_v51 = vmul.f32 %v4496_v17, %v4470_v25 }
 0x885   :  { %5939 = vrcp.f32 %v4474_v6  ;;  %v4501_v43 = vmul.f32 1.442695, %v4498_v51 }
 0x887   :  { %5941 = vpow2.f32 %v4501_v43 }
 0x88b   :  { %v5940_v57 = vpop.eup %5939 }
 0x88c   :  { %v4478_v18 = vmul.f32 1.0614054, %v5940_v57 }
 0x88d   :  { %v5942_v19 = vpop.eup %5941 }
 0x88e   :  { %v4480_v59 = vadd.f32 -1.4531521, %v4478_v18 }
 0x890   :  { %v4482_v61 = vmul.f32 %v5940_v57, %v4480_v59 }
 0x892   :  { %v4484_v22 = vadd.f32 1.4214138, %v4482_v61 }
 0x894   :  { %v4486_v60 = vmul.f32 %v5940_v57, %v4484_v22 }
 0x896   :  { %v4488_v27 = vadd.f32 -0.28449672, %v4486_v60 }
 0x898   :  { %v4490_v9 = vmul.f32 %v5940_v57, %v4488_v27 }
 0x89a   :  { %v4492_v35 = vadd.f32 0.2548296, %v4490_v9 }
 0x89c   :  { %v4494_v44 = vmul.f32 %v5940_v57, %v4492_v35  ;;  %v4748_v57 = vpop.f32.mrf.mxu0 }
 0x89e   :  { %v4504_v11 = vmul.f32 %v5942_v19, %v4494_v44 }
 0x8a0   :  { %v4506_v37 = vsub.f32 1.0, %v4504_v11 }
 0x8a2   :  { %v4510_v53 = vsub.f32 0.0, %v4506_v37 }
 0x8a4   :  { %v4512_v10 = vsel %vm4508_vm10, %v4506_v37, %v4510_v53 }
 0x8a5   :  { %v4514_v33 = vadd.f32 1.0, %v4512_v10 }
 0x8a7   :  { %v4516_v62 = vmul.f32 0.5, %v4514_v33 }
 0x8a9   :  { %v4522_v50 = vadd.f32 1e-12, %v4516_v62  ;;  %v4532_v24 = vsub.f32 1.0, %v4516_v62 }
 0x8ab   :  { %5943 = vlog2.f32 %v4522_v50  ;;  %v4534_v39 = vadd.f32 1e-12, %v4532_v24 }
 0x8ad   :  { %5945 = vlog2.f32 %v4534_v39 }
 0x8b1   :  { %v5944_v52 = vpop.eup %5943 }
 0x8b2   :  { %v4526_v12 = vmul.f32 0.6931472, %v5944_v52 }
 0x8b3   :  { %v5946_v55 = vpop.eup %5945 }
 0x8b4   :  { %v4530_v4 = vadd.f32 %v4528_v56, %v4526_v12  ;;  %v4538_v26 = vmul.f32 0.6931472, %v5946_v55 }
 0x8b6   :  { %v4540_v36 = vsub.f32 %v4530_v4, %v4538_v26 }
 0x8b8   :  { %v5651_v14 = vmul.f32 -10.0, %v4540_v36 }
 0x8ba   :  { %v4547_v13 = vmul.f32 1.442695, %v5651_v14 }
 0x8bc   :  { %5947 = vpow2.f32 %v4547_v13 }
 0x8c2   :  { %v5948_v7 = vpop.eup %5947 }
 0x8c3   :  { %v4550_v3 = vadd.f32 1.0, %v5948_v7 }
 0x8c5   :  { %5949 = vrcp.f32 %v4550_v3  ;;  %v4577_v49 = vand.u32 2147483648, %v4550_v3  ;;  %v4575_v0 = vand.u32 2147483647, %v4550_v3  ;;  %vm4571_vm12 = vweird.f32 %v4550_v3 }
 0x8c7   :  { %v4578_v34 = vor.u32 1.1754944e-38, %v4577_v49  ;;  %vm4576_vm15 = vcmp.eq.f32.partialorder %v4575_v0, 8.507059e+37 }
 0x8cb   :  { %v5950_v15 = vpop.eup %5949 }
 0x8cc   :  { %v4567_v46 = vmul.f32 %v5950_v15, %v4550_v3  ;;  %vm4572_vm11 = vweird.f32 %v5950_v15 }
 0x8cd   :  { %vm4573_vm13 = vmor %vm4571_vm12, %vm4572_vm11 }
 0x8ce   :  { %v4568_v29 = vsub.f32 1.0, %v4567_v46 }
 0x8d0   :  { %v4569_v21 = vmul.f32 %v5950_v15, %v4568_v29 }
 0x8d2   :  { %v4570_v41 = vadd.f32 %v5950_v15, %v4569_v21 }
 0x8d4   :  { %v4574_v32 = vsel %vm4573_vm13, %v5950_v15, %v4570_v41 }
 0x8d5   :  { %v4579_v48 = vsel %vm4576_vm15, %v4578_v34, %v4574_v32 }
 0x8d6   :  { %vm4584_vm0 = vcmp.lt.f32.partialorder %v4582_v16, %v4579_v48 }
 0x8d7   :  { %v5653_v63 = vsel %vm4584_vm0, 1.0, %v6069_v40 }
 0x8d8   :  { %v4590_v30 = vsub.f32 %v5653_v63, %v4579_v48 }
 0x8da   :  { %v4592_v54 = vadd.f32 %v4590_v30, %v4579_v48 }
 0x8dc   :  { %v4640_v20 = vmul.f32 %v4638_v38, %v4592_v54 }
 0x8de   :  { %4677 = vmatmul.f32.vlgmr.msrb.gmra.mxu3 %v4640_v20 }
 0x8e1   :  { %v4658_v2 = vpop.f32.mrf.mxu2 }
 0x8f6   :  { %v4768_v47 = vpop.f32.mrf.mxu1 }
 0x8f7   :  { %v4769_v40 = vadd.f32 %v4768_v47, %v4748_v57 }
 0x961   :  { %v4678_v58 = vpop.f32.mrf.mxu3 }
 0x962   :  { %v4679_v28 = vadd.f32 %v4678_v58, %v4658_v2 }
 0x964   :  { %v4681_v23 = vsel %vm4381_vm14, %v4679_v28, 0.0 }
 0x965   :  { %v4682_v5 = vrot.slane %v4681_v23, 4 }
 0x967   :  { %v4683_v31 = vadd.f32 %v4682_v5, %v4681_v23 }
 0x969   :  { %v4684_v45 = vrot.slane %v4683_v31, 2 }
 0x96b   :  { %v4685_v8 = vadd.f32 %v4684_v45, %v4683_v31 }
 0x96d   :  { %v4686_v25 = vrot.slane %v4685_v8, 1 }
 0x96f   :  { %v4687_v6 = vadd.f32 %v4686_v25, %v4685_v8 }
 0x971   :  { %v4688_v17 = vmul.f32 0.125, %v4687_v6 }
 0x973   :  { %v4771_v18 = vadd.f32 %v4769_v40, %v4688_v17 }
 0x975   :  { %4773 = vst.msk [vmem:[#allocation7] sm:$0x1] %vm4772_vm2, %v4771_v18 }
 0x976   :  { %4784 = dma.vmem_to_hbm [thread:$0]  %s4780_s8, 16, %s4782_s22, [#allocation4]  }
 0x977   :  { %6061 = dma.done.wait [#allocation4], 16  }
 0x978   :  { %6062 = vsyncadd [#allocation4], 4294967280 }
 0x979   :  { %4789 = vsyncpa [#allocation3], 1 }
 0x97a   :  { %4790 = vsyncpa [#allocation6], 1 }
 0x97b   :  { %4791 = vsyncpa [#allocation4], 1 }

</bundles_post_ra>
